<compile_context>
chip_gen: v5e
topology: v5e:2x2
jax: 0.10.0
libtpu: 0.0.40
codegen_flags: <defaults>
</compile_context>

<pallas_src>
from functools import partial

import jax
import jax.numpy as jnp
from jax import lax
from jax.experimental import pallas as pl
from jax.experimental.pallas import tpu as pltpu

_NEG_INF = -1e30
_VMEM_LIMIT = 48 * 1024 * 1024  # fits v7x's 64 MiB VMEM; well under v5e/v6e 128 MiB


def _pick_tile(dim, pref, align):
    """Largest multiple of `align` <= pref that divides dim; falls back to dim."""
    t = min(pref, dim)
    t = (t // align) * align
    while t >= align:
        if dim % t == 0:
            return t
        t -= align
    return dim


# --------------------------------------------------------------------------
# Tiled matmul (qkv_proj and o_proj): P1 pipelining + P3 accumulator.
# --------------------------------------------------------------------------
def _matmul_kernel(x_ref, w_ref, o_ref, acc_ref):
    @pl.when(pl.program_id(2) == 0)
    def _init():
        acc_ref[...] = jnp.zeros_like(acc_ref)

    acc_ref[...] += jnp.dot(x_ref[...], w_ref[...],
                            preferred_element_type=jnp.float32)

    @pl.when(pl.program_id(2) == pl.num_programs(2) - 1)
    def _done():
        o_ref[...] = acc_ref[...].astype(o_ref.dtype)


def _matmul(x, w, out_dtype, *, bm=1024, bn=1024, bk=512):
    M, K = x.shape
    K2, N = w.shape
    assert K == K2
    tm = _pick_tile(M, bm, 16)    # bf16 second-minor packs 16 rows / vreg
    tn = _pick_tile(N, bn, 128)
    tk = _pick_tile(K, bk, 128)
    grid = (M // tm, N // tn, K // tk)
    return pl.pallas_call(
        _matmul_kernel,
        out_shape=jax.ShapeDtypeStruct((M, N), out_dtype),
        grid=grid,
        in_specs=[pl.BlockSpec((tm, tk), lambda i, j, k: (i, k)),
                  pl.BlockSpec((tk, tn), lambda i, j, k: (k, j))],
        out_specs=pl.BlockSpec((tm, tn), lambda i, j, k: (i, j)),
        scratch_shapes=[pltpu.VMEM((tm, tn), jnp.float32)],
        compiler_params=pltpu.CompilerParams(
            dimension_semantics=("parallel", "parallel", "arbitrary"),
            vmem_limit_bytes=_VMEM_LIMIT),
    )(x, w)


# --------------------------------------------------------------------------
# RoPE prepass: rotate the q|k portion of qkv once (neox style), fold the
# attention scaling into q.  Grid: (rot_head, seq_tile), all parallel.
# --------------------------------------------------------------------------
def _rope_kernel(x_ref, cos_ref, sin_ref, o_ref, *, half, num_q_heads, scaling):
    h = pl.program_id(0)
    x = x_ref[...].astype(jnp.float32)
    # neox: out = [x1*cos - x2*sin, x2*cos + x1*sin]
    #     = x * [cos,cos] + roll(x, half, lane) * [-sin, sin]
    rot = x * cos_ref[...] + pltpu.roll(x, shift=half, axis=1) * sin_ref[...]
    scale = jnp.where(h < num_q_heads, jnp.float32(scaling), jnp.float32(1.0))
    o_ref[...] = (rot * scale).astype(o_ref.dtype)


def _rope_qk(qkv, cos, sin, *, num_heads, num_kv_heads, head_dim, scaling,
             out_dtype, block_s=2048):
    S = qkv.shape[0]
    n_rot_heads = num_heads + num_kv_heads     # q heads then k heads, contiguous
    half = head_dim // 2
    ts = _pick_tile(S, block_s, 16)
    kernel = partial(_rope_kernel, half=half, num_q_heads=num_heads,
                     scaling=scaling)
    return pl.pallas_call(
        kernel,
        out_shape=jax.ShapeDtypeStruct((S, n_rot_heads * head_dim), out_dtype),
        grid=(n_rot_heads, S // ts),
        in_specs=[pl.BlockSpec((ts, head_dim), lambda h, s: (s, h)),
                  pl.BlockSpec((ts, head_dim), lambda h, s: (s, 0)),
                  pl.BlockSpec((ts, head_dim), lambda h, s: (s, 0))],
        out_specs=pl.BlockSpec((ts, head_dim), lambda h, s: (s, h)),
        compiler_params=pltpu.CompilerParams(
            dimension_semantics=("parallel", "parallel"),
            vmem_limit_bytes=_VMEM_LIMIT),
    )(qkv, cos, sin)


# --------------------------------------------------------------------------
# Flash attention, one whole GQA group per grid step.
# Grid: (kv_head, flattened lower-triangular (q_tile, kv_tile) schedule).
# --------------------------------------------------------------------------
def _flash_attn_kernel(qi_ref, ki_ref, q_ref, k_ref, v_ref, o_ref,
                       m_scr, l_scr, acc_scr,
                       *, group, head_dim, block_q, block_k):
    t = pl.program_id(1)
    qi = qi_ref[t]
    ki = ki_ref[t]

    @pl.when(ki == 0)
    def _init():
        m_scr[...] = jnp.full_like(m_scr, _NEG_INF)
        l_scr[...] = jnp.zeros_like(l_scr)
        acc_scr[...] = jnp.zeros_like(acc_scr)

    def _update(masked):
        k = k_ref[...]                     # (tk, hd) bf16, pre-rotated
        v = v_ref[...]                     # (tk, hd) bf16
        if masked:
            row = lax.broadcasted_iota(jnp.int32, (block_q, block_k), 0)
            col = lax.broadcasted_iota(jnp.int32, (block_q, block_k), 1)
            tri = row >= col               # tq == tk -> local mask suffices
        for g in range(group):             # static loop: reuse k/v for the group
            q_g = q_ref[:, g * head_dim:(g + 1) * head_dim]   # pre-rotated+scaled
            s = lax.dot_general(q_g, k, (((1,), (1,)), ((), ())),
                                preferred_element_type=jnp.float32)  # [tq, tk]
            if masked:
                s = jnp.where(tri, s, _NEG_INF)
            m_prev = m_scr[:, g:g + 1]
            m_new = jnp.maximum(m_prev, jnp.max(s, axis=-1, keepdims=True))
            alpha = jnp.exp(m_prev - m_new)
            p = jnp.exp(s - m_new)
            l_scr[:, g:g + 1] = alpha * l_scr[:, g:g + 1] + jnp.sum(
                p, axis=-1, keepdims=True)
            acc = acc_scr[:, g * head_dim:(g + 1) * head_dim]
            acc_scr[:, g * head_dim:(g + 1) * head_dim] = alpha * acc + jnp.dot(
                p.astype(v.dtype), v, preferred_element_type=jnp.float32)
            m_scr[:, g:g + 1] = m_new

    @pl.when(ki < qi)      # strictly below the diagonal: no mask needed
    def _below():
        _update(masked=False)

    @pl.when(ki == qi)     # diagonal tile: mask, then finalize this q tile
    def _diag_and_finalize():
        _update(masked=True)
        inv_l = pl.reciprocal(l_scr[...], approx=True)        # (tq, group)
        for g in range(group):
            o_ref[:, g * head_dim:(g + 1) * head_dim] = (
                acc_scr[:, g * head_dim:(g + 1) * head_dim]
                * inv_l[:, g:g + 1]).astype(o_ref.dtype)


def _flash_attention(qk_rot, qkv, *, num_heads, num_kv_heads, head_dim,
                     out_dtype, block_q=512):
    S = qk_rot.shape[0]
    group = num_heads // num_kv_heads
    q_size = num_heads * head_dim

    tq = _pick_tile(S, block_q, 16)
    assert S % tq == 0
    nq = S // tq

    # Flattened lower-triangular (q_tile, kv_tile) schedule: no dead grid steps.
    qi_list, ki_list = [], []
    for qi in range(nq):
        for ki in range(qi + 1):
            qi_list.append(qi)
            ki_list.append(ki)
    qi_tbl = jnp.asarray(qi_list, dtype=jnp.int32)
    ki_tbl = jnp.asarray(ki_list, dtype=jnp.int32)
    n_steps = len(qi_list)

    # Heads of GQA group g are contiguous in the flat q feature dim.
    def q_map(g, t, qi_ref, ki_ref):
        return (qi_ref[t], g)                                   # blk = group*hd

    def k_map(g, t, qi_ref, ki_ref):
        return (ki_ref[t], num_heads + g)                       # blk = hd

    def v_map(g, t, qi_ref, ki_ref):
        return (ki_ref[t], num_heads + num_kv_heads + g)        # blk = hd (in qkv)

    def o_map(g, t, qi_ref, ki_ref):
        return (qi_ref[t], g)

    kernel = partial(_flash_attn_kernel, group=group, head_dim=head_dim,
                     block_q=tq, block_k=tq)

    return pl.pallas_call(
        kernel,
        out_shape=jax.ShapeDtypeStruct((S, q_size), out_dtype),
        grid_spec=pltpu.PrefetchScalarGridSpec(
            num_scalar_prefetch=2,
            grid=(num_kv_heads, n_steps),
            in_specs=[
                pl.BlockSpec((tq, group * head_dim), q_map),   # rotated+scaled q
                pl.BlockSpec((tq, head_dim), k_map),           # rotated k
                pl.BlockSpec((tq, head_dim), v_map),           # raw v (from qkv)
            ],
            out_specs=pl.BlockSpec((tq, group * head_dim), o_map),
            scratch_shapes=[
                pltpu.VMEM((tq, group), jnp.float32),            # running max m
                pltpu.VMEM((tq, group), jnp.float32),            # running denom l
                pltpu.VMEM((tq, group * head_dim), jnp.float32), # output acc
            ],
        ),
        compiler_params=pltpu.CompilerParams(
            dimension_semantics=("parallel", "arbitrary"),
            vmem_limit_bytes=_VMEM_LIMIT),
    )(qi_tbl, ki_tbl, qk_rot, qk_rot, qkv)


# --------------------------------------------------------------------------
# Wrapper: qkv_proj -> rope prepass -> attention -> o_proj
# --------------------------------------------------------------------------
def mixtral_attention(positions, hidden_states, wqkv_t, wo_t,
                      cos_cache, sin_cache,
                      *, num_heads, num_kv_heads, block_q=512):
    """positions: [S] int32; hidden_states: [S, H];
    wqkv_t: [H, (num_heads+2*num_kv_heads)*head_dim] (pre-transposed, bf16);
    wo_t: [num_heads*head_dim, H] (pre-transposed, bf16);
    cos_cache/sin_cache: [max_pos, head_dim] lane-dense rotary tables."""
    S, H = hidden_states.shape
    head_dim = H // num_heads
    assert head_dim % 128 == 0, "head_dim must be a multiple of 128"
    scaling = head_dim ** -0.5
    compute_dtype = hidden_states.dtype

    # rotary cache lookup (glue; mirrors the module's rotary cache indexing)
    cos = cos_cache[positions]            # [S, head_dim]  ([cos, cos])
    sin = sin_cache[positions]            # [S, head_dim]  ([-sin, sin])

    # 1) qkv projection (no bias)
    qkv = _matmul(hidden_states, wqkv_t, compute_dtype)

    # 2) RoPE on q|k once (scaling folded into q), then flash attention
    qk_rot = _rope_qk(qkv, cos, sin, num_heads=num_heads,
                      num_kv_heads=num_kv_heads, head_dim=head_dim,
                      scaling=scaling, out_dtype=compute_dtype)
    attn_out = _flash_attention(qk_rot, qkv, num_heads=num_heads,
                                num_kv_heads=num_kv_heads, head_dim=head_dim,
                                out_dtype=compute_dtype, block_q=block_q)

    # 3) output projection (no bias)
    return _matmul(attn_out, wo_t, hidden_states.dtype)


# --------------------------------------------------------------------------
# Pure-JAX reference (f32) for a correctness spot-check.
# --------------------------------------------------------------------------
def _reference(positions, x, wqkv_t, wo_t, num_heads, num_kv_heads, rope_theta):
    S, H = x.shape
    head_dim = H // num_heads
    half = head_dim // 2
    scaling = head_dim ** -0.5
    q_size = num_heads * head_dim
    kv_size = num_kv_heads * head_dim

    xf = x.astype(jnp.float32)
    qkv = xf @ wqkv_t.astype(jnp.float32)
    q = qkv[:, :q_size]
    k = qkv[:, q_size:q_size + kv_size]
    v = qkv[:, q_size + kv_size:]

    inv_freq = 1.0 / (rope_theta ** (jnp.arange(0, half, dtype=jnp.float32) / half))
    freqs = positions.astype(jnp.float32)[:, None] * inv_freq[None, :]
    cos, sin = jnp.cos(freqs), jnp.sin(freqs)

    def rope(xh):
        xh = xh.reshape(S, -1, head_dim)
        x1, x2 = xh[..., :half], xh[..., half:]
        return jnp.concatenate([x1 * cos[:, None, :] - x2 * sin[:, None, :],
                                x2 * cos[:, None, :] + x1 * sin[:, None, :]], axis=-1)

    qh = rope(q)                                        # [S, nh, hd]
    kh = rope(k)                                        # [S, nkv, hd]
    vh = v.reshape(S, num_kv_heads, head_dim)
    group = num_heads // num_kv_heads
    kh = jnp.repeat(kh, group, axis=1)
    vh = jnp.repeat(vh, group, axis=1)

    s = jnp.einsum('qhd,khd->hqk', qh, kh) * scaling
    mask = jnp.tril(jnp.ones((S, S), dtype=bool))
    s = jnp.where(mask[None], s, -jnp.inf)
    p = jax.nn.softmax(s, axis=-1)
    o = jnp.einsum('hqk,khd->qhd', p, vh).reshape(S, q_size)
    return o @ wo_t.astype(jnp.float32)


if __name__ == "__main__":
    # Small config consistent with the module (head_dim=128 like real Mixtral):
    S = 512
    hidden_size = 512
    num_heads = 4
    num_kv_heads = 2
    head_dim = hidden_size // num_heads          # 128
    q_size = num_heads * head_dim
    kv_size = num_kv_heads * head_dim
    rope_theta = 10000.0
    max_position = 2048
    half = head_dim // 2

    key = jax.random.PRNGKey(0)
    k1, k2, k3 = jax.random.split(key, 3)

    hidden_states = jax.random.normal(
        k1, (S, hidden_size), dtype=jnp.float32).astype(jnp.bfloat16)
    positions = jnp.arange(S, dtype=jnp.int32)

    # torch Linear layout is [out_features, in_features]; transpose + bf16 cast
    # happen ONCE here ("load time"), not inside the per-call wrapper.
    wqkv = 0.05 * jax.random.normal(k2, (q_size + 2 * kv_size, hidden_size), jnp.float32)
    wo = 0.05 * jax.random.normal(k3, (hidden_size, q_size), jnp.float32)
    wqkv_t = jnp.asarray(wqkv.T, dtype=jnp.bfloat16)        # [H, q+2kv]
    wo_t = jnp.asarray(wo.T, dtype=jnp.bfloat16)            # [q_size, H]

    # Lane-dense rotary caches built once: [cos, cos] and [-sin, sin].
    inv_freq = 1.0 / (rope_theta ** (jnp.arange(0, half, dtype=jnp.float32) / half))
    t = jnp.arange(max_position, dtype=jnp.float32)
    freqs = t[:, None] * inv_freq[None, :]
    cos_cache = jnp.concatenate([jnp.cos(freqs), jnp.cos(freqs)], axis=-1)
    sin_cache = jnp.concatenate([-jnp.sin(freqs), jnp.sin(freqs)], axis=-1)

    out = mixtral_attention(positions, hidden_states, wqkv_t, wo_t,
                            cos_cache, sin_cache,
                            num_heads=num_heads, num_kv_heads=num_kv_heads)
    out = jax.block_until_ready(out)
    assert out.shape == (S, hidden_size)
    assert bool(jnp.all(jnp.isfinite(out.astype(jnp.float32))))

    ref = _reference(positions, hidden_states, wqkv_t, wo_t,
                     num_heads, num_kv_heads, rope_theta)
    abs_err = float(jnp.max(jnp.abs(out.astype(jnp.float32) - ref)))
    rel_err = abs_err / (float(jnp.max(jnp.abs(ref))) + 1e-6)
    assert rel_err < 3e-2, f"rel error vs reference: {rel_err} (abs {abs_err})"
    print("KERNEL_OK")
</pallas_src>

<mosaic_0001>
module attributes {stable_mosaic.version = 11 : i64} {
  func.func @_matmul_kernel(%arg0: i32, %arg1: i32, %arg2: i32, %arg3: memref<512x512xbf16, #tpu.memory_space<vmem>>, %arg4: memref<512x1024xbf16, #tpu.memory_space<vmem>>, %arg5: memref<512x1024xbf16, #tpu.memory_space<vmem>>, %arg6: memref<512x1024xf32, #tpu.memory_space<vmem>>) attributes {dimension_semantics = [#tpu.dimension_semantics<parallel>, #tpu.dimension_semantics<parallel>, #tpu.dimension_semantics<arbitrary>], iteration_bounds = array<i64: 1, 1, 1>, scalar_prefetch = 0 : i64, scratch_operands = 1 : i64, tpu.core_type = #tpu.core_type<tc>, window_params = [{transform_indices = @transform_0, window_bounds = array<i64: 512, 512>}, {transform_indices = @transform_1, window_bounds = array<i64: 512, 1024>}, {transform_indices = @transform_2, window_bounds = array<i64: 512, 1024>}]} {
    %c0_i32 = arith.constant 0 : i32
    %0 = arith.cmpi eq, %arg2, %c0_i32 : i32
    %1 = arith.extui %0 : i1 to i32
    %c0_i32_0 = arith.constant 0 : i32
    %2 = arith.cmpi ne, %1, %c0_i32_0 : i32
    scf.if %2 {
      %cst_10 = arith.constant 0.000000e+00 : f32
      %12 = vector.broadcast %cst_10 : f32 to vector<512x1024xf32>
      %c0_11 = arith.constant 0 : index
      %c0_12 = arith.constant 0 : index
      %13 = vector.load %arg6[%c0_11, %c0_12] : memref<512x1024xf32, #tpu.memory_space<vmem>>, vector<512x1024xf32>
      tpu.vector_store %arg6[%c0_11, %c0_12], %12 {strides = array<i32>} : memref<512x1024xf32, #tpu.memory_space<vmem>>, vector<512x1024xf32>,
    } else {
    }
    %c0 = arith.constant 0 : index
    %c0_1 = arith.constant 0 : index
    %3 = vector.load %arg6[%c0, %c0_1] : memref<512x1024xf32, #tpu.memory_space<vmem>>, vector<512x1024xf32>
    %c0_2 = arith.constant 0 : index
    %c0_3 = arith.constant 0 : index
    %4 = vector.load %arg3[%c0_2, %c0_3] : memref<512x512xbf16, #tpu.memory_space<vmem>>, vector<512x512xbf16>
    %c0_4 = arith.constant 0 : index
    %c0_5 = arith.constant 0 : index
    %5 = vector.load %arg4[%c0_4, %c0_5] : memref<512x1024xbf16, #tpu.memory_space<vmem>>, vector<512x1024xbf16>
    %cst = arith.constant dense<0.000000e+00> : vector<512x1024xf32>
    %6 = tpu.matmul %4, %5, %cst {dimension_numbers = #tpu.dot_dimension_numbers<[1], [0], [0], [1], [0, 0, 1, 1], [], []>} : vector<512x512xbf16>, vector<512x1024xbf16>, vector<512x1024xf32> -> vector<512x1024xf32>
    %7 = arith.addf %3, %6 : vector<512x1024xf32>
    %c0_6 = arith.constant 0 : index
    %c0_7 = arith.constant 0 : index
    %8 = vector.load %arg6[%c0_6, %c0_7] : memref<512x1024xf32, #tpu.memory_space<vmem>>, vector<512x1024xf32>
    tpu.vector_store %arg6[%c0_6, %c0_7], %7 {strides = array<i32>} : memref<512x1024xf32, #tpu.memory_space<vmem>>, vector<512x1024xf32>,
    %c0_i32_8 = arith.constant 0 : i32
    %9 = arith.cmpi eq, %arg2, %c0_i32_8 : i32
    %10 = arith.extui %9 : i1 to i32
    %c0_i32_9 = arith.constant 0 : i32
    %11 = arith.cmpi ne, %10, %c0_i32_9 : i32
    scf.if %11 {
      %c0_10 = arith.constant 0 : index
      %c0_11 = arith.constant 0 : index
      %12 = vector.load %arg6[%c0_10, %c0_11] : memref<512x1024xf32, #tpu.memory_space<vmem>>, vector<512x1024xf32>
      %13 = arith.truncf %12 : vector<512x1024xf32> to vector<512x1024xbf16>
      %c0_12 = arith.constant 0 : index
      %c0_13 = arith.constant 0 : index
      %14 = vector.load %arg5[%c0_12, %c0_13] : memref<512x1024xbf16, #tpu.memory_space<vmem>>, vector<512x1024xbf16>
      tpu.vector_store %arg5[%c0_12, %c0_13], %13 {strides = array<i32>} : memref<512x1024xbf16, #tpu.memory_space<vmem>>, vector<512x1024xbf16>,
    } else {
    }
    return
  }
  func.func @transform_0(%arg0: i32, %arg1: i32, %arg2: i32) -> (i32, i32) {
    %c0_i32 = arith.constant 0 : i32
    return %arg0, %arg2 : i32, i32
  }
  func.func @transform_1(%arg0: i32, %arg1: i32, %arg2: i32) -> (i32, i32) {
    %c0_i32 = arith.constant 0 : i32
    return %arg2, %arg1 : i32, i32
  }
  func.func @transform_2(%arg0: i32, %arg1: i32, %arg2: i32) -> (i32, i32) {
    %c0_i32 = arith.constant 0 : i32
    return %arg0, %arg1 : i32, i32
  }
}

</mosaic_0001>

<bundles_post_ra>
// kernel: tpu_custom_call.1
= control target key start
LH: loop header
LB: loop body
LE: loop exit
PB: predicated region body
PF: predicated region fallthrough
CT: control target
= control target key end

     0   :  { %7 = vsyncpa [#allocation4], 0  ;;  %s14945_s0 = inlined_call_operand.hbm [shape: bf16[512,512], index: 0, kind: input, shape index: {}]   ;;  %s14946_s1 = inlined_call_operand.hbm [shape: bf16[512,1024], index: 1, kind: input, shape index: {}]   ;;  %s14947_s2 = inlined_call_operand.hbm [shape: bf16[512,1024], index: 2, kind: output, shape index: {}]  }
   0x1   :  { %8 = vsyncpa [#allocation7], 0 }
   0x2   :  { %9 = vsyncpa [#allocation5], 0  ;;  %s14_s11 = sshll.u32 %s14945_s0, 4  ;;  %s12860_s12 = smov [#allocation3]   ;;  %s15_s11 = int_to_ptr.hbm [resolvable:$true] %s14_s11 }
   0x3   :  { %s16_s13 = sshll.u32 %s12860_s12, 4  ;;  %s27_s16 = sshll.u32 %s14946_s1, 4  ;;  %s17_s13 = int_to_ptr.vmem [resolvable:$true] %s16_s13  ;;  %s28_s16 = int_to_ptr.hbm [resolvable:$true] %s27_s16 }
   0x4   :  { %s12861_s17 = smov 256   ;;  %s12862_s18 = smov 16  }
   0x5   :  { %22 = dma.hbm_to_vmem [thread:$0]  %s15_s11, 16384, %s17_s13, [#allocation4], %s12861_s17, %s12861_s17, %s12862_s18  }
   0x6   :  { %s12863_s19 = smov [#allocation6]   ;;  %s12864_s21 = smov 512  }
   0x7   :  { %s29_s20 = sshll.u32 %s12863_s19, 4  ;;  %s12865_s22 = smov 32   ;;  %s30_s20 = int_to_ptr.vmem [resolvable:$true] %s29_s20 }
   0x8   :  { %35 = dma.hbm_to_vmem [thread:$0]  %s28_s16, 32768, %s30_s20, [#allocation7], %s12864_s21, %s12864_s21, %s12865_s22  }
   0x9   :  { %12854 = dma.done.wait [#allocation4], 16384  }
   0xa   :  { %12855 = vsyncadd [#allocation4], 4294950912 }
   0xb   :  { %12856 = dma.done.wait [#allocation7], 32768  }
   0xc   :  { %12857 = vsyncadd [#allocation7], 4294934528  ;;  %v11593_v0 = vld [vmem:[#allocation6 + $0x1c0] sm:$0xf]  ;;  %s12866_s0 = smov [#allocation8]   ;;  %s10841_s25 = sshll.u32 %s14947_s2, 4  ;;  %s10842_s25 = int_to_ptr.hbm [resolvable:$true] %s10841_s25 }
   0xd   :  { %v12579_v1 = vld [vmem:[#allocation6 + $0x1dc] sm:$0xf0]  ;;  %s10839_s1 = sshll.u32 %s12866_s0, 4  ;;  %s10840_s1 = int_to_ptr.vmem [resolvable:$true] %s10839_s1 }
   0xe   :  { %v11849_v2 = vld [vmem:[#allocation6 + $0x3c0] sm:$0xf]  ;;  %v11594_v3 = vor.u32 %v12579_v1, %v11593_v0 }
   0xf   :  { %v12643_v4 = vld [vmem:[#allocation6 + $0x3dc] sm:$0xf0] }
  0x10   :  { %v12105_v5 = vld [vmem:[#allocation6 + $0x5c0] sm:$0xf]  ;;  %v11850_v7 = vor.u32 %v12643_v4, %v11849_v2  ;;  %3376 = vmatpush.bf16.msra.mxu0 %v11594_v3 }
  0x11   :  { %v12707_v6 = vld [vmem:[#allocation6 + $0x5dc] sm:$0xf0] }
  0x12   :  { %v12106_v8 = vor.u32 %v12707_v6, %v12105_v5  ;;  %v12361_v9 = vld [vmem:[#allocation6 + $0x7c0] sm:$0xf]  ;;  %3545 = vmatpush.bf16.msra.mxu1 %v11850_v7 }
  0x13   :  { %v12771_v10 = vld [vmem:[#allocation6 + $0x7dc] sm:$0xf0] }
  0x14   :  { %v11561_v11 = vld [vmem:[#allocation6 + $0x180] sm:$0xf]  ;;  %v12362_v12 = vor.u32 %v12771_v10, %v12361_v9  ;;  %3714 = vmatpush.bf16.msra.mxu2 %v12106_v8 }
  0x15   :  { %v12571_v13 = vld [vmem:[#allocation6 + $0x19c] sm:$0xf0] }
  0x16   :  { %v11817_v14 = vld [vmem:[#allocation6 + $0x380] sm:$0xf]  ;;  %v11562_v16 = vor.u32 %v12571_v13, %v11561_v11  ;;  %3883 = vmatpush.bf16.msra.mxu3 %v12362_v12 }
  0x17   :  { %v12635_v15 = vld [vmem:[#allocation6 + $0x39c] sm:$0xf0] }
  0x18   :  { %v11818_v17 = vor.u32 %v12635_v15, %v11817_v14  ;;  %v12073_v18 = vld [vmem:[#allocation6 + $0x580] sm:$0xf]  ;;  %3377 = vmatpush.bf16.msra.mxu0 %v11562_v16 }
  0x19   :  { %v12699_v19 = vld [vmem:[#allocation6 + $0x59c] sm:$0xf0] }
  0x1a   :  { %v12329_v20 = vld [vmem:[#allocation6 + $0x780] sm:$0xf]  ;;  %v12074_v21 = vor.u32 %v12699_v19, %v12073_v18  ;;  %3546 = vmatpush.bf16.msra.mxu1 %v11818_v17 }
  0x1b   :  { %v12763_v22 = vld [vmem:[#allocation6 + $0x79c] sm:$0xf0] }
  0x1c   :  { %v11529_v23 = vld [vmem:[#allocation6 + $0x140] sm:$0xf]  ;;  %v12330_v25 = vor.u32 %v12763_v22, %v12329_v20  ;;  %3715 = vmatpush.bf16.msra.mxu2 %v12074_v21 }
  0x1d   :  { %v12563_v24 = vld [vmem:[#allocation6 + $0x15c] sm:$0xf0] }
  0x1e   :  { %v11785_v26 = vld [vmem:[#allocation6 + $0x340] sm:$0xf]  ;;  %v11530_v29 = vor.u32 %v12563_v24, %v11529_v23  ;;  %3884 = vmatpush.bf16.msra.mxu3 %v12330_v25 }
  0x1f   :  { %v12627_v27 = vld [vmem:[#allocation6 + $0x35c] sm:$0xf0] }
  0x20   :  { %v12041_v28 = vld [vmem:[#allocation6 + $0x540] sm:$0xf]  ;;  %v11786_v33 = vor.u32 %v12627_v27, %v11785_v26  ;;  %3378 = vmatpush.bf16.msra.mxu0 %v11530_v29  ;;  %v12393_v29 = vld [vmem:[#allocation3 + $0xc] sm:$0xf0] }
  0x21   :  { %v12691_v30 = vld [vmem:[#allocation6 + $0x55c] sm:$0xf0] }
  0x22   :  { %v12297_v31 = vld [vmem:[#allocation6 + $0x740] sm:$0xf]  ;;  %v12042_v34 = vor.u32 %v12691_v30, %v12041_v28  ;;  %3547 = vmatpush.bf16.msra.mxu1 %v11786_v33  ;;  %v12391_v30 = vld [vmem:[#allocation3 + $0x4] sm:$0xf] }
  0x23   :  { %v12755_v32 = vld [vmem:[#allocation6 + $0x75c] sm:$0xf0] }
  0x24   :  { %v11497_v35 = vld [vmem:[#allocation6 + $0x100] sm:$0xf]  ;;  %v12298_v38 = vor.u32 %v12755_v32, %v12297_v31  ;;  %3716 = vmatpush.bf16.msra.mxu2 %v12042_v34  ;;  %v12703_v31 = vld [vmem:[#allocation6 + $0x5c4] sm:$0xf]  ;;  %v10859_v34 = vld [vmem:[#allocation3 + $0x10] sm:$0xf0] }
  0x25   :  { %v12555_v36 = vld [vmem:[#allocation6 + $0x11c] sm:$0xf0]  ;;  %v12107_v32 = vld [vmem:[#allocation6 + $0x5e0] sm:$0xf0] }
  0x26   :  { %v11753_v37 = vld [vmem:[#allocation6 + $0x300] sm:$0xf]  ;;  %v11498_v44 = vor.u32 %v12555_v36, %v11497_v35  ;;  %3885 = vmatpush.bf16.msra.mxu3 %v12298_v38  ;;  %v12767_v35 = vld [vmem:[#allocation6 + $0x7c4] sm:$0xf] }
  0x27   :  { %v12619_v39 = vld [vmem:[#allocation6 + $0x31c] sm:$0xf0]  ;;  %v12363_v36 = vld [vmem:[#allocation6 + $0x7e0] sm:$0xf0] }
  0x28   :  { %v12009_v40 = vld [vmem:[#allocation6 + $0x500] sm:$0xf]  ;;  %v11754_v45 = vor.u32 %v12619_v39, %v11753_v37  ;;  %3379 = vmatpush.bf16.msra.mxu0 %v11498_v44  ;;  %v10865_v39 = vld [vmem:[#allocation3 + $0x8] sm:$0xf]  ;;  %v12110_v44 = vor.u32 %v12703_v31, %v12107_v32  ;;  %v10907_v31 = vld [vmem:[#allocation3 + $0x70] sm:$0xf0] }
  0x29   :  { %v12683_v41 = vld [vmem:[#allocation6 + $0x51c] sm:$0xf0]  ;;  %v10913_v32 = vld [vmem:[#allocation3 + $0x68] sm:$0xf] }
  0x2a   :  { %v12265_v42 = vld [vmem:[#allocation6 + $0x700] sm:$0xf]  ;;  %v12010_v46 = vor.u32 %v12683_v41, %v12009_v40  ;;  %3548 = vmatpush.bf16.msra.mxu1 %v11754_v45  ;;  %v12394_v40 = vld [vmem:[#allocation3 + $0x14] sm:$0xf0]  ;;  %v12392_v41 = vld [vmem:[#allocation3 + $0xc] sm:$0xf] }
  0x2b   :  { %v12747_v43 = vld [vmem:[#allocation6 + $0x71c] sm:$0xf0]  ;;  %v12575_v45 = vld [vmem:[#allocation6 + $0x1c4] sm:$0xf] }
  0x2c   :  { %v11465_v47 = vld [vmem:[#allocation6 + $0xc0] sm:$0xf]  ;;  %v12266_v50 = vor.u32 %v12747_v43, %v12265_v42  ;;  %3717 = vmatpush.bf16.msra.mxu2 %v12010_v46  ;;  %v10867_v43 = vld [vmem:[#allocation3 + $0x18] sm:$0xf0]  ;;  %v11595_v46 = vld [vmem:[#allocation6 + $0x1e0] sm:$0xf0] }
  0x2d   :  { %v12547_v48 = vld [vmem:[#allocation6 + $0xdc] sm:$0xf0] }
  0x2e   :  { %v11721_v49 = vld [vmem:[#allocation6 + $0x2c0] sm:$0xf]  ;;  %v11466_v56 = vor.u32 %v12547_v48, %v11465_v47  ;;  %3886 = vmatpush.bf16.msra.mxu3 %v12266_v50  ;;  %v12366_v48 = vor.u32 %v12767_v35, %v12363_v36  ;;  %v11851_v50 = vld [vmem:[#allocation6 + $0x3e0] sm:$0xf0]  ;;  %v10915_v35 = vld [vmem:[#allocation3 + $0x78] sm:$0xf0] }
  0x2f   :  { %v12611_v51 = vld [vmem:[#allocation6 + $0x2dc] sm:$0xf0] }
  0x30   :  { %v11977_v52 = vld [vmem:[#allocation6 + $0x4c0] sm:$0xf]  ;;  %v11722_v57 = vor.u32 %v12611_v51, %v11721_v49  ;;  %3380 = vmatpush.bf16.msra.mxu0 %v11466_v56  ;;  %v12639_v49 = vld [vmem:[#allocation6 + $0x3c4] sm:$0xf]  ;;  %v12893_v51 = vor.u32 %v12391_v30, %v10859_v34  ;;  %v12404_v34 = vld [vmem:[#allocation3 + $0x6c] sm:$0xf] }
  0x31   :  { %v12675_v53 = vld [vmem:[#allocation6 + $0x4dc] sm:$0xf0]  ;;  %v12403_v30 = vld [vmem:[#allocation3 + $0x64] sm:$0xf] }
  0x32   :  { %v12233_v54 = vld [vmem:[#allocation6 + $0x6c0] sm:$0xf]  ;;  %v11978_v58 = vor.u32 %v12675_v53, %v11977_v52  ;;  %3549 = vmatpush.bf16.msra.mxu1 %v11722_v57  ;;  %v12895_v52 = vor.u32 %v12394_v40, %v10865_v39  ;;  %v12897_v53 = vor.u32 %v12392_v41, %v10867_v43  ;;  %v12397_v57 = vld [vmem:[#allocation3 + $0x2c] sm:$0xf0]  ;;  %v12933_v39 = vor.u32 %v12404_v34, %v10915_v35  ;;  %v10923_v43 = vld [vmem:[#allocation3 + $0x90] sm:$0xf0] }
  0x33   :  { %v12739_v55 = vld [vmem:[#allocation6 + $0x6dc] sm:$0xf0]  ;;  %v12409_v41 = vld [vmem:[#allocation3 + $0x8c] sm:$0xf0]  ;;  %v11787_v34 = vld [vmem:[#allocation6 + $0x360] sm:$0xf0] }
  0x34   :  { %v11433_v59 = vld [vmem:[#allocation6 + $0x80] sm:$0xf]  ;;  %v12234_v62 = vor.u32 %v12739_v55, %v12233_v54  ;;  %3718 = vmatpush.bf16.msra.mxu2 %v11978_v58  ;;  %v11598_v54 = vor.u32 %v12575_v45, %v11595_v46  ;;  %v11854_v55 = vor.u32 %v12639_v49, %v11851_v50  ;;  %v12395_v58 = vld [vmem:[#allocation3 + $0x24] sm:$0xf]  ;;  %v12410_v45 = vld [vmem:[#allocation3 + $0x94] sm:$0xf0] }
  0x35   :  { %v12539_v60 = vld [vmem:[#allocation6 + $0x9c] sm:$0xf0]  ;;  %v12408_v46 = vld [vmem:[#allocation3 + $0x8c] sm:$0xf] }
  0x36   :  { %v11689_v61 = vld [vmem:[#allocation6 + $0x280] sm:$0xf]  ;;  %v11434_v4 = vor.u32 %v12539_v60, %v11433_v59  ;;  %3887 = vmatpush.bf16.msra.mxu3 %v12234_v62  ;;  %v10875_v59 = vld [vmem:[#allocation3 + $0x30] sm:$0xf0]  ;;  %v10881_v60 = vld [vmem:[#allocation3 + $0x28] sm:$0xf] }
  0x37   :  { %v12603_v63 = vld [vmem:[#allocation6 + $0x29c] sm:$0xf0]  ;;  %v12396_v62 = vld [vmem:[#allocation3 + $0x2c] sm:$0xf] }
  0x38   :  { %v11945_v0 = vld [vmem:[#allocation6 + $0x480] sm:$0xf]  ;;  %v11690_v5 = vor.u32 %v12603_v63, %v11689_v61  ;;  %3381 = vmatpush.bf16.msra.mxu0 %v11434_v4  ;;  %v12398_v61 = vld [vmem:[#allocation3 + $0x34] sm:$0xf0]  ;;  %v10883_v63 = vld [vmem:[#allocation3 + $0x38] sm:$0xf0] }
  0x39   :  { %v12667_v1 = vld [vmem:[#allocation6 + $0x49c] sm:$0xf0] }
  0x3a   :  { %v12201_v2 = vld [vmem:[#allocation6 + $0x680] sm:$0xf]  ;;  %v11946_v6 = vor.u32 %v12667_v1, %v11945_v0  ;;  %3550 = vmatpush.bf16.msra.mxu1 %v11690_v5  ;;  %v12905_v1 = vor.u32 %v12395_v58, %v10875_v59  ;;  %v12401_v5 = vld [vmem:[#allocation3 + $0x4c] sm:$0xf0]  ;;  %v12411_v58 = vld [vmem:[#allocation3 + $0xa4] sm:$0xf] }
  0x3b   :  { %v12731_v3 = vld [vmem:[#allocation6 + $0x69c] sm:$0xf0]  ;;  %v10939_v59 = vld [vmem:[#allocation3 + $0xb0] sm:$0xf0] }
  0x3c   :  { %v11401_v7 = vld [vmem:[#allocation6 + $0x40] sm:$0xf]  ;;  %v12202_v10 = vor.u32 %v12731_v3, %v12201_v2  ;;  %3719 = vmatpush.bf16.msra.mxu2 %v11946_v6  ;;  %15186 = vst [vmem:[#allocation12_spill] sm:$0xff] %v12905_v1  ;;  %v12907_v2 = vor.u32 %v12398_v61, %v10881_v60  ;;  %v12909_v3 = vor.u32 %v12396_v62, %v10883_v63  ;;  %v12399_v6 = vld [vmem:[#allocation3 + $0x44] sm:$0xf] }
  0x3d   :  { %v12531_v8 = vld [vmem:[#allocation6 + $0x5c] sm:$0xf0]  ;;  %v10945_v60 = vld [vmem:[#allocation3 + $0xa8] sm:$0xf]  ;;  %v12414_v61 = vld [vmem:[#allocation3 + $0xb4] sm:$0xf0] }
  0x3e   :  { %v11657_v9 = vld [vmem:[#allocation6 + $0x240] sm:$0xf]  ;;  %v11402_v17 = vor.u32 %v12531_v8, %v11401_v7  ;;  %3888 = vmatpush.bf16.msra.mxu3 %v12202_v10  ;;  %15187 = vst [vmem:[#allocation13_spill] sm:$0xff] %v12907_v2  ;;  %v10891_v7 = vld [vmem:[#allocation3 + $0x50] sm:$0xf0] }
  0x3f   :  { %v12595_v11 = vld [vmem:[#allocation6 + $0x25c] sm:$0xf0]  ;;  %15188 = vst [vmem:[#allocation14_spill] sm:$0xff] %v12909_v3  ;;  %v10897_v8 = vld [vmem:[#allocation3 + $0x48] sm:$0xf] }
  0x40   :  { %v11913_v12 = vld [vmem:[#allocation6 + $0x440] sm:$0xf]  ;;  %v11658_v21 = vor.u32 %v12595_v11, %v11657_v9  ;;  %3382 = vmatpush.bf16.msra.mxu0 %v11402_v17  ;;  %v12402_v9 = vld [vmem:[#allocation3 + $0x54] sm:$0xf0]  ;;  %v12400_v10 = vld [vmem:[#allocation3 + $0x4c] sm:$0xf] }
  0x41   :  { %v12659_v13 = vld [vmem:[#allocation6 + $0x45c] sm:$0xf0]  ;;  %v10899_v11 = vld [vmem:[#allocation3 + $0x58] sm:$0xf0]  ;;  %v12075_v17 = vld [vmem:[#allocation6 + $0x5a0] sm:$0xf0] }
  0x42   :  { %v12169_v14 = vld [vmem:[#allocation6 + $0x640] sm:$0xf]  ;;  %v11914_v22 = vor.u32 %v12659_v13, %v11913_v12  ;;  %3551 = vmatpush.bf16.msra.mxu1 %v11658_v21  ;;  %v12917_v13 = vor.u32 %v12399_v6, %v10891_v7  ;;  %v12567_v21 = vld [vmem:[#allocation6 + $0x184] sm:$0xf]  ;;  %v12412_v62 = vld [vmem:[#allocation3 + $0xac] sm:$0xf]  ;;  %v12955_v6 = vor.u32 %v12414_v61, %v10945_v60 }
  0x43   :  { %v12723_v15 = vld [vmem:[#allocation6 + $0x65c] sm:$0xf0]  ;;  %v10947_v63 = vld [vmem:[#allocation3 + $0xb8] sm:$0xf0]  ;;  %v12425_v61 = vld [vmem:[#allocation3 + $0x10c] sm:$0xf0] }
  0x44   :  { %v11369_v16 = vld [vmem:[#allocation6] sm:$0xf]  ;;  %v12170_v26 = vor.u32 %v12723_v15, %v12169_v14  ;;  %3720 = vmatpush.bf16.msra.mxu2 %v11914_v22  ;;  %15190 = vst [vmem:[#allocation16_spill] sm:$0xff] %v12917_v13  ;;  %v12919_v14 = vor.u32 %v12402_v9, %v10897_v8  ;;  %v12921_v15 = vor.u32 %v12400_v10, %v10899_v11  ;;  %v11563_v22 = vld [vmem:[#allocation6 + $0x1a0] sm:$0xf0] }
  0x45   :  { %v12523_v18 = vld [vmem:[#allocation6 + $0x1c] sm:$0xf0]  ;;  %15194 = vst [vmem:[#allocation20_spill] sm:$0xff] %v12955_v6  ;;  %v12957_v7 = vor.u32 %v12412_v62, %v10947_v63  ;;  %v12417_v9 = vld [vmem:[#allocation3 + $0xcc] sm:$0xf0] }
  0x46   :  { %v11625_v19 = vld [vmem:[#allocation6 + $0x200] sm:$0xf]  ;;  %v11370_v33 = vor.u32 %v12523_v18, %v11369_v16  ;;  %3889 = vmatpush.bf16.msra.mxu3 %v12170_v26  ;;  %15191 = vst [vmem:[#allocation17_spill] sm:$0xff] %v12919_v14  ;;  %v12695_v16 = vld [vmem:[#allocation6 + $0x584] sm:$0xf] }
  0x47   :  { %v12587_v20 = vld [vmem:[#allocation6 + $0x21c] sm:$0xf0]  ;;  %15192 = vst [vmem:[#allocation18_spill] sm:$0xff] %v12921_v15  ;;  %v12759_v18 = vld [vmem:[#allocation6 + $0x784] sm:$0xf] }
  0x48   :  { %v11881_v23 = vld [vmem:[#allocation6 + $0x400] sm:$0xf]  ;;  %v11626_v37 = vor.u32 %v12587_v20, %v11625_v19  ;;  %3383 = vmatpush.bf16.msra.mxu0 %v11370_v33  ;;  %v12078_v19 = vor.u32 %v12695_v16, %v12075_v17  ;;  %v12331_v20 = vld [vmem:[#allocation6 + $0x7a0] sm:$0xf0]  ;;  %v12406_v33 = vld [vmem:[#allocation3 + $0x74] sm:$0xf0] }
  0x49   :  { %v12651_v24 = vld [vmem:[#allocation6 + $0x41c] sm:$0xf0]  ;;  %v11819_v26 = vld [vmem:[#allocation6 + $0x3a0] sm:$0xf0]  ;;  %15195 = vst [vmem:[#allocation21_spill] sm:$0xff] %v12957_v7 }
  0x4a   :  { %v12137_v25 = vld [vmem:[#allocation6 + $0x600] sm:$0xf]  ;;  %v11882_v38 = vor.u32 %v12651_v24, %v11881_v23  ;;  %3552 = vmatpush.bf16.msra.mxu1 %v11626_v37  ;;  %v12334_v23 = vor.u32 %v12759_v18, %v12331_v20  ;;  %v11566_v24 = vor.u32 %v12567_v21, %v11563_v22  ;;  %v12929_v37 = vor.u32 %v12403_v30, %v10907_v31  ;;  %v12415_v10 = vld [vmem:[#allocation3 + $0xc4] sm:$0xf]  ;;  %v10955_v11 = vld [vmem:[#allocation3 + $0xd0] sm:$0xf0] }
  0x4b   :  { %v12715_v27 = vld [vmem:[#allocation6 + $0x61c] sm:$0xf0]  ;;  %v10961_v16 = vld [vmem:[#allocation3 + $0xc8] sm:$0xf]  ;;  %v12418_v17 = vld [vmem:[#allocation3 + $0xd4] sm:$0xf0]  ;;  %v12965_v21 = vor.u32 %v12415_v10, %v10955_v11 }
  0x4c   :  { %v10857_v28 = vld [vmem:[#allocation3] sm:$0xf]  ;;  %v12138_v42 = vor.u32 %v12715_v27, %v12137_v25  ;;  %3721 = vmatpush.bf16.msra.mxu2 %v11882_v38  ;;  %4052 = vmatpush.bf16.msrb.mxu0 %v11598_v54  ;;  %v12631_v25 = vld [vmem:[#allocation6 + $0x384] sm:$0xf]  ;;  %v12931_v38 = vor.u32 %v12406_v33, %v10913_v32  ;;  %v12416_v18 = vld [vmem:[#allocation3 + $0xcc] sm:$0xf]  ;;  %v12967_v22 = vor.u32 %v12418_v17, %v10961_v16 }
  0x4d   :  { %v12891_v47 = vor.u32 %v12393_v29, %v10857_v28  ;;  %3553 = vmatmul.bf16.vlgmr.msra.gmra.mxu1 %v12893_v51  ;;  %v10873_v56 = vld [vmem:[#allocation3 + $0x20] sm:$0xf]  ;;  %v11822_v27 = vor.u32 %v12631_v25, %v11819_v26  ;;  %v12405_v29 = vld [vmem:[#allocation3 + $0x6c] sm:$0xf0]  ;;  %15197 = vst [vmem:[#allocation23_spill] sm:$0xff] %v12965_v21 }
  0x4e   :  { %3890 = vmatpush.bf16.msra.mxu3 %v12138_v42  ;;  %4221 = vmatpush.bf16.msrb.mxu1 %v11854_v55  ;;  %v12903_v0 = vor.u32 %v12397_v57, %v10873_v56  ;;  %v10889_v4 = vld [vmem:[#allocation3 + $0x40] sm:$0xf]  ;;  %v12407_v42 = vld [vmem:[#allocation3 + $0x84] sm:$0xf]  ;;  %v12413_v57 = vld [vmem:[#allocation3 + $0xac] sm:$0xf0] }
  0x4f   :  { %3384 = vmatmul.bf16.vlgmr.msra.gmra.mxu0 %v12891_v47  ;;  %3722 = vmatmul.bf16.vlgmr.msra.gmra.mxu2 %v12895_v52  ;;  %v12915_v12 = vor.u32 %v12401_v5, %v10889_v4  ;;  %v10905_v28 = vld [vmem:[#allocation3 + $0x60] sm:$0xf]  ;;  %v12941_v50 = vor.u32 %v12407_v42, %v10923_v43  ;;  %v12953_v5 = vor.u32 %v12411_v58, %v10939_v59  ;;  %v12043_v25 = vld [vmem:[#allocation6 + $0x560] sm:$0xf0]  ;;  %v10971_v43 = vld [vmem:[#allocation3 + $0xf0] sm:$0xf0] }
  0x50   :  { %4390 = vmatpush.bf16.msrb.mxu2 %v12110_v44  ;;  %4053 = vmatpush.bf16.msrb.mxu0 %v11566_v24  ;;  %v12927_v36 = vor.u32 %v12405_v29, %v10905_v28  ;;  %v10921_v40 = vld [vmem:[#allocation3 + $0x80] sm:$0xf]  ;;  %v10929_v44 = vld [vmem:[#allocation3 + $0x88] sm:$0xf]  ;;  %15198 = vst [vmem:[#allocation24_spill] sm:$0xff] %v12967_v22 }
  0x51   :  { %3891 = vmatmul.bf16.vlgmr.msra.gmra.mxu3 %v12897_v53  ;;  %15189 = vst [vmem:[#allocation15_spill] sm:$0xff] %v12915_v12  ;;  %v12939_v49 = vor.u32 %v12409_v41, %v10921_v40  ;;  %v12943_v54 = vor.u32 %v12410_v45, %v10929_v44  ;;  %v10937_v56 = vld [vmem:[#allocation3 + $0xa0] sm:$0xf]  ;;  %v12687_v24 = vld [vmem:[#allocation6 + $0x544] sm:$0xf] }
  0x52   :  { %4559 = vmatpush.bf16.msrb.mxu3 %v12366_v48  ;;  %4222 = vmatpush.bf16.msrb.mxu1 %v11822_v27  ;;  %v10931_v48 = vld [vmem:[#allocation3 + $0x98] sm:$0xf0]  ;;  %v12951_v4 = vor.u32 %v12413_v57, %v10937_v56  ;;  %15193 = vst [vmem:[#allocation19_spill] sm:$0xff] %v12953_v5  ;;  %v10953_v8 = vld [vmem:[#allocation3 + $0xc0] sm:$0xf]  ;;  %v12046_v27 = vor.u32 %v12687_v24, %v12043_v25 }
  0x53   :  { %v12945_v55 = vor.u32 %v12408_v46, %v10931_v48  ;;  %v12963_v20 = vor.u32 %v12417_v9, %v10953_v8  ;;  %v12751_v26 = vld [vmem:[#allocation6 + $0x744] sm:$0xf]  ;;  %v10969_v35 = vld [vmem:[#allocation3 + $0xe0] sm:$0xf]  ;;  %v12421_v40 = vld [vmem:[#allocation3 + $0xec] sm:$0xf0] }
  0x54   :  { %4391 = vmatpush.bf16.msrb.mxu2 %v12078_v19  ;;  %v10963_v19 = vld [vmem:[#allocation3 + $0xd8] sm:$0xf0]  ;;  %v12299_v28 = vld [vmem:[#allocation6 + $0x760] sm:$0xf0]  ;;  %v10977_v44 = vld [vmem:[#allocation3 + $0xe8] sm:$0xf]  ;;  %v12975_v56 = vor.u32 %v12421_v40, %v10969_v35 }
  0x55   :  { %15196 = vst [vmem:[#allocation22_spill] sm:$0xff] %v12963_v20  ;;  %v12302_v29 = vor.u32 %v12751_v26, %v12299_v28  ;;  %v12559_v30 = vld [vmem:[#allocation6 + $0x144] sm:$0xf]  ;;  %v12422_v45 = vld [vmem:[#allocation3 + $0xf4] sm:$0xf0] }
  0x56   :  { %4560 = vmatpush.bf16.msrb.mxu3 %v12334_v23  ;;  %v12969_v23 = vor.u32 %v12416_v18, %v10963_v19  ;;  %v11531_v31 = vld [vmem:[#allocation6 + $0x160] sm:$0xf0]  ;;  %v12420_v46 = vld [vmem:[#allocation3 + $0xec] sm:$0xf]  ;;  %v10979_v48 = vld [vmem:[#allocation3 + $0xf8] sm:$0xf0]  ;;  %v12979_v58 = vor.u32 %v12422_v45, %v10977_v44 }
  0x57   :  { %v12623_v32 = vld [vmem:[#allocation6 + $0x344] sm:$0xf]  ;;  %v11534_v33 = vor.u32 %v12559_v30, %v11531_v31  ;;  %v12981_v59 = vor.u32 %v12420_v46, %v10979_v48  ;;  %v10985_v60 = vld [vmem:[#allocation3 + $0x100] sm:$0xf]  ;;  %v10987_v63 = vld [vmem:[#allocation3 + $0x110] sm:$0xf0] }
  0x58   :  { %15199 = vst [vmem:[#allocation25_spill] sm:$0xff] %v12969_v23  ;;  %4392 = vmatpush.bf16.msrb.mxu2 %v12046_v27  ;;  %v12419_v41 = vld [vmem:[#allocation3 + $0xe4] sm:$0xf]  ;;  %v11790_v42 = vor.u32 %v12623_v32, %v11787_v34  ;;  %v10993_v8 = vld [vmem:[#allocation3 + $0x108] sm:$0xf]  ;;  %v12987_v16 = vor.u32 %v12425_v61, %v10985_v60 }
  0x59   :  { %4054 = vmatpush.bf16.msrb.mxu0 %v11534_v33  ;;  %v12977_v57 = vor.u32 %v12419_v41, %v10971_v43  ;;  %v12423_v62 = vld [vmem:[#allocation3 + $0x104] sm:$0xf]  ;;  %v12426_v9 = vld [vmem:[#allocation3 + $0x114] sm:$0xf0]  ;;  %v12424_v10 = vld [vmem:[#allocation3 + $0x10c] sm:$0xf] }
  0x5a   :  { %4561 = vmatpush.bf16.msrb.mxu3 %v12302_v29  ;;  %4223 = vmatpush.bf16.msrb.mxu1 %v11790_v42  ;;  %v10995_v11 = vld [vmem:[#allocation3 + $0x118] sm:$0xf0]  ;;  %v12989_v18 = vor.u32 %v12423_v62, %v10987_v63  ;;  %v12991_v19 = vor.u32 %v12426_v9, %v10993_v8  ;;  %v11001_v34 = vld [vmem:[#allocation3 + $0x120] sm:$0xf]  ;;  %v12429_v35 = vld [vmem:[#allocation3 + $0x12c] sm:$0xf0] }
  0x5b   :  { %v12993_v25 = vor.u32 %v12424_v10, %v10995_v11  ;;  %v12427_v40 = vld [vmem:[#allocation3 + $0x124] sm:$0xf]  ;;  %v11003_v41 = vld [vmem:[#allocation3 + $0x130] sm:$0xf0]  ;;  %v11009_v42 = vld [vmem:[#allocation3 + $0x128] sm:$0xf]  ;;  %v13001_v48 = vor.u32 %v12429_v35, %v11001_v34 }
  0x5c   :  { %v12430_v43 = vld [vmem:[#allocation3 + $0x134] sm:$0xf0]  ;;  %v12428_v44 = vld [vmem:[#allocation3 + $0x12c] sm:$0xf]  ;;  %v11011_v45 = vld [vmem:[#allocation3 + $0x138] sm:$0xf0]  ;;  %v13003_v63 = vor.u32 %v12427_v40, %v11003_v41 }
  0x5d   :  { %3558 = vmatmul.bf16.gmra.mxu1 %v12905_v1  ;;  %15200 = vst [vmem:[#allocation26_spill] sm:$0xff] %v12993_v25  ;;  %v13005_v8 = vor.u32 %v12430_v43, %v11009_v42  ;;  %v13007_v10 = vor.u32 %v12428_v44, %v11011_v45  ;;  %v12433_v34 = vld [vmem:[#allocation3 + $0x14c] sm:$0xf0]  ;;  %v12431_v35 = vld [vmem:[#allocation3 + $0x144] sm:$0xf] }
  0x5e   :  { %15201 = vst [vmem:[#allocation27_spill] sm:$0xff] %v13001_v48  ;;  %v11019_v40 = vld [vmem:[#allocation3 + $0x150] sm:$0xf0]  ;;  %v11025_v41 = vld [vmem:[#allocation3 + $0x148] sm:$0xf] }
  0x5f   :  { %3389 = vmatmul.bf16.gmra.mxu0 %v12903_v0  ;;  %3727 = vmatmul.bf16.gmra.mxu2 %v12907_v2  ;;  %15202 = vst [vmem:[#allocation28_spill] sm:$0xff] %v13003_v63  ;;  %v12434_v42 = vld [vmem:[#allocation3 + $0x154] sm:$0xf0]  ;;  %v12432_v43 = vld [vmem:[#allocation3 + $0x14c] sm:$0xf] }
  0x60   :  { %15203 = vst [vmem:[#allocation29_spill] sm:$0xff] %v13005_v8  ;;  %v11027_v44 = vld [vmem:[#allocation3 + $0x158] sm:$0xf0] }
  0x61   :  { %3896 = vmatmul.bf16.gmra.mxu3 %v12909_v3  ;;  %15204 = vst [vmem:[#allocation30_spill] sm:$0xff] %v13007_v10 }
  0x6d   :  { %3563 = vmatmul.bf16.gmra.mxu1 %v12917_v13 }
  0x6f   :  { %3394 = vmatmul.bf16.gmra.mxu0 %v12915_v12  ;;  %3732 = vmatmul.bf16.gmra.mxu2 %v12919_v14 }
  0x71   :  { %3901 = vmatmul.bf16.gmra.mxu3 %v12921_v15 }
  0x7d   :  { %3568 = vmatmul.bf16.gmra.mxu1 %v12929_v37 }
  0x7f   :  { %3399 = vmatmul.bf16.gmra.mxu0 %v12927_v36  ;;  %3737 = vmatmul.bf16.gmra.mxu2 %v12931_v38 }
  0x81   :  { %3906 = vmatmul.bf16.gmra.mxu3 %v12933_v39 }
  0x8d   :  { %3573 = vmatmul.bf16.gmra.mxu1 %v12941_v50 }
  0x8f   :  { %3404 = vmatmul.bf16.gmra.mxu0 %v12939_v49  ;;  %3742 = vmatmul.bf16.gmra.mxu2 %v12943_v54 }
  0x91   :  { %3911 = vmatmul.bf16.gmra.mxu3 %v12945_v55 }
  0x9d   :  { %3578 = vmatmul.bf16.gmra.mxu1 %v12953_v5 }
  0x9f   :  { %3409 = vmatmul.bf16.gmra.mxu0 %v12951_v4  ;;  %3747 = vmatmul.bf16.gmra.mxu2 %v12955_v6 }
  0xa1   :  { %3916 = vmatmul.bf16.gmra.mxu3 %v12957_v7 }
  0xad   :  { %3583 = vmatmul.bf16.gmra.mxu1 %v12965_v21 }
  0xaf   :  { %3414 = vmatmul.bf16.gmra.mxu0 %v12963_v20  ;;  %3752 = vmatmul.bf16.gmra.mxu2 %v12967_v22 }
  0xb1   :  { %3921 = vmatmul.bf16.gmra.mxu3 %v12969_v23 }
  0xbd   :  { %3588 = vmatmul.bf16.gmra.mxu1 %v12977_v57 }
  0xbf   :  { %3419 = vmatmul.bf16.gmra.mxu0 %v12975_v56  ;;  %3757 = vmatmul.bf16.gmra.mxu2 %v12979_v58 }
  0xc1   :  { %3926 = vmatmul.bf16.gmra.mxu3 %v12981_v59 }
  0xca   :  { %v3554_v24 = vpop.f32.mrf.mxu1 }
  0xcc   :  { %v3385_v17 = vpop.f32.mrf.mxu0 }
  0xcd   :  { %v3555_v26 = vadd.f32 %v3554_v24, %v3385_v17  ;;  %3593 = vmatmul.bf16.gmra.mxu1 %v12989_v18 }
  0xcf   :  { %3424 = vmatmul.bf16.gmra.mxu0 %v12987_v16  ;;  %3762 = vmatmul.bf16.gmra.mxu2 %v12991_v19 }
  0xd1   :  { %3931 = vmatmul.bf16.gmra.mxu3 %v12993_v25 }
  0xd2   :  { %v3723_v27 = vpop.f32.mrf.mxu2  ;;  %v3556_v31 = vpop.f32.mrf.mxu1 }
  0xd3   :  { %v3724_v28 = vadd.f32 %v3723_v27, %v3555_v26 }
  0xd4   :  { %v3892_v29 = vpop.f32.mrf.mxu3  ;;  %v3387_v30 = vpop.f32.mrf.mxu0 }
  0xd5   :  { %v12999_v32 = vadd.f32 %v3892_v29, %v3724_v28  ;;  %v3557_v33 = vadd.f32 %v3556_v31, %v3387_v30 }
  0xda   :  { %v3725_v46 = vpop.f32.mrf.mxu2  ;;  %v3559_v9 = vpop.f32.mrf.mxu1 }
  0xdb   :  { %v3726_v60 = vadd.f32 %v3725_v46, %v3557_v33  ;;  %v11017_v33 = vld [vmem:[#allocation3 + $0x140] sm:$0xf] }
  0xdc   :  { %v3894_v61 = vpop.f32.mrf.mxu3  ;;  %v3390_v62 = vpop.f32.mrf.mxu0  ;;  %v13017_v46 = vor.u32 %v12433_v34, %v11017_v33  ;;  %v12743_v33 = vld [vmem:[#allocation6 + $0x704] sm:$0xf] }
  0xdd   :  { %v13009_v11 = vadd.f32 %v3894_v61, %v3726_v60  ;;  %v3560_v17 = vadd.f32 %v3559_v9, %v3390_v62  ;;  %3598 = vmatmul.bf16.gmra.mxu1 %v13003_v63  ;;  %v13019_v9 = vor.u32 %v12431_v35, %v11019_v40  ;;  %v12267_v35 = vld [vmem:[#allocation6 + $0x720] sm:$0xf0] }
  0xde   :  { %15206 = vst [vmem:[#allocation32_spill] sm:$0xff] %v13017_v46 }
  0xdf   :  { %3429 = vmatmul.bf16.gmra.mxu0 %v13001_v48  ;;  %3767 = vmatmul.bf16.gmra.mxu2 %v13005_v8  ;;  %15207 = vst [vmem:[#allocation33_spill] sm:$0xff] %v13019_v9 }
  0xe1   :  { %3936 = vmatmul.bf16.gmra.mxu3 %v13007_v10 }
  0xe2   :  { %v3728_v24 = vpop.f32.mrf.mxu2  ;;  %v3561_v29 = vpop.f32.mrf.mxu1 }
  0xe3   :  { %v3729_v26 = vadd.f32 %v3728_v24, %v3560_v17  ;;  %v13021_v17 = vor.u32 %v12434_v42, %v11025_v41  ;;  %v12270_v41 = vor.u32 %v12743_v33, %v12267_v35  ;;  %v11041_v33 = vld [vmem:[#allocation3 + $0x168] sm:$0xf]  ;;  %v12436_v35 = vld [vmem:[#allocation3 + $0x16c] sm:$0xf] }
  0xe4   :  { %v3897_v27 = vpop.f32.mrf.mxu3  ;;  %v3392_v28 = vpop.f32.mrf.mxu0 }
  0xe5   :  { %v13015_v30 = vadd.f32 %v3897_v27, %v3729_v26  ;;  %v3562_v31 = vadd.f32 %v3561_v29, %v3392_v28  ;;  %15208 = vst [vmem:[#allocation34_spill] sm:$0xff] %v13021_v17  ;;  %v13023_v26 = vor.u32 %v12432_v43, %v11027_v44  ;;  %v12679_v29 = vld [vmem:[#allocation6 + $0x504] sm:$0xf]  ;;  %4562 = vmatpush.bf16.msrb.mxu3 %v12270_v41 }
  0xe7   :  { %15205 = vst [vmem:[#allocation31_spill] sm:$0xff] %v13015_v30  ;;  %v11035_v30 = vld [vmem:[#allocation3 + $0x170] sm:$0xf0] }
  0xe8   :  { %15209 = vst [vmem:[#allocation35_spill] sm:$0xff] %v13023_v26 }
  0xea   :  { %v3730_v45 = vpop.f32.mrf.mxu2  ;;  %v3564_v24 = vpop.f32.mrf.mxu1 }
  0xeb   :  { %v3731_v60 = vadd.f32 %v3730_v45, %v3562_v31  ;;  %v12011_v31 = vld [vmem:[#allocation6 + $0x520] sm:$0xf0] }
  0xec   :  { %v3899_v61 = vpop.f32.mrf.mxu3  ;;  %v3395_v62 = vpop.f32.mrf.mxu0  ;;  %v12014_v34 = vor.u32 %v12679_v29, %v12011_v31  ;;  %v12435_v29 = vld [vmem:[#allocation3 + $0x164] sm:$0xf] }
  0xed   :  { %v13025_v27 = vadd.f32 %v3899_v61, %v3731_v60  ;;  %v3565_v28 = vadd.f32 %v3564_v24, %v3395_v62  ;;  %3603 = vmatmul.bf16.gmra.mxu1 %v13019_v9  ;;  %v12551_v62 = vld [vmem:[#allocation6 + $0x104] sm:$0xf] }
  0xee   :  { %4393 = vmatpush.bf16.msrb.mxu2 %v12014_v34  ;;  %v11499_v24 = vld [vmem:[#allocation6 + $0x120] sm:$0xf0]  ;;  %v11043_v34 = vld [vmem:[#allocation3 + $0x178] sm:$0xf0] }
  0xef   :  { %15210 = vst [vmem:[#allocation36_spill] sm:$0xff] %v13025_v27  ;;  %3434 = vmatmul.bf16.gmra.mxu0 %v13017_v46  ;;  %3772 = vmatmul.bf16.gmra.mxu2 %v13021_v17  ;;  %v12615_v17 = vld [vmem:[#allocation6 + $0x304] sm:$0xf]  ;;  %v11033_v27 = vld [vmem:[#allocation3 + $0x160] sm:$0xf] }
  0xf0   :  { %v11755_v9 = vld [vmem:[#allocation6 + $0x320] sm:$0xf0]  ;;  %v12437_v46 = vld [vmem:[#allocation3 + $0x16c] sm:$0xf0] }
  0xf1   :  { %3941 = vmatmul.bf16.gmra.mxu3 %v13023_v26  ;;  %v11502_v26 = vor.u32 %v12551_v62, %v11499_v24  ;;  %v11758_v31 = vor.u32 %v12615_v17, %v11755_v9  ;;  %v13033_v41 = vor.u32 %v12437_v46, %v11033_v27 }
  0xf2   :  { %v3733_v40 = vpop.f32.mrf.mxu2  ;;  %v3566_v45 = vpop.f32.mrf.mxu1 }
  0xf3   :  { %v3734_v42 = vadd.f32 %v3733_v40, %v3565_v28  ;;  %v12438_v28 = vld [vmem:[#allocation3 + $0x174] sm:$0xf0]  ;;  %4055 = vmatpush.bf16.msrb.mxu0 %v11502_v26  ;;  %4224 = vmatpush.bf16.msrb.mxu1 %v11758_v31  ;;  %15212 = vst [vmem:[#allocation38_spill] sm:$0xff] %v13033_v41 }
  0xf4   :  { %v3902_v43 = vpop.f32.mrf.mxu3  ;;  %v3397_v44 = vpop.f32.mrf.mxu0  ;;  %v13037_v62 = vor.u32 %v12438_v28, %v11041_v33  ;;  %v11049_v33 = vld [vmem:[#allocation3 + $0x180] sm:$0xf]  ;;  %v12441_v28 = vld [vmem:[#allocation3 + $0x18c] sm:$0xf0] }
  0xf5   :  { %v13031_v60 = vadd.f32 %v3902_v43, %v3734_v42  ;;  %v3567_v61 = vadd.f32 %v3566_v45, %v3397_v44  ;;  %v13035_v45 = vor.u32 %v12435_v29, %v11035_v30 }
  0xf6   :  { %15214 = vst [vmem:[#allocation40_spill] sm:$0xff] %v13037_v62 }
  0xf7   :  { %15211 = vst [vmem:[#allocation37_spill] sm:$0xff] %v13031_v60  ;;  %v13039_v60 = vor.u32 %v12436_v35, %v11043_v34  ;;  %v12439_v35 = vld [vmem:[#allocation3 + $0x184] sm:$0xf]  ;;  %v11051_v34 = vld [vmem:[#allocation3 + $0x190] sm:$0xf0] }
  0xf8   :  { %15213 = vst [vmem:[#allocation39_spill] sm:$0xff] %v13035_v45 }
  0xf9   :  { %15215 = vst [vmem:[#allocation41_spill] sm:$0xff] %v13039_v60 }
  0xfa   :  { %v3735_v40 = vpop.f32.mrf.mxu2  ;;  %v3569_v24 = vpop.f32.mrf.mxu1 }
  0xfb   :  { %v3736_v42 = vadd.f32 %v3735_v40, %v3567_v61  ;;  %v11057_v40 = vld [vmem:[#allocation3 + $0x188] sm:$0xf] }
  0xfc   :  { %v3904_v43 = vpop.f32.mrf.mxu3  ;;  %v3400_v44 = vpop.f32.mrf.mxu0 }
  0xfd   :  { %v13041_v9 = vadd.f32 %v3904_v43, %v3736_v42  ;;  %v3570_v17 = vadd.f32 %v3569_v24, %v3400_v44  ;;  %3608 = vmatmul.bf16.gmra.mxu1 %v13035_v45  ;;  %v12442_v42 = vld [vmem:[#allocation3 + $0x194] sm:$0xf0]  ;;  %v12440_v43 = vld [vmem:[#allocation3 + $0x18c] sm:$0xf]  ;;  %v11059_v44 = vld [vmem:[#allocation3 + $0x198] sm:$0xf0] }
  0xff   :  { %15216 = vst [vmem:[#allocation42_spill] sm:$0xff] %v13041_v9  ;;  %3439 = vmatmul.bf16.gmra.mxu0 %v13033_v41  ;;  %3777 = vmatmul.bf16.gmra.mxu2 %v13037_v62  ;;  %v13049_v62 = vor.u32 %v12441_v28, %v11049_v33  ;;  %v13053_v9 = vor.u32 %v12442_v42, %v11057_v40  ;;  %v11099_v41 = vld [vmem:[#allocation3 + $0x1f0] sm:$0xf0] }
 0x101   :  { %3946 = vmatmul.bf16.gmra.mxu3 %v13039_v60  ;;  %15218 = vst [vmem:[#allocation44_spill] sm:$0xff] %v13049_v62 }
 0x102   :  { %v3738_v46 = vpop.f32.mrf.mxu2  ;;  %v3571_v61 = vpop.f32.mrf.mxu1  ;;  %15220 = vst [vmem:[#allocation46_spill] sm:$0xff] %v13053_v9 }
 0x103   :  { %v3739_v26 = vadd.f32 %v3738_v46, %v3570_v17  ;;  %v13051_v46 = vor.u32 %v12439_v35, %v11051_v34 }
 0x104   :  { %v3907_v30 = vpop.f32.mrf.mxu3  ;;  %v3402_v27 = vpop.f32.mrf.mxu0 }
 0x105   :  { %v13047_v29 = vadd.f32 %v3907_v30, %v3739_v26  ;;  %v3572_v31 = vadd.f32 %v3571_v61, %v3402_v27  ;;  %15219 = vst [vmem:[#allocation45_spill] sm:$0xff] %v13051_v46  ;;  %v13055_v30 = vor.u32 %v12440_v43, %v11059_v44  ;;  %v11065_v43 = vld [vmem:[#allocation3 + $0x1a0] sm:$0xf]  ;;  %v11067_v44 = vld [vmem:[#allocation3 + $0x1b0] sm:$0xf0] }
 0x107   :  { %15217 = vst [vmem:[#allocation43_spill] sm:$0xff] %v13047_v29 }
 0x108   :  { %15221 = vst [vmem:[#allocation47_spill] sm:$0xff] %v13055_v30 }
 0x10a   :  { %v3740_v24 = vpop.f32.mrf.mxu2  ;;  %v3574_v26 = vpop.f32.mrf.mxu1 }
 0x10b   :  { %v3741_v60 = vadd.f32 %v3740_v24, %v3572_v31  ;;  %v11073_v24 = vld [vmem:[#allocation3 + $0x1a8] sm:$0xf] }
 0x10c   :  { %v3909_v45 = vpop.f32.mrf.mxu3  ;;  %v3405_v17 = vpop.f32.mrf.mxu0 }
 0x10d   :  { %v13057_v27 = vadd.f32 %v3909_v45, %v3741_v60  ;;  %v3575_v61 = vadd.f32 %v3574_v26, %v3405_v17  ;;  %3613 = vmatmul.bf16.gmra.mxu1 %v13051_v46  ;;  %v12445_v60 = vld [vmem:[#allocation3 + $0x1ac] sm:$0xf0]  ;;  %v12443_v45 = vld [vmem:[#allocation3 + $0x1a4] sm:$0xf]  ;;  %v12446_v17 = vld [vmem:[#allocation3 + $0x1b4] sm:$0xf0] }
 0x10e   :  { %v12444_v26 = vld [vmem:[#allocation3 + $0x1ac] sm:$0xf]  ;;  %v11075_v46 = vld [vmem:[#allocation3 + $0x1b8] sm:$0xf0]  ;;  %v13069_v29 = vor.u32 %v12446_v17, %v11073_v24  ;;  %v11081_v24 = vld [vmem:[#allocation3 + $0x1c0] sm:$0xf] }
 0x10f   :  { %15222 = vst [vmem:[#allocation48_spill] sm:$0xff] %v13057_v27  ;;  %3444 = vmatmul.bf16.gmra.mxu0 %v13049_v62  ;;  %3782 = vmatmul.bf16.gmra.mxu2 %v13053_v9  ;;  %v13065_v9 = vor.u32 %v12445_v60, %v11065_v43  ;;  %v11083_v17 = vld [vmem:[#allocation3 + $0x1d0] sm:$0xf0] }
 0x110   :  { %15226 = vst [vmem:[#allocation52_spill] sm:$0xff] %v13069_v29 }
 0x111   :  { %3951 = vmatmul.bf16.gmra.mxu3 %v13055_v30  ;;  %15224 = vst [vmem:[#allocation50_spill] sm:$0xff] %v13065_v9 }
 0x112   :  { %v3743_v31 = vpop.f32.mrf.mxu2  ;;  %v3576_v34 = vpop.f32.mrf.mxu1 }
 0x113   :  { %v3744_v33 = vadd.f32 %v3743_v31, %v3575_v61  ;;  %v13067_v31 = vor.u32 %v12443_v45, %v11067_v44 }
 0x114   :  { %v3912_v28 = vpop.f32.mrf.mxu3  ;;  %v3407_v35 = vpop.f32.mrf.mxu0 }
 0x115   :  { %v13063_v40 = vadd.f32 %v3912_v28, %v3744_v33  ;;  %v3577_v42 = vadd.f32 %v3576_v34, %v3407_v35  ;;  %15225 = vst [vmem:[#allocation51_spill] sm:$0xff] %v13067_v31  ;;  %v13071_v28 = vor.u32 %v12444_v26, %v11075_v46  ;;  %v11089_v26 = vld [vmem:[#allocation3 + $0x1c8] sm:$0xf] }
 0x117   :  { %15223 = vst [vmem:[#allocation49_spill] sm:$0xff] %v13063_v40 }
 0x118   :  { %15227 = vst [vmem:[#allocation53_spill] sm:$0xff] %v13071_v28 }
 0x11a   :  { %v3745_v27 = vpop.f32.mrf.mxu2  ;;  %v3579_v33 = vpop.f32.mrf.mxu1 }
 0x11b   :  { %v3746_v30 = vadd.f32 %v3745_v27, %v3577_v42 }
 0x11c   :  { %v3914_v62 = vpop.f32.mrf.mxu3  ;;  %v3410_v61 = vpop.f32.mrf.mxu0 }
 0x11d   :  { %v13073_v35 = vadd.f32 %v3914_v62, %v3746_v30  ;;  %v3580_v34 = vadd.f32 %v3579_v33, %v3410_v61  ;;  %3618 = vmatmul.bf16.gmra.mxu1 %v13067_v31  ;;  %v12449_v62 = vld [vmem:[#allocation3 + $0x1cc] sm:$0xf0]  ;;  %v12447_v30 = vld [vmem:[#allocation3 + $0x1c4] sm:$0xf]  ;;  %v12450_v61 = vld [vmem:[#allocation3 + $0x1d4] sm:$0xf0] }
 0x11e   :  { %v12448_v33 = vld [vmem:[#allocation3 + $0x1cc] sm:$0xf]  ;;  %v11091_v31 = vld [vmem:[#allocation3 + $0x1d8] sm:$0xf0]  ;;  %v13085_v40 = vor.u32 %v12450_v61, %v11089_v26 }
 0x11f   :  { %15228 = vst [vmem:[#allocation54_spill] sm:$0xff] %v13073_v35  ;;  %3449 = vmatmul.bf16.gmra.mxu0 %v13065_v9  ;;  %3787 = vmatmul.bf16.gmra.mxu2 %v13069_v29  ;;  %v13081_v29 = vor.u32 %v12449_v62, %v11081_v24  ;;  %v12735_v24 = vld [vmem:[#allocation6 + $0x6c4] sm:$0xf] }
 0x120   :  { %15232 = vst [vmem:[#allocation58_spill] sm:$0xff] %v13085_v40 }
 0x121   :  { %3956 = vmatmul.bf16.gmra.mxu3 %v13071_v28  ;;  %15230 = vst [vmem:[#allocation56_spill] sm:$0xff] %v13081_v29 }
 0x122   :  { %v3748_v27 = vpop.f32.mrf.mxu2  ;;  %v3581_v45 = vpop.f32.mrf.mxu1 }
 0x123   :  { %v3749_v42 = vadd.f32 %v3748_v27, %v3580_v34  ;;  %v13083_v27 = vor.u32 %v12447_v30, %v11083_v17  ;;  %v12235_v30 = vld [vmem:[#allocation6 + $0x6e0] sm:$0xf0] }
 0x124   :  { %v3917_v43 = vpop.f32.mrf.mxu3  ;;  %v3412_v60 = vpop.f32.mrf.mxu0  ;;  %v12238_v26 = vor.u32 %v12735_v24, %v12235_v30  ;;  %v11105_v24 = vld [vmem:[#allocation3 + $0x1e8] sm:$0xf]  ;;  %v12452_v30 = vld [vmem:[#allocation3 + $0x1ec] sm:$0xf] }
 0x125   :  { %v13079_v44 = vadd.f32 %v3917_v43, %v3749_v42  ;;  %v3582_v46 = vadd.f32 %v3581_v45, %v3412_v60  ;;  %15231 = vst [vmem:[#allocation57_spill] sm:$0xff] %v13083_v27  ;;  %v13087_v43 = vor.u32 %v12448_v33, %v11091_v31 }
 0x126   :  { %4563 = vmatpush.bf16.msrb.mxu3 %v12238_v26 }
 0x127   :  { %15229 = vst [vmem:[#allocation55_spill] sm:$0xff] %v13079_v44  ;;  %v12453_v44 = vld [vmem:[#allocation3 + $0x1ec] sm:$0xf0] }
 0x128   :  { %15233 = vst [vmem:[#allocation59_spill] sm:$0xff] %v13087_v43 }
 0x12a   :  { %v3750_v35 = vpop.f32.mrf.mxu2  ;;  %v3584_v42 = vpop.f32.mrf.mxu1 }
 0x12b   :  { %v3751_v28 = vadd.f32 %v3750_v35, %v3582_v46  ;;  %v12671_v35 = vld [vmem:[#allocation6 + $0x4c4] sm:$0xf] }
 0x12c   :  { %v3919_v9 = vpop.f32.mrf.mxu3  ;;  %v3415_v34 = vpop.f32.mrf.mxu0  ;;  %v11979_v46 = vld [vmem:[#allocation6 + $0x4e0] sm:$0xf0] }
 0x12d   :  { %v13089_v60 = vadd.f32 %v3919_v9, %v3751_v28  ;;  %v3585_v45 = vadd.f32 %v3584_v42, %v3415_v34  ;;  %3623 = vmatmul.bf16.gmra.mxu1 %v13083_v27  ;;  %v11982_v62 = vor.u32 %v12671_v35, %v11979_v46  ;;  %v12543_v42 = vld [vmem:[#allocation6 + $0xc4] sm:$0xf] }
 0x12e   :  { %v12607_v27 = vld [vmem:[#allocation6 + $0x2c4] sm:$0xf] }
 0x12f   :  { %15234 = vst [vmem:[#allocation60_spill] sm:$0xff] %v13089_v60  ;;  %3454 = vmatmul.bf16.gmra.mxu0 %v13081_v29  ;;  %3792 = vmatmul.bf16.gmra.mxu2 %v13085_v40  ;;  %v11467_v40 = vld [vmem:[#allocation6 + $0xe0] sm:$0xf0]  ;;  %v11097_v29 = vld [vmem:[#allocation3 + $0x1e0] sm:$0xf] }
 0x130   :  { %4394 = vmatpush.bf16.msrb.mxu2 %v11982_v62  ;;  %v11723_v60 = vld [vmem:[#allocation6 + $0x2e0] sm:$0xf0]  ;;  %v11107_v62 = vld [vmem:[#allocation3 + $0x1f8] sm:$0xf0]  ;;  %v13097_v26 = vor.u32 %v12453_v44, %v11097_v29 }
 0x131   :  { %3961 = vmatmul.bf16.gmra.mxu3 %v13087_v43  ;;  %v11470_v43 = vor.u32 %v12543_v42, %v11467_v40  ;;  %v12451_v35 = vld [vmem:[#allocation3 + $0x1e4] sm:$0xf]  ;;  %v11726_v46 = vor.u32 %v12607_v27, %v11723_v60 }
 0x132   :  { %v3753_v17 = vpop.f32.mrf.mxu2  ;;  %v3586_v28 = vpop.f32.mrf.mxu1  ;;  %15236 = vst [vmem:[#allocation62_spill] sm:$0xff] %v13097_v26 }
 0x133   :  { %v3754_v31 = vadd.f32 %v3753_v17, %v3585_v45  ;;  %v12454_v45 = vld [vmem:[#allocation3 + $0x1f4] sm:$0xf0]  ;;  %4056 = vmatpush.bf16.msrb.mxu0 %v11470_v43  ;;  %4225 = vmatpush.bf16.msrb.mxu1 %v11726_v46 }
 0x134   :  { %v3922_v61 = vpop.f32.mrf.mxu3  ;;  %v3417_v9 = vpop.f32.mrf.mxu0  ;;  %v13101_v40 = vor.u32 %v12454_v45, %v11105_v24  ;;  %v11113_v24 = vld [vmem:[#allocation3 + $0x200] sm:$0xf]  ;;  %v12457_v45 = vld [vmem:[#allocation3 + $0x20c] sm:$0xf0] }
 0x135   :  { %v13095_v33 = vadd.f32 %v3922_v61, %v3754_v31  ;;  %v3587_v34 = vadd.f32 %v3586_v28, %v3417_v9  ;;  %v13099_v28 = vor.u32 %v12451_v35, %v11099_v41 }
 0x136   :  { %15238 = vst [vmem:[#allocation64_spill] sm:$0xff] %v13101_v40 }
 0x137   :  { %15235 = vst [vmem:[#allocation61_spill] sm:$0xff] %v13095_v33  ;;  %v13103_v33 = vor.u32 %v12452_v30, %v11107_v62  ;;  %v12455_v30 = vld [vmem:[#allocation3 + $0x204] sm:$0xf]  ;;  %v11115_v62 = vld [vmem:[#allocation3 + $0x210] sm:$0xf0] }
 0x138   :  { %15237 = vst [vmem:[#allocation63_spill] sm:$0xff] %v13099_v28 }
 0x139   :  { %15239 = vst [vmem:[#allocation65_spill] sm:$0xff] %v13103_v33 }
 0x13a   :  { %v3755_v17 = vpop.f32.mrf.mxu2  ;;  %v3589_v42 = vpop.f32.mrf.mxu1 }
 0x13b   :  { %v3756_v31 = vadd.f32 %v3755_v17, %v3587_v34  ;;  %v11121_v17 = vld [vmem:[#allocation3 + $0x208] sm:$0xf] }
 0x13c   :  { %v3924_v61 = vpop.f32.mrf.mxu3  ;;  %v3420_v9 = vpop.f32.mrf.mxu0 }
 0x13d   :  { %v13105_v27 = vadd.f32 %v3924_v61, %v3756_v31  ;;  %v3590_v60 = vadd.f32 %v3589_v42, %v3420_v9  ;;  %3628 = vmatmul.bf16.gmra.mxu1 %v13099_v28  ;;  %v12458_v31 = vld [vmem:[#allocation3 + $0x214] sm:$0xf0]  ;;  %v12456_v61 = vld [vmem:[#allocation3 + $0x20c] sm:$0xf]  ;;  %v11123_v9 = vld [vmem:[#allocation3 + $0x218] sm:$0xf0] }
 0x13f   :  { %15240 = vst [vmem:[#allocation66_spill] sm:$0xff] %v13105_v27  ;;  %3459 = vmatmul.bf16.gmra.mxu0 %v13097_v26  ;;  %3797 = vmatmul.bf16.gmra.mxu2 %v13101_v40  ;;  %v13113_v40 = vor.u32 %v12457_v45, %v11113_v24  ;;  %v13117_v27 = vor.u32 %v12458_v31, %v11121_v17  ;;  %v11163_v26 = vld [vmem:[#allocation3 + $0x270] sm:$0xf0] }
 0x141   :  { %3966 = vmatmul.bf16.gmra.mxu3 %v13103_v33  ;;  %15242 = vst [vmem:[#allocation68_spill] sm:$0xff] %v13113_v40 }
 0x142   :  { %v3758_v29 = vpop.f32.mrf.mxu2  ;;  %v3591_v34 = vpop.f32.mrf.mxu1  ;;  %15244 = vst [vmem:[#allocation70_spill] sm:$0xff] %v13117_v27 }
 0x143   :  { %v3759_v44 = vadd.f32 %v3758_v29, %v3590_v60  ;;  %v13115_v29 = vor.u32 %v12455_v30, %v11115_v62 }
 0x144   :  { %v3927_v41 = vpop.f32.mrf.mxu3  ;;  %v3422_v43 = vpop.f32.mrf.mxu0 }
 0x145   :  { %v13111_v35 = vadd.f32 %v3927_v41, %v3759_v44  ;;  %v3592_v46 = vadd.f32 %v3591_v34, %v3422_v43  ;;  %15243 = vst [vmem:[#allocation69_spill] sm:$0xff] %v13115_v29  ;;  %v13119_v41 = vor.u32 %v12456_v61, %v11123_v9  ;;  %v11129_v61 = vld [vmem:[#allocation3 + $0x220] sm:$0xf]  ;;  %v11131_v9 = vld [vmem:[#allocation3 + $0x230] sm:$0xf0] }
 0x147   :  { %15241 = vst [vmem:[#allocation67_spill] sm:$0xff] %v13111_v35 }
 0x148   :  { %15245 = vst [vmem:[#allocation71_spill] sm:$0xff] %v13119_v41 }
 0x14a   :  { %v3760_v42 = vpop.f32.mrf.mxu2  ;;  %v3594_v44 = vpop.f32.mrf.mxu1 }
 0x14b   :  { %v3761_v33 = vadd.f32 %v3760_v42, %v3592_v46  ;;  %v11137_v42 = vld [vmem:[#allocation3 + $0x228] sm:$0xf] }
 0x14c   :  { %v3929_v28 = vpop.f32.mrf.mxu3  ;;  %v3425_v60 = vpop.f32.mrf.mxu0 }
 0x14d   :  { %v13121_v43 = vadd.f32 %v3929_v28, %v3761_v33  ;;  %v3595_v34 = vadd.f32 %v3594_v44, %v3425_v60  ;;  %3633 = vmatmul.bf16.gmra.mxu1 %v13115_v29  ;;  %v12461_v33 = vld [vmem:[#allocation3 + $0x22c] sm:$0xf0]  ;;  %v12459_v28 = vld [vmem:[#allocation3 + $0x224] sm:$0xf]  ;;  %v12462_v60 = vld [vmem:[#allocation3 + $0x234] sm:$0xf0] }
 0x14e   :  { %v12460_v44 = vld [vmem:[#allocation3 + $0x22c] sm:$0xf]  ;;  %v11139_v29 = vld [vmem:[#allocation3 + $0x238] sm:$0xf0]  ;;  %v13133_v35 = vor.u32 %v12462_v60, %v11137_v42  ;;  %v11145_v42 = vld [vmem:[#allocation3 + $0x240] sm:$0xf] }
 0x14f   :  { %15246 = vst [vmem:[#allocation72_spill] sm:$0xff] %v13121_v43  ;;  %3464 = vmatmul.bf16.gmra.mxu0 %v13113_v40  ;;  %3802 = vmatmul.bf16.gmra.mxu2 %v13117_v27  ;;  %v13129_v27 = vor.u32 %v12461_v33, %v11129_v61  ;;  %v11147_v60 = vld [vmem:[#allocation3 + $0x250] sm:$0xf0] }
 0x150   :  { %15250 = vst [vmem:[#allocation76_spill] sm:$0xff] %v13133_v35 }
 0x151   :  { %3971 = vmatmul.bf16.gmra.mxu3 %v13119_v41  ;;  %15248 = vst [vmem:[#allocation74_spill] sm:$0xff] %v13129_v27 }
 0x152   :  { %v3763_v46 = vpop.f32.mrf.mxu2  ;;  %v3596_v62 = vpop.f32.mrf.mxu1 }
 0x153   :  { %v3764_v24 = vadd.f32 %v3763_v46, %v3595_v34  ;;  %v13131_v46 = vor.u32 %v12459_v28, %v11131_v9 }
 0x154   :  { %v3932_v45 = vpop.f32.mrf.mxu3  ;;  %v3427_v30 = vpop.f32.mrf.mxu0 }
 0x155   :  { %v13127_v17 = vadd.f32 %v3932_v45, %v3764_v24  ;;  %v3597_v31 = vadd.f32 %v3596_v62, %v3427_v30  ;;  %15249 = vst [vmem:[#allocation75_spill] sm:$0xff] %v13131_v46  ;;  %v13135_v45 = vor.u32 %v12460_v44, %v11139_v29  ;;  %v11153_v44 = vld [vmem:[#allocation3 + $0x248] sm:$0xf] }
 0x157   :  { %15247 = vst [vmem:[#allocation73_spill] sm:$0xff] %v13127_v17 }
 0x158   :  { %15251 = vst [vmem:[#allocation77_spill] sm:$0xff] %v13135_v45 }
 0x15a   :  { %v3765_v43 = vpop.f32.mrf.mxu2  ;;  %v3599_v24 = vpop.f32.mrf.mxu1 }
 0x15b   :  { %v3766_v41 = vadd.f32 %v3765_v43, %v3597_v31 }
 0x15c   :  { %v3934_v40 = vpop.f32.mrf.mxu3  ;;  %v3430_v34 = vpop.f32.mrf.mxu0 }
 0x15d   :  { %v13137_v30 = vadd.f32 %v3934_v40, %v3766_v41  ;;  %v3600_v62 = vadd.f32 %v3599_v24, %v3430_v34  ;;  %3638 = vmatmul.bf16.gmra.mxu1 %v13131_v46  ;;  %v12465_v40 = vld [vmem:[#allocation3 + $0x24c] sm:$0xf0]  ;;  %v12463_v41 = vld [vmem:[#allocation3 + $0x244] sm:$0xf]  ;;  %v12466_v34 = vld [vmem:[#allocation3 + $0x254] sm:$0xf0] }
 0x15e   :  { %v12464_v24 = vld [vmem:[#allocation3 + $0x24c] sm:$0xf]  ;;  %v11155_v46 = vld [vmem:[#allocation3 + $0x258] sm:$0xf0]  ;;  %v13149_v17 = vor.u32 %v12466_v34, %v11153_v44 }
 0x15f   :  { %15252 = vst [vmem:[#allocation78_spill] sm:$0xff] %v13137_v30  ;;  %3469 = vmatmul.bf16.gmra.mxu0 %v13129_v27  ;;  %3807 = vmatmul.bf16.gmra.mxu2 %v13133_v35  ;;  %v13145_v35 = vor.u32 %v12465_v40, %v11145_v42  ;;  %v12727_v42 = vld [vmem:[#allocation6 + $0x684] sm:$0xf] }
 0x160   :  { %15256 = vst [vmem:[#allocation82_spill] sm:$0xff] %v13149_v17 }
 0x161   :  { %3976 = vmatmul.bf16.gmra.mxu3 %v13135_v45  ;;  %15254 = vst [vmem:[#allocation80_spill] sm:$0xff] %v13145_v35 }
 0x162   :  { %v3768_v43 = vpop.f32.mrf.mxu2  ;;  %v3601_v28 = vpop.f32.mrf.mxu1 }
 0x163   :  { %v3769_v31 = vadd.f32 %v3768_v43, %v3600_v62  ;;  %v13147_v43 = vor.u32 %v12463_v41, %v11147_v60  ;;  %v12203_v41 = vld [vmem:[#allocation6 + $0x6a0] sm:$0xf0] }
 0x164   :  { %v3937_v61 = vpop.f32.mrf.mxu3  ;;  %v3432_v33 = vpop.f32.mrf.mxu0  ;;  %v12206_v44 = vor.u32 %v12727_v42, %v12203_v41  ;;  %v11169_v42 = vld [vmem:[#allocation3 + $0x268] sm:$0xf]  ;;  %v12468_v41 = vld [vmem:[#allocation3 + $0x26c] sm:$0xf] }
 0x165   :  { %v13143_v9 = vadd.f32 %v3937_v61, %v3769_v31  ;;  %v3602_v29 = vadd.f32 %v3601_v28, %v3432_v33  ;;  %15255 = vst [vmem:[#allocation81_spill] sm:$0xff] %v13147_v43  ;;  %v13151_v61 = vor.u32 %v12464_v24, %v11155_v46 }
 0x166   :  { %4564 = vmatpush.bf16.msrb.mxu3 %v12206_v44 }
 0x167   :  { %15253 = vst [vmem:[#allocation79_spill] sm:$0xff] %v13143_v9  ;;  %v12469_v9 = vld [vmem:[#allocation3 + $0x26c] sm:$0xf0] }
 0x168   :  { %15257 = vst [vmem:[#allocation83_spill] sm:$0xff] %v13151_v61 }
 0x16a   :  { %v3770_v30 = vpop.f32.mrf.mxu2  ;;  %v3604_v31 = vpop.f32.mrf.mxu1 }
 0x16b   :  { %v3771_v45 = vadd.f32 %v3770_v30, %v3602_v29  ;;  %v12663_v30 = vld [vmem:[#allocation6 + $0x484] sm:$0xf] }
 0x16c   :  { %v3939_v27 = vpop.f32.mrf.mxu3  ;;  %v3435_v62 = vpop.f32.mrf.mxu0  ;;  %v11947_v29 = vld [vmem:[#allocation6 + $0x4a0] sm:$0xf0] }
 0x16d   :  { %v13153_v33 = vadd.f32 %v3939_v27, %v3771_v45  ;;  %v3605_v28 = vadd.f32 %v3604_v31, %v3435_v62  ;;  %3643 = vmatmul.bf16.gmra.mxu1 %v13147_v43  ;;  %v11950_v40 = vor.u32 %v12663_v30, %v11947_v29  ;;  %v12535_v31 = vld [vmem:[#allocation6 + $0x84] sm:$0xf] }
 0x16e   :  { %v12599_v43 = vld [vmem:[#allocation6 + $0x284] sm:$0xf] }
 0x16f   :  { %15258 = vst [vmem:[#allocation84_spill] sm:$0xff] %v13153_v33  ;;  %3474 = vmatmul.bf16.gmra.mxu0 %v13145_v35  ;;  %3812 = vmatmul.bf16.gmra.mxu2 %v13149_v17  ;;  %v11435_v17 = vld [vmem:[#allocation6 + $0xa0] sm:$0xf0]  ;;  %v11161_v35 = vld [vmem:[#allocation3 + $0x260] sm:$0xf] }
 0x170   :  { %4395 = vmatpush.bf16.msrb.mxu2 %v11950_v40  ;;  %v11691_v33 = vld [vmem:[#allocation6 + $0x2a0] sm:$0xf0]  ;;  %v11171_v40 = vld [vmem:[#allocation3 + $0x278] sm:$0xf0]  ;;  %v13161_v44 = vor.u32 %v12469_v9, %v11161_v35 }
 0x171   :  { %3981 = vmatmul.bf16.gmra.mxu3 %v13151_v61  ;;  %v11438_v61 = vor.u32 %v12535_v31, %v11435_v17  ;;  %v12467_v30 = vld [vmem:[#allocation3 + $0x264] sm:$0xf]  ;;  %v11694_v29 = vor.u32 %v12599_v43, %v11691_v33 }
 0x172   :  { %v3773_v60 = vpop.f32.mrf.mxu2  ;;  %v3606_v45 = vpop.f32.mrf.mxu1  ;;  %15260 = vst [vmem:[#allocation86_spill] sm:$0xff] %v13161_v44 }
 0x173   :  { %v3774_v46 = vadd.f32 %v3773_v60, %v3605_v28  ;;  %v12470_v28 = vld [vmem:[#allocation3 + $0x274] sm:$0xf0]  ;;  %4057 = vmatpush.bf16.msrb.mxu0 %v11438_v61  ;;  %4226 = vmatpush.bf16.msrb.mxu1 %v11694_v29 }
 0x174   :  { %v3942_v34 = vpop.f32.mrf.mxu3  ;;  %v3437_v27 = vpop.f32.mrf.mxu0  ;;  %v13165_v17 = vor.u32 %v12470_v28, %v11169_v42  ;;  %v11177_v42 = vld [vmem:[#allocation3 + $0x280] sm:$0xf]  ;;  %v12473_v28 = vld [vmem:[#allocation3 + $0x28c] sm:$0xf0] }
 0x175   :  { %v13159_v24 = vadd.f32 %v3942_v34, %v3774_v46  ;;  %v3607_v62 = vadd.f32 %v3606_v45, %v3437_v27  ;;  %v13163_v45 = vor.u32 %v12467_v30, %v11163_v26 }
 0x176   :  { %15262 = vst [vmem:[#allocation88_spill] sm:$0xff] %v13165_v17 }
 0x177   :  { %15259 = vst [vmem:[#allocation85_spill] sm:$0xff] %v13159_v24  ;;  %v13167_v24 = vor.u32 %v12468_v41, %v11171_v40  ;;  %v12471_v41 = vld [vmem:[#allocation3 + $0x284] sm:$0xf]  ;;  %v11179_v40 = vld [vmem:[#allocation3 + $0x290] sm:$0xf0] }
 0x178   :  { %15261 = vst [vmem:[#allocation87_spill] sm:$0xff] %v13163_v45 }
 0x179   :  { %15263 = vst [vmem:[#allocation89_spill] sm:$0xff] %v13167_v24 }
 0x17a   :  { %v3775_v60 = vpop.f32.mrf.mxu2  ;;  %v3609_v31 = vpop.f32.mrf.mxu1 }
 0x17b   :  { %v3776_v46 = vadd.f32 %v3775_v60, %v3607_v62  ;;  %v11185_v60 = vld [vmem:[#allocation3 + $0x288] sm:$0xf] }
 0x17c   :  { %v3944_v34 = vpop.f32.mrf.mxu3  ;;  %v3440_v27 = vpop.f32.mrf.mxu0 }
 0x17d   :  { %v13169_v43 = vadd.f32 %v3944_v34, %v3776_v46  ;;  %v3610_v33 = vadd.f32 %v3609_v31, %v3440_v27  ;;  %3648 = vmatmul.bf16.gmra.mxu1 %v13163_v45  ;;  %v12474_v46 = vld [vmem:[#allocation3 + $0x294] sm:$0xf0]  ;;  %v12472_v34 = vld [vmem:[#allocation3 + $0x28c] sm:$0xf]  ;;  %v11187_v27 = vld [vmem:[#allocation3 + $0x298] sm:$0xf0] }
 0x17f   :  { %15264 = vst [vmem:[#allocation90_spill] sm:$0xff] %v13169_v43  ;;  %3479 = vmatmul.bf16.gmra.mxu0 %v13161_v44  ;;  %3817 = vmatmul.bf16.gmra.mxu2 %v13165_v17  ;;  %v13177_v17 = vor.u32 %v12473_v28, %v11177_v42  ;;  %v13181_v43 = vor.u32 %v12474_v46, %v11185_v60  ;;  %v11227_v44 = vld [vmem:[#allocation3 + $0x2f0] sm:$0xf0] }
 0x181   :  { %3986 = vmatmul.bf16.gmra.mxu3 %v13167_v24  ;;  %15266 = vst [vmem:[#allocation92_spill] sm:$0xff] %v13177_v17 }
 0x182   :  { %v3778_v35 = vpop.f32.mrf.mxu2  ;;  %v3611_v62 = vpop.f32.mrf.mxu1  ;;  %15268 = vst [vmem:[#allocation94_spill] sm:$0xff] %v13181_v43 }
 0x183   :  { %v3779_v9 = vadd.f32 %v3778_v35, %v3610_v33  ;;  %v13179_v35 = vor.u32 %v12471_v41, %v11179_v40 }
 0x184   :  { %v3947_v26 = vpop.f32.mrf.mxu3  ;;  %v3442_v61 = vpop.f32.mrf.mxu0 }
 0x185   :  { %v13175_v30 = vadd.f32 %v3947_v26, %v3779_v9  ;;  %v3612_v29 = vadd.f32 %v3611_v62, %v3442_v61  ;;  %15267 = vst [vmem:[#allocation93_spill] sm:$0xff] %v13179_v35  ;;  %v13183_v26 = vor.u32 %v12472_v34, %v11187_v27  ;;  %v11193_v34 = vld [vmem:[#allocation3 + $0x2a0] sm:$0xf]  ;;  %v11195_v27 = vld [vmem:[#allocation3 + $0x2b0] sm:$0xf0] }
 0x187   :  { %15265 = vst [vmem:[#allocation91_spill] sm:$0xff] %v13175_v30 }
 0x188   :  { %15269 = vst [vmem:[#allocation95_spill] sm:$0xff] %v13183_v26 }
 0x18a   :  { %v3780_v31 = vpop.f32.mrf.mxu2  ;;  %v3614_v9 = vpop.f32.mrf.mxu1 }
 0x18b   :  { %v3781_v24 = vadd.f32 %v3780_v31, %v3612_v29  ;;  %v11201_v31 = vld [vmem:[#allocation3 + $0x2a8] sm:$0xf] }
 0x18c   :  { %v3949_v45 = vpop.f32.mrf.mxu3  ;;  %v3445_v33 = vpop.f32.mrf.mxu0 }
 0x18d   :  { %v13185_v61 = vadd.f32 %v3949_v45, %v3781_v24  ;;  %v3615_v62 = vadd.f32 %v3614_v9, %v3445_v33  ;;  %3653 = vmatmul.bf16.gmra.mxu1 %v13179_v35  ;;  %v12477_v24 = vld [vmem:[#allocation3 + $0x2ac] sm:$0xf0]  ;;  %v12475_v45 = vld [vmem:[#allocation3 + $0x2a4] sm:$0xf]  ;;  %v12478_v33 = vld [vmem:[#allocation3 + $0x2b4] sm:$0xf0] }
 0x18e   :  { %v12476_v9 = vld [vmem:[#allocation3 + $0x2ac] sm:$0xf]  ;;  %v11203_v35 = vld [vmem:[#allocation3 + $0x2b8] sm:$0xf0]  ;;  %v13197_v30 = vor.u32 %v12478_v33, %v11201_v31  ;;  %v11209_v31 = vld [vmem:[#allocation3 + $0x2c0] sm:$0xf] }
 0x18f   :  { %15270 = vst [vmem:[#allocation96_spill] sm:$0xff] %v13185_v61  ;;  %3484 = vmatmul.bf16.gmra.mxu0 %v13177_v17  ;;  %3822 = vmatmul.bf16.gmra.mxu2 %v13181_v43  ;;  %v13193_v43 = vor.u32 %v12477_v24, %v11193_v34  ;;  %v11211_v33 = vld [vmem:[#allocation3 + $0x2d0] sm:$0xf0] }
 0x190   :  { %15274 = vst [vmem:[#allocation100_spill] sm:$0xff] %v13197_v30 }
 0x191   :  { %3991 = vmatmul.bf16.gmra.mxu3 %v13183_v26  ;;  %15272 = vst [vmem:[#allocation98_spill] sm:$0xff] %v13193_v43 }
 0x192   :  { %v3783_v29 = vpop.f32.mrf.mxu2  ;;  %v3616_v40 = vpop.f32.mrf.mxu1 }
 0x193   :  { %v3784_v42 = vadd.f32 %v3783_v29, %v3615_v62  ;;  %v13195_v29 = vor.u32 %v12475_v45, %v11195_v27 }
 0x194   :  { %v3952_v28 = vpop.f32.mrf.mxu3  ;;  %v3447_v41 = vpop.f32.mrf.mxu0 }
 0x195   :  { %v13191_v60 = vadd.f32 %v3952_v28, %v3784_v42  ;;  %v3617_v46 = vadd.f32 %v3616_v40, %v3447_v41  ;;  %15273 = vst [vmem:[#allocation99_spill] sm:$0xff] %v13195_v29  ;;  %v13199_v28 = vor.u32 %v12476_v9, %v11203_v35  ;;  %v11217_v9 = vld [vmem:[#allocation3 + $0x2c8] sm:$0xf] }
 0x197   :  { %15271 = vst [vmem:[#allocation97_spill] sm:$0xff] %v13191_v60 }
 0x198   :  { %15275 = vst [vmem:[#allocation101_spill] sm:$0xff] %v13199_v28 }
 0x19a   :  { %v3785_v61 = vpop.f32.mrf.mxu2  ;;  %v3619_v42 = vpop.f32.mrf.mxu1 }
 0x19b   :  { %v3786_v26 = vadd.f32 %v3785_v61, %v3617_v46 }
 0x19c   :  { %v3954_v17 = vpop.f32.mrf.mxu3  ;;  %v3450_v62 = vpop.f32.mrf.mxu0 }
 0x19d   :  { %v13201_v41 = vadd.f32 %v3954_v17, %v3786_v26  ;;  %v3620_v40 = vadd.f32 %v3619_v42, %v3450_v62  ;;  %3658 = vmatmul.bf16.gmra.mxu1 %v13195_v29  ;;  %v12481_v17 = vld [vmem:[#allocation3 + $0x2cc] sm:$0xf0]  ;;  %v12479_v26 = vld [vmem:[#allocation3 + $0x2c4] sm:$0xf]  ;;  %v12482_v62 = vld [vmem:[#allocation3 + $0x2d4] sm:$0xf0] }
 0x19e   :  { %v12480_v42 = vld [vmem:[#allocation3 + $0x2cc] sm:$0xf]  ;;  %v11219_v29 = vld [vmem:[#allocation3 + $0x2d8] sm:$0xf0]  ;;  %v13213_v60 = vor.u32 %v12482_v62, %v11217_v9 }
 0x19f   :  { %15276 = vst [vmem:[#allocation102_spill] sm:$0xff] %v13201_v41  ;;  %3489 = vmatmul.bf16.gmra.mxu0 %v13193_v43  ;;  %3827 = vmatmul.bf16.gmra.mxu2 %v13197_v30  ;;  %v13209_v30 = vor.u32 %v12481_v17, %v11209_v31  ;;  %v12719_v31 = vld [vmem:[#allocation6 + $0x644] sm:$0xf] }
 0x1a0   :  { %15280 = vst [vmem:[#allocation106_spill] sm:$0xff] %v13213_v60 }
 0x1a1   :  { %3996 = vmatmul.bf16.gmra.mxu3 %v13199_v28  ;;  %15278 = vst [vmem:[#allocation104_spill] sm:$0xff] %v13209_v30 }
 0x1a2   :  { %v3788_v61 = vpop.f32.mrf.mxu2  ;;  %v3621_v45 = vpop.f32.mrf.mxu1 }
 0x1a3   :  { %v3789_v46 = vadd.f32 %v3788_v61, %v3620_v40  ;;  %v13211_v61 = vor.u32 %v12479_v26, %v11211_v33  ;;  %v12171_v26 = vld [vmem:[#allocation6 + $0x660] sm:$0xf0] }
 0x1a4   :  { %v3957_v34 = vpop.f32.mrf.mxu3  ;;  %v3452_v24 = vpop.f32.mrf.mxu0  ;;  %v12174_v9 = vor.u32 %v12719_v31, %v12171_v26  ;;  %v11233_v31 = vld [vmem:[#allocation3 + $0x2e8] sm:$0xf]  ;;  %v12484_v26 = vld [vmem:[#allocation3 + $0x2ec] sm:$0xf] }
 0x1a5   :  { %v13207_v27 = vadd.f32 %v3957_v34, %v3789_v46  ;;  %v3622_v35 = vadd.f32 %v3621_v45, %v3452_v24  ;;  %15279 = vst [vmem:[#allocation105_spill] sm:$0xff] %v13211_v61  ;;  %v13215_v34 = vor.u32 %v12480_v42, %v11219_v29 }
 0x1a6   :  { %4565 = vmatpush.bf16.msrb.mxu3 %v12174_v9 }
 0x1a7   :  { %15277 = vst [vmem:[#allocation103_spill] sm:$0xff] %v13207_v27  ;;  %v12485_v27 = vld [vmem:[#allocation3 + $0x2ec] sm:$0xf0] }
 0x1a8   :  { %15281 = vst [vmem:[#allocation107_spill] sm:$0xff] %v13215_v34 }
 0x1aa   :  { %v3790_v41 = vpop.f32.mrf.mxu2  ;;  %v3624_v46 = vpop.f32.mrf.mxu1 }
 0x1ab   :  { %v3791_v28 = vadd.f32 %v3790_v41, %v3622_v35  ;;  %v12655_v41 = vld [vmem:[#allocation6 + $0x444] sm:$0xf] }
 0x1ac   :  { %v3959_v43 = vpop.f32.mrf.mxu3  ;;  %v3455_v40 = vpop.f32.mrf.mxu0  ;;  %v11915_v35 = vld [vmem:[#allocation6 + $0x460] sm:$0xf0] }
 0x1ad   :  { %v13217_v24 = vadd.f32 %v3959_v43, %v3791_v28  ;;  %v3625_v45 = vadd.f32 %v3624_v46, %v3455_v40  ;;  %3663 = vmatmul.bf16.gmra.mxu1 %v13211_v61  ;;  %v11918_v17 = vor.u32 %v12655_v41, %v11915_v35  ;;  %v12527_v46 = vld [vmem:[#allocation6 + $0x44] sm:$0xf] }
 0x1ae   :  { %v12591_v61 = vld [vmem:[#allocation6 + $0x244] sm:$0xf] }
 0x1af   :  { %15282 = vst [vmem:[#allocation108_spill] sm:$0xff] %v13217_v24  ;;  %3494 = vmatmul.bf16.gmra.mxu0 %v13209_v30  ;;  %3832 = vmatmul.bf16.gmra.mxu2 %v13213_v60  ;;  %v11403_v60 = vld [vmem:[#allocation6 + $0x60] sm:$0xf0]  ;;  %v11225_v30 = vld [vmem:[#allocation3 + $0x2e0] sm:$0xf] }
 0x1b0   :  { %4396 = vmatpush.bf16.msrb.mxu2 %v11918_v17  ;;  %v11659_v24 = vld [vmem:[#allocation6 + $0x260] sm:$0xf0]  ;;  %v11235_v17 = vld [vmem:[#allocation3 + $0x2f8] sm:$0xf0]  ;;  %v13225_v9 = vor.u32 %v12485_v27, %v11225_v30 }
 0x1b1   :  { %4001 = vmatmul.bf16.gmra.mxu3 %v13215_v34  ;;  %v11406_v34 = vor.u32 %v12527_v46, %v11403_v60  ;;  %v12483_v41 = vld [vmem:[#allocation3 + $0x2e4] sm:$0xf]  ;;  %v11662_v35 = vor.u32 %v12591_v61, %v11659_v24 }
 0x1b2   :  { %v3793_v33 = vpop.f32.mrf.mxu2  ;;  %v3626_v28 = vpop.f32.mrf.mxu1  ;;  %15284 = vst [vmem:[#allocation110_spill] sm:$0xff] %v13225_v9 }
 0x1b3   :  { %v3794_v29 = vadd.f32 %v3793_v33, %v3625_v45  ;;  %v12486_v45 = vld [vmem:[#allocation3 + $0x2f4] sm:$0xf0]  ;;  %4058 = vmatpush.bf16.msrb.mxu0 %v11406_v34  ;;  %4227 = vmatpush.bf16.msrb.mxu1 %v11662_v35 }
 0x1b4   :  { %v3962_v62 = vpop.f32.mrf.mxu3  ;;  %v3457_v43 = vpop.f32.mrf.mxu0  ;;  %v13229_v60 = vor.u32 %v12486_v45, %v11233_v31  ;;  %v11241_v31 = vld [vmem:[#allocation3 + $0x300] sm:$0xf]  ;;  %v12489_v45 = vld [vmem:[#allocation3 + $0x30c] sm:$0xf0] }
 0x1b5   :  { %v13223_v42 = vadd.f32 %v3962_v62, %v3794_v29  ;;  %v3627_v40 = vadd.f32 %v3626_v28, %v3457_v43  ;;  %v13227_v28 = vor.u32 %v12483_v41, %v11227_v44 }
 0x1b6   :  { %15286 = vst [vmem:[#allocation112_spill] sm:$0xff] %v13229_v60 }
 0x1b7   :  { %15283 = vst [vmem:[#allocation109_spill] sm:$0xff] %v13223_v42  ;;  %v13231_v42 = vor.u32 %v12484_v26, %v11235_v17  ;;  %v12487_v26 = vld [vmem:[#allocation3 + $0x304] sm:$0xf]  ;;  %v11243_v17 = vld [vmem:[#allocation3 + $0x310] sm:$0xf0] }
 0x1b8   :  { %15285 = vst [vmem:[#allocation111_spill] sm:$0xff] %v13227_v28 }
 0x1b9   :  { %15287 = vst [vmem:[#allocation113_spill] sm:$0xff] %v13231_v42 }
 0x1ba   :  { %v3795_v33 = vpop.f32.mrf.mxu2  ;;  %v3629_v46 = vpop.f32.mrf.mxu1 }
 0x1bb   :  { %v3796_v29 = vadd.f32 %v3795_v33, %v3627_v40  ;;  %v11249_v33 = vld [vmem:[#allocation3 + $0x308] sm:$0xf] }
 0x1bc   :  { %v3964_v62 = vpop.f32.mrf.mxu3  ;;  %v3460_v43 = vpop.f32.mrf.mxu0 }
 0x1bd   :  { %v13233_v61 = vadd.f32 %v3964_v62, %v3796_v29  ;;  %v3630_v24 = vadd.f32 %v3629_v46, %v3460_v43  ;;  %3668 = vmatmul.bf16.gmra.mxu1 %v13227_v28  ;;  %v12490_v29 = vld [vmem:[#allocation3 + $0x314] sm:$0xf0]  ;;  %v12488_v62 = vld [vmem:[#allocation3 + $0x30c] sm:$0xf]  ;;  %v11251_v43 = vld [vmem:[#allocation3 + $0x318] sm:$0xf0] }
 0x1bf   :  { %15288 = vst [vmem:[#allocation114_spill] sm:$0xff] %v13233_v61  ;;  %3499 = vmatmul.bf16.gmra.mxu0 %v13225_v9  ;;  %3837 = vmatmul.bf16.gmra.mxu2 %v13229_v60  ;;  %v13241_v60 = vor.u32 %v12489_v45, %v11241_v31  ;;  %v13245_v61 = vor.u32 %v12490_v29, %v11249_v33  ;;  %v11291_v9 = vld [vmem:[#allocation3 + $0x370] sm:$0xf0] }
 0x1c1   :  { %4006 = vmatmul.bf16.gmra.mxu3 %v13231_v42  ;;  %15290 = vst [vmem:[#allocation116_spill] sm:$0xff] %v13241_v60 }
 0x1c2   :  { %v3798_v30 = vpop.f32.mrf.mxu2  ;;  %v3631_v40 = vpop.f32.mrf.mxu1  ;;  %15292 = vst [vmem:[#allocation118_spill] sm:$0xff] %v13245_v61 }
 0x1c3   :  { %v3799_v27 = vadd.f32 %v3798_v30, %v3630_v24  ;;  %v13243_v30 = vor.u32 %v12487_v26, %v11243_v17 }
 0x1c4   :  { %v3967_v44 = vpop.f32.mrf.mxu3  ;;  %v3462_v34 = vpop.f32.mrf.mxu0 }
 0x1c5   :  { %v13239_v41 = vadd.f32 %v3967_v44, %v3799_v27  ;;  %v3632_v35 = vadd.f32 %v3631_v40, %v3462_v34  ;;  %15291 = vst [vmem:[#allocation117_spill] sm:$0xff] %v13243_v30  ;;  %v13247_v44 = vor.u32 %v12488_v62, %v11251_v43  ;;  %v11257_v62 = vld [vmem:[#allocation3 + $0x320] sm:$0xf]  ;;  %v11259_v43 = vld [vmem:[#allocation3 + $0x330] sm:$0xf0] }
 0x1c7   :  { %15289 = vst [vmem:[#allocation115_spill] sm:$0xff] %v13239_v41 }
 0x1c8   :  { %15293 = vst [vmem:[#allocation119_spill] sm:$0xff] %v13247_v44 }
 0x1ca   :  { %v3800_v46 = vpop.f32.mrf.mxu2  ;;  %v3634_v27 = vpop.f32.mrf.mxu1 }
 0x1cb   :  { %v3801_v42 = vadd.f32 %v3800_v46, %v3632_v35  ;;  %v11265_v46 = vld [vmem:[#allocation3 + $0x328] sm:$0xf] }
 0x1cc   :  { %v3969_v28 = vpop.f32.mrf.mxu3  ;;  %v3465_v24 = vpop.f32.mrf.mxu0 }
 0x1cd   :  { %v13249_v34 = vadd.f32 %v3969_v28, %v3801_v42  ;;  %v3635_v40 = vadd.f32 %v3634_v27, %v3465_v24  ;;  %3673 = vmatmul.bf16.gmra.mxu1 %v13243_v30  ;;  %v12493_v42 = vld [vmem:[#allocation3 + $0x32c] sm:$0xf0]  ;;  %v12491_v28 = vld [vmem:[#allocation3 + $0x324] sm:$0xf]  ;;  %v12494_v24 = vld [vmem:[#allocation3 + $0x334] sm:$0xf0] }
 0x1ce   :  { %v12492_v27 = vld [vmem:[#allocation3 + $0x32c] sm:$0xf]  ;;  %v11267_v30 = vld [vmem:[#allocation3 + $0x338] sm:$0xf0]  ;;  %v13261_v41 = vor.u32 %v12494_v24, %v11265_v46  ;;  %v11273_v46 = vld [vmem:[#allocation3 + $0x340] sm:$0xf] }
 0x1cf   :  { %15294 = vst [vmem:[#allocation120_spill] sm:$0xff] %v13249_v34  ;;  %3504 = vmatmul.bf16.gmra.mxu0 %v13241_v60  ;;  %3842 = vmatmul.bf16.gmra.mxu2 %v13245_v61  ;;  %v13257_v61 = vor.u32 %v12493_v42, %v11257_v62  ;;  %v11275_v24 = vld [vmem:[#allocation3 + $0x350] sm:$0xf0] }
 0x1d0   :  { %15298 = vst [vmem:[#allocation124_spill] sm:$0xff] %v13261_v41 }
 0x1d1   :  { %4011 = vmatmul.bf16.gmra.mxu3 %v13247_v44  ;;  %15296 = vst [vmem:[#allocation122_spill] sm:$0xff] %v13257_v61 }
 0x1d2   :  { %v3803_v35 = vpop.f32.mrf.mxu2  ;;  %v3636_v17 = vpop.f32.mrf.mxu1 }
 0x1d3   :  { %v3804_v31 = vadd.f32 %v3803_v35, %v3635_v40  ;;  %v13259_v35 = vor.u32 %v12491_v28, %v11259_v43 }
 0x1d4   :  { %v3972_v45 = vpop.f32.mrf.mxu3  ;;  %v3467_v26 = vpop.f32.mrf.mxu0 }
 0x1d5   :  { %v13255_v33 = vadd.f32 %v3972_v45, %v3804_v31  ;;  %v3637_v29 = vadd.f32 %v3636_v17, %v3467_v26  ;;  %15297 = vst [vmem:[#allocation123_spill] sm:$0xff] %v13259_v35  ;;  %v13263_v45 = vor.u32 %v12492_v27, %v11267_v30  ;;  %v11281_v27 = vld [vmem:[#allocation3 + $0x348] sm:$0xf] }
 0x1d7   :  { %15295 = vst [vmem:[#allocation121_spill] sm:$0xff] %v13255_v33 }
 0x1d8   :  { %15299 = vst [vmem:[#allocation125_spill] sm:$0xff] %v13263_v45 }
 0x1da   :  { %v3805_v34 = vpop.f32.mrf.mxu2  ;;  %v3639_v31 = vpop.f32.mrf.mxu1 }
 0x1db   :  { %v3806_v44 = vadd.f32 %v3805_v34, %v3637_v29 }
 0x1dc   :  { %v3974_v60 = vpop.f32.mrf.mxu3  ;;  %v3470_v40 = vpop.f32.mrf.mxu0 }
 0x1dd   :  { %v13265_v26 = vadd.f32 %v3974_v60, %v3806_v44  ;;  %v3640_v17 = vadd.f32 %v3639_v31, %v3470_v40  ;;  %3678 = vmatmul.bf16.gmra.mxu1 %v13259_v35  ;;  %v12497_v60 = vld [vmem:[#allocation3 + $0x34c] sm:$0xf0]  ;;  %v12495_v44 = vld [vmem:[#allocation3 + $0x344] sm:$0xf]  ;;  %v12498_v40 = vld [vmem:[#allocation3 + $0x354] sm:$0xf0] }
 0x1de   :  { %v12496_v31 = vld [vmem:[#allocation3 + $0x34c] sm:$0xf]  ;;  %v11283_v35 = vld [vmem:[#allocation3 + $0x358] sm:$0xf0]  ;;  %v13277_v33 = vor.u32 %v12498_v40, %v11281_v27 }
 0x1df   :  { %15300 = vst [vmem:[#allocation126_spill] sm:$0xff] %v13265_v26  ;;  %3509 = vmatmul.bf16.gmra.mxu0 %v13257_v61  ;;  %3847 = vmatmul.bf16.gmra.mxu2 %v13261_v41  ;;  %v13273_v41 = vor.u32 %v12497_v60, %v11273_v46  ;;  %v12711_v46 = vld [vmem:[#allocation6 + $0x604] sm:$0xf] }
 0x1e0   :  { %15304 = vst [vmem:[#allocation130_spill] sm:$0xff] %v13277_v33 }
 0x1e1   :  { %4016 = vmatmul.bf16.gmra.mxu3 %v13263_v45  ;;  %15302 = vst [vmem:[#allocation128_spill] sm:$0xff] %v13273_v41 }
 0x1e2   :  { %v3808_v34 = vpop.f32.mrf.mxu2  ;;  %v3641_v28 = vpop.f32.mrf.mxu1 }
 0x1e3   :  { %v3809_v29 = vadd.f32 %v3808_v34, %v3640_v17  ;;  %v13275_v34 = vor.u32 %v12495_v44, %v11275_v24  ;;  %v12139_v44 = vld [vmem:[#allocation6 + $0x620] sm:$0xf0] }
 0x1e4   :  { %v3977_v62 = vpop.f32.mrf.mxu3  ;;  %v3472_v42 = vpop.f32.mrf.mxu0  ;;  %v12142_v27 = vor.u32 %v12711_v46, %v12139_v44  ;;  %v11297_v46 = vld [vmem:[#allocation3 + $0x368] sm:$0xf]  ;;  %v12500_v44 = vld [vmem:[#allocation3 + $0x36c] sm:$0xf] }
 0x1e5   :  { %v13271_v43 = vadd.f32 %v3977_v62, %v3809_v29  ;;  %v3642_v30 = vadd.f32 %v3641_v28, %v3472_v42  ;;  %15303 = vst [vmem:[#allocation129_spill] sm:$0xff] %v13275_v34  ;;  %v13279_v62 = vor.u32 %v12496_v31, %v11283_v35 }
 0x1e6   :  { %4566 = vmatpush.bf16.msrb.mxu3 %v12142_v27 }
 0x1e7   :  { %15301 = vst [vmem:[#allocation127_spill] sm:$0xff] %v13271_v43  ;;  %v12501_v43 = vld [vmem:[#allocation3 + $0x36c] sm:$0xf0] }
 0x1e8   :  { %15305 = vst [vmem:[#allocation131_spill] sm:$0xff] %v13279_v62 }
 0x1ea   :  { %v3810_v26 = vpop.f32.mrf.mxu2  ;;  %v3644_v29 = vpop.f32.mrf.mxu1 }
 0x1eb   :  { %v3811_v45 = vadd.f32 %v3810_v26, %v3642_v30  ;;  %v12647_v26 = vld [vmem:[#allocation6 + $0x404] sm:$0xf] }
 0x1ec   :  { %v3979_v61 = vpop.f32.mrf.mxu3  ;;  %v3475_v17 = vpop.f32.mrf.mxu0  ;;  %v11883_v30 = vld [vmem:[#allocation6 + $0x420] sm:$0xf0] }
 0x1ed   :  { %v13281_v42 = vadd.f32 %v3979_v61, %v3811_v45  ;;  %v3645_v28 = vadd.f32 %v3644_v29, %v3475_v17  ;;  %3683 = vmatmul.bf16.gmra.mxu1 %v13275_v34  ;;  %v11886_v60 = vor.u32 %v12647_v26, %v11883_v30  ;;  %v12519_v29 = vld [vmem:[#allocation6 + $0x4] sm:$0xf] }
 0x1ee   :  { %v12583_v34 = vld [vmem:[#allocation6 + $0x204] sm:$0xf] }
 0x1ef   :  { %15306 = vst [vmem:[#allocation132_spill] sm:$0xff] %v13281_v42  ;;  %3514 = vmatmul.bf16.gmra.mxu0 %v13273_v41  ;;  %3852 = vmatmul.bf16.gmra.mxu2 %v13277_v33  ;;  %v11371_v33 = vld [vmem:[#allocation6 + $0x20] sm:$0xf0]  ;;  %v11289_v41 = vld [vmem:[#allocation3 + $0x360] sm:$0xf] }
 0x1f0   :  { %4397 = vmatpush.bf16.msrb.mxu2 %v11886_v60  ;;  %v11627_v42 = vld [vmem:[#allocation6 + $0x220] sm:$0xf0]  ;;  %v11299_v60 = vld [vmem:[#allocation3 + $0x378] sm:$0xf0]  ;;  %v13289_v27 = vor.u32 %v12501_v43, %v11289_v41 }
 0x1f1   :  { %4021 = vmatmul.bf16.gmra.mxu3 %v13279_v62  ;;  %v11374_v62 = vor.u32 %v12519_v29, %v11371_v33  ;;  %v12499_v26 = vld [vmem:[#allocation3 + $0x364] sm:$0xf]  ;;  %v11630_v30 = vor.u32 %v12583_v34, %v11627_v42 }
 0x1f2   :  { %v3813_v24 = vpop.f32.mrf.mxu2  ;;  %v3646_v45 = vpop.f32.mrf.mxu1  ;;  %15308 = vst [vmem:[#allocation134_spill] sm:$0xff] %v13289_v27 }
 0x1f3   :  { %v3814_v35 = vadd.f32 %v3813_v24, %v3645_v28  ;;  %v12502_v28 = vld [vmem:[#allocation3 + $0x374] sm:$0xf0]  ;;  %4059 = vmatpush.bf16.msrb.mxu0 %v11374_v62  ;;  %4228 = vmatpush.bf16.msrb.mxu1 %v11630_v30 }
 0x1f4   :  { %v3982_v40 = vpop.f32.mrf.mxu3  ;;  %v3477_v61 = vpop.f32.mrf.mxu0  ;;  %v13293_v33 = vor.u32 %v12502_v28, %v11297_v46  ;;  %v11305_v46 = vld [vmem:[#allocation3 + $0x380] sm:$0xf]  ;;  %v12505_v28 = vld [vmem:[#allocation3 + $0x38c] sm:$0xf0] }
 0x1f5   :  { %v13287_v31 = vadd.f32 %v3982_v40, %v3814_v35  ;;  %v3647_v17 = vadd.f32 %v3646_v45, %v3477_v61  ;;  %v13291_v45 = vor.u32 %v12499_v26, %v11291_v9 }
 0x1f6   :  { %15310 = vst [vmem:[#allocation136_spill] sm:$0xff] %v13293_v33 }
 0x1f7   :  { %15307 = vst [vmem:[#allocation133_spill] sm:$0xff] %v13287_v31  ;;  %v13295_v31 = vor.u32 %v12500_v44, %v11299_v60  ;;  %v12503_v44 = vld [vmem:[#allocation3 + $0x384] sm:$0xf]  ;;  %v11307_v60 = vld [vmem:[#allocation3 + $0x390] sm:$0xf0] }
 0x1f8   :  { %15309 = vst [vmem:[#allocation135_spill] sm:$0xff] %v13291_v45 }
 0x1f9   :  { %15311 = vst [vmem:[#allocation137_spill] sm:$0xff] %v13295_v31 }
 0x1fa   :  { %v3815_v24 = vpop.f32.mrf.mxu2  ;;  %v3649_v29 = vpop.f32.mrf.mxu1 }
 0x1fb   :  { %v3816_v35 = vadd.f32 %v3815_v24, %v3647_v17  ;;  %v11313_v24 = vld [vmem:[#allocation3 + $0x388] sm:$0xf] }
 0x1fc   :  { %v3984_v40 = vpop.f32.mrf.mxu3  ;;  %v3480_v61 = vpop.f32.mrf.mxu0 }
 0x1fd   :  { %v13297_v34 = vadd.f32 %v3984_v40, %v3816_v35  ;;  %v3650_v42 = vadd.f32 %v3649_v29, %v3480_v61  ;;  %3688 = vmatmul.bf16.gmra.mxu1 %v13291_v45  ;;  %v12506_v35 = vld [vmem:[#allocation3 + $0x394] sm:$0xf0]  ;;  %v12504_v40 = vld [vmem:[#allocation3 + $0x38c] sm:$0xf]  ;;  %v11315_v61 = vld [vmem:[#allocation3 + $0x398] sm:$0xf0] }
 0x1ff   :  { %15312 = vst [vmem:[#allocation138_spill] sm:$0xff] %v13297_v34  ;;  %3519 = vmatmul.bf16.gmra.mxu0 %v13289_v27  ;;  %3857 = vmatmul.bf16.gmra.mxu2 %v13293_v33  ;;  %v13305_v33 = vor.u32 %v12505_v28, %v11305_v46  ;;  %v13309_v34 = vor.u32 %v12506_v35, %v11313_v24  ;;  %v11355_v27 = vld [vmem:[#allocation3 + $0x3f0] sm:$0xf0] }
 0x201   :  { %4026 = vmatmul.bf16.gmra.mxu3 %v13295_v31  ;;  %15314 = vst [vmem:[#allocation140_spill] sm:$0xff] %v13305_v33 }
 0x202   :  { %v3818_v41 = vpop.f32.mrf.mxu2  ;;  %v3651_v17 = vpop.f32.mrf.mxu1  ;;  %15316 = vst [vmem:[#allocation142_spill] sm:$0xff] %v13309_v34 }
 0x203   :  { %v3819_v43 = vadd.f32 %v3818_v41, %v3650_v42  ;;  %v13307_v41 = vor.u32 %v12503_v44, %v11307_v60 }
 0x204   :  { %v3987_v9 = vpop.f32.mrf.mxu3  ;;  %v3482_v62 = vpop.f32.mrf.mxu0 }
 0x205   :  { %v13303_v26 = vadd.f32 %v3987_v9, %v3819_v43  ;;  %v3652_v30 = vadd.f32 %v3651_v17, %v3482_v62  ;;  %15315 = vst [vmem:[#allocation141_spill] sm:$0xff] %v13307_v41  ;;  %v13311_v9 = vor.u32 %v12504_v40, %v11315_v61  ;;  %v11321_v40 = vld [vmem:[#allocation3 + $0x3a0] sm:$0xf]  ;;  %v11323_v61 = vld [vmem:[#allocation3 + $0x3b0] sm:$0xf0] }
 0x207   :  { %15313 = vst [vmem:[#allocation139_spill] sm:$0xff] %v13303_v26 }
 0x208   :  { %15317 = vst [vmem:[#allocation143_spill] sm:$0xff] %v13311_v9 }
 0x20a   :  { %v3820_v29 = vpop.f32.mrf.mxu2  ;;  %v3654_v43 = vpop.f32.mrf.mxu1 }
 0x20b   :  { %v3821_v31 = vadd.f32 %v3820_v29, %v3652_v30  ;;  %v11329_v29 = vld [vmem:[#allocation3 + $0x3a8] sm:$0xf] }
 0x20c   :  { %v3989_v45 = vpop.f32.mrf.mxu3  ;;  %v3485_v42 = vpop.f32.mrf.mxu0 }
 0x20d   :  { %v13313_v62 = vadd.f32 %v3989_v45, %v3821_v31  ;;  %v3655_v17 = vadd.f32 %v3654_v43, %v3485_v42  ;;  %3693 = vmatmul.bf16.gmra.mxu1 %v13307_v41  ;;  %v12509_v31 = vld [vmem:[#allocation3 + $0x3ac] sm:$0xf0]  ;;  %v12507_v45 = vld [vmem:[#allocation3 + $0x3a4] sm:$0xf]  ;;  %v12510_v42 = vld [vmem:[#allocation3 + $0x3b4] sm:$0xf0] }
 0x20e   :  { %v12508_v43 = vld [vmem:[#allocation3 + $0x3ac] sm:$0xf]  ;;  %v11331_v41 = vld [vmem:[#allocation3 + $0x3b8] sm:$0xf0]  ;;  %v13325_v26 = vor.u32 %v12510_v42, %v11329_v29  ;;  %v11337_v29 = vld [vmem:[#allocation3 + $0x3c0] sm:$0xf] }
 0x20f   :  { %15318 = vst [vmem:[#allocation144_spill] sm:$0xff] %v13313_v62  ;;  %3524 = vmatmul.bf16.gmra.mxu0 %v13305_v33  ;;  %3862 = vmatmul.bf16.gmra.mxu2 %v13309_v34  ;;  %v13321_v34 = vor.u32 %v12509_v31, %v11321_v40  ;;  %v11339_v42 = vld [vmem:[#allocation3 + $0x3d0] sm:$0xf0] }
 0x210   :  { %15322 = vst [vmem:[#allocation148_spill] sm:$0xff] %v13325_v26 }
 0x211   :  { %4031 = vmatmul.bf16.gmra.mxu3 %v13311_v9  ;;  %15320 = vst [vmem:[#allocation146_spill] sm:$0xff] %v13321_v34 }
 0x212   :  { %v3823_v30 = vpop.f32.mrf.mxu2  ;;  %v3656_v60 = vpop.f32.mrf.mxu1 }
 0x213   :  { %v3824_v46 = vadd.f32 %v3823_v30, %v3655_v17  ;;  %v13323_v30 = vor.u32 %v12507_v45, %v11323_v61 }
 0x214   :  { %v3992_v28 = vpop.f32.mrf.mxu3  ;;  %v3487_v44 = vpop.f32.mrf.mxu0 }
 0x215   :  { %v13319_v24 = vadd.f32 %v3992_v28, %v3824_v46  ;;  %v3657_v35 = vadd.f32 %v3656_v60, %v3487_v44  ;;  %15321 = vst [vmem:[#allocation147_spill] sm:$0xff] %v13323_v30  ;;  %v13327_v28 = vor.u32 %v12508_v43, %v11331_v41  ;;  %v11345_v43 = vld [vmem:[#allocation3 + $0x3c8] sm:$0xf] }
 0x217   :  { %15319 = vst [vmem:[#allocation145_spill] sm:$0xff] %v13319_v24 }
 0x218   :  { %15323 = vst [vmem:[#allocation149_spill] sm:$0xff] %v13327_v28 }
 0x21a   :  { %v3825_v62 = vpop.f32.mrf.mxu2  ;;  %v3659_v46 = vpop.f32.mrf.mxu1 }
 0x21b   :  { %v3826_v9 = vadd.f32 %v3825_v62, %v3657_v35 }
 0x21c   :  { %v3994_v33 = vpop.f32.mrf.mxu3  ;;  %v3490_v17 = vpop.f32.mrf.mxu0 }
 0x21d   :  { %v13329_v44 = vadd.f32 %v3994_v33, %v3826_v9  ;;  %v3660_v60 = vadd.f32 %v3659_v46, %v3490_v17  ;;  %3698 = vmatmul.bf16.gmra.mxu1 %v13323_v30  ;;  %v12513_v33 = vld [vmem:[#allocation3 + $0x3cc] sm:$0xf0]  ;;  %v12511_v9 = vld [vmem:[#allocation3 + $0x3c4] sm:$0xf]  ;;  %v12514_v17 = vld [vmem:[#allocation3 + $0x3d4] sm:$0xf0] }
 0x21e   :  { %v12512_v46 = vld [vmem:[#allocation3 + $0x3cc] sm:$0xf]  ;;  %v11347_v30 = vld [vmem:[#allocation3 + $0x3d8] sm:$0xf0]  ;;  %v13341_v24 = vor.u32 %v12514_v17, %v11345_v43 }
 0x21f   :  { %15324 = vst [vmem:[#allocation150_spill] sm:$0xff] %v13329_v44  ;;  %3529 = vmatmul.bf16.gmra.mxu0 %v13321_v34  ;;  %3867 = vmatmul.bf16.gmra.mxu2 %v13325_v26  ;;  %v13337_v26 = vor.u32 %v12513_v33, %v11337_v29  ;;  %v12369_v29 = vld [vmem:[#allocation6 + $0x7c8] sm:$0xf] }
 0x220   :  { %15328 = vst [vmem:[#allocation154_spill] sm:$0xff] %v13341_v24 }
 0x221   :  { %4036 = vmatmul.bf16.gmra.mxu3 %v13327_v28  ;;  %15326 = vst [vmem:[#allocation152_spill] sm:$0xff] %v13337_v26 }
 0x222   :  { %v3828_v62 = vpop.f32.mrf.mxu2  ;;  %v3661_v45 = vpop.f32.mrf.mxu1 }
 0x223   :  { %v3829_v35 = vadd.f32 %v3828_v62, %v3660_v60  ;;  %v13339_v62 = vor.u32 %v12511_v9, %v11339_v42  ;;  %v12772_v9 = vld [vmem:[#allocation6 + $0x7e4] sm:$0xf0] }
 0x224   :  { %v3997_v40 = vpop.f32.mrf.mxu3  ;;  %v3492_v31 = vpop.f32.mrf.mxu0  ;;  %v12370_v43 = vor.u32 %v12772_v9, %v12369_v29  ;;  %v11361_v29 = vld [vmem:[#allocation3 + $0x3e8] sm:$0xf]  ;;  %v12516_v9 = vld [vmem:[#allocation3 + $0x3ec] sm:$0xf] }
 0x225   :  { %v13335_v61 = vadd.f32 %v3997_v40, %v3829_v35  ;;  %v3662_v41 = vadd.f32 %v3661_v45, %v3492_v31  ;;  %15327 = vst [vmem:[#allocation153_spill] sm:$0xff] %v13339_v62  ;;  %v13343_v40 = vor.u32 %v12512_v46, %v11347_v30 }
 0x226   :  { %5235 = vmatpush.bf16.msra.mxu3 %v12370_v43 }
 0x227   :  { %15325 = vst [vmem:[#allocation151_spill] sm:$0xff] %v13335_v61  ;;  %v12517_v61 = vld [vmem:[#allocation3 + $0x3ec] sm:$0xf0] }
 0x228   :  { %15329 = vst [vmem:[#allocation155_spill] sm:$0xff] %v13343_v40 }
 0x22a   :  { %v3830_v44 = vpop.f32.mrf.mxu2  ;;  %v3664_v35 = vpop.f32.mrf.mxu1 }
 0x22b   :  { %v3831_v28 = vadd.f32 %v3830_v44, %v3662_v41  ;;  %v12113_v44 = vld [vmem:[#allocation6 + $0x5c8] sm:$0xf] }
 0x22c   :  { %v3999_v34 = vpop.f32.mrf.mxu3  ;;  %v3495_v60 = vpop.f32.mrf.mxu0  ;;  %v12708_v41 = vld [vmem:[#allocation6 + $0x5e4] sm:$0xf0] }
 0x22d   :  { %v13345_v31 = vadd.f32 %v3999_v34, %v3831_v28  ;;  %v3665_v45 = vadd.f32 %v3664_v35, %v3495_v60  ;;  %3703 = vmatmul.bf16.gmra.mxu1 %v13339_v62  ;;  %v12114_v33 = vor.u32 %v12708_v41, %v12113_v44  ;;  %v11601_v35 = vld [vmem:[#allocation6 + $0x1c8] sm:$0xf]  ;;  %v12515_v44 = vld [vmem:[#allocation3 + $0x3e4] sm:$0xf] }
 0x22e   :  { %v11857_v62 = vld [vmem:[#allocation6 + $0x3c8] sm:$0xf] }
 0x22f   :  { %15330 = vst [vmem:[#allocation156_spill] sm:$0xff] %v13345_v31  ;;  %3534 = vmatmul.bf16.gmra.mxu0 %v13337_v26  ;;  %3872 = vmatmul.bf16.gmra.mxu2 %v13341_v24  ;;  %v12580_v24 = vld [vmem:[#allocation6 + $0x1e4] sm:$0xf0]  ;;  %v11353_v26 = vld [vmem:[#allocation3 + $0x3e0] sm:$0xf] }
 0x230   :  { %5066 = vmatpush.bf16.msra.mxu2 %v12114_v33  ;;  %v12644_v31 = vld [vmem:[#allocation6 + $0x3e4] sm:$0xf0]  ;;  %v11363_v33 = vld [vmem:[#allocation3 + $0x3f8] sm:$0xf0]  ;;  %v13353_v43 = vor.u32 %v12517_v61, %v11353_v26 }
 0x231   :  { %4041 = vmatmul.bf16.gmra.mxu3 %v13343_v40  ;;  %v11602_v40 = vor.u32 %v12580_v24, %v11601_v35  ;;  %v11858_v41 = vor.u32 %v12644_v31, %v11857_v62 }
 0x232   :  { %v3833_v42 = vpop.f32.mrf.mxu2  ;;  %v3666_v28 = vpop.f32.mrf.mxu1 }
 0x233   :  { %v3834_v30 = vadd.f32 %v3833_v42, %v3665_v45  ;;  %v12518_v45 = vld [vmem:[#allocation3 + $0x3f4] sm:$0xf0]  ;;  %4728 = vmatpush.bf16.msra.mxu0 %v11602_v40  ;;  %4897 = vmatpush.bf16.msra.mxu1 %v11858_v41 }
 0x234   :  { %v4002_v17 = vpop.f32.mrf.mxu3  ;;  %v3497_v34 = vpop.f32.mrf.mxu0  ;;  %v13357_v24 = vor.u32 %v12518_v45, %v11361_v29 }
 0x235   :  { %v13351_v46 = vadd.f32 %v4002_v17, %v3834_v30  ;;  %v3667_v60 = vadd.f32 %v3666_v28, %v3497_v34  ;;  %v13355_v28 = vor.u32 %v12515_v44, %v11355_v27 }
 0x237   :  { %15331 = vst [vmem:[#allocation157_spill] sm:$0xff] %v13351_v46  ;;  %v13359_v46 = vor.u32 %v12516_v9, %v11363_v33 }
 0x238   :  { %15332 = vst [vmem:[#allocation158_spill] sm:$0xff] %v13355_v28 }
 0x23a   :  { %v3835_v42 = vpop.f32.mrf.mxu2  ;;  %v3669_v35 = vpop.f32.mrf.mxu1 }
 0x23b   :  { %v3836_v30 = vadd.f32 %v3835_v42, %v3667_v60 }
 0x23c   :  { %v4004_v17 = vpop.f32.mrf.mxu3  ;;  %v3500_v34 = vpop.f32.mrf.mxu0 }
 0x23d   :  { %v13361_v62 = vadd.f32 %v4004_v17, %v3836_v30  ;;  %v3670_v31 = vadd.f32 %v3669_v35, %v3500_v34  ;;  %3708 = vmatmul.bf16.gmra.mxu1 %v13355_v28 }
 0x23f   :  { %3539 = vmatmul.bf16.gmra.mxu0 %v13353_v43  ;;  %3877 = vmatmul.bf16.gmra.mxu2 %v13357_v24 }
 0x241   :  { %4046 = vmatmul.bf16.gmra.mxu3 %v13359_v46 }
 0x242   :  { %v3838_v26 = vpop.f32.mrf.mxu2  ;;  %v3671_v60 = vpop.f32.mrf.mxu1 }
 0x243   :  { %v3839_v61 = vadd.f32 %v3838_v26, %v3670_v31 }
 0x244   :  { %v4007_v27 = vpop.f32.mrf.mxu3  ;;  %v3502_v40 = vpop.f32.mrf.mxu0 }
 0x245   :  { %v13367_v44 = vadd.f32 %v4007_v27, %v3839_v61  ;;  %v3672_v41 = vadd.f32 %v3671_v60, %v3502_v40 }
 0x24a   :  { %v3840_v29 = vpop.f32.mrf.mxu2  ;;  %v3674_v42 = vpop.f32.mrf.mxu1 }
 0x24b   :  { %v3841_v45 = vadd.f32 %v3840_v29, %v3672_v41 }
 0x24c   :  { %v4009_v9 = vpop.f32.mrf.mxu3  ;;  %v3505_v33 = vpop.f32.mrf.mxu0 }
 0x24d   :  { %v13369_v30 = vadd.f32 %v4009_v9, %v3841_v45  ;;  %v3675_v17 = vadd.f32 %v3674_v42, %v3505_v33  ;;  %4229 = vmatmul.bf16.vlgmr.msrb.gmra.mxu1 %v12893_v51 }
 0x24f   :  { %4060 = vmatmul.bf16.vlgmr.msrb.gmra.mxu0 %v12891_v47  ;;  %4398 = vmatmul.bf16.vlgmr.msrb.gmra.mxu2 %v12895_v52 }
 0x251   :  { %4567 = vmatmul.bf16.vlgmr.msrb.gmra.mxu3 %v12897_v53 }
 0x252   :  { %v3843_v34 = vpop.f32.mrf.mxu2  ;;  %v3676_v61 = vpop.f32.mrf.mxu1 }
 0x253   :  { %v3844_v35 = vadd.f32 %v3843_v34, %v3675_v17 }
 0x254   :  { %v4012_v31 = vpop.f32.mrf.mxu3  ;;  %v3507_v26 = vpop.f32.mrf.mxu0 }
 0x255   :  { %v13375_v27 = vadd.f32 %v4012_v31, %v3844_v35  ;;  %v3677_v40 = vadd.f32 %v3676_v61, %v3507_v26 }
 0x25a   :  { %v3845_v60 = vpop.f32.mrf.mxu2  ;;  %v3679_v9 = vpop.f32.mrf.mxu1 }
 0x25b   :  { %v3846_v41 = vadd.f32 %v3845_v60, %v3677_v40 }
 0x25c   :  { %v4014_v29 = vpop.f32.mrf.mxu3  ;;  %v3510_v45 = vpop.f32.mrf.mxu0 }
 0x25d   :  { %v13377_v33 = vadd.f32 %v4014_v29, %v3846_v41  ;;  %v3680_v42 = vadd.f32 %v3679_v9, %v3510_v45  ;;  %4234 = vmatmul.bf16.gmra.mxu1 %v12905_v1 }
 0x25f   :  { %15333 = vst [vmem:[#allocation159_spill] sm:$0xff] %v13377_v33  ;;  %4065 = vmatmul.bf16.gmra.mxu0 %v12903_v0  ;;  %4403 = vmatmul.bf16.gmra.mxu2 %v12907_v2 }
 0x261   :  { %4572 = vmatmul.bf16.gmra.mxu3 %v12909_v3 }
 0x262   :  { %v3848_v17 = vpop.f32.mrf.mxu2  ;;  %v3681_v26 = vpop.f32.mrf.mxu1 }
 0x263   :  { %v3849_v34 = vadd.f32 %v3848_v17, %v3680_v42  ;;  %v12081_v42 = vld [vmem:[#allocation6 + $0x588] sm:$0xf] }
 0x264   :  { %v4017_v35 = vpop.f32.mrf.mxu3  ;;  %v3512_v31 = vpop.f32.mrf.mxu0  ;;  %v12700_v17 = vld [vmem:[#allocation6 + $0x5a4] sm:$0xf0] }
 0x265   :  { %v13383_v61 = vadd.f32 %v4017_v35, %v3849_v34  ;;  %v3682_v40 = vadd.f32 %v3681_v26, %v3512_v31  ;;  %v12337_v34 = vld [vmem:[#allocation6 + $0x788] sm:$0xf]  ;;  %v12082_v35 = vor.u32 %v12700_v17, %v12081_v42 }
 0x266   :  { %v12764_v31 = vld [vmem:[#allocation6 + $0x7a4] sm:$0xf0] }
 0x267   :  { %15334 = vst [vmem:[#allocation160_spill] sm:$0xff] %v13383_v61  ;;  %5067 = vmatpush.bf16.msra.mxu2 %v12082_v35 }
 0x26a   :  { %v3850_v60 = vpop.f32.mrf.mxu2  ;;  %v3684_v9 = vpop.f32.mrf.mxu1 }
 0x26b   :  { %v3851_v41 = vadd.f32 %v3850_v60, %v3682_v40  ;;  %v12338_v40 = vor.u32 %v12764_v31, %v12337_v34 }
 0x26c   :  { %v4019_v29 = vpop.f32.mrf.mxu3  ;;  %v3515_v45 = vpop.f32.mrf.mxu0 }
 0x26d   :  { %v13385_v33 = vadd.f32 %v4019_v29, %v3851_v41  ;;  %v3685_v1 = vadd.f32 %v3684_v9, %v3515_v45  ;;  %4239 = vmatmul.bf16.gmra.mxu1 %v12917_v13  ;;  %5236 = vmatpush.bf16.msra.mxu3 %v12338_v40  ;;  %v11569_v13 = vld [vmem:[#allocation6 + $0x188] sm:$0xf] }
 0x26f   :  { %15335 = vst [vmem:[#allocation161_spill] sm:$0xff] %v13385_v33  ;;  %4070 = vmatmul.bf16.gmra.mxu0 %v12915_v12  ;;  %4408 = vmatmul.bf16.gmra.mxu2 %v12919_v14  ;;  %v12572_v14 = vld [vmem:[#allocation6 + $0x1a4] sm:$0xf0] }
 0x270   :  { %v11825_v33 = vld [vmem:[#allocation6 + $0x388] sm:$0xf] }
 0x271   :  { %4577 = vmatmul.bf16.gmra.mxu3 %v12921_v15  ;;  %v11570_v15 = vor.u32 %v12572_v14, %v11569_v13  ;;  %v12636_v12 = vld [vmem:[#allocation6 + $0x3a4] sm:$0xf0] }
 0x272   :  { %v3853_v26 = vpop.f32.mrf.mxu2  ;;  %v3686_v29 = vpop.f32.mrf.mxu1  ;;  %v11826_v3 = vor.u32 %v12636_v12, %v11825_v33 }
 0x273   :  { %v3854_v60 = vadd.f32 %v3853_v26, %v3685_v1  ;;  %4729 = vmatpush.bf16.msra.mxu0 %v11570_v15 }
 0x274   :  { %v4022_v61 = vpop.f32.mrf.mxu3  ;;  %v3517_v41 = vpop.f32.mrf.mxu0  ;;  %4898 = vmatpush.bf16.msra.mxu1 %v11826_v3 }
 0x275   :  { %v13391_v45 = vadd.f32 %v4022_v61, %v3854_v60  ;;  %v3687_v9 = vadd.f32 %v3686_v29, %v3517_v41 }
 0x27a   :  { %v3855_v42 = vpop.f32.mrf.mxu2  ;;  %v3689_v31 = vpop.f32.mrf.mxu1 }
 0x27b   :  { %v3856_v17 = vadd.f32 %v3855_v42, %v3687_v9 }
 0x27c   :  { %v4024_v34 = vpop.f32.mrf.mxu3  ;;  %v3520_v1 = vpop.f32.mrf.mxu0 }
 0x27d   :  { %v13393_v26 = vadd.f32 %v4024_v34, %v3856_v17  ;;  %v3690_v35 = vadd.f32 %v3689_v31, %v3520_v1  ;;  %4244 = vmatmul.bf16.gmra.mxu1 %v12929_v37 }
 0x27f   :  { %4075 = vmatmul.bf16.gmra.mxu0 %v12927_v36  ;;  %4413 = vmatmul.bf16.gmra.mxu2 %v12931_v38 }
 0x281   :  { %4582 = vmatmul.bf16.gmra.mxu3 %v12933_v39 }
 0x282   :  { %v3858_v13 = vpop.f32.mrf.mxu2  ;;  %v3691_v15 = vpop.f32.mrf.mxu1 }
 0x283   :  { %v3859_v12 = vadd.f32 %v3858_v13, %v3690_v35 }
 0x284   :  { %v4027_v14 = vpop.f32.mrf.mxu3  ;;  %v3522_v3 = vpop.f32.mrf.mxu0 }
 0x285   :  { %v13399_v33 = vadd.f32 %v4027_v14, %v3859_v12  ;;  %v3692_v61 = vadd.f32 %v3691_v15, %v3522_v3 }
 0x28a   :  { %v3860_v40 = vpop.f32.mrf.mxu2  ;;  %v3694_v9 = vpop.f32.mrf.mxu1 }
 0x28b   :  { %v3861_v60 = vadd.f32 %v3860_v40, %v3692_v61 }
 0x28c   :  { %v4029_v41 = vpop.f32.mrf.mxu3  ;;  %v3525_v29 = vpop.f32.mrf.mxu0 }
 0x28d   :  { %v13401_v42 = vadd.f32 %v4029_v41, %v3861_v60  ;;  %v3695_v17 = vadd.f32 %v3694_v9, %v3525_v29  ;;  %4249 = vmatmul.bf16.gmra.mxu1 %v12941_v50 }
 0x28f   :  { %4080 = vmatmul.bf16.gmra.mxu0 %v12939_v49  ;;  %4418 = vmatmul.bf16.gmra.mxu2 %v12943_v54 }
 0x291   :  { %4587 = vmatmul.bf16.gmra.mxu3 %v12945_v55 }
 0x292   :  { %v3863_v34 = vpop.f32.mrf.mxu2  ;;  %v3696_v13 = vpop.f32.mrf.mxu1 }
 0x293   :  { %v3864_v1 = vadd.f32 %v3863_v34, %v3695_v17 }
 0x294   :  { %v4032_v31 = vpop.f32.mrf.mxu3  ;;  %v3527_v35 = vpop.f32.mrf.mxu0 }
 0x295   :  { %v13407_v12 = vadd.f32 %v4032_v31, %v3864_v1  ;;  %v3697_v14 = vadd.f32 %v3696_v13, %v3527_v35 }
 0x29a   :  { %v3865_v3 = vpop.f32.mrf.mxu2  ;;  %v3699_v60 = vpop.f32.mrf.mxu1 }
 0x29b   :  { %v3866_v15 = vadd.f32 %v3865_v3, %v3697_v14 }
 0x29c   :  { %v4034_v61 = vpop.f32.mrf.mxu3  ;;  %v3530_v40 = vpop.f32.mrf.mxu0 }
 0x29d   :  { %v13409_v41 = vadd.f32 %v4034_v61, %v3866_v15  ;;  %v3700_v29 = vadd.f32 %v3699_v60, %v3530_v40  ;;  %4254 = vmatmul.bf16.gmra.mxu1 %v12953_v5 }
 0x29f   :  { %15336 = vst [vmem:[#allocation162_spill] sm:$0xff] %v13409_v41  ;;  %4085 = vmatmul.bf16.gmra.mxu0 %v12951_v4  ;;  %4423 = vmatmul.bf16.gmra.mxu2 %v12955_v6 }
 0x2a1   :  { %4592 = vmatmul.bf16.gmra.mxu3 %v12957_v7  ;;  %v12628_v7 = vld [vmem:[#allocation6 + $0x364] sm:$0xf0] }
 0x2a2   :  { %v3868_v9 = vpop.f32.mrf.mxu2  ;;  %v3701_v31 = vpop.f32.mrf.mxu1 }
 0x2a3   :  { %v3869_v17 = vadd.f32 %v3868_v9, %v3700_v29  ;;  %v12049_v29 = vld [vmem:[#allocation6 + $0x548] sm:$0xf] }
 0x2a4   :  { %v4037_v34 = vpop.f32.mrf.mxu3  ;;  %v3532_v1 = vpop.f32.mrf.mxu0  ;;  %v12692_v9 = vld [vmem:[#allocation6 + $0x564] sm:$0xf0] }
 0x2a5   :  { %v13415_v35 = vadd.f32 %v4037_v34, %v3869_v17  ;;  %v3702_v13 = vadd.f32 %v3701_v31, %v3532_v1  ;;  %v12305_v17 = vld [vmem:[#allocation6 + $0x748] sm:$0xf]  ;;  %v12050_v34 = vor.u32 %v12692_v9, %v12049_v29 }
 0x2a6   :  { %v12756_v1 = vld [vmem:[#allocation6 + $0x764] sm:$0xf0] }
 0x2a7   :  { %15337 = vst [vmem:[#allocation163_spill] sm:$0xff] %v13415_v35  ;;  %5068 = vmatpush.bf16.msra.mxu2 %v12050_v34 }
 0x2aa   :  { %v3870_v14 = vpop.f32.mrf.mxu2  ;;  %v3704_v40 = vpop.f32.mrf.mxu1 }
 0x2ab   :  { %v3871_v3 = vadd.f32 %v3870_v14, %v3702_v13  ;;  %v12306_v13 = vor.u32 %v12756_v1, %v12305_v17 }
 0x2ac   :  { %v4039_v15 = vpop.f32.mrf.mxu3  ;;  %v3535_v61 = vpop.f32.mrf.mxu0 }
 0x2ad   :  { %v13417_v60 = vadd.f32 %v4039_v15, %v3871_v3  ;;  %v3705_v5 = vadd.f32 %v3704_v40, %v3535_v61  ;;  %4259 = vmatmul.bf16.gmra.mxu1 %v12965_v21  ;;  %5237 = vmatpush.bf16.msra.mxu3 %v12306_v13  ;;  %v11537_v21 = vld [vmem:[#allocation6 + $0x148] sm:$0xf] }
 0x2af   :  { %15338 = vst [vmem:[#allocation164_spill] sm:$0xff] %v13417_v60  ;;  %4090 = vmatmul.bf16.gmra.mxu0 %v12963_v20  ;;  %4428 = vmatmul.bf16.gmra.mxu2 %v12967_v22  ;;  %v12564_v22 = vld [vmem:[#allocation6 + $0x164] sm:$0xf0] }
 0x2b0   :  { %v11793_v60 = vld [vmem:[#allocation6 + $0x348] sm:$0xf]  ;;  %v11538_v20 = vor.u32 %v12564_v22, %v11537_v21 }
 0x2b1   :  { %4597 = vmatmul.bf16.gmra.mxu3 %v12969_v23  ;;  %v11794_v41 = vor.u32 %v12628_v7, %v11793_v60 }
 0x2b2   :  { %v3873_v31 = vpop.f32.mrf.mxu2  ;;  %v3706_v15 = vpop.f32.mrf.mxu1  ;;  %4730 = vmatpush.bf16.msra.mxu0 %v11538_v20 }
 0x2b3   :  { %v3874_v14 = vadd.f32 %v3873_v31, %v3705_v5  ;;  %4899 = vmatpush.bf16.msra.mxu1 %v11794_v41 }
 0x2b4   :  { %v4042_v35 = vpop.f32.mrf.mxu3  ;;  %v3537_v3 = vpop.f32.mrf.mxu0 }
 0x2b5   :  { %v13423_v61 = vadd.f32 %v4042_v35, %v3874_v14  ;;  %v3707_v40 = vadd.f32 %v3706_v15, %v3537_v3 }
 0x2ba   :  { %v3875_v23 = vpop.f32.mrf.mxu2  ;;  %v3709_v17 = vpop.f32.mrf.mxu1 }
 0x2bb   :  { %v3876_v6 = vadd.f32 %v3875_v23, %v3707_v40 }
 0x2bc   :  { %v4044_v29 = vpop.f32.mrf.mxu3  ;;  %v3540_v9 = vpop.f32.mrf.mxu0 }
 0x2bd   :  { %v13425_v5 = vadd.f32 %v4044_v29, %v3876_v6  ;;  %v3710_v34 = vadd.f32 %v3709_v17, %v3540_v9  ;;  %4264 = vmatmul.bf16.gmra.mxu1 %v12977_v57 }
 0x2bf   :  { %4095 = vmatmul.bf16.gmra.mxu0 %v12975_v56  ;;  %4433 = vmatmul.bf16.gmra.mxu2 %v12979_v58 }
 0x2c1   :  { %4602 = vmatmul.bf16.gmra.mxu3 %v12981_v59 }
 0x2c2   :  { %v3878_v21 = vpop.f32.mrf.mxu2  ;;  %v3711_v1 = vpop.f32.mrf.mxu1 }
 0x2c3   :  { %v3879_v22 = vadd.f32 %v3878_v21, %v3710_v34 }
 0x2c4   :  { %v4047_v23 = vpop.f32.mrf.mxu3  ;;  %v3542_v35 = vpop.f32.mrf.mxu0 }
 0x2c5   :  { %v13431_v7 = vadd.f32 %v4047_v23, %v3879_v22  ;;  %v3712_v20 = vadd.f32 %v3711_v1, %v3542_v35 }
 0x2ca   :  { %v3880_v6 = vpop.f32.mrf.mxu2  ;;  %v4230_v13 = vpop.f32.mrf.mxu1 }
 0x2cb   :  { %v3881_v60 = vadd.f32 %v3880_v6, %v3712_v20 }
 0x2cc   :  { %v4049_v31 = vpop.f32.mrf.mxu3  ;;  %v4061_v41 = vpop.f32.mrf.mxu0 }
 0x2cd   :  { %v13433_v14 = vadd.f32 %v4049_v31, %v3881_v60  ;;  %v4231_v3 = vadd.f32 %v4230_v13, %v4061_v41  ;;  %4269 = vmatmul.bf16.gmra.mxu1 %v12989_v18 }
 0x2cf   :  { %4100 = vmatmul.bf16.gmra.mxu0 %v12987_v16  ;;  %4438 = vmatmul.bf16.gmra.mxu2 %v12991_v19 }
 0x2d1   :  { %4607 = vmatmul.bf16.gmra.mxu3 %v12993_v25 }
 0x2d2   :  { %v4399_v15 = vpop.f32.mrf.mxu2  ;;  %v4232_v17 = vpop.f32.mrf.mxu1 }
 0x2d3   :  { %v4400_v40 = vadd.f32 %v4399_v15, %v4231_v3 }
 0x2d4   :  { %v4568_v29 = vpop.f32.mrf.mxu3  ;;  %v4063_v9 = vpop.f32.mrf.mxu0 }
 0x2d5   :  { %v4569_v34 = vadd.f32 %v4568_v29, %v4400_v40  ;;  %v4233_v22 = vadd.f32 %v4232_v17, %v4063_v9  ;;  %v15339_v9 = vld [vmem:[#allocation31_spill] sm:$0xff] }
 0x2d7   :  { %v10323_v21 = vpack.c.bf16 %v4569_v34, %v12999_v32 }
 0x2d9   :  { %10579 = vst [vmem:[#allocation8] sm:$0xff] %v10323_v21 }
 0x2da   :  { %v4401_v23 = vpop.f32.mrf.mxu2  ;;  %v4235_v6 = vpop.f32.mrf.mxu1 }
 0x2db   :  { %v4402_v35 = vadd.f32 %v4401_v23, %v4233_v22 }
 0x2dc   :  { %v4570_v1 = vpop.f32.mrf.mxu3  ;;  %v4066_v20 = vpop.f32.mrf.mxu0 }
 0x2dd   :  { %v4571_v60 = vadd.f32 %v4570_v1, %v4402_v35  ;;  %v4236_v41 = vadd.f32 %v4235_v6, %v4066_v20  ;;  %4274 = vmatmul.bf16.gmra.mxu1 %v13003_v63  ;;  %v15340_v20 = vld [vmem:[#allocation32_spill] sm:$0xff] }
 0x2de   :  { %v15341_v6 = vld [vmem:[#allocation36_spill] sm:$0xff] }
 0x2df   :  { %4105 = vmatmul.bf16.gmra.mxu0 %v13001_v48  ;;  %v10327_v31 = vpack.c.bf16 %v4571_v60, %v13009_v11  ;;  %4443 = vmatmul.bf16.gmra.mxu2 %v13005_v8 }
 0x2e1   :  { %4612 = vmatmul.bf16.gmra.mxu3 %v13007_v10  ;;  %10583 = vst [vmem:[#allocation8 + $0x20] sm:$0xff] %v10327_v31  ;;  %v11761_v10 = vld [vmem:[#allocation6 + $0x308] sm:$0xf] }
 0x2e2   :  { %v4404_v32 = vpop.f32.mrf.mxu2  ;;  %v4237_v40 = vpop.f32.mrf.mxu1 }
 0x2e3   :  { %v4405_v13 = vadd.f32 %v4404_v32, %v4236_v41  ;;  %v15342_v41 = vld [vmem:[#allocation33_spill] sm:$0xff]  ;;  %v15343_v32 = vld [vmem:[#allocation34_spill] sm:$0xff] }
 0x2e4   :  { %v4573_v3 = vpop.f32.mrf.mxu3  ;;  %v4068_v15 = vpop.f32.mrf.mxu0 }
 0x2e5   :  { %v4574_v29 = vadd.f32 %v4573_v3, %v4405_v13  ;;  %v4238_v34 = vadd.f32 %v4237_v40, %v4068_v15  ;;  %v15344_v13 = vld [vmem:[#allocation35_spill] sm:$0xff]  ;;  %v12017_v3 = vld [vmem:[#allocation6 + $0x508] sm:$0xf] }
 0x2e6   :  { %v12684_v15 = vld [vmem:[#allocation6 + $0x524] sm:$0xf0] }
 0x2e7   :  { %v10331_v17 = vpack.c.bf16 %v4574_v29, %v15339_v9  ;;  %v12018_v29 = vor.u32 %v12684_v15, %v12017_v3  ;;  %v12273_v9 = vld [vmem:[#allocation6 + $0x708] sm:$0xf] }
 0x2e8   :  { %v12620_v3 = vld [vmem:[#allocation6 + $0x324] sm:$0xf0] }
 0x2e9   :  { %10587 = vst [vmem:[#allocation8 + $0x40] sm:$0xff] %v10331_v17  ;;  %v12748_v17 = vld [vmem:[#allocation6 + $0x724] sm:$0xf0]  ;;  %5069 = vmatpush.bf16.msra.mxu2 %v12018_v29  ;;  %v15346_v29 = vld [vmem:[#allocation38_spill] sm:$0xff] }
 0x2ea   :  { %v4406_v21 = vpop.f32.mrf.mxu2  ;;  %v4240_v35 = vpop.f32.mrf.mxu1 }
 0x2eb   :  { %v4407_v11 = vadd.f32 %v4406_v21, %v4238_v34 }
 0x2ec   :  { %v4575_v22 = vpop.f32.mrf.mxu3  ;;  %v4071_v23 = vpop.f32.mrf.mxu0 }
 0x2ed   :  { %v4576_v1 = vadd.f32 %v4575_v22, %v4407_v11  ;;  %v4241_v31 = vadd.f32 %v4240_v35, %v4071_v23  ;;  %4279 = vmatmul.bf16.gmra.mxu1 %v15342_v41  ;;  %v12274_v22 = vor.u32 %v12748_v17, %v12273_v9  ;;  %v15345_v35 = vld [vmem:[#allocation37_spill] sm:$0xff]  ;;  %v15347_v17 = vld [vmem:[#allocation42_spill] sm:$0xff] }
 0x2ef   :  { %4110 = vmatmul.bf16.gmra.mxu0 %v15340_v20  ;;  %v10335_v60 = vpack.c.bf16 %v4576_v1, %v15341_v6  ;;  %4448 = vmatmul.bf16.gmra.mxu2 %v15343_v32 }
 0x2f0   :  { %5238 = vmatpush.bf16.msra.mxu3 %v12274_v22 }
 0x2f1   :  { %4617 = vmatmul.bf16.gmra.mxu3 %v15344_v13  ;;  %10591 = vst [vmem:[#allocation8 + $0x60] sm:$0xff] %v10335_v60  ;;  %v11505_v13 = vld [vmem:[#allocation6 + $0x108] sm:$0xf] }
 0x2f2   :  { %v4409_v40 = vpop.f32.mrf.mxu2  ;;  %v4242_v20 = vpop.f32.mrf.mxu1  ;;  %v12556_v60 = vld [vmem:[#allocation6 + $0x124] sm:$0xf0] }
 0x2f3   :  { %v4410_v34 = vadd.f32 %v4409_v40, %v4241_v31  ;;  %v11506_v41 = vor.u32 %v12556_v60, %v11505_v13  ;;  %v11762_v40 = vor.u32 %v12620_v3, %v11761_v10  ;;  %v15350_v13 = vld [vmem:[#allocation41_spill] sm:$0xff] }
 0x2f4   :  { %v4578_v21 = vpop.f32.mrf.mxu3  ;;  %v4073_v11 = vpop.f32.mrf.mxu0 }
 0x2f5   :  { %v4579_v23 = vadd.f32 %v4578_v21, %v4410_v34  ;;  %v4243_v6 = vadd.f32 %v4242_v20, %v4073_v11  ;;  %4731 = vmatpush.bf16.msra.mxu0 %v11506_v41  ;;  %4900 = vmatpush.bf16.msra.mxu1 %v11762_v40  ;;  %v15348_v20 = vld [vmem:[#allocation39_spill] sm:$0xff]  ;;  %v15349_v11 = vld [vmem:[#allocation40_spill] sm:$0xff] }
 0x2f7   :  { %v10339_v1 = vpack.c.bf16 %v4579_v23, %v15345_v35 }
 0x2f9   :  { %10595 = vst [vmem:[#allocation8 + $0x80] sm:$0xff] %v10339_v1 }
 0x2fa   :  { %v4411_v32 = vpop.f32.mrf.mxu2  ;;  %v4245_v63 = vpop.f32.mrf.mxu1 }
 0x2fb   :  { %v4412_v15 = vadd.f32 %v4411_v32, %v4243_v6 }
 0x2fc   :  { %v4580_v8 = vpop.f32.mrf.mxu3  ;;  %v4076_v31 = vpop.f32.mrf.mxu0 }
 0x2fd   :  { %v4581_v9 = vadd.f32 %v4580_v8, %v4412_v15  ;;  %v4246_v21 = vadd.f32 %v4245_v63, %v4076_v31  ;;  %4284 = vmatmul.bf16.gmra.mxu1 %v15348_v20  ;;  %v15351_v8 = vld [vmem:[#allocation43_spill] sm:$0xff] }
 0x2ff   :  { %4115 = vmatmul.bf16.gmra.mxu0 %v15346_v29  ;;  %v10343_v34 = vpack.c.bf16 %v4581_v9, %v15347_v17  ;;  %4453 = vmatmul.bf16.gmra.mxu2 %v15349_v11  ;;  %v15352_v9 = vld [vmem:[#allocation44_spill] sm:$0xff]  ;;  %v11729_v11 = vld [vmem:[#allocation6 + $0x2c8] sm:$0xf] }
 0x300   :  { %v15353_v17 = vld [vmem:[#allocation48_spill] sm:$0xff] }
 0x301   :  { %4622 = vmatmul.bf16.gmra.mxu3 %v15350_v13  ;;  %10599 = vst [vmem:[#allocation8 + $0xa0] sm:$0xff] %v10343_v34 }
 0x302   :  { %v4414_v32 = vpop.f32.mrf.mxu2  ;;  %v4247_v35 = vpop.f32.mrf.mxu1 }
 0x303   :  { %v4415_v22 = vadd.f32 %v4414_v32, %v4246_v21  ;;  %v15354_v21 = vld [vmem:[#allocation45_spill] sm:$0xff]  ;;  %v15355_v32 = vld [vmem:[#allocation46_spill] sm:$0xff] }
 0x304   :  { %v4583_v23 = vpop.f32.mrf.mxu3  ;;  %v4078_v10 = vpop.f32.mrf.mxu0 }
 0x305   :  { %v4584_v41 = vadd.f32 %v4583_v23, %v4415_v22  ;;  %v4248_v6 = vadd.f32 %v4247_v35, %v4078_v10  ;;  %v15356_v22 = vld [vmem:[#allocation47_spill] sm:$0xff] }
 0x307   :  { %v10347_v1 = vpack.c.bf16 %v4584_v41, %v15351_v8 }
 0x309   :  { %10603 = vst [vmem:[#allocation8 + $0xc0] sm:$0xff] %v10347_v1 }
 0x30a   :  { %v4416_v60 = vpop.f32.mrf.mxu2  ;;  %v4250_v31 = vpop.f32.mrf.mxu1 }
 0x30b   :  { %v4417_v3 = vadd.f32 %v4416_v60, %v4248_v6  ;;  %v15357_v6 = vld [vmem:[#allocation49_spill] sm:$0xff] }
 0x30c   :  { %v4585_v63 = vpop.f32.mrf.mxu3  ;;  %v4081_v15 = vpop.f32.mrf.mxu0 }
 0x30d   :  { %v4586_v40 = vadd.f32 %v4585_v63, %v4417_v3  ;;  %v4251_v13 = vadd.f32 %v4250_v31, %v4081_v15  ;;  %4289 = vmatmul.bf16.gmra.mxu1 %v15354_v21 }
 0x30f   :  { %4120 = vmatmul.bf16.gmra.mxu0 %v15352_v9  ;;  %v10351_v34 = vpack.c.bf16 %v4586_v40, %v15353_v17  ;;  %4458 = vmatmul.bf16.gmra.mxu2 %v15355_v32  ;;  %v15358_v32 = vld [vmem:[#allocation50_spill] sm:$0xff] }
 0x311   :  { %4627 = vmatmul.bf16.gmra.mxu3 %v15356_v22  ;;  %10607 = vst [vmem:[#allocation8 + $0xe0] sm:$0xff] %v10351_v34  ;;  %v15359_v22 = vld [vmem:[#allocation54_spill] sm:$0xff] }
 0x312   :  { %v4419_v23 = vpop.f32.mrf.mxu2  ;;  %v4252_v8 = vpop.f32.mrf.mxu1 }
 0x313   :  { %v4420_v10 = vadd.f32 %v4419_v23, %v4251_v13  ;;  %v15360_v13 = vld [vmem:[#allocation51_spill] sm:$0xff]  ;;  %v15361_v23 = vld [vmem:[#allocation52_spill] sm:$0xff] }
 0x314   :  { %v4588_v35 = vpop.f32.mrf.mxu3  ;;  %v4083_v41 = vpop.f32.mrf.mxu0 }
 0x315   :  { %v4589_v1 = vadd.f32 %v4588_v35, %v4420_v10  ;;  %v4253_v3 = vadd.f32 %v4252_v8, %v4083_v41  ;;  %v15362_v10 = vld [vmem:[#allocation53_spill] sm:$0xff] }
 0x317   :  { %v10355_v60 = vpack.c.bf16 %v4589_v1, %v15357_v6 }
 0x319   :  { %10611 = vst [vmem:[#allocation8 + $0x100] sm:$0xff] %v10355_v60 }
 0x31a   :  { %v4421_v63 = vpop.f32.mrf.mxu2  ;;  %v4255_v17 = vpop.f32.mrf.mxu1 }
 0x31b   :  { %v4422_v40 = vadd.f32 %v4421_v63, %v4253_v3  ;;  %v15363_v3 = vld [vmem:[#allocation55_spill] sm:$0xff] }
 0x31c   :  { %v4590_v15 = vpop.f32.mrf.mxu3  ;;  %v4086_v31 = vpop.f32.mrf.mxu0 }
 0x31d   :  { %v4591_v21 = vadd.f32 %v4590_v15, %v4422_v40  ;;  %v4256_v9 = vadd.f32 %v4255_v17, %v4086_v31  ;;  %4294 = vmatmul.bf16.gmra.mxu1 %v15360_v13 }
 0x31f   :  { %4125 = vmatmul.bf16.gmra.mxu0 %v15358_v32  ;;  %v10359_v34 = vpack.c.bf16 %v4591_v21, %v15359_v22  ;;  %4463 = vmatmul.bf16.gmra.mxu2 %v15361_v23  ;;  %v15364_v23 = vld [vmem:[#allocation56_spill] sm:$0xff] }
 0x321   :  { %4632 = vmatmul.bf16.gmra.mxu3 %v15362_v10  ;;  %10615 = vst [vmem:[#allocation8 + $0x120] sm:$0xff] %v10359_v34  ;;  %v15365_v10 = vld [vmem:[#allocation60_spill] sm:$0xff] }
 0x322   :  { %v4424_v35 = vpop.f32.mrf.mxu2  ;;  %v4257_v6 = vpop.f32.mrf.mxu1 }
 0x323   :  { %v4425_v41 = vadd.f32 %v4424_v35, %v4256_v9  ;;  %v15366_v9 = vld [vmem:[#allocation57_spill] sm:$0xff]  ;;  %v15367_v35 = vld [vmem:[#allocation58_spill] sm:$0xff] }
 0x324   :  { %v4593_v8 = vpop.f32.mrf.mxu3  ;;  %v4088_v1 = vpop.f32.mrf.mxu0 }
 0x325   :  { %v4594_v60 = vadd.f32 %v4593_v8, %v4425_v41  ;;  %v4258_v40 = vadd.f32 %v4257_v6, %v4088_v1  ;;  %v15368_v41 = vld [vmem:[#allocation59_spill] sm:$0xff]  ;;  %v11985_v8 = vld [vmem:[#allocation6 + $0x4c8] sm:$0xf] }
 0x326   :  { %v12676_v1 = vld [vmem:[#allocation6 + $0x4e4] sm:$0xf0] }
 0x327   :  { %v10363_v63 = vpack.c.bf16 %v4594_v60, %v15363_v3  ;;  %v11986_v60 = vor.u32 %v12676_v1, %v11985_v8  ;;  %v12241_v3 = vld [vmem:[#allocation6 + $0x6c8] sm:$0xf] }
 0x328   :  { %v12612_v8 = vld [vmem:[#allocation6 + $0x2e4] sm:$0xf0] }
 0x329   :  { %10619 = vst [vmem:[#allocation8 + $0x140] sm:$0xff] %v10363_v63  ;;  %v12740_v63 = vld [vmem:[#allocation6 + $0x6e4] sm:$0xf0]  ;;  %5070 = vmatpush.bf16.msra.mxu2 %v11986_v60  ;;  %v15370_v60 = vld [vmem:[#allocation62_spill] sm:$0xff] }
 0x32a   :  { %v4426_v15 = vpop.f32.mrf.mxu2  ;;  %v4260_v17 = vpop.f32.mrf.mxu1 }
 0x32b   :  { %v4427_v21 = vadd.f32 %v4426_v15, %v4258_v40 }
 0x32c   :  { %v4595_v22 = vpop.f32.mrf.mxu3  ;;  %v4091_v31 = vpop.f32.mrf.mxu0 }
 0x32d   :  { %v4596_v13 = vadd.f32 %v4595_v22, %v4427_v21  ;;  %v4261_v32 = vadd.f32 %v4260_v17, %v4091_v31  ;;  %4299 = vmatmul.bf16.gmra.mxu1 %v15366_v9  ;;  %v12242_v22 = vor.u32 %v12740_v63, %v12241_v3  ;;  %v15371_v63 = vld [vmem:[#allocation66_spill] sm:$0xff] }
 0x32f   :  { %4130 = vmatmul.bf16.gmra.mxu0 %v15364_v23  ;;  %v10367_v34 = vpack.c.bf16 %v4596_v13, %v15365_v10  ;;  %4468 = vmatmul.bf16.gmra.mxu2 %v15367_v35  ;;  %v15369_v10 = vld [vmem:[#allocation61_spill] sm:$0xff] }
 0x330   :  { %5239 = vmatpush.bf16.msra.mxu3 %v12242_v22 }
 0x331   :  { %4637 = vmatmul.bf16.gmra.mxu3 %v15368_v41  ;;  %10623 = vst [vmem:[#allocation8 + $0x160] sm:$0xff] %v10367_v34  ;;  %v11473_v41 = vld [vmem:[#allocation6 + $0xc8] sm:$0xf] }
 0x332   :  { %v4429_v6 = vpop.f32.mrf.mxu2  ;;  %v4262_v23 = vpop.f32.mrf.mxu1  ;;  %v12548_v34 = vld [vmem:[#allocation6 + $0xe4] sm:$0xf0] }
 0x333   :  { %v4430_v40 = vadd.f32 %v4429_v6, %v4261_v32  ;;  %v11474_v9 = vor.u32 %v12548_v34, %v11473_v41  ;;  %v11730_v6 = vor.u32 %v12612_v8, %v11729_v11  ;;  %v15374_v41 = vld [vmem:[#allocation65_spill] sm:$0xff] }
 0x334   :  { %v4598_v15 = vpop.f32.mrf.mxu3  ;;  %v4093_v21 = vpop.f32.mrf.mxu0 }
 0x335   :  { %v4599_v13 = vadd.f32 %v4598_v15, %v4430_v40  ;;  %v4263_v17 = vadd.f32 %v4262_v23, %v4093_v21  ;;  %4732 = vmatpush.bf16.msra.mxu0 %v11474_v9  ;;  %4901 = vmatpush.bf16.msra.mxu1 %v11730_v6  ;;  %v15372_v23 = vld [vmem:[#allocation63_spill] sm:$0xff]  ;;  %v15373_v21 = vld [vmem:[#allocation64_spill] sm:$0xff] }
 0x337   :  { %v10371_v31 = vpack.c.bf16 %v4599_v13, %v15369_v10 }
 0x339   :  { %10627 = vst [vmem:[#allocation8 + $0x180] sm:$0xff] %v10371_v31 }
 0x33a   :  { %v4431_v35 = vpop.f32.mrf.mxu2  ;;  %v4265_v29 = vpop.f32.mrf.mxu1 }
 0x33b   :  { %v4432_v1 = vadd.f32 %v4431_v35, %v4263_v17 }
 0x33c   :  { %v4600_v20 = vpop.f32.mrf.mxu3  ;;  %v4096_v32 = vpop.f32.mrf.mxu0 }
 0x33d   :  { %v4601_v3 = vadd.f32 %v4600_v20, %v4432_v1  ;;  %v4266_v15 = vadd.f32 %v4265_v29, %v4096_v32  ;;  %4304 = vmatmul.bf16.gmra.mxu1 %v15372_v23  ;;  %v15375_v20 = vld [vmem:[#allocation67_spill] sm:$0xff] }
 0x33f   :  { %4135 = vmatmul.bf16.gmra.mxu0 %v15370_v60  ;;  %v10375_v40 = vpack.c.bf16 %v4601_v3, %v15371_v63  ;;  %4473 = vmatmul.bf16.gmra.mxu2 %v15373_v21  ;;  %v15376_v3 = vld [vmem:[#allocation68_spill] sm:$0xff]  ;;  %v11697_v21 = vld [vmem:[#allocation6 + $0x288] sm:$0xf] }
 0x340   :  { %v15377_v63 = vld [vmem:[#allocation72_spill] sm:$0xff] }
 0x341   :  { %4642 = vmatmul.bf16.gmra.mxu3 %v15374_v41  ;;  %10631 = vst [vmem:[#allocation8 + $0x1a0] sm:$0xff] %v10375_v40 }
 0x342   :  { %v4434_v35 = vpop.f32.mrf.mxu2  ;;  %v4267_v10 = vpop.f32.mrf.mxu1 }
 0x343   :  { %v4435_v22 = vadd.f32 %v4434_v35, %v4266_v15  ;;  %v15378_v15 = vld [vmem:[#allocation69_spill] sm:$0xff]  ;;  %v15379_v35 = vld [vmem:[#allocation70_spill] sm:$0xff] }
 0x344   :  { %v4603_v13 = vpop.f32.mrf.mxu3  ;;  %v4098_v11 = vpop.f32.mrf.mxu0 }
 0x345   :  { %v4604_v9 = vadd.f32 %v4603_v13, %v4435_v22  ;;  %v4268_v17 = vadd.f32 %v4267_v10, %v4098_v11  ;;  %v15380_v22 = vld [vmem:[#allocation71_spill] sm:$0xff] }
 0x347   :  { %v10379_v31 = vpack.c.bf16 %v4604_v9, %v15375_v20 }
 0x349   :  { %10635 = vst [vmem:[#allocation8 + $0x1c0] sm:$0xff] %v10379_v31 }
 0x34a   :  { %v4436_v34 = vpop.f32.mrf.mxu2  ;;  %v4270_v32 = vpop.f32.mrf.mxu1 }
 0x34b   :  { %v4437_v8 = vadd.f32 %v4436_v34, %v4268_v17  ;;  %v15381_v17 = vld [vmem:[#allocation73_spill] sm:$0xff] }
 0x34c   :  { %v4605_v29 = vpop.f32.mrf.mxu3  ;;  %v4101_v1 = vpop.f32.mrf.mxu0 }
 0x34d   :  { %v4606_v6 = vadd.f32 %v4605_v29, %v4437_v8  ;;  %v4271_v41 = vadd.f32 %v4270_v32, %v4101_v1  ;;  %4309 = vmatmul.bf16.gmra.mxu1 %v15378_v15 }
 0x34f   :  { %4140 = vmatmul.bf16.gmra.mxu0 %v15376_v3  ;;  %v10383_v40 = vpack.c.bf16 %v4606_v6, %v15377_v63  ;;  %4478 = vmatmul.bf16.gmra.mxu2 %v15379_v35  ;;  %v15382_v35 = vld [vmem:[#allocation74_spill] sm:$0xff] }
 0x351   :  { %4647 = vmatmul.bf16.gmra.mxu3 %v15380_v22  ;;  %10639 = vst [vmem:[#allocation8 + $0x1e0] sm:$0xff] %v10383_v40  ;;  %v15383_v22 = vld [vmem:[#allocation78_spill] sm:$0xff] }
 0x352   :  { %v4439_v13 = vpop.f32.mrf.mxu2  ;;  %v4272_v20 = vpop.f32.mrf.mxu1 }
 0x353   :  { %v4440_v11 = vadd.f32 %v4439_v13, %v4271_v41  ;;  %v15384_v41 = vld [vmem:[#allocation75_spill] sm:$0xff]  ;;  %v15385_v13 = vld [vmem:[#allocation76_spill] sm:$0xff] }
 0x354   :  { %v4608_v10 = vpop.f32.mrf.mxu3  ;;  %v4103_v9 = vpop.f32.mrf.mxu0 }
 0x355   :  { %v4609_v31 = vadd.f32 %v4608_v10, %v4440_v11  ;;  %v4273_v8 = vadd.f32 %v4272_v20, %v4103_v9  ;;  %v15386_v11 = vld [vmem:[#allocation77_spill] sm:$0xff] }
 0x357   :  { %v10387_v34 = vpack.c.bf16 %v4609_v31, %v15381_v17 }
 0x359   :  { %10643 = vst [vmem:[#allocation8 + $0x200] sm:$0xff] %v10387_v34 }
 0x35a   :  { %v4441_v29 = vpop.f32.mrf.mxu2  ;;  %v4275_v63 = vpop.f32.mrf.mxu1 }
 0x35b   :  { %v4442_v6 = vadd.f32 %v4441_v29, %v4273_v8  ;;  %v15387_v8 = vld [vmem:[#allocation79_spill] sm:$0xff] }
 0x35c   :  { %v4610_v1 = vpop.f32.mrf.mxu3  ;;  %v4106_v32 = vpop.f32.mrf.mxu0 }
 0x35d   :  { %v4611_v15 = vadd.f32 %v4610_v1, %v4442_v6  ;;  %v4276_v3 = vadd.f32 %v4275_v63, %v4106_v32  ;;  %4314 = vmatmul.bf16.gmra.mxu1 %v15384_v41 }
 0x35f   :  { %4145 = vmatmul.bf16.gmra.mxu0 %v15382_v35  ;;  %v10391_v40 = vpack.c.bf16 %v4611_v15, %v15383_v22  ;;  %4483 = vmatmul.bf16.gmra.mxu2 %v15385_v13  ;;  %v15388_v13 = vld [vmem:[#allocation80_spill] sm:$0xff] }
 0x361   :  { %4652 = vmatmul.bf16.gmra.mxu3 %v15386_v11  ;;  %10647 = vst [vmem:[#allocation8 + $0x220] sm:$0xff] %v10391_v40  ;;  %v15389_v11 = vld [vmem:[#allocation84_spill] sm:$0xff] }
 0x362   :  { %v4444_v10 = vpop.f32.mrf.mxu2  ;;  %v4277_v17 = vpop.f32.mrf.mxu1 }
 0x363   :  { %v4445_v9 = vadd.f32 %v4444_v10, %v4276_v3  ;;  %v15390_v3 = vld [vmem:[#allocation81_spill] sm:$0xff]  ;;  %v15391_v10 = vld [vmem:[#allocation82_spill] sm:$0xff] }
 0x364   :  { %v4613_v20 = vpop.f32.mrf.mxu3  ;;  %v4108_v31 = vpop.f32.mrf.mxu0 }
 0x365   :  { %v4614_v34 = vadd.f32 %v4613_v20, %v4445_v9  ;;  %v4278_v6 = vadd.f32 %v4277_v17, %v4108_v31  ;;  %v15392_v9 = vld [vmem:[#allocation83_spill] sm:$0xff]  ;;  %v11953_v20 = vld [vmem:[#allocation6 + $0x488] sm:$0xf] }
 0x366   :  { %v12668_v31 = vld [vmem:[#allocation6 + $0x4a4] sm:$0xf0] }
 0x367   :  { %v10395_v29 = vpack.c.bf16 %v4614_v34, %v15387_v8  ;;  %v11954_v34 = vor.u32 %v12668_v31, %v11953_v20  ;;  %v12209_v8 = vld [vmem:[#allocation6 + $0x688] sm:$0xf] }
 0x368   :  { %v12604_v20 = vld [vmem:[#allocation6 + $0x2a4] sm:$0xf0] }
 0x369   :  { %10651 = vst [vmem:[#allocation8 + $0x240] sm:$0xff] %v10395_v29  ;;  %v12732_v29 = vld [vmem:[#allocation6 + $0x6a4] sm:$0xf0]  ;;  %5071 = vmatpush.bf16.msra.mxu2 %v11954_v34  ;;  %v15394_v34 = vld [vmem:[#allocation86_spill] sm:$0xff] }
 0x36a   :  { %v4446_v1 = vpop.f32.mrf.mxu2  ;;  %v4280_v63 = vpop.f32.mrf.mxu1 }
 0x36b   :  { %v4447_v15 = vadd.f32 %v4446_v1, %v4278_v6 }
 0x36c   :  { %v4615_v22 = vpop.f32.mrf.mxu3  ;;  %v4111_v32 = vpop.f32.mrf.mxu0 }
 0x36d   :  { %v4616_v41 = vadd.f32 %v4615_v22, %v4447_v15  ;;  %v4281_v35 = vadd.f32 %v4280_v63, %v4111_v32  ;;  %4319 = vmatmul.bf16.gmra.mxu1 %v15390_v3  ;;  %v12210_v22 = vor.u32 %v12732_v29, %v12209_v8  ;;  %v15395_v29 = vld [vmem:[#allocation90_spill] sm:$0xff] }
 0x36f   :  { %4150 = vmatmul.bf16.gmra.mxu0 %v15388_v13  ;;  %v10399_v40 = vpack.c.bf16 %v4616_v41, %v15389_v11  ;;  %4488 = vmatmul.bf16.gmra.mxu2 %v15391_v10  ;;  %v15393_v11 = vld [vmem:[#allocation85_spill] sm:$0xff] }
 0x370   :  { %5240 = vmatpush.bf16.msra.mxu3 %v12210_v22 }
 0x371   :  { %4657 = vmatmul.bf16.gmra.mxu3 %v15392_v9  ;;  %10655 = vst [vmem:[#allocation8 + $0x260] sm:$0xff] %v10399_v40  ;;  %v11441_v9 = vld [vmem:[#allocation6 + $0x88] sm:$0xf] }
 0x372   :  { %v4449_v17 = vpop.f32.mrf.mxu2  ;;  %v4282_v13 = vpop.f32.mrf.mxu1  ;;  %v12540_v40 = vld [vmem:[#allocation6 + $0xa4] sm:$0xf0] }
 0x373   :  { %v4450_v6 = vadd.f32 %v4449_v17, %v4281_v35  ;;  %v11442_v3 = vor.u32 %v12540_v40, %v11441_v9  ;;  %v11698_v17 = vor.u32 %v12604_v20, %v11697_v21  ;;  %v15398_v9 = vld [vmem:[#allocation89_spill] sm:$0xff] }
 0x374   :  { %v4618_v1 = vpop.f32.mrf.mxu3  ;;  %v4113_v15 = vpop.f32.mrf.mxu0 }
 0x375   :  { %v4619_v41 = vadd.f32 %v4618_v1, %v4450_v6  ;;  %v4283_v63 = vadd.f32 %v4282_v13, %v4113_v15  ;;  %4733 = vmatpush.bf16.msra.mxu0 %v11442_v3  ;;  %4902 = vmatpush.bf16.msra.mxu1 %v11698_v17  ;;  %v15396_v13 = vld [vmem:[#allocation87_spill] sm:$0xff]  ;;  %v15397_v15 = vld [vmem:[#allocation88_spill] sm:$0xff] }
 0x377   :  { %v10403_v32 = vpack.c.bf16 %v4619_v41, %v15393_v11 }
 0x379   :  { %10659 = vst [vmem:[#allocation8 + $0x280] sm:$0xff] %v10403_v32 }
 0x37a   :  { %v4451_v10 = vpop.f32.mrf.mxu2  ;;  %v4285_v60 = vpop.f32.mrf.mxu1 }
 0x37b   :  { %v4452_v31 = vadd.f32 %v4451_v10, %v4283_v63 }
 0x37c   :  { %v4620_v23 = vpop.f32.mrf.mxu3  ;;  %v4116_v35 = vpop.f32.mrf.mxu0 }
 0x37d   :  { %v4621_v8 = vadd.f32 %v4620_v23, %v4452_v31  ;;  %v4286_v1 = vadd.f32 %v4285_v60, %v4116_v35  ;;  %4324 = vmatmul.bf16.gmra.mxu1 %v15396_v13  ;;  %v15399_v23 = vld [vmem:[#allocation91_spill] sm:$0xff] }
 0x37f   :  { %4155 = vmatmul.bf16.gmra.mxu0 %v15394_v34  ;;  %v10407_v6 = vpack.c.bf16 %v4621_v8, %v15395_v29  ;;  %4493 = vmatmul.bf16.gmra.mxu2 %v15397_v15  ;;  %v15400_v8 = vld [vmem:[#allocation92_spill] sm:$0xff]  ;;  %v11665_v15 = vld [vmem:[#allocation6 + $0x248] sm:$0xf] }
 0x380   :  { %v15401_v29 = vld [vmem:[#allocation96_spill] sm:$0xff] }
 0x381   :  { %4662 = vmatmul.bf16.gmra.mxu3 %v15398_v9  ;;  %10663 = vst [vmem:[#allocation8 + $0x2a0] sm:$0xff] %v10407_v6 }
 0x382   :  { %v4454_v10 = vpop.f32.mrf.mxu2  ;;  %v4287_v11 = vpop.f32.mrf.mxu1 }
 0x383   :  { %v4455_v22 = vadd.f32 %v4454_v10, %v4286_v1  ;;  %v15402_v1 = vld [vmem:[#allocation93_spill] sm:$0xff]  ;;  %v15403_v10 = vld [vmem:[#allocation94_spill] sm:$0xff] }
 0x384   :  { %v4623_v41 = vpop.f32.mrf.mxu3  ;;  %v4118_v21 = vpop.f32.mrf.mxu0 }
 0x385   :  { %v4624_v3 = vadd.f32 %v4623_v41, %v4455_v22  ;;  %v4288_v63 = vadd.f32 %v4287_v11, %v4118_v21  ;;  %v15404_v22 = vld [vmem:[#allocation95_spill] sm:$0xff] }
 0x387   :  { %v10411_v32 = vpack.c.bf16 %v4624_v3, %v15399_v23 }
 0x389   :  { %10667 = vst [vmem:[#allocation8 + $0x2c0] sm:$0xff] %v10411_v32 }
 0x38a   :  { %v4456_v40 = vpop.f32.mrf.mxu2  ;;  %v4290_v35 = vpop.f32.mrf.mxu1 }
 0x38b   :  { %v4457_v20 = vadd.f32 %v4456_v40, %v4288_v63  ;;  %v15405_v63 = vld [vmem:[#allocation97_spill] sm:$0xff] }
 0x38c   :  { %v4625_v60 = vpop.f32.mrf.mxu3  ;;  %v4121_v31 = vpop.f32.mrf.mxu0 }
 0x38d   :  { %v4626_v17 = vadd.f32 %v4625_v60, %v4457_v20  ;;  %v4291_v9 = vadd.f32 %v4290_v35, %v4121_v31  ;;  %4329 = vmatmul.bf16.gmra.mxu1 %v15402_v1 }
 0x38f   :  { %4160 = vmatmul.bf16.gmra.mxu0 %v15400_v8  ;;  %v10415_v6 = vpack.c.bf16 %v4626_v17, %v15401_v29  ;;  %4498 = vmatmul.bf16.gmra.mxu2 %v15403_v10  ;;  %v15406_v10 = vld [vmem:[#allocation98_spill] sm:$0xff] }
 0x391   :  { %4667 = vmatmul.bf16.gmra.mxu3 %v15404_v22  ;;  %10671 = vst [vmem:[#allocation8 + $0x2e0] sm:$0xff] %v10415_v6  ;;  %v15407_v22 = vld [vmem:[#allocation102_spill] sm:$0xff] }
 0x392   :  { %v4459_v41 = vpop.f32.mrf.mxu2  ;;  %v4292_v23 = vpop.f32.mrf.mxu1 }
 0x393   :  { %v4460_v21 = vadd.f32 %v4459_v41, %v4291_v9  ;;  %v15408_v9 = vld [vmem:[#allocation99_spill] sm:$0xff]  ;;  %v15409_v41 = vld [vmem:[#allocation100_spill] sm:$0xff] }
 0x394   :  { %v4628_v11 = vpop.f32.mrf.mxu3  ;;  %v4123_v3 = vpop.f32.mrf.mxu0 }
 0x395   :  { %v4629_v32 = vadd.f32 %v4628_v11, %v4460_v21  ;;  %v4293_v20 = vadd.f32 %v4292_v23, %v4123_v3  ;;  %v15410_v21 = vld [vmem:[#allocation101_spill] sm:$0xff] }
 0x397   :  { %v10419_v40 = vpack.c.bf16 %v4629_v32, %v15405_v63 }
 0x399   :  { %10675 = vst [vmem:[#allocation8 + $0x300] sm:$0xff] %v10419_v40 }
 0x39a   :  { %v4461_v60 = vpop.f32.mrf.mxu2  ;;  %v4295_v29 = vpop.f32.mrf.mxu1 }
 0x39b   :  { %v4462_v17 = vadd.f32 %v4461_v60, %v4293_v20  ;;  %v15411_v20 = vld [vmem:[#allocation103_spill] sm:$0xff] }
 0x39c   :  { %v4630_v31 = vpop.f32.mrf.mxu3  ;;  %v4126_v35 = vpop.f32.mrf.mxu0 }
 0x39d   :  { %v4631_v1 = vadd.f32 %v4630_v31, %v4462_v17  ;;  %v4296_v8 = vadd.f32 %v4295_v29, %v4126_v35  ;;  %4334 = vmatmul.bf16.gmra.mxu1 %v15408_v9 }
 0x39f   :  { %4165 = vmatmul.bf16.gmra.mxu0 %v15406_v10  ;;  %v10423_v6 = vpack.c.bf16 %v4631_v1, %v15407_v22  ;;  %4503 = vmatmul.bf16.gmra.mxu2 %v15409_v41  ;;  %v15412_v41 = vld [vmem:[#allocation104_spill] sm:$0xff] }
 0x3a1   :  { %4672 = vmatmul.bf16.gmra.mxu3 %v15410_v21  ;;  %10679 = vst [vmem:[#allocation8 + $0x320] sm:$0xff] %v10423_v6  ;;  %v15413_v21 = vld [vmem:[#allocation108_spill] sm:$0xff] }
 0x3a2   :  { %v4464_v11 = vpop.f32.mrf.mxu2  ;;  %v4297_v63 = vpop.f32.mrf.mxu1 }
 0x3a3   :  { %v4465_v3 = vadd.f32 %v4464_v11, %v4296_v8  ;;  %v15414_v8 = vld [vmem:[#allocation105_spill] sm:$0xff]  ;;  %v15415_v11 = vld [vmem:[#allocation106_spill] sm:$0xff] }
 0x3a4   :  { %v4633_v23 = vpop.f32.mrf.mxu3  ;;  %v4128_v32 = vpop.f32.mrf.mxu0 }
 0x3a5   :  { %v4634_v40 = vadd.f32 %v4633_v23, %v4465_v3  ;;  %v4298_v17 = vadd.f32 %v4297_v63, %v4128_v32  ;;  %v15416_v3 = vld [vmem:[#allocation107_spill] sm:$0xff]  ;;  %v11921_v23 = vld [vmem:[#allocation6 + $0x448] sm:$0xf] }
 0x3a6   :  { %v12660_v32 = vld [vmem:[#allocation6 + $0x464] sm:$0xf0] }
 0x3a7   :  { %v10427_v60 = vpack.c.bf16 %v4634_v40, %v15411_v20  ;;  %v11922_v40 = vor.u32 %v12660_v32, %v11921_v23  ;;  %v12177_v20 = vld [vmem:[#allocation6 + $0x648] sm:$0xf] }
 0x3a8   :  { %v12596_v23 = vld [vmem:[#allocation6 + $0x264] sm:$0xf0] }
 0x3a9   :  { %10683 = vst [vmem:[#allocation8 + $0x340] sm:$0xff] %v10427_v60  ;;  %v12724_v60 = vld [vmem:[#allocation6 + $0x664] sm:$0xf0]  ;;  %5072 = vmatpush.bf16.msra.mxu2 %v11922_v40  ;;  %v15418_v40 = vld [vmem:[#allocation110_spill] sm:$0xff] }
 0x3aa   :  { %v4466_v31 = vpop.f32.mrf.mxu2  ;;  %v4300_v29 = vpop.f32.mrf.mxu1 }
 0x3ab   :  { %v4467_v1 = vadd.f32 %v4466_v31, %v4298_v17 }
 0x3ac   :  { %v4635_v22 = vpop.f32.mrf.mxu3  ;;  %v4131_v35 = vpop.f32.mrf.mxu0 }
 0x3ad   :  { %v4636_v9 = vadd.f32 %v4635_v22, %v4467_v1  ;;  %v4301_v10 = vadd.f32 %v4300_v29, %v4131_v35  ;;  %4339 = vmatmul.bf16.gmra.mxu1 %v15414_v8  ;;  %v12178_v22 = vor.u32 %v12724_v60, %v12177_v20  ;;  %v15419_v60 = vld [vmem:[#allocation114_spill] sm:$0xff] }
 0x3af   :  { %4170 = vmatmul.bf16.gmra.mxu0 %v15412_v41  ;;  %v10431_v6 = vpack.c.bf16 %v4636_v9, %v15413_v21  ;;  %4508 = vmatmul.bf16.gmra.mxu2 %v15415_v11  ;;  %v15417_v21 = vld [vmem:[#allocation109_spill] sm:$0xff] }
 0x3b0   :  { %5241 = vmatpush.bf16.msra.mxu3 %v12178_v22 }
 0x3b1   :  { %4677 = vmatmul.bf16.gmra.mxu3 %v15416_v3  ;;  %10687 = vst [vmem:[#allocation8 + $0x360] sm:$0xff] %v10431_v6  ;;  %v11409_v3 = vld [vmem:[#allocation6 + $0x48] sm:$0xf] }
 0x3b2   :  { %v4469_v63 = vpop.f32.mrf.mxu2  ;;  %v4302_v41 = vpop.f32.mrf.mxu1  ;;  %v12532_v6 = vld [vmem:[#allocation6 + $0x64] sm:$0xf0] }
 0x3b3   :  { %v4470_v17 = vadd.f32 %v4469_v63, %v4301_v10  ;;  %v11410_v8 = vor.u32 %v12532_v6, %v11409_v3  ;;  %v11666_v63 = vor.u32 %v12596_v23, %v11665_v15  ;;  %v15422_v3 = vld [vmem:[#allocation113_spill] sm:$0xff] }
 0x3b4   :  { %v4638_v31 = vpop.f32.mrf.mxu3  ;;  %v4133_v1 = vpop.f32.mrf.mxu0 }
 0x3b5   :  { %v4639_v9 = vadd.f32 %v4638_v31, %v4470_v17  ;;  %v4303_v29 = vadd.f32 %v4302_v41, %v4133_v1  ;;  %4734 = vmatpush.bf16.msra.mxu0 %v11410_v8  ;;  %4903 = vmatpush.bf16.msra.mxu1 %v11666_v63  ;;  %v15420_v41 = vld [vmem:[#allocation111_spill] sm:$0xff]  ;;  %v15421_v1 = vld [vmem:[#allocation112_spill] sm:$0xff] }
 0x3b7   :  { %v10435_v35 = vpack.c.bf16 %v4639_v9, %v15417_v21 }
 0x3b9   :  { %10691 = vst [vmem:[#allocation8 + $0x380] sm:$0xff] %v10435_v35 }
 0x3ba   :  { %v4471_v11 = vpop.f32.mrf.mxu2  ;;  %v4305_v34 = vpop.f32.mrf.mxu1 }
 0x3bb   :  { %v4472_v32 = vadd.f32 %v4471_v11, %v4303_v29 }
 0x3bc   :  { %v4640_v13 = vpop.f32.mrf.mxu3  ;;  %v4136_v10 = vpop.f32.mrf.mxu0 }
 0x3bd   :  { %v4641_v20 = vadd.f32 %v4640_v13, %v4472_v32  ;;  %v4306_v31 = vadd.f32 %v4305_v34, %v4136_v10  ;;  %4344 = vmatmul.bf16.gmra.mxu1 %v15420_v41  ;;  %v15423_v13 = vld [vmem:[#allocation115_spill] sm:$0xff] }
 0x3bf   :  { %4175 = vmatmul.bf16.gmra.mxu0 %v15418_v40  ;;  %v10439_v17 = vpack.c.bf16 %v4641_v20, %v15419_v60  ;;  %4513 = vmatmul.bf16.gmra.mxu2 %v15421_v1  ;;  %v15424_v20 = vld [vmem:[#allocation116_spill] sm:$0xff]  ;;  %v11633_v1 = vld [vmem:[#allocation6 + $0x208] sm:$0xf] }
 0x3c0   :  { %v15425_v60 = vld [vmem:[#allocation120_spill] sm:$0xff] }
 0x3c1   :  { %4682 = vmatmul.bf16.gmra.mxu3 %v15422_v3  ;;  %10695 = vst [vmem:[#allocation8 + $0x3a0] sm:$0xff] %v10439_v17 }
 0x3c2   :  { %v4474_v11 = vpop.f32.mrf.mxu2  ;;  %v4307_v21 = vpop.f32.mrf.mxu1 }
 0x3c3   :  { %v4475_v22 = vadd.f32 %v4474_v11, %v4306_v31  ;;  %v15426_v31 = vld [vmem:[#allocation117_spill] sm:$0xff]  ;;  %v15427_v11 = vld [vmem:[#allocation118_spill] sm:$0xff] }
 0x3c4   :  { %v4643_v9 = vpop.f32.mrf.mxu3  ;;  %v4138_v15 = vpop.f32.mrf.mxu0 }
 0x3c5   :  { %v4644_v8 = vadd.f32 %v4643_v9, %v4475_v22  ;;  %v4308_v29 = vadd.f32 %v4307_v21, %v4138_v15  ;;  %v15428_v22 = vld [vmem:[#allocation119_spill] sm:$0xff] }
 0x3c7   :  { %v10443_v35 = vpack.c.bf16 %v4644_v8, %v15423_v13 }
 0x3c9   :  { %10699 = vst [vmem:[#allocation8 + $0x3c0] sm:$0xff] %v10443_v35 }
 0x3ca   :  { %v4476_v6 = vpop.f32.mrf.mxu2  ;;  %v4310_v10 = vpop.f32.mrf.mxu1 }
 0x3cb   :  { %v4477_v23 = vadd.f32 %v4476_v6, %v4308_v29  ;;  %v15429_v29 = vld [vmem:[#allocation121_spill] sm:$0xff] }
 0x3cc   :  { %v4645_v34 = vpop.f32.mrf.mxu3  ;;  %v4141_v32 = vpop.f32.mrf.mxu0 }
 0x3cd   :  { %v4646_v63 = vadd.f32 %v4645_v34, %v4477_v23  ;;  %v4311_v3 = vadd.f32 %v4310_v10, %v4141_v32  ;;  %4349 = vmatmul.bf16.gmra.mxu1 %v15426_v31 }
 0x3cf   :  { %4180 = vmatmul.bf16.gmra.mxu0 %v15424_v20  ;;  %v10447_v17 = vpack.c.bf16 %v4646_v63, %v15425_v60  ;;  %4518 = vmatmul.bf16.gmra.mxu2 %v15427_v11  ;;  %v15430_v11 = vld [vmem:[#allocation122_spill] sm:$0xff] }
 0x3d1   :  { %4687 = vmatmul.bf16.gmra.mxu3 %v15428_v22  ;;  %10703 = vst [vmem:[#allocation8 + $0x3e0] sm:$0xff] %v10447_v17  ;;  %v15431_v22 = vld [vmem:[#allocation126_spill] sm:$0xff] }
 0x3d2   :  { %v4479_v9 = vpop.f32.mrf.mxu2  ;;  %v4312_v13 = vpop.f32.mrf.mxu1 }
 0x3d3   :  { %v4480_v15 = vadd.f32 %v4479_v9, %v4311_v3  ;;  %v15432_v3 = vld [vmem:[#allocation123_spill] sm:$0xff]  ;;  %v15433_v9 = vld [vmem:[#allocation124_spill] sm:$0xff] }
 0x3d4   :  { %v4648_v21 = vpop.f32.mrf.mxu3  ;;  %v4143_v8 = vpop.f32.mrf.mxu0 }
 0x3d5   :  { %v4649_v35 = vadd.f32 %v4648_v21, %v4480_v15  ;;  %v4313_v23 = vadd.f32 %v4312_v13, %v4143_v8  ;;  %v15434_v15 = vld [vmem:[#allocation125_spill] sm:$0xff] }
 0x3d7   :  { %v10451_v6 = vpack.c.bf16 %v4649_v35, %v15429_v29 }
 0x3d9   :  { %10707 = vst [vmem:[#allocation8 + $0x400] sm:$0xff] %v10451_v6 }
 0x3da   :  { %v4481_v34 = vpop.f32.mrf.mxu2  ;;  %v4315_v60 = vpop.f32.mrf.mxu1 }
 0x3db   :  { %v4482_v63 = vadd.f32 %v4481_v34, %v4313_v23  ;;  %v15435_v23 = vld [vmem:[#allocation127_spill] sm:$0xff] }
 0x3dc   :  { %v4650_v32 = vpop.f32.mrf.mxu3  ;;  %v4146_v10 = vpop.f32.mrf.mxu0 }
 0x3dd   :  { %v4651_v31 = vadd.f32 %v4650_v32, %v4482_v63  ;;  %v4316_v20 = vadd.f32 %v4315_v60, %v4146_v10  ;;  %4354 = vmatmul.bf16.gmra.mxu1 %v15432_v3 }
 0x3df   :  { %4185 = vmatmul.bf16.gmra.mxu0 %v15430_v11  ;;  %v10455_v17 = vpack.c.bf16 %v4651_v31, %v15431_v22  ;;  %4523 = vmatmul.bf16.gmra.mxu2 %v15433_v9  ;;  %v15436_v9 = vld [vmem:[#allocation128_spill] sm:$0xff] }
 0x3e1   :  { %4692 = vmatmul.bf16.gmra.mxu3 %v15434_v15  ;;  %10711 = vst [vmem:[#allocation8 + $0x420] sm:$0xff] %v10455_v17  ;;  %v15437_v15 = vld [vmem:[#allocation132_spill] sm:$0xff] }
 0x3e2   :  { %v4484_v21 = vpop.f32.mrf.mxu2  ;;  %v4317_v29 = vpop.f32.mrf.mxu1 }
 0x3e3   :  { %v4485_v8 = vadd.f32 %v4484_v21, %v4316_v20  ;;  %v15438_v20 = vld [vmem:[#allocation129_spill] sm:$0xff]  ;;  %v15439_v21 = vld [vmem:[#allocation130_spill] sm:$0xff] }
 0x3e4   :  { %v4653_v13 = vpop.f32.mrf.mxu3  ;;  %v4148_v35 = vpop.f32.mrf.mxu0 }
 0x3e5   :  { %v4654_v6 = vadd.f32 %v4653_v13, %v4485_v8  ;;  %v4318_v63 = vadd.f32 %v4317_v29, %v4148_v35  ;;  %v15440_v8 = vld [vmem:[#allocation131_spill] sm:$0xff]  ;;  %v11889_v13 = vld [vmem:[#allocation6 + $0x408] sm:$0xf] }
 0x3e6   :  { %v12652_v35 = vld [vmem:[#allocation6 + $0x424] sm:$0xf0] }
 0x3e7   :  { %v10459_v34 = vpack.c.bf16 %v4654_v6, %v15435_v23  ;;  %v11890_v6 = vor.u32 %v12652_v35, %v11889_v13  ;;  %v12145_v23 = vld [vmem:[#allocation6 + $0x608] sm:$0xf] }
 0x3e8   :  { %v12588_v13 = vld [vmem:[#allocation6 + $0x224] sm:$0xf0] }
 0x3e9   :  { %10715 = vst [vmem:[#allocation8 + $0x440] sm:$0xff] %v10459_v34  ;;  %v12716_v34 = vld [vmem:[#allocation6 + $0x624] sm:$0xf0]  ;;  %5073 = vmatpush.bf16.msra.mxu2 %v11890_v6  ;;  %v15442_v6 = vld [vmem:[#allocation134_spill] sm:$0xff] }
 0x3ea   :  { %v4486_v32 = vpop.f32.mrf.mxu2  ;;  %v4320_v60 = vpop.f32.mrf.mxu1 }
 0x3eb   :  { %v4487_v31 = vadd.f32 %v4486_v32, %v4318_v63 }
 0x3ec   :  { %v4655_v22 = vpop.f32.mrf.mxu3  ;;  %v4151_v10 = vpop.f32.mrf.mxu0 }
 0x3ed   :  { %v4656_v3 = vadd.f32 %v4655_v22, %v4487_v31  ;;  %v4321_v11 = vadd.f32 %v4320_v60, %v4151_v10  ;;  %4359 = vmatmul.bf16.gmra.mxu1 %v15438_v20  ;;  %v12146_v22 = vor.u32 %v12716_v34, %v12145_v23  ;;  %v15443_v34 = vld [vmem:[#allocation138_spill] sm:$0xff] }
 0x3ef   :  { %4190 = vmatmul.bf16.gmra.mxu0 %v15436_v9  ;;  %v10463_v17 = vpack.c.bf16 %v4656_v3, %v15437_v15  ;;  %4528 = vmatmul.bf16.gmra.mxu2 %v15439_v21  ;;  %v15441_v15 = vld [vmem:[#allocation133_spill] sm:$0xff] }
 0x3f0   :  { %5242 = vmatpush.bf16.msra.mxu3 %v12146_v22 }
 0x3f1   :  { %4697 = vmatmul.bf16.gmra.mxu3 %v15440_v8  ;;  %10719 = vst [vmem:[#allocation8 + $0x460] sm:$0xff] %v10463_v17  ;;  %v11377_v8 = vld [vmem:[#allocation6 + $0x8] sm:$0xf] }
 0x3f2   :  { %v4489_v29 = vpop.f32.mrf.mxu2  ;;  %v4322_v9 = vpop.f32.mrf.mxu1  ;;  %v12524_v17 = vld [vmem:[#allocation6 + $0x24] sm:$0xf0] }
 0x3f3   :  { %v4490_v63 = vadd.f32 %v4489_v29, %v4321_v11  ;;  %v11378_v20 = vor.u32 %v12524_v17, %v11377_v8  ;;  %v11634_v29 = vor.u32 %v12588_v13, %v11633_v1  ;;  %v15446_v8 = vld [vmem:[#allocation137_spill] sm:$0xff] }
 0x3f4   :  { %v4658_v32 = vpop.f32.mrf.mxu3  ;;  %v4153_v31 = vpop.f32.mrf.mxu0 }
 0x3f5   :  { %v4659_v3 = vadd.f32 %v4658_v32, %v4490_v63  ;;  %v4323_v60 = vadd.f32 %v4322_v9, %v4153_v31  ;;  %4735 = vmatpush.bf16.msra.mxu0 %v11378_v20  ;;  %4904 = vmatpush.bf16.msra.mxu1 %v11634_v29  ;;  %v15444_v9 = vld [vmem:[#allocation135_spill] sm:$0xff]  ;;  %v15445_v31 = vld [vmem:[#allocation136_spill] sm:$0xff] }
 0x3f7   :  { %v10467_v10 = vpack.c.bf16 %v4659_v3, %v15441_v15 }
 0x3f9   :  { %10723 = vst [vmem:[#allocation8 + $0x480] sm:$0xff] %v10467_v10 }
 0x3fa   :  { %v4491_v21 = vpop.f32.mrf.mxu2  ;;  %v4325_v40 = vpop.f32.mrf.mxu1 }
 0x3fb   :  { %v4492_v35 = vadd.f32 %v4491_v21, %v4323_v60 }
 0x3fc   :  { %v4660_v41 = vpop.f32.mrf.mxu3  ;;  %v4156_v11 = vpop.f32.mrf.mxu0 }
 0x3fd   :  { %v4661_v23 = vadd.f32 %v4660_v41, %v4492_v35  ;;  %v4326_v32 = vadd.f32 %v4325_v40, %v4156_v11  ;;  %4364 = vmatmul.bf16.gmra.mxu1 %v15444_v9  ;;  %v15447_v41 = vld [vmem:[#allocation139_spill] sm:$0xff] }
 0x3ff   :  { %4195 = vmatmul.bf16.gmra.mxu0 %v15442_v6  ;;  %v10471_v63 = vpack.c.bf16 %v4661_v23, %v15443_v34  ;;  %4533 = vmatmul.bf16.gmra.mxu2 %v15445_v31  ;;  %v15448_v23 = vld [vmem:[#allocation140_spill] sm:$0xff]  ;;  %v12640_v31 = vld [vmem:[#allocation6 + $0x3cc] sm:$0xf] }
 0x400   :  { %v15449_v34 = vld [vmem:[#allocation144_spill] sm:$0xff] }
 0x401   :  { %4702 = vmatmul.bf16.gmra.mxu3 %v15446_v8  ;;  %10727 = vst [vmem:[#allocation8 + $0x4a0] sm:$0xff] %v10471_v63 }
 0x402   :  { %v4494_v21 = vpop.f32.mrf.mxu2  ;;  %v4327_v15 = vpop.f32.mrf.mxu1 }
 0x403   :  { %v4495_v22 = vadd.f32 %v4494_v21, %v4326_v32  ;;  %v15450_v32 = vld [vmem:[#allocation141_spill] sm:$0xff]  ;;  %v15451_v21 = vld [vmem:[#allocation142_spill] sm:$0xff] }
 0x404   :  { %v4663_v3 = vpop.f32.mrf.mxu3  ;;  %v4158_v1 = vpop.f32.mrf.mxu0 }
 0x405   :  { %v4664_v20 = vadd.f32 %v4663_v3, %v4495_v22  ;;  %v4328_v60 = vadd.f32 %v4327_v15, %v4158_v1  ;;  %v15452_v22 = vld [vmem:[#allocation143_spill] sm:$0xff] }
 0x407   :  { %v10475_v10 = vpack.c.bf16 %v4664_v20, %v15447_v41 }
 0x409   :  { %10731 = vst [vmem:[#allocation8 + $0x4c0] sm:$0xff] %v10475_v10 }
 0x40a   :  { %v4496_v17 = vpop.f32.mrf.mxu2  ;;  %v4330_v11 = vpop.f32.mrf.mxu1 }
 0x40b   :  { %v4497_v13 = vadd.f32 %v4496_v17, %v4328_v60  ;;  %v15453_v60 = vld [vmem:[#allocation145_spill] sm:$0xff] }
 0x40c   :  { %v4665_v40 = vpop.f32.mrf.mxu3  ;;  %v4161_v35 = vpop.f32.mrf.mxu0 }
 0x40d   :  { %v4666_v29 = vadd.f32 %v4665_v40, %v4497_v13  ;;  %v4331_v8 = vadd.f32 %v4330_v11, %v4161_v35  ;;  %4369 = vmatmul.bf16.gmra.mxu1 %v15450_v32 }
 0x40f   :  { %4200 = vmatmul.bf16.gmra.mxu0 %v15448_v23  ;;  %v10479_v63 = vpack.c.bf16 %v4666_v29, %v15449_v34  ;;  %4538 = vmatmul.bf16.gmra.mxu2 %v15451_v21  ;;  %v15454_v21 = vld [vmem:[#allocation146_spill] sm:$0xff] }
 0x411   :  { %4707 = vmatmul.bf16.gmra.mxu3 %v15452_v22  ;;  %10735 = vst [vmem:[#allocation8 + $0x4e0] sm:$0xff] %v10479_v63  ;;  %v15455_v22 = vld [vmem:[#allocation150_spill] sm:$0xff] }
 0x412   :  { %v4499_v3 = vpop.f32.mrf.mxu2  ;;  %v4332_v41 = vpop.f32.mrf.mxu1 }
 0x413   :  { %v4500_v1 = vadd.f32 %v4499_v3, %v4331_v8  ;;  %v15456_v8 = vld [vmem:[#allocation147_spill] sm:$0xff]  ;;  %v15457_v3 = vld [vmem:[#allocation148_spill] sm:$0xff] }
 0x414   :  { %v4668_v15 = vpop.f32.mrf.mxu3  ;;  %v4163_v20 = vpop.f32.mrf.mxu0 }
 0x415   :  { %v4669_v10 = vadd.f32 %v4668_v15, %v4500_v1  ;;  %v4333_v13 = vadd.f32 %v4332_v41, %v4163_v20  ;;  %v15458_v1 = vld [vmem:[#allocation149_spill] sm:$0xff] }
 0x417   :  { %v10483_v17 = vpack.c.bf16 %v4669_v10, %v15453_v60 }
 0x419   :  { %10739 = vst [vmem:[#allocation8 + $0x500] sm:$0xff] %v10483_v17 }
 0x41a   :  { %v4501_v40 = vpop.f32.mrf.mxu2  ;;  %v4335_v34 = vpop.f32.mrf.mxu1 }
 0x41b   :  { %v4502_v29 = vadd.f32 %v4501_v40, %v4333_v13  ;;  %v15459_v13 = vld [vmem:[#allocation151_spill] sm:$0xff] }
 0x41c   :  { %v4670_v35 = vpop.f32.mrf.mxu3  ;;  %v4166_v11 = vpop.f32.mrf.mxu0 }
 0x41d   :  { %v4671_v32 = vadd.f32 %v4670_v35, %v4502_v29  ;;  %v4336_v23 = vadd.f32 %v4335_v34, %v4166_v11  ;;  %4374 = vmatmul.bf16.gmra.mxu1 %v15456_v8 }
 0x41f   :  { %4205 = vmatmul.bf16.gmra.mxu0 %v15454_v21  ;;  %v10487_v63 = vpack.c.bf16 %v4671_v32, %v15455_v22  ;;  %4543 = vmatmul.bf16.gmra.mxu2 %v15457_v3  ;;  %v15460_v3 = vld [vmem:[#allocation152_spill] sm:$0xff] }
 0x421   :  { %4712 = vmatmul.bf16.gmra.mxu3 %v15458_v1  ;;  %10743 = vst [vmem:[#allocation8 + $0x520] sm:$0xff] %v10487_v63  ;;  %v15461_v1 = vld [vmem:[#allocation156_spill] sm:$0xff] }
 0x422   :  { %v4504_v15 = vpop.f32.mrf.mxu2  ;;  %v4337_v60 = vpop.f32.mrf.mxu1 }
 0x423   :  { %v4505_v20 = vadd.f32 %v4504_v15, %v4336_v23  ;;  %v15462_v23 = vld [vmem:[#allocation153_spill] sm:$0xff]  ;;  %v15463_v15 = vld [vmem:[#allocation154_spill] sm:$0xff] }
 0x424   :  { %v4673_v41 = vpop.f32.mrf.mxu3  ;;  %v4168_v10 = vpop.f32.mrf.mxu0 }
 0x425   :  { %v4674_v17 = vadd.f32 %v4673_v41, %v4505_v20  ;;  %v4338_v29 = vadd.f32 %v4337_v60, %v4168_v10  ;;  %v15464_v20 = vld [vmem:[#allocation155_spill] sm:$0xff]  ;;  %v12704_v41 = vld [vmem:[#allocation6 + $0x5cc] sm:$0xf] }
 0x426   :  { %v12115_v10 = vld [vmem:[#allocation6 + $0x5e8] sm:$0xf0] }
 0x427   :  { %v10491_v40 = vpack.c.bf16 %v4674_v17, %v15459_v13  ;;  %v12118_v17 = vor.u32 %v12704_v41, %v12115_v10  ;;  %v12768_v13 = vld [vmem:[#allocation6 + $0x7cc] sm:$0xf] }
 0x428   :  { %v11859_v41 = vld [vmem:[#allocation6 + $0x3e8] sm:$0xf0] }
 0x429   :  { %10747 = vst [vmem:[#allocation8 + $0x540] sm:$0xff] %v10491_v40  ;;  %v12371_v40 = vld [vmem:[#allocation6 + $0x7e8] sm:$0xf0]  ;;  %5742 = vmatpush.bf16.msrb.mxu2 %v12118_v17 }
 0x42a   :  { %v4506_v35 = vpop.f32.mrf.mxu2  ;;  %v4340_v34 = vpop.f32.mrf.mxu1 }
 0x42b   :  { %v4507_v32 = vadd.f32 %v4506_v35, %v4338_v29 }
 0x42c   :  { %v4675_v22 = vpop.f32.mrf.mxu3  ;;  %v4171_v11 = vpop.f32.mrf.mxu0 }
 0x42d   :  { %v4676_v8 = vadd.f32 %v4675_v22, %v4507_v32  ;;  %v4341_v21 = vadd.f32 %v4340_v34, %v4171_v11  ;;  %4379 = vmatmul.bf16.gmra.mxu1 %v15462_v23  ;;  %v12374_v22 = vor.u32 %v12768_v13, %v12371_v40 }
 0x42f   :  { %4210 = vmatmul.bf16.gmra.mxu0 %v15460_v3  ;;  %v10495_v63 = vpack.c.bf16 %v4676_v8, %v15461_v1  ;;  %4548 = vmatmul.bf16.gmra.mxu2 %v15463_v15  ;;  %v15465_v1 = vld [vmem:[#allocation157_spill] sm:$0xff] }
 0x430   :  { %5911 = vmatpush.bf16.msrb.mxu3 %v12374_v22 }
 0x431   :  { %4717 = vmatmul.bf16.gmra.mxu3 %v15464_v20  ;;  %10751 = vst [vmem:[#allocation8 + $0x560] sm:$0xff] %v10495_v63  ;;  %v12576_v20 = vld [vmem:[#allocation6 + $0x1cc] sm:$0xf] }
 0x432   :  { %v4509_v60 = vpop.f32.mrf.mxu2  ;;  %v4342_v3 = vpop.f32.mrf.mxu1  ;;  %v11603_v63 = vld [vmem:[#allocation6 + $0x1e8] sm:$0xf0] }
 0x433   :  { %v4510_v29 = vadd.f32 %v4509_v60, %v4341_v21  ;;  %v11606_v23 = vor.u32 %v12576_v20, %v11603_v63  ;;  %v11862_v60 = vor.u32 %v12640_v31, %v11859_v41 }
 0x434   :  { %v4678_v35 = vpop.f32.mrf.mxu3  ;;  %v4173_v32 = vpop.f32.mrf.mxu0 }
 0x435   :  { %v4679_v8 = vadd.f32 %v4678_v35, %v4510_v29  ;;  %v4343_v34 = vadd.f32 %v4342_v3, %v4173_v32  ;;  %5404 = vmatpush.bf16.msrb.mxu0 %v11606_v23  ;;  %5573 = vmatpush.bf16.msrb.mxu1 %v11862_v60 }
 0x437   :  { %v10499_v11 = vpack.c.bf16 %v4679_v8, %v15465_v1 }
 0x439   :  { %10755 = vst [vmem:[#allocation8 + $0x580] sm:$0xff] %v10499_v11 }
 0x43a   :  { %v4511_v15 = vpop.f32.mrf.mxu2  ;;  %v4345_v6 = vpop.f32.mrf.mxu1 }
 0x43b   :  { %v4512_v10 = vadd.f32 %v4511_v15, %v4343_v34 }
 0x43c   :  { %v4680_v9 = vpop.f32.mrf.mxu3  ;;  %v4176_v21 = vpop.f32.mrf.mxu0 }
 0x43d   :  { %v4681_v13 = vadd.f32 %v4680_v9, %v4512_v10  ;;  %v4346_v40 = vadd.f32 %v4345_v6, %v4176_v21  ;;  %4384 = vmatmul.bf16.gmra.mxu1 %v13355_v28 }
 0x43f   :  { %4215 = vmatmul.bf16.gmra.mxu0 %v13353_v43  ;;  %v10503_v17 = vpack.c.bf16 %v4681_v13, %v13361_v62  ;;  %4553 = vmatmul.bf16.gmra.mxu2 %v13357_v24 }
 0x441   :  { %4722 = vmatmul.bf16.gmra.mxu3 %v13359_v46  ;;  %10759 = vst [vmem:[#allocation8 + $0x5a0] sm:$0xff] %v10503_v17 }
 0x442   :  { %v4514_v3 = vpop.f32.mrf.mxu2  ;;  %v4347_v29 = vpop.f32.mrf.mxu1 }
 0x443   :  { %v4515_v15 = vadd.f32 %v4514_v3, %v4346_v40 }
 0x444   :  { %v4683_v20 = vpop.f32.mrf.mxu3  ;;  %v4178_v31 = vpop.f32.mrf.mxu0 }
 0x445   :  { %v4684_v23 = vadd.f32 %v4683_v20, %v4515_v15  ;;  %v4348_v35 = vadd.f32 %v4347_v29, %v4178_v31  ;;  %v15466_v29 = vld [vmem:[#allocation159_spill] sm:$0xff] }
 0x447   :  { %v10507_v9 = vpack.c.bf16 %v4684_v23, %v13367_v44 }
 0x449   :  { %10763 = vst [vmem:[#allocation8 + $0x5c0] sm:$0xff] %v10507_v9 }
 0x44a   :  { %v4516_v32 = vpop.f32.mrf.mxu2  ;;  %v4350_v8 = vpop.f32.mrf.mxu1 }
 0x44b   :  { %v4517_v62 = vadd.f32 %v4516_v32, %v4348_v35  ;;  %v15467_v35 = vld [vmem:[#allocation12_spill] sm:$0xff]  ;;  %v15468_v32 = vld [vmem:[#allocation14_spill] sm:$0xff] }
 0x44c   :  { %v4685_v6 = vpop.f32.mrf.mxu3  ;;  %v4181_v22 = vpop.f32.mrf.mxu0 }
 0x44d   :  { %v4686_v1 = vadd.f32 %v4685_v6, %v4517_v62  ;;  %v4351_v34 = vadd.f32 %v4350_v8, %v4181_v22  ;;  %4905 = vmatmul.bf16.vlgmr.msra.gmra.mxu1 %v12893_v51 }
 0x44f   :  { %4736 = vmatmul.bf16.vlgmr.msra.gmra.mxu0 %v12891_v47  ;;  %v10511_v11 = vpack.c.bf16 %v4686_v1, %v13369_v30  ;;  %5074 = vmatmul.bf16.vlgmr.msra.gmra.mxu2 %v12895_v52 }
 0x451   :  { %5243 = vmatmul.bf16.vlgmr.msra.gmra.mxu3 %v12897_v53  ;;  %10767 = vst [vmem:[#allocation8 + $0x5e0] sm:$0xff] %v10511_v11  ;;  %v15469_v11 = vld [vmem:[#allocation160_spill] sm:$0xff] }
 0x452   :  { %v4519_v44 = vpop.f32.mrf.mxu2  ;;  %v4352_v21 = vpop.f32.mrf.mxu1 }
 0x453   :  { %v4520_v63 = vadd.f32 %v4519_v44, %v4351_v34 }
 0x454   :  { %v4688_v41 = vpop.f32.mrf.mxu3  ;;  %v4183_v10 = vpop.f32.mrf.mxu0 }
 0x455   :  { %v4689_v60 = vadd.f32 %v4688_v41, %v4520_v63  ;;  %v4353_v17 = vadd.f32 %v4352_v21, %v4183_v10 }
 0x457   :  { %v10515_v13 = vpack.c.bf16 %v4689_v60, %v13375_v27 }
 0x459   :  { %10771 = vst [vmem:[#allocation8 + $0x600] sm:$0xff] %v10515_v13 }
 0x45a   :  { %v4521_v40 = vpop.f32.mrf.mxu2  ;;  %v4355_v20 = vpop.f32.mrf.mxu1 }
 0x45b   :  { %v4522_v30 = vadd.f32 %v4521_v40, %v4353_v17  ;;  %v15470_v17 = vld [vmem:[#allocation15_spill] sm:$0xff]  ;;  %v15471_v40 = vld [vmem:[#allocation161_spill] sm:$0xff] }
 0x45c   :  { %v4690_v3 = vpop.f32.mrf.mxu3  ;;  %v4186_v15 = vpop.f32.mrf.mxu0 }
 0x45d   :  { %v4691_v31 = vadd.f32 %v4690_v3, %v4522_v30  ;;  %v4356_v9 = vadd.f32 %v4355_v20, %v4186_v15  ;;  %4910 = vmatmul.bf16.gmra.mxu1 %v15467_v35  ;;  %v15472_v15 = vld [vmem:[#allocation16_spill] sm:$0xff]  ;;  %v15473_v20 = vld [vmem:[#allocation17_spill] sm:$0xff] }
 0x45f   :  { %4741 = vmatmul.bf16.gmra.mxu0 %v12903_v0  ;;  %v10519_v23 = vpack.c.bf16 %v4691_v31, %v15466_v29  ;;  %5079 = vmatmul.bf16.gmra.mxu2 %v12907_v2  ;;  %v15474_v31 = vld [vmem:[#allocation18_spill] sm:$0xff]  ;;  %v12696_v29 = vld [vmem:[#allocation6 + $0x58c] sm:$0xf] }
 0x461   :  { %5248 = vmatmul.bf16.gmra.mxu3 %v15468_v32  ;;  %10775 = vst [vmem:[#allocation8 + $0x620] sm:$0xff] %v10519_v23  ;;  %v12083_v23 = vld [vmem:[#allocation6 + $0x5a8] sm:$0xf0] }
 0x462   :  { %v4524_v27 = vpop.f32.mrf.mxu2  ;;  %v4357_v8 = vpop.f32.mrf.mxu1 }
 0x463   :  { %v4525_v62 = vadd.f32 %v4524_v27, %v4356_v9  ;;  %v12086_v27 = vor.u32 %v12696_v29, %v12083_v23 }
 0x464   :  { %v4693_v6 = vpop.f32.mrf.mxu3  ;;  %v4188_v22 = vpop.f32.mrf.mxu0 }
 0x465   :  { %v4694_v1 = vadd.f32 %v4693_v6, %v4525_v62  ;;  %v4358_v44 = vadd.f32 %v4357_v8, %v4188_v22  ;;  %v12760_v62 = vld [vmem:[#allocation6 + $0x78c] sm:$0xf]  ;;  %5743 = vmatpush.bf16.msrb.mxu2 %v12086_v27 }
 0x466   :  { %v12339_v6 = vld [vmem:[#allocation6 + $0x7a8] sm:$0xf0] }
 0x467   :  { %v10523_v34 = vpack.c.bf16 %v4694_v1, %v15469_v11  ;;  %v12342_v11 = vor.u32 %v12760_v62, %v12339_v6 }
 0x469   :  { %10779 = vst [vmem:[#allocation8 + $0x640] sm:$0xff] %v10523_v34  ;;  %5912 = vmatpush.bf16.msrb.mxu3 %v12342_v11 }
 0x46a   :  { %v4526_v63 = vpop.f32.mrf.mxu2  ;;  %v4360_v60 = vpop.f32.mrf.mxu1 }
 0x46b   :  { %v4527_v41 = vadd.f32 %v4526_v63, %v4358_v44 }
 0x46c   :  { %v4695_v10 = vpop.f32.mrf.mxu3  ;;  %v4191_v21 = vpop.f32.mrf.mxu0 }
 0x46d   :  { %v4696_v13 = vadd.f32 %v4695_v10, %v4527_v41  ;;  %v4361_v3 = vadd.f32 %v4360_v60, %v4191_v21  ;;  %4915 = vmatmul.bf16.gmra.mxu1 %v15472_v15  ;;  %v12568_v10 = vld [vmem:[#allocation6 + $0x18c] sm:$0xf] }
 0x46e   :  { %v11571_v21 = vld [vmem:[#allocation6 + $0x1a8] sm:$0xf0] }
 0x46f   :  { %4746 = vmatmul.bf16.gmra.mxu0 %v15470_v17  ;;  %v10527_v30 = vpack.c.bf16 %v4696_v13, %v15471_v40  ;;  %5084 = vmatmul.bf16.gmra.mxu2 %v15473_v20  ;;  %v11574_v13 = vor.u32 %v12568_v10, %v11571_v21  ;;  %v12632_v40 = vld [vmem:[#allocation6 + $0x38c] sm:$0xf] }
 0x471   :  { %5253 = vmatmul.bf16.gmra.mxu3 %v15474_v31  ;;  %10783 = vst [vmem:[#allocation8 + $0x660] sm:$0xff] %v10527_v30  ;;  %v11827_v30 = vld [vmem:[#allocation6 + $0x3a8] sm:$0xf0]  ;;  %5405 = vmatpush.bf16.msrb.mxu0 %v11574_v13 }
 0x472   :  { %v4529_v9 = vpop.f32.mrf.mxu2  ;;  %v4362_v34 = vpop.f32.mrf.mxu1 }
 0x473   :  { %v4530_v22 = vadd.f32 %v4529_v9, %v4361_v3  ;;  %v11830_v9 = vor.u32 %v12632_v40, %v11827_v30 }
 0x474   :  { %v4698_v8 = vpop.f32.mrf.mxu3  ;;  %v4193_v1 = vpop.f32.mrf.mxu0 }
 0x475   :  { %v4699_v44 = vadd.f32 %v4698_v8, %v4530_v22  ;;  %v4363_v41 = vadd.f32 %v4362_v34, %v4193_v1  ;;  %5574 = vmatpush.bf16.msrb.mxu1 %v11830_v9 }
 0x477   :  { %v10531_v63 = vpack.c.bf16 %v4699_v44, %v13391_v45 }
 0x479   :  { %10787 = vst [vmem:[#allocation8 + $0x680] sm:$0xff] %v10531_v63 }
 0x47a   :  { %v4531_v60 = vpop.f32.mrf.mxu2  ;;  %v4365_v31 = vpop.f32.mrf.mxu1 }
 0x47b   :  { %v4532_v29 = vadd.f32 %v4531_v60, %v4363_v41 }
 0x47c   :  { %v4700_v23 = vpop.f32.mrf.mxu3  ;;  %v4196_v3 = vpop.f32.mrf.mxu0 }
 0x47d   :  { %v4701_v62 = vadd.f32 %v4700_v23, %v4532_v29  ;;  %v4366_v27 = vadd.f32 %v4365_v31, %v4196_v3  ;;  %4920 = vmatmul.bf16.gmra.mxu1 %v12929_v37 }
 0x47f   :  { %4751 = vmatmul.bf16.gmra.mxu0 %v12927_v36  ;;  %v10535_v45 = vpack.c.bf16 %v4701_v62, %v13393_v26  ;;  %5089 = vmatmul.bf16.gmra.mxu2 %v12931_v38 }
 0x481   :  { %5258 = vmatmul.bf16.gmra.mxu3 %v12933_v39  ;;  %10791 = vst [vmem:[#allocation8 + $0x6a0] sm:$0xff] %v10535_v45 }
 0x482   :  { %v4534_v6 = vpop.f32.mrf.mxu2  ;;  %v4367_v11 = vpop.f32.mrf.mxu1 }
 0x483   :  { %v4535_v22 = vadd.f32 %v4534_v6, %v4366_v27 }
 0x484   :  { %v4703_v8 = vpop.f32.mrf.mxu3  ;;  %v4198_v1 = vpop.f32.mrf.mxu0 }
 0x485   :  { %v4704_v34 = vadd.f32 %v4703_v8, %v4535_v22  ;;  %v4368_v63 = vadd.f32 %v4367_v11, %v4198_v1  ;;  %v15475_v11 = vld [vmem:[#allocation162_spill] sm:$0xff] }
 0x487   :  { %v10539_v44 = vpack.c.bf16 %v4704_v34, %v13399_v33 }
 0x489   :  { %10795 = vst [vmem:[#allocation8 + $0x6c0] sm:$0xff] %v10539_v44 }
 0x48a   :  { %v4536_v41 = vpop.f32.mrf.mxu2  ;;  %v4370_v21 = vpop.f32.mrf.mxu1 }
 0x48b   :  { %v4537_v26 = vadd.f32 %v4536_v41, %v4368_v63  ;;  %v15476_v63 = vld [vmem:[#allocation19_spill] sm:$0xff]  ;;  %v15477_v41 = vld [vmem:[#allocation20_spill] sm:$0xff] }
 0x48c   :  { %v4705_v31 = vpop.f32.mrf.mxu3  ;;  %v4201_v10 = vpop.f32.mrf.mxu0 }
 0x48d   :  { %v4706_v60 = vadd.f32 %v4705_v31, %v4537_v26  ;;  %v4371_v40 = vadd.f32 %v4370_v21, %v4201_v10  ;;  %4925 = vmatmul.bf16.gmra.mxu1 %v12941_v50  ;;  %v15478_v26 = vld [vmem:[#allocation21_spill] sm:$0xff] }
 0x48f   :  { %4756 = vmatmul.bf16.gmra.mxu0 %v12939_v49  ;;  %v10543_v13 = vpack.c.bf16 %v4706_v60, %v13401_v42  ;;  %5094 = vmatmul.bf16.gmra.mxu2 %v12943_v54 }
 0x491   :  { %5263 = vmatmul.bf16.gmra.mxu3 %v12945_v55  ;;  %10799 = vst [vmem:[#allocation8 + $0x6e0] sm:$0xff] %v10543_v13 }
 0x492   :  { %v4539_v33 = vpop.f32.mrf.mxu2  ;;  %v4372_v3 = vpop.f32.mrf.mxu1 }
 0x493   :  { %v4540_v30 = vadd.f32 %v4539_v33, %v4371_v40  ;;  %v15479_v40 = vld [vmem:[#allocation163_spill] sm:$0xff] }
 0x494   :  { %v4708_v29 = vpop.f32.mrf.mxu3  ;;  %v4203_v23 = vpop.f32.mrf.mxu0 }
 0x495   :  { %v4709_v9 = vadd.f32 %v4708_v29, %v4540_v30  ;;  %v4373_v45 = vadd.f32 %v4372_v3, %v4203_v23 }
 0x497   :  { %v10547_v62 = vpack.c.bf16 %v4709_v9, %v13407_v12 }
 0x499   :  { %10803 = vst [vmem:[#allocation8 + $0x700] sm:$0xff] %v10547_v62 }
 0x49a   :  { %v4541_v27 = vpop.f32.mrf.mxu2  ;;  %v4375_v8 = vpop.f32.mrf.mxu1 }
 0x49b   :  { %v4542_v42 = vadd.f32 %v4541_v27, %v4373_v45  ;;  %v15480_v27 = vld [vmem:[#allocation22_spill] sm:$0xff] }
 0x49c   :  { %v4710_v6 = vpop.f32.mrf.mxu3  ;;  %v4206_v22 = vpop.f32.mrf.mxu0 }
 0x49d   :  { %v4711_v1 = vadd.f32 %v4710_v6, %v4542_v42  ;;  %v4376_v44 = vadd.f32 %v4375_v8, %v4206_v22  ;;  %4930 = vmatmul.bf16.gmra.mxu1 %v15476_v63  ;;  %v15481_v42 = vld [vmem:[#allocation164_spill] sm:$0xff]  ;;  %v15482_v8 = vld [vmem:[#allocation23_spill] sm:$0xff] }
 0x49f   :  { %4761 = vmatmul.bf16.gmra.mxu0 %v12951_v4  ;;  %v10551_v34 = vpack.c.bf16 %v4711_v1, %v15475_v11  ;;  %5099 = vmatmul.bf16.gmra.mxu2 %v15477_v41  ;;  %v15483_v1 = vld [vmem:[#allocation24_spill] sm:$0xff]  ;;  %v15484_v11 = vld [vmem:[#allocation25_spill] sm:$0xff] }
 0x4a1   :  { %5268 = vmatmul.bf16.gmra.mxu3 %v15478_v26  ;;  %10807 = vst [vmem:[#allocation8 + $0x720] sm:$0xff] %v10551_v34  ;;  %v12688_v34 = vld [vmem:[#allocation6 + $0x54c] sm:$0xf] }
 0x4a2   :  { %v4544_v12 = vpop.f32.mrf.mxu2  ;;  %v4377_v60 = vpop.f32.mrf.mxu1 }
 0x4a3   :  { %v4545_v31 = vadd.f32 %v4544_v12, %v4376_v44  ;;  %v12051_v44 = vld [vmem:[#allocation6 + $0x568] sm:$0xf0] }
 0x4a4   :  { %v4713_v10 = vpop.f32.mrf.mxu3  ;;  %v4208_v21 = vpop.f32.mrf.mxu0 }
 0x4a5   :  { %v4714_v13 = vadd.f32 %v4713_v10, %v4545_v31  ;;  %v4378_v30 = vadd.f32 %v4377_v60, %v4208_v21  ;;  %v12054_v31 = vor.u32 %v12688_v34, %v12051_v44  ;;  %v12752_v10 = vld [vmem:[#allocation6 + $0x74c] sm:$0xf] }
 0x4a6   :  { %v12307_v21 = vld [vmem:[#allocation6 + $0x768] sm:$0xf0] }
 0x4a7   :  { %v10555_v33 = vpack.c.bf16 %v4714_v13, %v15479_v40  ;;  %5744 = vmatpush.bf16.msrb.mxu2 %v12054_v31 }
 0x4a9   :  { %10811 = vst [vmem:[#allocation8 + $0x740] sm:$0xff] %v10555_v33  ;;  %v12310_v33 = vor.u32 %v12752_v10, %v12307_v21 }
 0x4aa   :  { %v4546_v29 = vpop.f32.mrf.mxu2  ;;  %v4380_v62 = vpop.f32.mrf.mxu1 }
 0x4ab   :  { %v4547_v23 = vadd.f32 %v4546_v29, %v4378_v30  ;;  %5913 = vmatpush.bf16.msrb.mxu3 %v12310_v33 }
 0x4ac   :  { %v4715_v3 = vpop.f32.mrf.mxu3  ;;  %v4211_v9 = vpop.f32.mrf.mxu0 }
 0x4ad   :  { %v4716_v45 = vadd.f32 %v4715_v3, %v4547_v23  ;;  %v4381_v22 = vadd.f32 %v4380_v62, %v4211_v9  ;;  %4935 = vmatmul.bf16.gmra.mxu1 %v15482_v8  ;;  %v12560_v23 = vld [vmem:[#allocation6 + $0x14c] sm:$0xf] }
 0x4ae   :  { %v11539_v3 = vld [vmem:[#allocation6 + $0x168] sm:$0xf0] }
 0x4af   :  { %4766 = vmatmul.bf16.gmra.mxu0 %v15480_v27  ;;  %v10559_v6 = vpack.c.bf16 %v4716_v45, %v15481_v42  ;;  %5104 = vmatmul.bf16.gmra.mxu2 %v15483_v1  ;;  %v12624_v9 = vld [vmem:[#allocation6 + $0x34c] sm:$0xf]  ;;  %v11542_v62 = vor.u32 %v12560_v23, %v11539_v3 }
 0x4b0   :  { %v11795_v45 = vld [vmem:[#allocation6 + $0x368] sm:$0xf0] }
 0x4b1   :  { %5273 = vmatmul.bf16.gmra.mxu3 %v15484_v11  ;;  %10815 = vst [vmem:[#allocation8 + $0x760] sm:$0xff] %v10559_v6  ;;  %v11798_v6 = vor.u32 %v12624_v9, %v11795_v45  ;;  %5406 = vmatpush.bf16.msrb.mxu0 %v11542_v62 }
 0x4b2   :  { %v4549_v12 = vpop.f32.mrf.mxu2  ;;  %v4382_v30 = vpop.f32.mrf.mxu1 }
 0x4b3   :  { %v4550_v60 = vadd.f32 %v4549_v12, %v4381_v22  ;;  %5575 = vmatpush.bf16.msrb.mxu1 %v11798_v6 }
 0x4b4   :  { %v4718_v13 = vpop.f32.mrf.mxu3  ;;  %v4213_v40 = vpop.f32.mrf.mxu0 }
 0x4b5   :  { %v4719_v29 = vadd.f32 %v4718_v13, %v4550_v60  ;;  %v4383_v34 = vadd.f32 %v4382_v30, %v4213_v40 }
 0x4b7   :  { %v10563_v42 = vpack.c.bf16 %v4719_v29, %v13423_v61 }
 0x4b9   :  { %10819 = vst [vmem:[#allocation8 + $0x780] sm:$0xff] %v10563_v42 }
 0x4ba   :  { %v4551_v22 = vpop.f32.mrf.mxu2  ;;  %v4385_v21 = vpop.f32.mrf.mxu1 }
 0x4bb   :  { %v4552_v44 = vadd.f32 %v4551_v22, %v4383_v34 }
 0x4bc   :  { %v4720_v12 = vpop.f32.mrf.mxu3  ;;  %v4216_v10 = vpop.f32.mrf.mxu0 }
 0x4bd   :  { %v4721_v31 = vadd.f32 %v4720_v12, %v4552_v44  ;;  %v4386_v13 = vadd.f32 %v4385_v21, %v4216_v10  ;;  %4940 = vmatmul.bf16.gmra.mxu1 %v12977_v57 }
 0x4bf   :  { %4771 = vmatmul.bf16.gmra.mxu0 %v12975_v56  ;;  %v10567_v60 = vpack.c.bf16 %v4721_v31, %v13425_v5  ;;  %5109 = vmatmul.bf16.gmra.mxu2 %v12979_v58 }
 0x4c1   :  { %5278 = vmatmul.bf16.gmra.mxu3 %v12981_v59  ;;  %10823 = vst [vmem:[#allocation8 + $0x7a0] sm:$0xff] %v10567_v60 }
 0x4c2   :  { %v4554_v61 = vpop.f32.mrf.mxu2  ;;  %v4387_v29 = vpop.f32.mrf.mxu1 }
 0x4c3   :  { %v4555_v40 = vadd.f32 %v4554_v61, %v4386_v13 }
 0x4c4   :  { %v4723_v33 = vpop.f32.mrf.mxu3  ;;  %v4218_v30 = vpop.f32.mrf.mxu0 }
 0x4c5   :  { %v4724_v23 = vadd.f32 %v4723_v33, %v4555_v40  ;;  %v4388_v9 = vadd.f32 %v4387_v29, %v4218_v30 }
 0x4c7   :  { %v10571_v3 = vpack.c.bf16 %v4724_v23, %v13431_v7 }
 0x4c9   :  { %10827 = vst [vmem:[#allocation8 + $0x7c0] sm:$0xff] %v10571_v3  ;;  %v15485_v3 = vld [vmem:[#allocation28_spill] sm:$0xff] }
 0x4ca   :  { %v4556_v62 = vpop.f32.mrf.mxu2  ;;  %v4906_v6 = vpop.f32.mrf.mxu1 }
 0x4cb   :  { %v4557_v5 = vadd.f32 %v4556_v62, %v4388_v9  ;;  %v15486_v9 = vld [vmem:[#allocation29_spill] sm:$0xff]  ;;  %v15487_v62 = vld [vmem:[#allocation30_spill] sm:$0xff] }
 0x4cc   :  { %v4725_v45 = vpop.f32.mrf.mxu3  ;;  %v4737_v42 = vpop.f32.mrf.mxu0 }
 0x4cd   :  { %v4726_v34 = vadd.f32 %v4725_v45, %v4557_v5  ;;  %v4907_v22 = vadd.f32 %v4906_v6, %v4737_v42  ;;  %4945 = vmatmul.bf16.gmra.mxu1 %v12989_v18 }
 0x4cf   :  { %4776 = vmatmul.bf16.gmra.mxu0 %v12987_v16  ;;  %v10575_v44 = vpack.c.bf16 %v4726_v34, %v13433_v14  ;;  %5114 = vmatmul.bf16.gmra.mxu2 %v12991_v19 }
 0x4d1   :  { %5283 = vmatmul.bf16.gmra.mxu3 %v12993_v25  ;;  %10831 = vst [vmem:[#allocation8 + $0x7e0] sm:$0xff] %v10575_v44 }
 0x4d2   :  { %v5075_v7 = vpop.f32.mrf.mxu2  ;;  %v4908_v31 = vpop.f32.mrf.mxu1 }
 0x4d3   :  { %v5076_v12 = vadd.f32 %v5075_v7, %v4907_v22 }
 0x4d4   :  { %v5244_v10 = vpop.f32.mrf.mxu3  ;;  %v4739_v21 = vpop.f32.mrf.mxu0 }
 0x4d5   :  { %v13631_v60 = vadd.f32 %v5244_v10, %v5076_v12  ;;  %v4909_v13 = vadd.f32 %v4908_v31, %v4739_v21 }
 0x4da   :  { %v5077_v61 = vpop.f32.mrf.mxu2  ;;  %v4911_v14 = vpop.f32.mrf.mxu1 }
 0x4db   :  { %v5078_v40 = vadd.f32 %v5077_v61, %v4909_v13 }
 0x4dc   :  { %v5246_v33 = vpop.f32.mrf.mxu3  ;;  %v4742_v30 = vpop.f32.mrf.mxu0 }
 0x4dd   :  { %v13633_v29 = vadd.f32 %v5246_v33, %v5078_v40  ;;  %v4912_v23 = vadd.f32 %v4911_v14, %v4742_v30  ;;  %4950 = vmatmul.bf16.gmra.mxu1 %v15485_v3  ;;  %v15490_v40 = vld [vmem:[#allocation32_spill] sm:$0xff]  ;;  %v15491_v33 = vld [vmem:[#allocation33_spill] sm:$0xff]  ;;  %v15492_v30 = vld [vmem:[#allocation34_spill] sm:$0xff] }
 0x4de   :  { %v15493_v14 = vld [vmem:[#allocation35_spill] sm:$0xff] }
 0x4df   :  { %4781 = vmatmul.bf16.gmra.mxu0 %v13001_v48  ;;  %5119 = vmatmul.bf16.gmra.mxu2 %v15486_v9 }
 0x4e1   :  { %5288 = vmatmul.bf16.gmra.mxu3 %v15487_v62 }
 0x4e2   :  { %v5080_v5 = vpop.f32.mrf.mxu2  ;;  %v4913_v34 = vpop.f32.mrf.mxu1 }
 0x4e3   :  { %v5081_v45 = vadd.f32 %v5080_v5, %v4912_v23  ;;  %v12680_v23 = vld [vmem:[#allocation6 + $0x50c] sm:$0xf] }
 0x4e4   :  { %v5249_v42 = vpop.f32.mrf.mxu3  ;;  %v4744_v6 = vpop.f32.mrf.mxu0  ;;  %v12019_v5 = vld [vmem:[#allocation6 + $0x528] sm:$0xf0] }
 0x4e5   :  { %v13639_v22 = vadd.f32 %v5249_v42, %v5081_v45  ;;  %v4914_v44 = vadd.f32 %v4913_v34, %v4744_v6  ;;  %v12744_v45 = vld [vmem:[#allocation6 + $0x70c] sm:$0xf]  ;;  %v12022_v42 = vor.u32 %v12680_v23, %v12019_v5 }
 0x4e6   :  { %v12275_v6 = vld [vmem:[#allocation6 + $0x728] sm:$0xf0] }
 0x4e7   :  { %15488 = vst [vmem:[#allocation31_spill] sm:$0xff] %v13639_v22  ;;  %5745 = vmatpush.bf16.msrb.mxu2 %v12022_v42 }
 0x4ea   :  { %v5082_v7 = vpop.f32.mrf.mxu2  ;;  %v4916_v31 = vpop.f32.mrf.mxu1 }
 0x4eb   :  { %v5083_v12 = vadd.f32 %v5082_v7, %v4914_v44  ;;  %v12278_v44 = vor.u32 %v12744_v45, %v12275_v6 }
 0x4ec   :  { %v5251_v10 = vpop.f32.mrf.mxu3  ;;  %v4747_v21 = vpop.f32.mrf.mxu0 }
 0x4ed   :  { %v13641_v13 = vadd.f32 %v5251_v10, %v5083_v12  ;;  %v4917_v61 = vadd.f32 %v4916_v31, %v4747_v21  ;;  %4955 = vmatmul.bf16.gmra.mxu1 %v15491_v33  ;;  %5914 = vmatpush.bf16.msrb.mxu3 %v12278_v44  ;;  %v12552_v33 = vld [vmem:[#allocation6 + $0x10c] sm:$0xf]  ;;  %v15496_v44 = vld [vmem:[#allocation38_spill] sm:$0xff] }
 0x4ef   :  { %15489 = vst [vmem:[#allocation36_spill] sm:$0xff] %v13641_v13  ;;  %4786 = vmatmul.bf16.gmra.mxu0 %v15490_v40  ;;  %5124 = vmatmul.bf16.gmra.mxu2 %v15492_v30  ;;  %v11507_v30 = vld [vmem:[#allocation6 + $0x128] sm:$0xf0] }
 0x4f0   :  { %v12616_v13 = vld [vmem:[#allocation6 + $0x30c] sm:$0xf] }
 0x4f1   :  { %5293 = vmatmul.bf16.gmra.mxu3 %v15493_v14  ;;  %v11510_v14 = vor.u32 %v12552_v33, %v11507_v30  ;;  %v11763_v40 = vld [vmem:[#allocation6 + $0x328] sm:$0xf0] }
 0x4f2   :  { %v5085_v34 = vpop.f32.mrf.mxu2  ;;  %v4918_v10 = vpop.f32.mrf.mxu1  ;;  %v11766_v62 = vor.u32 %v12616_v13, %v11763_v40 }
 0x4f3   :  { %v5086_v7 = vadd.f32 %v5085_v34, %v4917_v61  ;;  %5407 = vmatpush.bf16.msrb.mxu0 %v11510_v14 }
 0x4f4   :  { %v5254_v22 = vpop.f32.mrf.mxu3  ;;  %v4749_v12 = vpop.f32.mrf.mxu0  ;;  %5576 = vmatpush.bf16.msrb.mxu1 %v11766_v62 }
 0x4f5   :  { %v13647_v21 = vadd.f32 %v5254_v22, %v5086_v7  ;;  %v4919_v31 = vadd.f32 %v4918_v10, %v4749_v12  ;;  %v15497_v22 = vld [vmem:[#allocation39_spill] sm:$0xff]  ;;  %v15498_v7 = vld [vmem:[#allocation40_spill] sm:$0xff]  ;;  %v15499_v12 = vld [vmem:[#allocation41_spill] sm:$0xff] }
 0x4f7   :  { %15494 = vst [vmem:[#allocation37_spill] sm:$0xff] %v13647_v21 }
 0x4fa   :  { %v5087_v23 = vpop.f32.mrf.mxu2  ;;  %v4921_v6 = vpop.f32.mrf.mxu1 }
 0x4fb   :  { %v5088_v5 = vadd.f32 %v5087_v23, %v4919_v31 }
 0x4fc   :  { %v5256_v45 = vpop.f32.mrf.mxu3  ;;  %v4752_v61 = vpop.f32.mrf.mxu0 }
 0x4fd   :  { %v13649_v34 = vadd.f32 %v5256_v45, %v5088_v5  ;;  %v4922_v42 = vadd.f32 %v4921_v6, %v4752_v61  ;;  %4960 = vmatmul.bf16.gmra.mxu1 %v15497_v22 }
 0x4ff   :  { %15495 = vst [vmem:[#allocation42_spill] sm:$0xff] %v13649_v34  ;;  %4791 = vmatmul.bf16.gmra.mxu0 %v15496_v44  ;;  %5129 = vmatmul.bf16.gmra.mxu2 %v15498_v7  ;;  %v15502_v34 = vld [vmem:[#allocation44_spill] sm:$0xff]  ;;  %v15503_v7 = vld [vmem:[#allocation45_spill] sm:$0xff] }
 0x501   :  { %5298 = vmatmul.bf16.gmra.mxu3 %v15499_v12  ;;  %v15504_v12 = vld [vmem:[#allocation46_spill] sm:$0xff] }
 0x502   :  { %v5090_v33 = vpop.f32.mrf.mxu2  ;;  %v4923_v30 = vpop.f32.mrf.mxu1 }
 0x503   :  { %v5091_v13 = vadd.f32 %v5090_v33, %v4922_v42  ;;  %v15505_v42 = vld [vmem:[#allocation47_spill] sm:$0xff] }
 0x504   :  { %v5259_v40 = vpop.f32.mrf.mxu3  ;;  %v4754_v62 = vpop.f32.mrf.mxu0 }
 0x505   :  { %v13655_v14 = vadd.f32 %v5259_v40, %v5091_v13  ;;  %v4924_v10 = vadd.f32 %v4923_v30, %v4754_v62 }
 0x507   :  { %15500 = vst [vmem:[#allocation43_spill] sm:$0xff] %v13655_v14 }
 0x50a   :  { %v5092_v31 = vpop.f32.mrf.mxu2  ;;  %v4926_v61 = vpop.f32.mrf.mxu1 }
 0x50b   :  { %v5093_v23 = vadd.f32 %v5092_v31, %v4924_v10 }
 0x50c   :  { %v5261_v5 = vpop.f32.mrf.mxu3  ;;  %v4757_v45 = vpop.f32.mrf.mxu0 }
 0x50d   :  { %v13657_v6 = vadd.f32 %v5261_v5, %v5093_v23  ;;  %v4927_v22 = vadd.f32 %v4926_v61, %v4757_v45  ;;  %4965 = vmatmul.bf16.gmra.mxu1 %v15503_v7 }
 0x50f   :  { %15501 = vst [vmem:[#allocation48_spill] sm:$0xff] %v13657_v6  ;;  %4796 = vmatmul.bf16.gmra.mxu0 %v15502_v34  ;;  %5134 = vmatmul.bf16.gmra.mxu2 %v15504_v12  ;;  %v15508_v34 = vld [vmem:[#allocation50_spill] sm:$0xff]  ;;  %v15509_v12 = vld [vmem:[#allocation51_spill] sm:$0xff] }
 0x511   :  { %5303 = vmatmul.bf16.gmra.mxu3 %v15505_v42  ;;  %v15510_v42 = vld [vmem:[#allocation52_spill] sm:$0xff] }
 0x512   :  { %v5095_v33 = vpop.f32.mrf.mxu2  ;;  %v4928_v30 = vpop.f32.mrf.mxu1 }
 0x513   :  { %v5096_v13 = vadd.f32 %v5095_v33, %v4927_v22  ;;  %v15511_v22 = vld [vmem:[#allocation53_spill] sm:$0xff] }
 0x514   :  { %v5264_v40 = vpop.f32.mrf.mxu3  ;;  %v4759_v62 = vpop.f32.mrf.mxu0 }
 0x515   :  { %v13663_v10 = vadd.f32 %v5264_v40, %v5096_v13  ;;  %v4929_v31 = vadd.f32 %v4928_v30, %v4759_v62 }
 0x517   :  { %15506 = vst [vmem:[#allocation49_spill] sm:$0xff] %v13663_v10 }
 0x51a   :  { %v5097_v14 = vpop.f32.mrf.mxu2  ;;  %v4931_v61 = vpop.f32.mrf.mxu1 }
 0x51b   :  { %v5098_v23 = vadd.f32 %v5097_v14, %v4929_v31 }
 0x51c   :  { %v5266_v5 = vpop.f32.mrf.mxu3  ;;  %v4762_v45 = vpop.f32.mrf.mxu0 }
 0x51d   :  { %v13665_v6 = vadd.f32 %v5266_v5, %v5098_v23  ;;  %v4932_v7 = vadd.f32 %v4931_v61, %v4762_v45  ;;  %4970 = vmatmul.bf16.gmra.mxu1 %v15509_v12 }
 0x51f   :  { %15507 = vst [vmem:[#allocation54_spill] sm:$0xff] %v13665_v6  ;;  %4801 = vmatmul.bf16.gmra.mxu0 %v15508_v34  ;;  %5139 = vmatmul.bf16.gmra.mxu2 %v15510_v42  ;;  %v15514_v34 = vld [vmem:[#allocation56_spill] sm:$0xff]  ;;  %v15515_v42 = vld [vmem:[#allocation57_spill] sm:$0xff] }
 0x521   :  { %5308 = vmatmul.bf16.gmra.mxu3 %v15511_v22  ;;  %v15516_v22 = vld [vmem:[#allocation58_spill] sm:$0xff] }
 0x522   :  { %v5100_v33 = vpop.f32.mrf.mxu2  ;;  %v4933_v30 = vpop.f32.mrf.mxu1 }
 0x523   :  { %v5101_v13 = vadd.f32 %v5100_v33, %v4932_v7  ;;  %v15517_v7 = vld [vmem:[#allocation59_spill] sm:$0xff]  ;;  %v12672_v33 = vld [vmem:[#allocation6 + $0x4cc] sm:$0xf] }
 0x524   :  { %v5269_v40 = vpop.f32.mrf.mxu3  ;;  %v4764_v62 = vpop.f32.mrf.mxu0 }
 0x525   :  { %v13671_v14 = vadd.f32 %v5269_v40, %v5101_v13  ;;  %v4934_v31 = vadd.f32 %v4933_v30, %v4764_v62  ;;  %v11987_v13 = vld [vmem:[#allocation6 + $0x4e8] sm:$0xf0] }
 0x526   :  { %v12736_v40 = vld [vmem:[#allocation6 + $0x6cc] sm:$0xf]  ;;  %v11990_v62 = vor.u32 %v12672_v33, %v11987_v13 }
 0x527   :  { %15512 = vst [vmem:[#allocation55_spill] sm:$0xff] %v13671_v14  ;;  %v12243_v30 = vld [vmem:[#allocation6 + $0x6e8] sm:$0xf0] }
 0x528   :  { %5746 = vmatpush.bf16.msrb.mxu2 %v11990_v62 }
 0x52a   :  { %v5102_v10 = vpop.f32.mrf.mxu2  ;;  %v4936_v61 = vpop.f32.mrf.mxu1 }
 0x52b   :  { %v5103_v23 = vadd.f32 %v5102_v10, %v4934_v31  ;;  %v12246_v31 = vor.u32 %v12736_v40, %v12243_v30 }
 0x52c   :  { %v5271_v5 = vpop.f32.mrf.mxu3  ;;  %v4767_v45 = vpop.f32.mrf.mxu0 }
 0x52d   :  { %v13673_v6 = vadd.f32 %v5271_v5, %v5103_v23  ;;  %v4937_v12 = vadd.f32 %v4936_v61, %v4767_v45  ;;  %4975 = vmatmul.bf16.gmra.mxu1 %v15515_v42  ;;  %5915 = vmatpush.bf16.msrb.mxu3 %v12246_v31  ;;  %v12544_v42 = vld [vmem:[#allocation6 + $0xcc] sm:$0xf]  ;;  %v15520_v31 = vld [vmem:[#allocation62_spill] sm:$0xff] }
 0x52f   :  { %15513 = vst [vmem:[#allocation60_spill] sm:$0xff] %v13673_v6  ;;  %4806 = vmatmul.bf16.gmra.mxu0 %v15514_v34  ;;  %5144 = vmatmul.bf16.gmra.mxu2 %v15516_v22  ;;  %v11475_v22 = vld [vmem:[#allocation6 + $0xe8] sm:$0xf0] }
 0x530   :  { %v12608_v6 = vld [vmem:[#allocation6 + $0x2cc] sm:$0xf] }
 0x531   :  { %5313 = vmatmul.bf16.gmra.mxu3 %v15517_v7  ;;  %v11478_v7 = vor.u32 %v12544_v42, %v11475_v22  ;;  %v11731_v34 = vld [vmem:[#allocation6 + $0x2e8] sm:$0xf0] }
 0x532   :  { %v5105_v10 = vpop.f32.mrf.mxu2  ;;  %v4938_v5 = vpop.f32.mrf.mxu1  ;;  %v11734_v21 = vor.u32 %v12608_v6, %v11731_v34 }
 0x533   :  { %v5106_v14 = vadd.f32 %v5105_v10, %v4937_v12  ;;  %5408 = vmatpush.bf16.msrb.mxu0 %v11478_v7 }
 0x534   :  { %v5274_v44 = vpop.f32.mrf.mxu3  ;;  %v4769_v23 = vpop.f32.mrf.mxu0  ;;  %5577 = vmatpush.bf16.msrb.mxu1 %v11734_v21 }
 0x535   :  { %v13679_v45 = vadd.f32 %v5274_v44, %v5106_v14  ;;  %v4939_v61 = vadd.f32 %v4938_v5, %v4769_v23  ;;  %v15521_v44 = vld [vmem:[#allocation63_spill] sm:$0xff]  ;;  %v15522_v14 = vld [vmem:[#allocation64_spill] sm:$0xff]  ;;  %v15523_v23 = vld [vmem:[#allocation65_spill] sm:$0xff] }
 0x537   :  { %15518 = vst [vmem:[#allocation61_spill] sm:$0xff] %v13679_v45 }
 0x53a   :  { %v5107_v33 = vpop.f32.mrf.mxu2  ;;  %v4941_v30 = vpop.f32.mrf.mxu1 }
 0x53b   :  { %v5108_v13 = vadd.f32 %v5107_v33, %v4939_v61 }
 0x53c   :  { %v5276_v40 = vpop.f32.mrf.mxu3  ;;  %v4772_v12 = vpop.f32.mrf.mxu0 }
 0x53d   :  { %v13681_v10 = vadd.f32 %v5276_v40, %v5108_v13  ;;  %v4942_v62 = vadd.f32 %v4941_v30, %v4772_v12  ;;  %4980 = vmatmul.bf16.gmra.mxu1 %v15521_v44 }
 0x53f   :  { %15519 = vst [vmem:[#allocation66_spill] sm:$0xff] %v13681_v10  ;;  %4811 = vmatmul.bf16.gmra.mxu0 %v15520_v31  ;;  %5149 = vmatmul.bf16.gmra.mxu2 %v15522_v14  ;;  %v15526_v10 = vld [vmem:[#allocation68_spill] sm:$0xff]  ;;  %v15527_v14 = vld [vmem:[#allocation69_spill] sm:$0xff] }
 0x541   :  { %5318 = vmatmul.bf16.gmra.mxu3 %v15523_v23  ;;  %v15528_v23 = vld [vmem:[#allocation70_spill] sm:$0xff] }
 0x542   :  { %v5110_v42 = vpop.f32.mrf.mxu2  ;;  %v4943_v22 = vpop.f32.mrf.mxu1 }
 0x543   :  { %v5111_v34 = vadd.f32 %v5110_v42, %v4942_v62  ;;  %v15529_v62 = vld [vmem:[#allocation71_spill] sm:$0xff] }
 0x544   :  { %v5279_v6 = vpop.f32.mrf.mxu3  ;;  %v4774_v21 = vpop.f32.mrf.mxu0 }
 0x545   :  { %v13687_v7 = vadd.f32 %v5279_v6, %v5111_v34  ;;  %v4944_v5 = vadd.f32 %v4943_v22, %v4774_v21 }
 0x547   :  { %15524 = vst [vmem:[#allocation67_spill] sm:$0xff] %v13687_v7 }
 0x54a   :  { %v5112_v61 = vpop.f32.mrf.mxu2  ;;  %v4946_v12 = vpop.f32.mrf.mxu1 }
 0x54b   :  { %v5113_v33 = vadd.f32 %v5112_v61, %v4944_v5 }
 0x54c   :  { %v5281_v13 = vpop.f32.mrf.mxu3  ;;  %v4777_v40 = vpop.f32.mrf.mxu0 }
 0x54d   :  { %v13689_v30 = vadd.f32 %v5281_v13, %v5113_v33  ;;  %v4947_v44 = vadd.f32 %v4946_v12, %v4777_v40  ;;  %4985 = vmatmul.bf16.gmra.mxu1 %v15527_v14 }
 0x54f   :  { %15525 = vst [vmem:[#allocation72_spill] sm:$0xff] %v13689_v30  ;;  %4816 = vmatmul.bf16.gmra.mxu0 %v15526_v10  ;;  %5154 = vmatmul.bf16.gmra.mxu2 %v15528_v23  ;;  %v15532_v10 = vld [vmem:[#allocation74_spill] sm:$0xff]  ;;  %v15533_v23 = vld [vmem:[#allocation75_spill] sm:$0xff] }
 0x551   :  { %5323 = vmatmul.bf16.gmra.mxu3 %v15529_v62  ;;  %v15534_v62 = vld [vmem:[#allocation76_spill] sm:$0xff] }
 0x552   :  { %v5115_v42 = vpop.f32.mrf.mxu2  ;;  %v4948_v22 = vpop.f32.mrf.mxu1 }
 0x553   :  { %v5116_v34 = vadd.f32 %v5115_v42, %v4947_v44  ;;  %v15535_v44 = vld [vmem:[#allocation77_spill] sm:$0xff] }
 0x554   :  { %v5284_v6 = vpop.f32.mrf.mxu3  ;;  %v4779_v21 = vpop.f32.mrf.mxu0 }
 0x555   :  { %v13695_v5 = vadd.f32 %v5284_v6, %v5116_v34  ;;  %v4949_v61 = vadd.f32 %v4948_v22, %v4779_v21 }
 0x557   :  { %15530 = vst [vmem:[#allocation73_spill] sm:$0xff] %v13695_v5 }
 0x55a   :  { %v5117_v7 = vpop.f32.mrf.mxu2  ;;  %v4951_v12 = vpop.f32.mrf.mxu1 }
 0x55b   :  { %v5118_v33 = vadd.f32 %v5117_v7, %v4949_v61 }
 0x55c   :  { %v5286_v13 = vpop.f32.mrf.mxu3  ;;  %v4782_v40 = vpop.f32.mrf.mxu0 }
 0x55d   :  { %v13697_v30 = vadd.f32 %v5286_v13, %v5118_v33  ;;  %v4952_v14 = vadd.f32 %v4951_v12, %v4782_v40  ;;  %4990 = vmatmul.bf16.gmra.mxu1 %v15533_v23 }
 0x55f   :  { %15531 = vst [vmem:[#allocation78_spill] sm:$0xff] %v13697_v30  ;;  %4821 = vmatmul.bf16.gmra.mxu0 %v15532_v10  ;;  %5159 = vmatmul.bf16.gmra.mxu2 %v15534_v62  ;;  %v15538_v10 = vld [vmem:[#allocation80_spill] sm:$0xff]  ;;  %v15539_v62 = vld [vmem:[#allocation81_spill] sm:$0xff] }
 0x561   :  { %5328 = vmatmul.bf16.gmra.mxu3 %v15535_v44  ;;  %v15540_v44 = vld [vmem:[#allocation82_spill] sm:$0xff] }
 0x562   :  { %v5120_v42 = vpop.f32.mrf.mxu2  ;;  %v4953_v22 = vpop.f32.mrf.mxu1 }
 0x563   :  { %v5121_v34 = vadd.f32 %v5120_v42, %v4952_v14  ;;  %v15541_v14 = vld [vmem:[#allocation83_spill] sm:$0xff]  ;;  %v12664_v42 = vld [vmem:[#allocation6 + $0x48c] sm:$0xf] }
 0x564   :  { %v5289_v6 = vpop.f32.mrf.mxu3  ;;  %v4784_v21 = vpop.f32.mrf.mxu0 }
 0x565   :  { %v13703_v7 = vadd.f32 %v5289_v6, %v5121_v34  ;;  %v4954_v61 = vadd.f32 %v4953_v22, %v4784_v21  ;;  %v11955_v34 = vld [vmem:[#allocation6 + $0x4a8] sm:$0xf0] }
 0x566   :  { %v12728_v6 = vld [vmem:[#allocation6 + $0x68c] sm:$0xf]  ;;  %v11958_v21 = vor.u32 %v12664_v42, %v11955_v34 }
 0x567   :  { %15536 = vst [vmem:[#allocation79_spill] sm:$0xff] %v13703_v7  ;;  %v12211_v22 = vld [vmem:[#allocation6 + $0x6a8] sm:$0xf0] }
 0x568   :  { %5747 = vmatpush.bf16.msrb.mxu2 %v11958_v21 }
 0x56a   :  { %v5122_v5 = vpop.f32.mrf.mxu2  ;;  %v4956_v12 = vpop.f32.mrf.mxu1 }
 0x56b   :  { %v5123_v33 = vadd.f32 %v5122_v5, %v4954_v61  ;;  %v12214_v61 = vor.u32 %v12728_v6, %v12211_v22 }
 0x56c   :  { %v5291_v13 = vpop.f32.mrf.mxu3  ;;  %v4787_v40 = vpop.f32.mrf.mxu0 }
 0x56d   :  { %v13705_v30 = vadd.f32 %v5291_v13, %v5123_v33  ;;  %v4957_v23 = vadd.f32 %v4956_v12, %v4787_v40  ;;  %4995 = vmatmul.bf16.gmra.mxu1 %v15539_v62  ;;  %5916 = vmatpush.bf16.msrb.mxu3 %v12214_v61  ;;  %v12536_v62 = vld [vmem:[#allocation6 + $0x8c] sm:$0xf]  ;;  %v15544_v61 = vld [vmem:[#allocation86_spill] sm:$0xff] }
 0x56f   :  { %15537 = vst [vmem:[#allocation84_spill] sm:$0xff] %v13705_v30  ;;  %4826 = vmatmul.bf16.gmra.mxu0 %v15538_v10  ;;  %5164 = vmatmul.bf16.gmra.mxu2 %v15540_v44  ;;  %v11443_v44 = vld [vmem:[#allocation6 + $0xa8] sm:$0xf0] }
 0x570   :  { %v12600_v30 = vld [vmem:[#allocation6 + $0x28c] sm:$0xf] }
 0x571   :  { %5333 = vmatmul.bf16.gmra.mxu3 %v15541_v14  ;;  %v11446_v14 = vor.u32 %v12536_v62, %v11443_v44  ;;  %v11699_v10 = vld [vmem:[#allocation6 + $0x2a8] sm:$0xf0] }
 0x572   :  { %v5125_v5 = vpop.f32.mrf.mxu2  ;;  %v4958_v13 = vpop.f32.mrf.mxu1  ;;  %v11702_v45 = vor.u32 %v12600_v30, %v11699_v10 }
 0x573   :  { %v5126_v7 = vadd.f32 %v5125_v5, %v4957_v23  ;;  %5409 = vmatpush.bf16.msrb.mxu0 %v11446_v14 }
 0x574   :  { %v5294_v31 = vpop.f32.mrf.mxu3  ;;  %v4789_v33 = vpop.f32.mrf.mxu0  ;;  %5578 = vmatpush.bf16.msrb.mxu1 %v11702_v45 }
 0x575   :  { %v13711_v40 = vadd.f32 %v5294_v31, %v5126_v7  ;;  %v4959_v12 = vadd.f32 %v4958_v13, %v4789_v33  ;;  %v15545_v31 = vld [vmem:[#allocation87_spill] sm:$0xff]  ;;  %v15546_v7 = vld [vmem:[#allocation88_spill] sm:$0xff]  ;;  %v15547_v33 = vld [vmem:[#allocation89_spill] sm:$0xff] }
 0x577   :  { %15542 = vst [vmem:[#allocation85_spill] sm:$0xff] %v13711_v40 }
 0x57a   :  { %v5127_v42 = vpop.f32.mrf.mxu2  ;;  %v4961_v22 = vpop.f32.mrf.mxu1 }
 0x57b   :  { %v5128_v34 = vadd.f32 %v5127_v42, %v4959_v12 }
 0x57c   :  { %v5296_v6 = vpop.f32.mrf.mxu3  ;;  %v4792_v23 = vpop.f32.mrf.mxu0 }
 0x57d   :  { %v13713_v5 = vadd.f32 %v5296_v6, %v5128_v34  ;;  %v4962_v21 = vadd.f32 %v4961_v22, %v4792_v23  ;;  %5000 = vmatmul.bf16.gmra.mxu1 %v15545_v31 }
 0x57f   :  { %15543 = vst [vmem:[#allocation90_spill] sm:$0xff] %v13713_v5  ;;  %4831 = vmatmul.bf16.gmra.mxu0 %v15544_v61  ;;  %5169 = vmatmul.bf16.gmra.mxu2 %v15546_v7  ;;  %v15550_v5 = vld [vmem:[#allocation92_spill] sm:$0xff]  ;;  %v15551_v7 = vld [vmem:[#allocation93_spill] sm:$0xff] }
 0x581   :  { %5338 = vmatmul.bf16.gmra.mxu3 %v15547_v33  ;;  %v15552_v33 = vld [vmem:[#allocation94_spill] sm:$0xff] }
 0x582   :  { %v5130_v62 = vpop.f32.mrf.mxu2  ;;  %v4963_v44 = vpop.f32.mrf.mxu1 }
 0x583   :  { %v5131_v10 = vadd.f32 %v5130_v62, %v4962_v21  ;;  %v15553_v21 = vld [vmem:[#allocation95_spill] sm:$0xff] }
 0x584   :  { %v5299_v30 = vpop.f32.mrf.mxu3  ;;  %v4794_v45 = vpop.f32.mrf.mxu0 }
 0x585   :  { %v13719_v14 = vadd.f32 %v5299_v30, %v5131_v10  ;;  %v4964_v13 = vadd.f32 %v4963_v44, %v4794_v45 }
 0x587   :  { %15548 = vst [vmem:[#allocation91_spill] sm:$0xff] %v13719_v14 }
 0x58a   :  { %v5132_v12 = vpop.f32.mrf.mxu2  ;;  %v4966_v23 = vpop.f32.mrf.mxu1 }
 0x58b   :  { %v5133_v42 = vadd.f32 %v5132_v12, %v4964_v13 }
 0x58c   :  { %v5301_v34 = vpop.f32.mrf.mxu3  ;;  %v4797_v6 = vpop.f32.mrf.mxu0 }
 0x58d   :  { %v13721_v22 = vadd.f32 %v5301_v34, %v5133_v42  ;;  %v4967_v31 = vadd.f32 %v4966_v23, %v4797_v6  ;;  %5005 = vmatmul.bf16.gmra.mxu1 %v15551_v7 }
 0x58f   :  { %15549 = vst [vmem:[#allocation96_spill] sm:$0xff] %v13721_v22  ;;  %4836 = vmatmul.bf16.gmra.mxu0 %v15550_v5  ;;  %5174 = vmatmul.bf16.gmra.mxu2 %v15552_v33  ;;  %v15556_v5 = vld [vmem:[#allocation98_spill] sm:$0xff]  ;;  %v15557_v33 = vld [vmem:[#allocation99_spill] sm:$0xff] }
 0x591   :  { %5343 = vmatmul.bf16.gmra.mxu3 %v15553_v21  ;;  %v15558_v21 = vld [vmem:[#allocation100_spill] sm:$0xff] }
 0x592   :  { %v5135_v62 = vpop.f32.mrf.mxu2  ;;  %v4968_v44 = vpop.f32.mrf.mxu1 }
 0x593   :  { %v5136_v10 = vadd.f32 %v5135_v62, %v4967_v31  ;;  %v15559_v31 = vld [vmem:[#allocation101_spill] sm:$0xff] }
 0x594   :  { %v5304_v30 = vpop.f32.mrf.mxu3  ;;  %v4799_v45 = vpop.f32.mrf.mxu0 }
 0x595   :  { %v13727_v13 = vadd.f32 %v5304_v30, %v5136_v10  ;;  %v4969_v12 = vadd.f32 %v4968_v44, %v4799_v45 }
 0x597   :  { %15554 = vst [vmem:[#allocation97_spill] sm:$0xff] %v13727_v13 }
 0x59a   :  { %v5137_v14 = vpop.f32.mrf.mxu2  ;;  %v4971_v23 = vpop.f32.mrf.mxu1 }
 0x59b   :  { %v5138_v42 = vadd.f32 %v5137_v14, %v4969_v12 }
 0x59c   :  { %v5306_v34 = vpop.f32.mrf.mxu3  ;;  %v4802_v6 = vpop.f32.mrf.mxu0 }
 0x59d   :  { %v13729_v22 = vadd.f32 %v5306_v34, %v5138_v42  ;;  %v4972_v7 = vadd.f32 %v4971_v23, %v4802_v6  ;;  %5010 = vmatmul.bf16.gmra.mxu1 %v15557_v33 }
 0x59f   :  { %15555 = vst [vmem:[#allocation102_spill] sm:$0xff] %v13729_v22  ;;  %4841 = vmatmul.bf16.gmra.mxu0 %v15556_v5  ;;  %5179 = vmatmul.bf16.gmra.mxu2 %v15558_v21  ;;  %v15562_v5 = vld [vmem:[#allocation104_spill] sm:$0xff]  ;;  %v15563_v21 = vld [vmem:[#allocation105_spill] sm:$0xff] }
 0x5a1   :  { %5348 = vmatmul.bf16.gmra.mxu3 %v15559_v31  ;;  %v15564_v31 = vld [vmem:[#allocation106_spill] sm:$0xff] }
 0x5a2   :  { %v5140_v62 = vpop.f32.mrf.mxu2  ;;  %v4973_v44 = vpop.f32.mrf.mxu1 }
 0x5a3   :  { %v5141_v10 = vadd.f32 %v5140_v62, %v4972_v7  ;;  %v15565_v7 = vld [vmem:[#allocation107_spill] sm:$0xff]  ;;  %v12656_v62 = vld [vmem:[#allocation6 + $0x44c] sm:$0xf] }
 0x5a4   :  { %v5309_v30 = vpop.f32.mrf.mxu3  ;;  %v4804_v45 = vpop.f32.mrf.mxu0 }
 0x5a5   :  { %v13735_v14 = vadd.f32 %v5309_v30, %v5141_v10  ;;  %v4974_v12 = vadd.f32 %v4973_v44, %v4804_v45  ;;  %v11923_v10 = vld [vmem:[#allocation6 + $0x468] sm:$0xf0] }
 0x5a6   :  { %v12720_v30 = vld [vmem:[#allocation6 + $0x64c] sm:$0xf]  ;;  %v11926_v45 = vor.u32 %v12656_v62, %v11923_v10 }
 0x5a7   :  { %15560 = vst [vmem:[#allocation103_spill] sm:$0xff] %v13735_v14  ;;  %v12179_v44 = vld [vmem:[#allocation6 + $0x668] sm:$0xf0] }
 0x5a8   :  { %5748 = vmatpush.bf16.msrb.mxu2 %v11926_v45 }
 0x5aa   :  { %v5142_v13 = vpop.f32.mrf.mxu2  ;;  %v4976_v23 = vpop.f32.mrf.mxu1 }
 0x5ab   :  { %v5143_v42 = vadd.f32 %v5142_v13, %v4974_v12  ;;  %v12182_v12 = vor.u32 %v12720_v30, %v12179_v44 }
 0x5ac   :  { %v5311_v34 = vpop.f32.mrf.mxu3  ;;  %v4807_v6 = vpop.f32.mrf.mxu0 }
 0x5ad   :  { %v13737_v22 = vadd.f32 %v5311_v34, %v5143_v42  ;;  %v4977_v33 = vadd.f32 %v4976_v23, %v4807_v6  ;;  %5015 = vmatmul.bf16.gmra.mxu1 %v15563_v21  ;;  %5917 = vmatpush.bf16.msrb.mxu3 %v12182_v12  ;;  %v12528_v21 = vld [vmem:[#allocation6 + $0x4c] sm:$0xf]  ;;  %v15568_v12 = vld [vmem:[#allocation110_spill] sm:$0xff] }
 0x5af   :  { %15561 = vst [vmem:[#allocation108_spill] sm:$0xff] %v13737_v22  ;;  %4846 = vmatmul.bf16.gmra.mxu0 %v15562_v5  ;;  %5184 = vmatmul.bf16.gmra.mxu2 %v15564_v31  ;;  %v11411_v31 = vld [vmem:[#allocation6 + $0x68] sm:$0xf0] }
 0x5b0   :  { %v12592_v22 = vld [vmem:[#allocation6 + $0x24c] sm:$0xf] }
 0x5b1   :  { %5353 = vmatmul.bf16.gmra.mxu3 %v15565_v7  ;;  %v11414_v7 = vor.u32 %v12528_v21, %v11411_v31  ;;  %v11667_v5 = vld [vmem:[#allocation6 + $0x268] sm:$0xf0] }
 0x5b2   :  { %v5145_v13 = vpop.f32.mrf.mxu2  ;;  %v4978_v34 = vpop.f32.mrf.mxu1  ;;  %v11670_v40 = vor.u32 %v12592_v22, %v11667_v5 }
 0x5b3   :  { %v5146_v14 = vadd.f32 %v5145_v13, %v4977_v33  ;;  %5410 = vmatpush.bf16.msrb.mxu0 %v11414_v7 }
 0x5b4   :  { %v5314_v61 = vpop.f32.mrf.mxu3  ;;  %v4809_v42 = vpop.f32.mrf.mxu0  ;;  %5579 = vmatpush.bf16.msrb.mxu1 %v11670_v40 }
 0x5b5   :  { %v13743_v6 = vadd.f32 %v5314_v61, %v5146_v14  ;;  %v4979_v23 = vadd.f32 %v4978_v34, %v4809_v42  ;;  %v15569_v61 = vld [vmem:[#allocation111_spill] sm:$0xff]  ;;  %v15570_v14 = vld [vmem:[#allocation112_spill] sm:$0xff]  ;;  %v15571_v42 = vld [vmem:[#allocation113_spill] sm:$0xff] }
 0x5b7   :  { %15566 = vst [vmem:[#allocation109_spill] sm:$0xff] %v13743_v6 }
 0x5ba   :  { %v5147_v62 = vpop.f32.mrf.mxu2  ;;  %v4981_v44 = vpop.f32.mrf.mxu1 }
 0x5bb   :  { %v5148_v10 = vadd.f32 %v5147_v62, %v4979_v23 }
 0x5bc   :  { %v5316_v30 = vpop.f32.mrf.mxu3  ;;  %v4812_v33 = vpop.f32.mrf.mxu0 }
 0x5bd   :  { %v13745_v13 = vadd.f32 %v5316_v30, %v5148_v10  ;;  %v4982_v45 = vadd.f32 %v4981_v44, %v4812_v33  ;;  %5020 = vmatmul.bf16.gmra.mxu1 %v15569_v61 }
 0x5bf   :  { %15567 = vst [vmem:[#allocation114_spill] sm:$0xff] %v13745_v13  ;;  %4851 = vmatmul.bf16.gmra.mxu0 %v15568_v12  ;;  %5189 = vmatmul.bf16.gmra.mxu2 %v15570_v14  ;;  %v15574_v13 = vld [vmem:[#allocation116_spill] sm:$0xff]  ;;  %v15575_v14 = vld [vmem:[#allocation117_spill] sm:$0xff] }
 0x5c1   :  { %5358 = vmatmul.bf16.gmra.mxu3 %v15571_v42  ;;  %v15576_v42 = vld [vmem:[#allocation118_spill] sm:$0xff] }
 0x5c2   :  { %v5150_v21 = vpop.f32.mrf.mxu2  ;;  %v4983_v31 = vpop.f32.mrf.mxu1 }
 0x5c3   :  { %v5151_v5 = vadd.f32 %v5150_v21, %v4982_v45  ;;  %v15577_v45 = vld [vmem:[#allocation119_spill] sm:$0xff] }
 0x5c4   :  { %v5319_v22 = vpop.f32.mrf.mxu3  ;;  %v4814_v40 = vpop.f32.mrf.mxu0 }
 0x5c5   :  { %v13751_v7 = vadd.f32 %v5319_v22, %v5151_v5  ;;  %v4984_v34 = vadd.f32 %v4983_v31, %v4814_v40 }
 0x5c7   :  { %15572 = vst [vmem:[#allocation115_spill] sm:$0xff] %v13751_v7 }
 0x5ca   :  { %v5152_v23 = vpop.f32.mrf.mxu2  ;;  %v4986_v33 = vpop.f32.mrf.mxu1 }
 0x5cb   :  { %v5153_v62 = vadd.f32 %v5152_v23, %v4984_v34 }
 0x5cc   :  { %v5321_v10 = vpop.f32.mrf.mxu3  ;;  %v4817_v30 = vpop.f32.mrf.mxu0 }
 0x5cd   :  { %v13753_v44 = vadd.f32 %v5321_v10, %v5153_v62  ;;  %v4987_v61 = vadd.f32 %v4986_v33, %v4817_v30  ;;  %5025 = vmatmul.bf16.gmra.mxu1 %v15575_v14 }
 0x5cf   :  { %15573 = vst [vmem:[#allocation120_spill] sm:$0xff] %v13753_v44  ;;  %4856 = vmatmul.bf16.gmra.mxu0 %v15574_v13  ;;  %5194 = vmatmul.bf16.gmra.mxu2 %v15576_v42  ;;  %v15580_v13 = vld [vmem:[#allocation122_spill] sm:$0xff]  ;;  %v15581_v42 = vld [vmem:[#allocation123_spill] sm:$0xff] }
 0x5d1   :  { %5363 = vmatmul.bf16.gmra.mxu3 %v15577_v45  ;;  %v15582_v45 = vld [vmem:[#allocation124_spill] sm:$0xff] }
 0x5d2   :  { %v5155_v21 = vpop.f32.mrf.mxu2  ;;  %v4988_v31 = vpop.f32.mrf.mxu1 }
 0x5d3   :  { %v5156_v5 = vadd.f32 %v5155_v21, %v4987_v61  ;;  %v15583_v61 = vld [vmem:[#allocation125_spill] sm:$0xff] }
 0x5d4   :  { %v5324_v22 = vpop.f32.mrf.mxu3  ;;  %v4819_v40 = vpop.f32.mrf.mxu0 }
 0x5d5   :  { %v13759_v34 = vadd.f32 %v5324_v22, %v5156_v5  ;;  %v4989_v23 = vadd.f32 %v4988_v31, %v4819_v40 }
 0x5d7   :  { %15578 = vst [vmem:[#allocation121_spill] sm:$0xff] %v13759_v34 }
 0x5da   :  { %v5157_v7 = vpop.f32.mrf.mxu2  ;;  %v4991_v33 = vpop.f32.mrf.mxu1 }
 0x5db   :  { %v5158_v62 = vadd.f32 %v5157_v7, %v4989_v23 }
 0x5dc   :  { %v5326_v10 = vpop.f32.mrf.mxu3  ;;  %v4822_v30 = vpop.f32.mrf.mxu0 }
 0x5dd   :  { %v13761_v44 = vadd.f32 %v5326_v10, %v5158_v62  ;;  %v4992_v14 = vadd.f32 %v4991_v33, %v4822_v30  ;;  %5030 = vmatmul.bf16.gmra.mxu1 %v15581_v42 }
 0x5df   :  { %15579 = vst [vmem:[#allocation126_spill] sm:$0xff] %v13761_v44  ;;  %4861 = vmatmul.bf16.gmra.mxu0 %v15580_v13  ;;  %5199 = vmatmul.bf16.gmra.mxu2 %v15582_v45  ;;  %v15586_v13 = vld [vmem:[#allocation128_spill] sm:$0xff]  ;;  %v15587_v45 = vld [vmem:[#allocation129_spill] sm:$0xff] }
 0x5e1   :  { %5368 = vmatmul.bf16.gmra.mxu3 %v15583_v61  ;;  %v15588_v61 = vld [vmem:[#allocation130_spill] sm:$0xff] }
 0x5e2   :  { %v5160_v21 = vpop.f32.mrf.mxu2  ;;  %v4993_v31 = vpop.f32.mrf.mxu1 }
 0x5e3   :  { %v5161_v5 = vadd.f32 %v5160_v21, %v4992_v14  ;;  %v15589_v14 = vld [vmem:[#allocation131_spill] sm:$0xff]  ;;  %v12648_v21 = vld [vmem:[#allocation6 + $0x40c] sm:$0xf] }
 0x5e4   :  { %v5329_v22 = vpop.f32.mrf.mxu3  ;;  %v4824_v40 = vpop.f32.mrf.mxu0 }
 0x5e5   :  { %v13767_v7 = vadd.f32 %v5329_v22, %v5161_v5  ;;  %v4994_v23 = vadd.f32 %v4993_v31, %v4824_v40  ;;  %v11891_v5 = vld [vmem:[#allocation6 + $0x428] sm:$0xf0] }
 0x5e6   :  { %v12712_v22 = vld [vmem:[#allocation6 + $0x60c] sm:$0xf]  ;;  %v11894_v40 = vor.u32 %v12648_v21, %v11891_v5 }
 0x5e7   :  { %15584 = vst [vmem:[#allocation127_spill] sm:$0xff] %v13767_v7  ;;  %v12147_v31 = vld [vmem:[#allocation6 + $0x628] sm:$0xf0] }
 0x5e8   :  { %5749 = vmatpush.bf16.msrb.mxu2 %v11894_v40 }
 0x5ea   :  { %v5162_v34 = vpop.f32.mrf.mxu2  ;;  %v4996_v33 = vpop.f32.mrf.mxu1 }
 0x5eb   :  { %v5163_v62 = vadd.f32 %v5162_v34, %v4994_v23  ;;  %v12150_v23 = vor.u32 %v12712_v22, %v12147_v31 }
 0x5ec   :  { %v5331_v10 = vpop.f32.mrf.mxu3  ;;  %v4827_v30 = vpop.f32.mrf.mxu0 }
 0x5ed   :  { %v13769_v44 = vadd.f32 %v5331_v10, %v5163_v62  ;;  %v4997_v42 = vadd.f32 %v4996_v33, %v4827_v30  ;;  %5035 = vmatmul.bf16.gmra.mxu1 %v15587_v45  ;;  %5918 = vmatpush.bf16.msrb.mxu3 %v12150_v23  ;;  %v12520_v45 = vld [vmem:[#allocation6 + $0xc] sm:$0xf]  ;;  %v15592_v23 = vld [vmem:[#allocation134_spill] sm:$0xff] }
 0x5ef   :  { %15585 = vst [vmem:[#allocation132_spill] sm:$0xff] %v13769_v44  ;;  %4866 = vmatmul.bf16.gmra.mxu0 %v15586_v13  ;;  %5204 = vmatmul.bf16.gmra.mxu2 %v15588_v61  ;;  %v11379_v61 = vld [vmem:[#allocation6 + $0x28] sm:$0xf0] }
 0x5f0   :  { %v12584_v44 = vld [vmem:[#allocation6 + $0x20c] sm:$0xf] }
 0x5f1   :  { %5373 = vmatmul.bf16.gmra.mxu3 %v15589_v14  ;;  %v11382_v14 = vor.u32 %v12520_v45, %v11379_v61  ;;  %v11635_v13 = vld [vmem:[#allocation6 + $0x228] sm:$0xf0] }
 0x5f2   :  { %v5165_v34 = vpop.f32.mrf.mxu2  ;;  %v4998_v10 = vpop.f32.mrf.mxu1  ;;  %v11638_v6 = vor.u32 %v12584_v44, %v11635_v13 }
 0x5f3   :  { %v5166_v7 = vadd.f32 %v5165_v34, %v4997_v42  ;;  %5411 = vmatpush.bf16.msrb.mxu0 %v11382_v14 }
 0x5f4   :  { %v5334_v12 = vpop.f32.mrf.mxu3  ;;  %v4829_v62 = vpop.f32.mrf.mxu0  ;;  %5580 = vmatpush.bf16.msrb.mxu1 %v11638_v6 }
 0x5f5   :  { %v13775_v30 = vadd.f32 %v5334_v12, %v5166_v7  ;;  %v4999_v33 = vadd.f32 %v4998_v10, %v4829_v62  ;;  %v15593_v12 = vld [vmem:[#allocation135_spill] sm:$0xff]  ;;  %v15594_v7 = vld [vmem:[#allocation136_spill] sm:$0xff]  ;;  %v15595_v62 = vld [vmem:[#allocation137_spill] sm:$0xff] }
 0x5f7   :  { %15590 = vst [vmem:[#allocation133_spill] sm:$0xff] %v13775_v30 }
 0x5fa   :  { %v5167_v21 = vpop.f32.mrf.mxu2  ;;  %v5001_v31 = vpop.f32.mrf.mxu1 }
 0x5fb   :  { %v5168_v5 = vadd.f32 %v5167_v21, %v4999_v33 }
 0x5fc   :  { %v5336_v22 = vpop.f32.mrf.mxu3  ;;  %v4832_v42 = vpop.f32.mrf.mxu0 }
 0x5fd   :  { %v13777_v34 = vadd.f32 %v5336_v22, %v5168_v5  ;;  %v5002_v40 = vadd.f32 %v5001_v31, %v4832_v42  ;;  %5040 = vmatmul.bf16.gmra.mxu1 %v15593_v12 }
 0x5ff   :  { %15591 = vst [vmem:[#allocation138_spill] sm:$0xff] %v13777_v34  ;;  %4871 = vmatmul.bf16.gmra.mxu0 %v15592_v23  ;;  %5209 = vmatmul.bf16.gmra.mxu2 %v15594_v7  ;;  %v15598_v34 = vld [vmem:[#allocation140_spill] sm:$0xff]  ;;  %v15599_v7 = vld [vmem:[#allocation141_spill] sm:$0xff] }
 0x601   :  { %5378 = vmatmul.bf16.gmra.mxu3 %v15595_v62  ;;  %v15600_v62 = vld [vmem:[#allocation142_spill] sm:$0xff] }
 0x602   :  { %v5170_v45 = vpop.f32.mrf.mxu2  ;;  %v5003_v61 = vpop.f32.mrf.mxu1 }
 0x603   :  { %v5171_v13 = vadd.f32 %v5170_v45, %v5002_v40  ;;  %v15601_v40 = vld [vmem:[#allocation143_spill] sm:$0xff] }
 0x604   :  { %v5339_v44 = vpop.f32.mrf.mxu3  ;;  %v4834_v6 = vpop.f32.mrf.mxu0 }
 0x605   :  { %v13783_v14 = vadd.f32 %v5339_v44, %v5171_v13  ;;  %v5004_v10 = vadd.f32 %v5003_v61, %v4834_v6 }
 0x607   :  { %15596 = vst [vmem:[#allocation139_spill] sm:$0xff] %v13783_v14 }
 0x60a   :  { %v5172_v33 = vpop.f32.mrf.mxu2  ;;  %v5006_v42 = vpop.f32.mrf.mxu1 }
 0x60b   :  { %v5173_v21 = vadd.f32 %v5172_v33, %v5004_v10 }
 0x60c   :  { %v5341_v5 = vpop.f32.mrf.mxu3  ;;  %v4837_v22 = vpop.f32.mrf.mxu0 }
 0x60d   :  { %v13785_v31 = vadd.f32 %v5341_v5, %v5173_v21  ;;  %v5007_v12 = vadd.f32 %v5006_v42, %v4837_v22  ;;  %5045 = vmatmul.bf16.gmra.mxu1 %v15599_v7 }
 0x60f   :  { %15597 = vst [vmem:[#allocation144_spill] sm:$0xff] %v13785_v31  ;;  %4876 = vmatmul.bf16.gmra.mxu0 %v15598_v34  ;;  %5214 = vmatmul.bf16.gmra.mxu2 %v15600_v62  ;;  %v15604_v34 = vld [vmem:[#allocation146_spill] sm:$0xff]  ;;  %v15605_v62 = vld [vmem:[#allocation147_spill] sm:$0xff] }
 0x611   :  { %5383 = vmatmul.bf16.gmra.mxu3 %v15601_v40  ;;  %v15606_v40 = vld [vmem:[#allocation148_spill] sm:$0xff] }
 0x612   :  { %v5175_v45 = vpop.f32.mrf.mxu2  ;;  %v5008_v61 = vpop.f32.mrf.mxu1 }
 0x613   :  { %v5176_v13 = vadd.f32 %v5175_v45, %v5007_v12  ;;  %v15607_v12 = vld [vmem:[#allocation149_spill] sm:$0xff] }
 0x614   :  { %v5344_v44 = vpop.f32.mrf.mxu3  ;;  %v4839_v6 = vpop.f32.mrf.mxu0 }
 0x615   :  { %v13791_v10 = vadd.f32 %v5344_v44, %v5176_v13  ;;  %v5009_v33 = vadd.f32 %v5008_v61, %v4839_v6 }
 0x617   :  { %15602 = vst [vmem:[#allocation145_spill] sm:$0xff] %v13791_v10 }
 0x61a   :  { %v5177_v14 = vpop.f32.mrf.mxu2  ;;  %v5011_v42 = vpop.f32.mrf.mxu1 }
 0x61b   :  { %v5178_v21 = vadd.f32 %v5177_v14, %v5009_v33 }
 0x61c   :  { %v5346_v5 = vpop.f32.mrf.mxu3  ;;  %v4842_v22 = vpop.f32.mrf.mxu0 }
 0x61d   :  { %v13793_v31 = vadd.f32 %v5346_v5, %v5178_v21  ;;  %v5012_v7 = vadd.f32 %v5011_v42, %v4842_v22  ;;  %5050 = vmatmul.bf16.gmra.mxu1 %v15605_v62 }
 0x61f   :  { %15603 = vst [vmem:[#allocation150_spill] sm:$0xff] %v13793_v31  ;;  %4881 = vmatmul.bf16.gmra.mxu0 %v15604_v34  ;;  %5219 = vmatmul.bf16.gmra.mxu2 %v15606_v40  ;;  %v15610_v34 = vld [vmem:[#allocation152_spill] sm:$0xff]  ;;  %v15611_v40 = vld [vmem:[#allocation153_spill] sm:$0xff] }
 0x621   :  { %5388 = vmatmul.bf16.gmra.mxu3 %v15607_v12  ;;  %v15612_v12 = vld [vmem:[#allocation154_spill] sm:$0xff] }
 0x622   :  { %v5180_v45 = vpop.f32.mrf.mxu2  ;;  %v5013_v61 = vpop.f32.mrf.mxu1 }
 0x623   :  { %v5181_v13 = vadd.f32 %v5180_v45, %v5012_v7  ;;  %v15613_v7 = vld [vmem:[#allocation155_spill] sm:$0xff]  ;;  %v12121_v45 = vld [vmem:[#allocation6 + $0x5d0] sm:$0xf] }
 0x624   :  { %v5349_v44 = vpop.f32.mrf.mxu3  ;;  %v4844_v6 = vpop.f32.mrf.mxu0 }
 0x625   :  { %v13799_v14 = vadd.f32 %v5349_v44, %v5181_v13  ;;  %v5014_v33 = vadd.f32 %v5013_v61, %v4844_v6  ;;  %v12709_v13 = vld [vmem:[#allocation6 + $0x5ec] sm:$0xf0] }
 0x626   :  { %v12377_v44 = vld [vmem:[#allocation6 + $0x7d0] sm:$0xf]  ;;  %v12122_v6 = vor.u32 %v12709_v13, %v12121_v45 }
 0x627   :  { %15608 = vst [vmem:[#allocation151_spill] sm:$0xff] %v13799_v14  ;;  %v12773_v61 = vld [vmem:[#allocation6 + $0x7ec] sm:$0xf0] }
 0x628   :  { %6418 = vmatpush.bf16.msra.mxu2 %v12122_v6 }
 0x62a   :  { %v5182_v10 = vpop.f32.mrf.mxu2  ;;  %v5016_v42 = vpop.f32.mrf.mxu1 }
 0x62b   :  { %v5183_v21 = vadd.f32 %v5182_v10, %v5014_v33  ;;  %v12378_v33 = vor.u32 %v12773_v61, %v12377_v44 }
 0x62c   :  { %v5351_v5 = vpop.f32.mrf.mxu3  ;;  %v4847_v22 = vpop.f32.mrf.mxu0 }
 0x62d   :  { %v13801_v31 = vadd.f32 %v5351_v5, %v5183_v21  ;;  %v5017_v62 = vadd.f32 %v5016_v42, %v4847_v22  ;;  %5055 = vmatmul.bf16.gmra.mxu1 %v15611_v40  ;;  %6587 = vmatpush.bf16.msra.mxu3 %v12378_v33  ;;  %v11609_v40 = vld [vmem:[#allocation6 + $0x1d0] sm:$0xf] }
 0x62f   :  { %15609 = vst [vmem:[#allocation156_spill] sm:$0xff] %v13801_v31  ;;  %4886 = vmatmul.bf16.gmra.mxu0 %v15610_v34  ;;  %5224 = vmatmul.bf16.gmra.mxu2 %v15612_v12  ;;  %v12581_v12 = vld [vmem:[#allocation6 + $0x1ec] sm:$0xf0] }
 0x630   :  { %v11865_v31 = vld [vmem:[#allocation6 + $0x3d0] sm:$0xf] }
 0x631   :  { %5393 = vmatmul.bf16.gmra.mxu3 %v15613_v7  ;;  %v11610_v7 = vor.u32 %v12581_v12, %v11609_v40  ;;  %v12645_v34 = vld [vmem:[#allocation6 + $0x3ec] sm:$0xf0] }
 0x632   :  { %v5185_v10 = vpop.f32.mrf.mxu2  ;;  %v5018_v5 = vpop.f32.mrf.mxu1  ;;  %v11866_v30 = vor.u32 %v12645_v34, %v11865_v31 }
 0x633   :  { %v5186_v14 = vadd.f32 %v5185_v10, %v5017_v62  ;;  %6080 = vmatpush.bf16.msra.mxu0 %v11610_v7 }
 0x634   :  { %v5354_v23 = vpop.f32.mrf.mxu3  ;;  %v4849_v21 = vpop.f32.mrf.mxu0  ;;  %6249 = vmatpush.bf16.msra.mxu1 %v11866_v30 }
 0x635   :  { %v13807_v22 = vadd.f32 %v5354_v23, %v5186_v14  ;;  %v5019_v42 = vadd.f32 %v5018_v5, %v4849_v21 }
 0x63a   :  { %v5187_v45 = vpop.f32.mrf.mxu2  ;;  %v5021_v61 = vpop.f32.mrf.mxu1 }
 0x63b   :  { %v5188_v13 = vadd.f32 %v5187_v45, %v5019_v42 }
 0x63c   :  { %v5356_v44 = vpop.f32.mrf.mxu3  ;;  %v4852_v62 = vpop.f32.mrf.mxu0 }
 0x63d   :  { %v13809_v10 = vadd.f32 %v5356_v44, %v5188_v13  ;;  %v5022_v6 = vadd.f32 %v5021_v61, %v4852_v62  ;;  %5060 = vmatmul.bf16.gmra.mxu1 %v13355_v28 }
 0x63f   :  { %4891 = vmatmul.bf16.gmra.mxu0 %v13353_v43  ;;  %5229 = vmatmul.bf16.gmra.mxu2 %v13357_v24 }
 0x641   :  { %5398 = vmatmul.bf16.gmra.mxu3 %v13359_v46 }
 0x642   :  { %v5190_v23 = vpop.f32.mrf.mxu2  ;;  %v5023_v40 = vpop.f32.mrf.mxu1 }
 0x643   :  { %v5191_v34 = vadd.f32 %v5190_v23, %v5022_v6 }
 0x644   :  { %v5359_v31 = vpop.f32.mrf.mxu3  ;;  %v4854_v30 = vpop.f32.mrf.mxu0 }
 0x645   :  { %v13815_v12 = vadd.f32 %v5359_v31, %v5191_v34  ;;  %v5024_v14 = vadd.f32 %v5023_v40, %v4854_v30 }
 0x64a   :  { %v5192_v7 = vpop.f32.mrf.mxu2  ;;  %v5026_v42 = vpop.f32.mrf.mxu1 }
 0x64b   :  { %v5193_v33 = vadd.f32 %v5192_v7, %v5024_v14 }
 0x64c   :  { %v5361_v21 = vpop.f32.mrf.mxu3  ;;  %v4857_v5 = vpop.f32.mrf.mxu0 }
 0x64d   :  { %v13817_v45 = vadd.f32 %v5361_v21, %v5193_v33  ;;  %v5027_v13 = vadd.f32 %v5026_v42, %v4857_v5  ;;  %5581 = vmatmul.bf16.vlgmr.msrb.gmra.mxu1 %v12893_v51 }
 0x64f   :  { %5412 = vmatmul.bf16.vlgmr.msrb.gmra.mxu0 %v12891_v47  ;;  %5750 = vmatmul.bf16.vlgmr.msrb.gmra.mxu2 %v12895_v52 }
 0x651   :  { %5919 = vmatmul.bf16.vlgmr.msrb.gmra.mxu3 %v12897_v53 }
 0x652   :  { %v5195_v44 = vpop.f32.mrf.mxu2  ;;  %v5028_v23 = vpop.f32.mrf.mxu1 }
 0x653   :  { %v5196_v62 = vadd.f32 %v5195_v44, %v5027_v13 }
 0x654   :  { %v5364_v61 = vpop.f32.mrf.mxu3  ;;  %v4859_v6 = vpop.f32.mrf.mxu0 }
 0x655   :  { %v13823_v34 = vadd.f32 %v5364_v61, %v5196_v62  ;;  %v5029_v31 = vadd.f32 %v5028_v23, %v4859_v6 }
 0x65a   :  { %v5197_v30 = vpop.f32.mrf.mxu2  ;;  %v5031_v33 = vpop.f32.mrf.mxu1 }
 0x65b   :  { %v5198_v40 = vadd.f32 %v5197_v30, %v5029_v31 }
 0x65c   :  { %v5366_v14 = vpop.f32.mrf.mxu3  ;;  %v4862_v7 = vpop.f32.mrf.mxu0 }
 0x65d   :  { %v13825_v21 = vadd.f32 %v5366_v14, %v5198_v40  ;;  %v5032_v5 = vadd.f32 %v5031_v33, %v4862_v7  ;;  %5586 = vmatmul.bf16.gmra.mxu1 %v15467_v35 }
 0x65f   :  { %5417 = vmatmul.bf16.gmra.mxu0 %v12903_v0  ;;  %5755 = vmatmul.bf16.gmra.mxu2 %v12907_v2 }
 0x661   :  { %5924 = vmatmul.bf16.gmra.mxu3 %v15468_v32 }
 0x662   :  { %v5200_v42 = vpop.f32.mrf.mxu2  ;;  %v5033_v61 = vpop.f32.mrf.mxu1 }
 0x663   :  { %v5201_v13 = vadd.f32 %v5200_v42, %v5032_v5  ;;  %v15616_v5 = vld [vmem:[#allocation18_spill] sm:$0xff] }
 0x664   :  { %v5369_v44 = vpop.f32.mrf.mxu3  ;;  %v4864_v62 = vpop.f32.mrf.mxu0  ;;  %v12089_v42 = vld [vmem:[#allocation6 + $0x590] sm:$0xf] }
 0x665   :  { %v13831_v6 = vadd.f32 %v5369_v44, %v5201_v13  ;;  %v5034_v23 = vadd.f32 %v5033_v61, %v4864_v62  ;;  %v12701_v13 = vld [vmem:[#allocation6 + $0x5ac] sm:$0xf0] }
 0x666   :  { %v12345_v44 = vld [vmem:[#allocation6 + $0x790] sm:$0xf]  ;;  %v12090_v62 = vor.u32 %v12701_v13, %v12089_v42 }
 0x667   :  { %15614 = vst [vmem:[#allocation157_spill] sm:$0xff] %v13831_v6  ;;  %v12765_v61 = vld [vmem:[#allocation6 + $0x7ac] sm:$0xf0] }
 0x668   :  { %6419 = vmatpush.bf16.msra.mxu2 %v12090_v62 }
 0x66a   :  { %v5202_v31 = vpop.f32.mrf.mxu2  ;;  %v5036_v7 = vpop.f32.mrf.mxu1 }
 0x66b   :  { %v5203_v30 = vadd.f32 %v5202_v31, %v5034_v23  ;;  %v12346_v31 = vor.u32 %v12765_v61, %v12345_v44 }
 0x66c   :  { %v5371_v40 = vpop.f32.mrf.mxu3  ;;  %v4867_v14 = vpop.f32.mrf.mxu0 }
 0x66d   :  { %v13833_v33 = vadd.f32 %v5371_v40, %v5203_v30  ;;  %v5037_v35 = vadd.f32 %v5036_v7, %v4867_v14  ;;  %5591 = vmatmul.bf16.gmra.mxu1 %v15472_v15  ;;  %6588 = vmatpush.bf16.msra.mxu3 %v12346_v31  ;;  %v11577_v15 = vld [vmem:[#allocation6 + $0x190] sm:$0xf] }
 0x66f   :  { %15615 = vst [vmem:[#allocation159_spill] sm:$0xff] %v13833_v33  ;;  %5422 = vmatmul.bf16.gmra.mxu0 %v15470_v17  ;;  %5760 = vmatmul.bf16.gmra.mxu2 %v15473_v20  ;;  %v12573_v20 = vld [vmem:[#allocation6 + $0x1ac] sm:$0xf0] }
 0x670   :  { %v11833_v33 = vld [vmem:[#allocation6 + $0x390] sm:$0xf] }
 0x671   :  { %5929 = vmatmul.bf16.gmra.mxu3 %v15616_v5  ;;  %v11578_v5 = vor.u32 %v12573_v20, %v11577_v15  ;;  %v12637_v17 = vld [vmem:[#allocation6 + $0x3ac] sm:$0xf0] }
 0x672   :  { %v5205_v23 = vpop.f32.mrf.mxu2  ;;  %v5038_v40 = vpop.f32.mrf.mxu1  ;;  %v11834_v2 = vor.u32 %v12637_v17, %v11833_v33 }
 0x673   :  { %v5206_v6 = vadd.f32 %v5205_v23, %v5037_v35  ;;  %6081 = vmatpush.bf16.msra.mxu0 %v11578_v5 }
 0x674   :  { %v5374_v32 = vpop.f32.mrf.mxu3  ;;  %v4869_v30 = vpop.f32.mrf.mxu0  ;;  %6250 = vmatpush.bf16.msra.mxu1 %v11834_v2 }
 0x675   :  { %v13839_v14 = vadd.f32 %v5374_v32, %v5206_v6  ;;  %v5039_v7 = vadd.f32 %v5038_v40, %v4869_v30 }
 0x67a   :  { %v5207_v42 = vpop.f32.mrf.mxu2  ;;  %v5041_v61 = vpop.f32.mrf.mxu1 }
 0x67b   :  { %v5208_v13 = vadd.f32 %v5207_v42, %v5039_v7 }
 0x67c   :  { %v5376_v44 = vpop.f32.mrf.mxu3  ;;  %v4872_v35 = vpop.f32.mrf.mxu0 }
 0x67d   :  { %v13841_v23 = vadd.f32 %v5376_v44, %v5208_v13  ;;  %v5042_v62 = vadd.f32 %v5041_v61, %v4872_v35  ;;  %5596 = vmatmul.bf16.gmra.mxu1 %v12929_v37 }
 0x67f   :  { %5427 = vmatmul.bf16.gmra.mxu0 %v12927_v36  ;;  %5765 = vmatmul.bf16.gmra.mxu2 %v12931_v38 }
 0x681   :  { %5934 = vmatmul.bf16.gmra.mxu3 %v12933_v39 }
 0x682   :  { %v5210_v32 = vpop.f32.mrf.mxu2  ;;  %v5043_v20 = vpop.f32.mrf.mxu1 }
 0x683   :  { %v5211_v17 = vadd.f32 %v5210_v32, %v5042_v62 }
 0x684   :  { %v5379_v15 = vpop.f32.mrf.mxu3  ;;  %v4874_v2 = vpop.f32.mrf.mxu0 }
 0x685   :  { %v13847_v6 = vadd.f32 %v5379_v15, %v5211_v17  ;;  %v5044_v33 = vadd.f32 %v5043_v20, %v4874_v2 }
 0x68a   :  { %v5212_v5 = vpop.f32.mrf.mxu2  ;;  %v5046_v7 = vpop.f32.mrf.mxu1 }
 0x68b   :  { %v5213_v31 = vadd.f32 %v5212_v5, %v5044_v33 }
 0x68c   :  { %v5381_v30 = vpop.f32.mrf.mxu3  ;;  %v4877_v40 = vpop.f32.mrf.mxu0 }
 0x68d   :  { %v13849_v42 = vadd.f32 %v5381_v30, %v5213_v31  ;;  %v5047_v13 = vadd.f32 %v5046_v7, %v4877_v40  ;;  %5601 = vmatmul.bf16.gmra.mxu1 %v12941_v50 }
 0x68f   :  { %5432 = vmatmul.bf16.gmra.mxu0 %v12939_v49  ;;  %5770 = vmatmul.bf16.gmra.mxu2 %v12943_v54 }
 0x691   :  { %5939 = vmatmul.bf16.gmra.mxu3 %v12945_v55 }
 0x692   :  { %v5215_v44 = vpop.f32.mrf.mxu2  ;;  %v5048_v32 = vpop.f32.mrf.mxu1 }
 0x693   :  { %v5216_v35 = vadd.f32 %v5215_v44, %v5047_v13 }
 0x694   :  { %v5384_v61 = vpop.f32.mrf.mxu3  ;;  %v4879_v62 = vpop.f32.mrf.mxu0 }
 0x695   :  { %v13855_v17 = vadd.f32 %v5384_v61, %v5216_v35  ;;  %v5049_v15 = vadd.f32 %v5048_v32, %v4879_v62 }
 0x69a   :  { %v5217_v2 = vpop.f32.mrf.mxu2  ;;  %v5051_v31 = vpop.f32.mrf.mxu1 }
 0x69b   :  { %v5218_v20 = vadd.f32 %v5217_v2, %v5049_v15 }
 0x69c   :  { %v5386_v33 = vpop.f32.mrf.mxu3  ;;  %v4882_v5 = vpop.f32.mrf.mxu0 }
 0x69d   :  { %v13857_v30 = vadd.f32 %v5386_v33, %v5218_v20  ;;  %v5052_v40 = vadd.f32 %v5051_v31, %v4882_v5  ;;  %5606 = vmatmul.bf16.gmra.mxu1 %v15476_v63 }
 0x69f   :  { %15617 = vst [vmem:[#allocation160_spill] sm:$0xff] %v13857_v30  ;;  %5437 = vmatmul.bf16.gmra.mxu0 %v12951_v4  ;;  %5775 = vmatmul.bf16.gmra.mxu2 %v15477_v41 }
 0x6a1   :  { %5944 = vmatmul.bf16.gmra.mxu3 %v15478_v26  ;;  %v12629_v26 = vld [vmem:[#allocation6 + $0x36c] sm:$0xf0] }
 0x6a2   :  { %v5220_v7 = vpop.f32.mrf.mxu2  ;;  %v5053_v61 = vpop.f32.mrf.mxu1 }
 0x6a3   :  { %v5221_v13 = vadd.f32 %v5220_v7, %v5052_v40  ;;  %v12057_v40 = vld [vmem:[#allocation6 + $0x550] sm:$0xf] }
 0x6a4   :  { %v5389_v44 = vpop.f32.mrf.mxu3  ;;  %v4884_v35 = vpop.f32.mrf.mxu0  ;;  %v12693_v7 = vld [vmem:[#allocation6 + $0x56c] sm:$0xf0] }
 0x6a5   :  { %v13863_v62 = vadd.f32 %v5389_v44, %v5221_v13  ;;  %v5054_v32 = vadd.f32 %v5053_v61, %v4884_v35  ;;  %v12313_v13 = vld [vmem:[#allocation6 + $0x750] sm:$0xf]  ;;  %v12058_v44 = vor.u32 %v12693_v7, %v12057_v40 }
 0x6a6   :  { %v12757_v35 = vld [vmem:[#allocation6 + $0x76c] sm:$0xf0] }
 0x6a7   :  { %15618 = vst [vmem:[#allocation161_spill] sm:$0xff] %v13863_v62  ;;  %6420 = vmatpush.bf16.msra.mxu2 %v12058_v44 }
 0x6aa   :  { %v5222_v15 = vpop.f32.mrf.mxu2  ;;  %v5056_v5 = vpop.f32.mrf.mxu1 }
 0x6ab   :  { %v5223_v2 = vadd.f32 %v5222_v15, %v5054_v32  ;;  %v12314_v32 = vor.u32 %v12757_v35, %v12313_v13 }
 0x6ac   :  { %v5391_v20 = vpop.f32.mrf.mxu3  ;;  %v4887_v33 = vpop.f32.mrf.mxu0 }
 0x6ad   :  { %v13865_v31 = vadd.f32 %v5391_v20, %v5223_v2  ;;  %v5057_v63 = vadd.f32 %v5056_v5, %v4887_v33  ;;  %5611 = vmatmul.bf16.gmra.mxu1 %v15482_v8  ;;  %6589 = vmatpush.bf16.msra.mxu3 %v12314_v32  ;;  %v11545_v8 = vld [vmem:[#allocation6 + $0x150] sm:$0xf] }
 0x6af   :  { %15619 = vst [vmem:[#allocation162_spill] sm:$0xff] %v13865_v31  ;;  %5442 = vmatmul.bf16.gmra.mxu0 %v15480_v27  ;;  %5780 = vmatmul.bf16.gmra.mxu2 %v15483_v1  ;;  %v12565_v1 = vld [vmem:[#allocation6 + $0x16c] sm:$0xf0] }
 0x6b0   :  { %v11801_v31 = vld [vmem:[#allocation6 + $0x350] sm:$0xf]  ;;  %v11546_v27 = vor.u32 %v12565_v1, %v11545_v8 }
 0x6b1   :  { %5949 = vmatmul.bf16.gmra.mxu3 %v15484_v11  ;;  %v11802_v30 = vor.u32 %v12629_v26, %v11801_v31 }
 0x6b2   :  { %v5225_v61 = vpop.f32.mrf.mxu2  ;;  %v5058_v20 = vpop.f32.mrf.mxu1  ;;  %6082 = vmatpush.bf16.msra.mxu0 %v11546_v27 }
 0x6b3   :  { %v5226_v15 = vadd.f32 %v5225_v61, %v5057_v63  ;;  %6251 = vmatpush.bf16.msra.mxu1 %v11802_v30 }
 0x6b4   :  { %v5394_v62 = vpop.f32.mrf.mxu3  ;;  %v4889_v2 = vpop.f32.mrf.mxu0 }
 0x6b5   :  { %v13871_v33 = vadd.f32 %v5394_v62, %v5226_v15  ;;  %v5059_v5 = vadd.f32 %v5058_v20, %v4889_v2 }
 0x6ba   :  { %v5227_v11 = vpop.f32.mrf.mxu2  ;;  %v5061_v13 = vpop.f32.mrf.mxu1 }
 0x6bb   :  { %v5228_v41 = vadd.f32 %v5227_v11, %v5059_v5 }
 0x6bc   :  { %v5396_v40 = vpop.f32.mrf.mxu3  ;;  %v4892_v7 = vpop.f32.mrf.mxu0 }
 0x6bd   :  { %v13873_v63 = vadd.f32 %v5396_v40, %v5228_v41  ;;  %v5062_v44 = vadd.f32 %v5061_v13, %v4892_v7  ;;  %5616 = vmatmul.bf16.gmra.mxu1 %v12977_v57 }
 0x6bf   :  { %5447 = vmatmul.bf16.gmra.mxu0 %v12975_v56  ;;  %5785 = vmatmul.bf16.gmra.mxu2 %v12979_v58 }
 0x6c1   :  { %5954 = vmatmul.bf16.gmra.mxu3 %v12981_v59 }
 0x6c2   :  { %v5230_v8 = vpop.f32.mrf.mxu2  ;;  %v5063_v35 = vpop.f32.mrf.mxu1 }
 0x6c3   :  { %v5231_v1 = vadd.f32 %v5230_v8, %v5062_v44 }
 0x6c4   :  { %v5399_v11 = vpop.f32.mrf.mxu3  ;;  %v4894_v62 = vpop.f32.mrf.mxu0 }
 0x6c5   :  { %v13879_v26 = vadd.f32 %v5399_v11, %v5231_v1  ;;  %v5064_v27 = vadd.f32 %v5063_v35, %v4894_v62 }
 0x6ca   :  { %v5232_v41 = vpop.f32.mrf.mxu2  ;;  %v5582_v32 = vpop.f32.mrf.mxu1 }
 0x6cb   :  { %v5233_v31 = vadd.f32 %v5232_v41, %v5064_v27 }
 0x6cc   :  { %v5401_v61 = vpop.f32.mrf.mxu3  ;;  %v5413_v30 = vpop.f32.mrf.mxu0 }
 0x6cd   :  { %v13881_v15 = vadd.f32 %v5401_v61, %v5233_v31  ;;  %v5583_v2 = vadd.f32 %v5582_v32, %v5413_v30  ;;  %5621 = vmatmul.bf16.gmra.mxu1 %v12989_v18  ;;  %v15620_v32 = vld [vmem:[#allocation30_spill] sm:$0xff] }
 0x6cf   :  { %5452 = vmatmul.bf16.gmra.mxu0 %v12987_v16  ;;  %5790 = vmatmul.bf16.gmra.mxu2 %v12991_v19 }
 0x6d1   :  { %5959 = vmatmul.bf16.gmra.mxu3 %v12993_v25 }
 0x6d2   :  { %v5751_v20 = vpop.f32.mrf.mxu2  ;;  %v5584_v13 = vpop.f32.mrf.mxu1 }
 0x6d3   :  { %v5752_v5 = vadd.f32 %v5751_v20, %v5583_v2 }
 0x6d4   :  { %v5920_v40 = vpop.f32.mrf.mxu3  ;;  %v5415_v7 = vpop.f32.mrf.mxu0 }
 0x6d5   :  { %v5921_v44 = vadd.f32 %v5920_v40, %v5752_v5  ;;  %v5585_v1 = vadd.f32 %v5584_v13, %v5415_v7  ;;  %v15621_v13 = vld [vmem:[#allocation31_spill] sm:$0xff] }
 0x6d7   :  { %v10324_v8 = vpack.c.bf16 %v5921_v44, %v13631_v60 }
 0x6d9   :  { %10580 = vst [vmem:[#allocation8 + $0x8] sm:$0xff] %v10324_v8 }
 0x6da   :  { %v5753_v11 = vpop.f32.mrf.mxu2  ;;  %v5587_v41 = vpop.f32.mrf.mxu1 }
 0x6db   :  { %v5754_v62 = vadd.f32 %v5753_v11, %v5585_v1 }
 0x6dc   :  { %v5922_v35 = vpop.f32.mrf.mxu3  ;;  %v5418_v27 = vpop.f32.mrf.mxu0 }
 0x6dd   :  { %v5923_v31 = vadd.f32 %v5922_v35, %v5754_v62  ;;  %v5588_v30 = vadd.f32 %v5587_v41, %v5418_v27  ;;  %5626 = vmatmul.bf16.gmra.mxu1 %v15485_v3  ;;  %v15622_v41 = vld [vmem:[#allocation32_spill] sm:$0xff] }
 0x6df   :  { %5457 = vmatmul.bf16.gmra.mxu0 %v13001_v48  ;;  %v10328_v61 = vpack.c.bf16 %v5923_v31, %v13633_v29  ;;  %5795 = vmatmul.bf16.gmra.mxu2 %v15486_v9  ;;  %v15623_v31 = vld [vmem:[#allocation36_spill] sm:$0xff]  ;;  %v11769_v9 = vld [vmem:[#allocation6 + $0x310] sm:$0xf] }
 0x6e1   :  { %5964 = vmatmul.bf16.gmra.mxu3 %v15620_v32  ;;  %10584 = vst [vmem:[#allocation8 + $0x28] sm:$0xff] %v10328_v61 }
 0x6e2   :  { %v5756_v60 = vpop.f32.mrf.mxu2  ;;  %v5589_v40 = vpop.f32.mrf.mxu1 }
 0x6e3   :  { %v5757_v2 = vadd.f32 %v5756_v60, %v5588_v30  ;;  %v15624_v30 = vld [vmem:[#allocation33_spill] sm:$0xff]  ;;  %v15625_v60 = vld [vmem:[#allocation34_spill] sm:$0xff] }
 0x6e4   :  { %v5925_v20 = vpop.f32.mrf.mxu3  ;;  %v5420_v5 = vpop.f32.mrf.mxu0 }
 0x6e5   :  { %v5926_v7 = vadd.f32 %v5925_v20, %v5757_v2  ;;  %v5590_v8 = vadd.f32 %v5589_v40, %v5420_v5  ;;  %v15626_v2 = vld [vmem:[#allocation35_spill] sm:$0xff]  ;;  %v12025_v20 = vld [vmem:[#allocation6 + $0x510] sm:$0xf] }
 0x6e6   :  { %v12685_v5 = vld [vmem:[#allocation6 + $0x52c] sm:$0xf0] }
 0x6e7   :  { %v10332_v44 = vpack.c.bf16 %v5926_v7, %v15621_v13  ;;  %v12026_v7 = vor.u32 %v12685_v5, %v12025_v20  ;;  %v12281_v13 = vld [vmem:[#allocation6 + $0x710] sm:$0xf] }
 0x6e8   :  { %v12621_v20 = vld [vmem:[#allocation6 + $0x32c] sm:$0xf0] }
 0x6e9   :  { %10588 = vst [vmem:[#allocation8 + $0x48] sm:$0xff] %v10332_v44  ;;  %v12749_v44 = vld [vmem:[#allocation6 + $0x72c] sm:$0xf0]  ;;  %6421 = vmatpush.bf16.msra.mxu2 %v12026_v7 }
 0x6ea   :  { %v5758_v1 = vpop.f32.mrf.mxu2  ;;  %v5592_v35 = vpop.f32.mrf.mxu1  ;;  %v15628_v7 = vld [vmem:[#allocation38_spill] sm:$0xff] }
 0x6eb   :  { %v5759_v29 = vadd.f32 %v5758_v1, %v5590_v8 }
 0x6ec   :  { %v5927_v11 = vpop.f32.mrf.mxu3  ;;  %v5423_v62 = vpop.f32.mrf.mxu0 }
 0x6ed   :  { %v5928_v27 = vadd.f32 %v5927_v11, %v5759_v29  ;;  %v5593_v32 = vadd.f32 %v5592_v35, %v5423_v62  ;;  %5631 = vmatmul.bf16.gmra.mxu1 %v15624_v30  ;;  %v12282_v11 = vor.u32 %v12749_v44, %v12281_v13  ;;  %v15627_v35 = vld [vmem:[#allocation37_spill] sm:$0xff]  ;;  %v15629_v44 = vld [vmem:[#allocation42_spill] sm:$0xff] }
 0x6ef   :  { %5462 = vmatmul.bf16.gmra.mxu0 %v15622_v41  ;;  %v10336_v61 = vpack.c.bf16 %v5928_v27, %v15623_v31  ;;  %5800 = vmatmul.bf16.gmra.mxu2 %v15625_v60 }
 0x6f0   :  { %6590 = vmatpush.bf16.msra.mxu3 %v12282_v11 }
 0x6f1   :  { %5969 = vmatmul.bf16.gmra.mxu3 %v15626_v2  ;;  %10592 = vst [vmem:[#allocation8 + $0x68] sm:$0xff] %v10336_v61  ;;  %v11513_v2 = vld [vmem:[#allocation6 + $0x110] sm:$0xf] }
 0x6f2   :  { %v5761_v40 = vpop.f32.mrf.mxu2  ;;  %v5594_v41 = vpop.f32.mrf.mxu1  ;;  %v12557_v61 = vld [vmem:[#allocation6 + $0x12c] sm:$0xf0] }
 0x6f3   :  { %v5762_v8 = vadd.f32 %v5761_v40, %v5593_v32  ;;  %v11514_v30 = vor.u32 %v12557_v61, %v11513_v2  ;;  %v11770_v40 = vor.u32 %v12621_v20, %v11769_v9  ;;  %v15632_v2 = vld [vmem:[#allocation41_spill] sm:$0xff] }
 0x6f4   :  { %v5930_v1 = vpop.f32.mrf.mxu3  ;;  %v5425_v29 = vpop.f32.mrf.mxu0 }
 0x6f5   :  { %v5931_v62 = vadd.f32 %v5930_v1, %v5762_v8  ;;  %v5595_v31 = vadd.f32 %v5594_v41, %v5425_v29  ;;  %6083 = vmatpush.bf16.msra.mxu0 %v11514_v30  ;;  %6252 = vmatpush.bf16.msra.mxu1 %v11770_v40  ;;  %v15630_v41 = vld [vmem:[#allocation39_spill] sm:$0xff]  ;;  %v15631_v29 = vld [vmem:[#allocation40_spill] sm:$0xff] }
 0x6f7   :  { %v10340_v27 = vpack.c.bf16 %v5931_v62, %v15627_v35 }
 0x6f9   :  { %10596 = vst [vmem:[#allocation8 + $0x88] sm:$0xff] %v10340_v27 }
 0x6fa   :  { %v5763_v60 = vpop.f32.mrf.mxu2  ;;  %v5597_v48 = vpop.f32.mrf.mxu1 }
 0x6fb   :  { %v5764_v5 = vadd.f32 %v5763_v60, %v5595_v31 }
 0x6fc   :  { %v5932_v3 = vpop.f32.mrf.mxu3  ;;  %v5428_v32 = vpop.f32.mrf.mxu0 }
 0x6fd   :  { %v5933_v13 = vadd.f32 %v5932_v3, %v5764_v5  ;;  %v5598_v1 = vadd.f32 %v5597_v48, %v5428_v32  ;;  %5636 = vmatmul.bf16.gmra.mxu1 %v15630_v41  ;;  %v15633_v3 = vld [vmem:[#allocation43_spill] sm:$0xff] }
 0x6ff   :  { %5467 = vmatmul.bf16.gmra.mxu0 %v15628_v7  ;;  %v10344_v8 = vpack.c.bf16 %v5933_v13, %v15629_v44  ;;  %5805 = vmatmul.bf16.gmra.mxu2 %v15631_v29  ;;  %v15634_v13 = vld [vmem:[#allocation44_spill] sm:$0xff]  ;;  %v11737_v29 = vld [vmem:[#allocation6 + $0x2d0] sm:$0xf] }
 0x700   :  { %v15635_v44 = vld [vmem:[#allocation48_spill] sm:$0xff] }
 0x701   :  { %5974 = vmatmul.bf16.gmra.mxu3 %v15632_v2  ;;  %10600 = vst [vmem:[#allocation8 + $0xa8] sm:$0xff] %v10344_v8 }
 0x702   :  { %v5766_v60 = vpop.f32.mrf.mxu2  ;;  %v5599_v35 = vpop.f32.mrf.mxu1 }
 0x703   :  { %v5767_v11 = vadd.f32 %v5766_v60, %v5598_v1  ;;  %v15636_v1 = vld [vmem:[#allocation45_spill] sm:$0xff]  ;;  %v15637_v60 = vld [vmem:[#allocation46_spill] sm:$0xff] }
 0x704   :  { %v5935_v62 = vpop.f32.mrf.mxu3  ;;  %v5430_v9 = vpop.f32.mrf.mxu0 }
 0x705   :  { %v5936_v30 = vadd.f32 %v5935_v62, %v5767_v11  ;;  %v5600_v31 = vadd.f32 %v5599_v35, %v5430_v9  ;;  %v15638_v11 = vld [vmem:[#allocation47_spill] sm:$0xff] }
 0x707   :  { %v10348_v27 = vpack.c.bf16 %v5936_v30, %v15633_v3 }
 0x709   :  { %10604 = vst [vmem:[#allocation8 + $0xc8] sm:$0xff] %v10348_v27 }
 0x70a   :  { %v5768_v61 = vpop.f32.mrf.mxu2  ;;  %v5602_v32 = vpop.f32.mrf.mxu1 }
 0x70b   :  { %v5769_v20 = vadd.f32 %v5768_v61, %v5600_v31  ;;  %v15639_v31 = vld [vmem:[#allocation49_spill] sm:$0xff] }
 0x70c   :  { %v5937_v48 = vpop.f32.mrf.mxu3  ;;  %v5433_v5 = vpop.f32.mrf.mxu0 }
 0x70d   :  { %v5938_v40 = vadd.f32 %v5937_v48, %v5769_v20  ;;  %v5603_v2 = vadd.f32 %v5602_v32, %v5433_v5  ;;  %5641 = vmatmul.bf16.gmra.mxu1 %v15636_v1 }
 0x70f   :  { %5472 = vmatmul.bf16.gmra.mxu0 %v15634_v13  ;;  %v10352_v8 = vpack.c.bf16 %v5938_v40, %v15635_v44  ;;  %5810 = vmatmul.bf16.gmra.mxu2 %v15637_v60  ;;  %v15640_v60 = vld [vmem:[#allocation50_spill] sm:$0xff] }
 0x711   :  { %5979 = vmatmul.bf16.gmra.mxu3 %v15638_v11  ;;  %10608 = vst [vmem:[#allocation8 + $0xe8] sm:$0xff] %v10352_v8  ;;  %v15641_v11 = vld [vmem:[#allocation54_spill] sm:$0xff] }
 0x712   :  { %v5771_v62 = vpop.f32.mrf.mxu2  ;;  %v5604_v3 = vpop.f32.mrf.mxu1 }
 0x713   :  { %v5772_v9 = vadd.f32 %v5771_v62, %v5603_v2  ;;  %v15642_v2 = vld [vmem:[#allocation51_spill] sm:$0xff]  ;;  %v15643_v62 = vld [vmem:[#allocation52_spill] sm:$0xff] }
 0x714   :  { %v5940_v35 = vpop.f32.mrf.mxu3  ;;  %v5435_v30 = vpop.f32.mrf.mxu0 }
 0x715   :  { %v5941_v27 = vadd.f32 %v5940_v35, %v5772_v9  ;;  %v5605_v20 = vadd.f32 %v5604_v3, %v5435_v30  ;;  %v15644_v9 = vld [vmem:[#allocation53_spill] sm:$0xff] }
 0x717   :  { %v10356_v61 = vpack.c.bf16 %v5941_v27, %v15639_v31 }
 0x719   :  { %10612 = vst [vmem:[#allocation8 + $0x108] sm:$0xff] %v10356_v61 }
 0x71a   :  { %v5773_v48 = vpop.f32.mrf.mxu2  ;;  %v5607_v44 = vpop.f32.mrf.mxu1 }
 0x71b   :  { %v5774_v40 = vadd.f32 %v5773_v48, %v5605_v20  ;;  %v15645_v20 = vld [vmem:[#allocation55_spill] sm:$0xff] }
 0x71c   :  { %v5942_v5 = vpop.f32.mrf.mxu3  ;;  %v5438_v32 = vpop.f32.mrf.mxu0 }
 0x71d   :  { %v5943_v1 = vadd.f32 %v5942_v5, %v5774_v40  ;;  %v5608_v13 = vadd.f32 %v5607_v44, %v5438_v32  ;;  %5646 = vmatmul.bf16.gmra.mxu1 %v15642_v2 }
 0x71f   :  { %5477 = vmatmul.bf16.gmra.mxu0 %v15640_v60  ;;  %v10360_v8 = vpack.c.bf16 %v5943_v1, %v15641_v11  ;;  %5815 = vmatmul.bf16.gmra.mxu2 %v15643_v62  ;;  %v15646_v62 = vld [vmem:[#allocation56_spill] sm:$0xff] }
 0x721   :  { %5984 = vmatmul.bf16.gmra.mxu3 %v15644_v9  ;;  %10616 = vst [vmem:[#allocation8 + $0x128] sm:$0xff] %v10360_v8  ;;  %v15647_v9 = vld [vmem:[#allocation60_spill] sm:$0xff] }
 0x722   :  { %v5776_v35 = vpop.f32.mrf.mxu2  ;;  %v5609_v31 = vpop.f32.mrf.mxu1 }
 0x723   :  { %v5777_v30 = vadd.f32 %v5776_v35, %v5608_v13  ;;  %v15648_v13 = vld [vmem:[#allocation57_spill] sm:$0xff]  ;;  %v15649_v35 = vld [vmem:[#allocation58_spill] sm:$0xff] }
 0x724   :  { %v5945_v3 = vpop.f32.mrf.mxu3  ;;  %v5440_v27 = vpop.f32.mrf.mxu0 }
 0x725   :  { %v5946_v61 = vadd.f32 %v5945_v3, %v5777_v30  ;;  %v5610_v40 = vadd.f32 %v5609_v31, %v5440_v27  ;;  %v15650_v30 = vld [vmem:[#allocation59_spill] sm:$0xff]  ;;  %v11993_v3 = vld [vmem:[#allocation6 + $0x4d0] sm:$0xf] }
 0x726   :  { %v12677_v27 = vld [vmem:[#allocation6 + $0x4ec] sm:$0xf0] }
 0x727   :  { %v10364_v48 = vpack.c.bf16 %v5946_v61, %v15645_v20  ;;  %v11994_v61 = vor.u32 %v12677_v27, %v11993_v3  ;;  %v12249_v20 = vld [vmem:[#allocation6 + $0x6d0] sm:$0xf] }
 0x728   :  { %v12613_v3 = vld [vmem:[#allocation6 + $0x2ec] sm:$0xf0] }
 0x729   :  { %10620 = vst [vmem:[#allocation8 + $0x148] sm:$0xff] %v10364_v48  ;;  %v12741_v48 = vld [vmem:[#allocation6 + $0x6ec] sm:$0xf0]  ;;  %6422 = vmatpush.bf16.msra.mxu2 %v11994_v61 }
 0x72a   :  { %v5778_v5 = vpop.f32.mrf.mxu2  ;;  %v5612_v44 = vpop.f32.mrf.mxu1  ;;  %v15652_v61 = vld [vmem:[#allocation62_spill] sm:$0xff] }
 0x72b   :  { %v5779_v1 = vadd.f32 %v5778_v5, %v5610_v40 }
 0x72c   :  { %v5947_v11 = vpop.f32.mrf.mxu3  ;;  %v5443_v32 = vpop.f32.mrf.mxu0 }
 0x72d   :  { %v5948_v2 = vadd.f32 %v5947_v11, %v5779_v1  ;;  %v5613_v60 = vadd.f32 %v5612_v44, %v5443_v32  ;;  %5651 = vmatmul.bf16.gmra.mxu1 %v15648_v13  ;;  %v12250_v11 = vor.u32 %v12741_v48, %v12249_v20  ;;  %v15653_v48 = vld [vmem:[#allocation66_spill] sm:$0xff] }
 0x72f   :  { %5482 = vmatmul.bf16.gmra.mxu0 %v15646_v62  ;;  %v10368_v8 = vpack.c.bf16 %v5948_v2, %v15647_v9  ;;  %5820 = vmatmul.bf16.gmra.mxu2 %v15649_v35  ;;  %v15651_v9 = vld [vmem:[#allocation61_spill] sm:$0xff] }
 0x730   :  { %6591 = vmatpush.bf16.msra.mxu3 %v12250_v11 }
 0x731   :  { %5989 = vmatmul.bf16.gmra.mxu3 %v15650_v30  ;;  %10624 = vst [vmem:[#allocation8 + $0x168] sm:$0xff] %v10368_v8  ;;  %v11481_v30 = vld [vmem:[#allocation6 + $0xd0] sm:$0xf] }
 0x732   :  { %v5781_v31 = vpop.f32.mrf.mxu2  ;;  %v5614_v62 = vpop.f32.mrf.mxu1  ;;  %v12549_v8 = vld [vmem:[#allocation6 + $0xec] sm:$0xf0] }
 0x733   :  { %v5782_v40 = vadd.f32 %v5781_v31, %v5613_v60  ;;  %v11482_v13 = vor.u32 %v12549_v8, %v11481_v30  ;;  %v11738_v31 = vor.u32 %v12613_v3, %v11737_v29  ;;  %v15656_v30 = vld [vmem:[#allocation65_spill] sm:$0xff] }
 0x734   :  { %v5950_v5 = vpop.f32.mrf.mxu3  ;;  %v5445_v1 = vpop.f32.mrf.mxu0 }
 0x735   :  { %v5951_v2 = vadd.f32 %v5950_v5, %v5782_v40  ;;  %v5615_v44 = vadd.f32 %v5614_v62, %v5445_v1  ;;  %6084 = vmatpush.bf16.msra.mxu0 %v11482_v13  ;;  %6253 = vmatpush.bf16.msra.mxu1 %v11738_v31  ;;  %v15654_v62 = vld [vmem:[#allocation63_spill] sm:$0xff]  ;;  %v15655_v1 = vld [vmem:[#allocation64_spill] sm:$0xff] }
 0x737   :  { %v10372_v32 = vpack.c.bf16 %v5951_v2, %v15651_v9 }
 0x739   :  { %10628 = vst [vmem:[#allocation8 + $0x188] sm:$0xff] %v10372_v32 }
 0x73a   :  { %v5783_v35 = vpop.f32.mrf.mxu2  ;;  %v5617_v7 = vpop.f32.mrf.mxu1 }
 0x73b   :  { %v5784_v27 = vadd.f32 %v5783_v35, %v5615_v44 }
 0x73c   :  { %v5952_v41 = vpop.f32.mrf.mxu3  ;;  %v5448_v60 = vpop.f32.mrf.mxu0 }
 0x73d   :  { %v5953_v20 = vadd.f32 %v5952_v41, %v5784_v27  ;;  %v5618_v5 = vadd.f32 %v5617_v7, %v5448_v60  ;;  %5656 = vmatmul.bf16.gmra.mxu1 %v15654_v62  ;;  %v15657_v41 = vld [vmem:[#allocation67_spill] sm:$0xff] }
 0x73f   :  { %5487 = vmatmul.bf16.gmra.mxu0 %v15652_v61  ;;  %v10376_v40 = vpack.c.bf16 %v5953_v20, %v15653_v48  ;;  %5825 = vmatmul.bf16.gmra.mxu2 %v15655_v1  ;;  %v15658_v20 = vld [vmem:[#allocation68_spill] sm:$0xff]  ;;  %v11705_v1 = vld [vmem:[#allocation6 + $0x290] sm:$0xf] }
 0x740   :  { %v15659_v48 = vld [vmem:[#allocation72_spill] sm:$0xff] }
 0x741   :  { %5994 = vmatmul.bf16.gmra.mxu3 %v15656_v30  ;;  %10632 = vst [vmem:[#allocation8 + $0x1a8] sm:$0xff] %v10376_v40 }
 0x742   :  { %v5786_v35 = vpop.f32.mrf.mxu2  ;;  %v5619_v9 = vpop.f32.mrf.mxu1 }
 0x743   :  { %v5787_v11 = vadd.f32 %v5786_v35, %v5618_v5  ;;  %v15660_v5 = vld [vmem:[#allocation69_spill] sm:$0xff]  ;;  %v15661_v35 = vld [vmem:[#allocation70_spill] sm:$0xff] }
 0x744   :  { %v5955_v2 = vpop.f32.mrf.mxu3  ;;  %v5450_v29 = vpop.f32.mrf.mxu0 }
 0x745   :  { %v5956_v13 = vadd.f32 %v5955_v2, %v5787_v11  ;;  %v5620_v44 = vadd.f32 %v5619_v9, %v5450_v29  ;;  %v15662_v11 = vld [vmem:[#allocation71_spill] sm:$0xff] }
 0x747   :  { %v10380_v32 = vpack.c.bf16 %v5956_v13, %v15657_v41 }
 0x749   :  { %10636 = vst [vmem:[#allocation8 + $0x1c8] sm:$0xff] %v10380_v32 }
 0x74a   :  { %v5788_v8 = vpop.f32.mrf.mxu2  ;;  %v5622_v60 = vpop.f32.mrf.mxu1 }
 0x74b   :  { %v5789_v3 = vadd.f32 %v5788_v8, %v5620_v44  ;;  %v15663_v44 = vld [vmem:[#allocation73_spill] sm:$0xff] }
 0x74c   :  { %v5957_v7 = vpop.f32.mrf.mxu3  ;;  %v5453_v27 = vpop.f32.mrf.mxu0 }
 0x74d   :  { %v5958_v31 = vadd.f32 %v5957_v7, %v5789_v3  ;;  %v5623_v30 = vadd.f32 %v5622_v60, %v5453_v27  ;;  %5661 = vmatmul.bf16.gmra.mxu1 %v15660_v5 }
 0x74f   :  { %5492 = vmatmul.bf16.gmra.mxu0 %v15658_v20  ;;  %v10384_v40 = vpack.c.bf16 %v5958_v31, %v15659_v48  ;;  %5830 = vmatmul.bf16.gmra.mxu2 %v15661_v35  ;;  %v15664_v35 = vld [vmem:[#allocation74_spill] sm:$0xff] }
 0x751   :  { %5999 = vmatmul.bf16.gmra.mxu3 %v15662_v11  ;;  %10640 = vst [vmem:[#allocation8 + $0x1e8] sm:$0xff] %v10384_v40  ;;  %v15665_v11 = vld [vmem:[#allocation78_spill] sm:$0xff] }
 0x752   :  { %v5791_v2 = vpop.f32.mrf.mxu2  ;;  %v5624_v41 = vpop.f32.mrf.mxu1 }
 0x753   :  { %v5792_v29 = vadd.f32 %v5791_v2, %v5623_v30  ;;  %v15666_v30 = vld [vmem:[#allocation75_spill] sm:$0xff]  ;;  %v15667_v2 = vld [vmem:[#allocation76_spill] sm:$0xff] }
 0x754   :  { %v5960_v9 = vpop.f32.mrf.mxu3  ;;  %v5455_v13 = vpop.f32.mrf.mxu0 }
 0x755   :  { %v5961_v32 = vadd.f32 %v5960_v9, %v5792_v29  ;;  %v5625_v3 = vadd.f32 %v5624_v41, %v5455_v13  ;;  %v15668_v29 = vld [vmem:[#allocation77_spill] sm:$0xff] }
 0x757   :  { %v10388_v8 = vpack.c.bf16 %v5961_v32, %v15663_v44 }
 0x759   :  { %10644 = vst [vmem:[#allocation8 + $0x208] sm:$0xff] %v10388_v8 }
 0x75a   :  { %v5793_v7 = vpop.f32.mrf.mxu2  ;;  %v5627_v48 = vpop.f32.mrf.mxu1 }
 0x75b   :  { %v5794_v31 = vadd.f32 %v5793_v7, %v5625_v3  ;;  %v15669_v3 = vld [vmem:[#allocation79_spill] sm:$0xff] }
 0x75c   :  { %v5962_v27 = vpop.f32.mrf.mxu3  ;;  %v5458_v60 = vpop.f32.mrf.mxu0 }
 0x75d   :  { %v5963_v5 = vadd.f32 %v5962_v27, %v5794_v31  ;;  %v5628_v20 = vadd.f32 %v5627_v48, %v5458_v60  ;;  %5666 = vmatmul.bf16.gmra.mxu1 %v15666_v30 }
 0x75f   :  { %5497 = vmatmul.bf16.gmra.mxu0 %v15664_v35  ;;  %v10392_v40 = vpack.c.bf16 %v5963_v5, %v15665_v11  ;;  %5835 = vmatmul.bf16.gmra.mxu2 %v15667_v2  ;;  %v15670_v2 = vld [vmem:[#allocation80_spill] sm:$0xff] }
 0x761   :  { %6004 = vmatmul.bf16.gmra.mxu3 %v15668_v29  ;;  %10648 = vst [vmem:[#allocation8 + $0x228] sm:$0xff] %v10392_v40  ;;  %v15671_v29 = vld [vmem:[#allocation84_spill] sm:$0xff] }
 0x762   :  { %v5796_v9 = vpop.f32.mrf.mxu2  ;;  %v5629_v44 = vpop.f32.mrf.mxu1 }
 0x763   :  { %v5797_v13 = vadd.f32 %v5796_v9, %v5628_v20  ;;  %v15672_v20 = vld [vmem:[#allocation81_spill] sm:$0xff]  ;;  %v15673_v9 = vld [vmem:[#allocation82_spill] sm:$0xff] }
 0x764   :  { %v5965_v41 = vpop.f32.mrf.mxu3  ;;  %v5460_v32 = vpop.f32.mrf.mxu0 }
 0x765   :  { %v5966_v8 = vadd.f32 %v5965_v41, %v5797_v13  ;;  %v5630_v31 = vadd.f32 %v5629_v44, %v5460_v32  ;;  %v15674_v13 = vld [vmem:[#allocation83_spill] sm:$0xff]  ;;  %v11961_v41 = vld [vmem:[#allocation6 + $0x490] sm:$0xf] }
 0x766   :  { %v12669_v32 = vld [vmem:[#allocation6 + $0x4ac] sm:$0xf0] }
 0x767   :  { %v10396_v7 = vpack.c.bf16 %v5966_v8, %v15669_v3  ;;  %v11962_v8 = vor.u32 %v12669_v32, %v11961_v41  ;;  %v12217_v3 = vld [vmem:[#allocation6 + $0x690] sm:$0xf] }
 0x768   :  { %v12605_v41 = vld [vmem:[#allocation6 + $0x2ac] sm:$0xf0] }
 0x769   :  { %10652 = vst [vmem:[#allocation8 + $0x248] sm:$0xff] %v10396_v7  ;;  %v12733_v7 = vld [vmem:[#allocation6 + $0x6ac] sm:$0xf0]  ;;  %6423 = vmatpush.bf16.msra.mxu2 %v11962_v8 }
 0x76a   :  { %v5798_v27 = vpop.f32.mrf.mxu2  ;;  %v5632_v48 = vpop.f32.mrf.mxu1  ;;  %v15676_v8 = vld [vmem:[#allocation86_spill] sm:$0xff] }
 0x76b   :  { %v5799_v5 = vadd.f32 %v5798_v27, %v5630_v31 }
 0x76c   :  { %v5967_v11 = vpop.f32.mrf.mxu3  ;;  %v5463_v60 = vpop.f32.mrf.mxu0 }
 0x76d   :  { %v5968_v30 = vadd.f32 %v5967_v11, %v5799_v5  ;;  %v5633_v35 = vadd.f32 %v5632_v48, %v5463_v60  ;;  %5671 = vmatmul.bf16.gmra.mxu1 %v15672_v20  ;;  %v12218_v11 = vor.u32 %v12733_v7, %v12217_v3  ;;  %v15677_v7 = vld [vmem:[#allocation90_spill] sm:$0xff] }
 0x76f   :  { %5502 = vmatmul.bf16.gmra.mxu0 %v15670_v2  ;;  %v10400_v40 = vpack.c.bf16 %v5968_v30, %v15671_v29  ;;  %5840 = vmatmul.bf16.gmra.mxu2 %v15673_v9  ;;  %v15675_v29 = vld [vmem:[#allocation85_spill] sm:$0xff] }
 0x770   :  { %6592 = vmatpush.bf16.msra.mxu3 %v12218_v11 }
 0x771   :  { %6009 = vmatmul.bf16.gmra.mxu3 %v15674_v13  ;;  %10656 = vst [vmem:[#allocation8 + $0x268] sm:$0xff] %v10400_v40  ;;  %v11449_v13 = vld [vmem:[#allocation6 + $0x90] sm:$0xf] }
 0x772   :  { %v5801_v44 = vpop.f32.mrf.mxu2  ;;  %v5634_v2 = vpop.f32.mrf.mxu1  ;;  %v12541_v40 = vld [vmem:[#allocation6 + $0xac] sm:$0xf0] }
 0x773   :  { %v5802_v31 = vadd.f32 %v5801_v44, %v5633_v35  ;;  %v11450_v20 = vor.u32 %v12541_v40, %v11449_v13  ;;  %v11706_v44 = vor.u32 %v12605_v41, %v11705_v1  ;;  %v15680_v13 = vld [vmem:[#allocation89_spill] sm:$0xff] }
 0x774   :  { %v5970_v27 = vpop.f32.mrf.mxu3  ;;  %v5465_v5 = vpop.f32.mrf.mxu0 }
 0x775   :  { %v5971_v30 = vadd.f32 %v5970_v27, %v5802_v31  ;;  %v5635_v48 = vadd.f32 %v5634_v2, %v5465_v5  ;;  %6085 = vmatpush.bf16.msra.mxu0 %v11450_v20  ;;  %6254 = vmatpush.bf16.msra.mxu1 %v11706_v44  ;;  %v15678_v2 = vld [vmem:[#allocation87_spill] sm:$0xff]  ;;  %v15679_v5 = vld [vmem:[#allocation88_spill] sm:$0xff] }
 0x777   :  { %v10404_v60 = vpack.c.bf16 %v5971_v30, %v15675_v29 }
 0x779   :  { %10660 = vst [vmem:[#allocation8 + $0x288] sm:$0xff] %v10404_v60 }
 0x77a   :  { %v5803_v9 = vpop.f32.mrf.mxu2  ;;  %v5637_v61 = vpop.f32.mrf.mxu1 }
 0x77b   :  { %v5804_v32 = vadd.f32 %v5803_v9, %v5635_v48 }
 0x77c   :  { %v5972_v62 = vpop.f32.mrf.mxu3  ;;  %v5468_v35 = vpop.f32.mrf.mxu0 }
 0x77d   :  { %v5973_v3 = vadd.f32 %v5972_v62, %v5804_v32  ;;  %v5638_v27 = vadd.f32 %v5637_v61, %v5468_v35  ;;  %5676 = vmatmul.bf16.gmra.mxu1 %v15678_v2  ;;  %v15681_v62 = vld [vmem:[#allocation91_spill] sm:$0xff] }
 0x77f   :  { %5507 = vmatmul.bf16.gmra.mxu0 %v15676_v8  ;;  %v10408_v31 = vpack.c.bf16 %v5973_v3, %v15677_v7  ;;  %5845 = vmatmul.bf16.gmra.mxu2 %v15679_v5  ;;  %v15682_v3 = vld [vmem:[#allocation92_spill] sm:$0xff]  ;;  %v11673_v5 = vld [vmem:[#allocation6 + $0x250] sm:$0xf] }
 0x780   :  { %v15683_v7 = vld [vmem:[#allocation96_spill] sm:$0xff] }
 0x781   :  { %6014 = vmatmul.bf16.gmra.mxu3 %v15680_v13  ;;  %10664 = vst [vmem:[#allocation8 + $0x2a8] sm:$0xff] %v10408_v31 }
 0x782   :  { %v5806_v9 = vpop.f32.mrf.mxu2  ;;  %v5639_v29 = vpop.f32.mrf.mxu1 }
 0x783   :  { %v5807_v11 = vadd.f32 %v5806_v9, %v5638_v27  ;;  %v15684_v27 = vld [vmem:[#allocation93_spill] sm:$0xff]  ;;  %v15685_v9 = vld [vmem:[#allocation94_spill] sm:$0xff] }
 0x784   :  { %v5975_v30 = vpop.f32.mrf.mxu3  ;;  %v5470_v1 = vpop.f32.mrf.mxu0 }
 0x785   :  { %v5976_v20 = vadd.f32 %v5975_v30, %v5807_v11  ;;  %v5640_v48 = vadd.f32 %v5639_v29, %v5470_v1  ;;  %v15686_v11 = vld [vmem:[#allocation95_spill] sm:$0xff] }
 0x787   :  { %v10412_v60 = vpack.c.bf16 %v5976_v20, %v15681_v62 }
 0x789   :  { %10668 = vst [vmem:[#allocation8 + $0x2c8] sm:$0xff] %v10412_v60 }
 0x78a   :  { %v5808_v40 = vpop.f32.mrf.mxu2  ;;  %v5642_v35 = vpop.f32.mrf.mxu1 }
 0x78b   :  { %v5809_v41 = vadd.f32 %v5808_v40, %v5640_v48  ;;  %v15687_v48 = vld [vmem:[#allocation97_spill] sm:$0xff] }
 0x78c   :  { %v5977_v61 = vpop.f32.mrf.mxu3  ;;  %v5473_v32 = vpop.f32.mrf.mxu0 }
 0x78d   :  { %v5978_v44 = vadd.f32 %v5977_v61, %v5809_v41  ;;  %v5643_v13 = vadd.f32 %v5642_v35, %v5473_v32  ;;  %5681 = vmatmul.bf16.gmra.mxu1 %v15684_v27 }
 0x78f   :  { %5512 = vmatmul.bf16.gmra.mxu0 %v15682_v3  ;;  %v10416_v31 = vpack.c.bf16 %v5978_v44, %v15683_v7  ;;  %5850 = vmatmul.bf16.gmra.mxu2 %v15685_v9  ;;  %v15688_v9 = vld [vmem:[#allocation98_spill] sm:$0xff] }
 0x791   :  { %6019 = vmatmul.bf16.gmra.mxu3 %v15686_v11  ;;  %10672 = vst [vmem:[#allocation8 + $0x2e8] sm:$0xff] %v10416_v31  ;;  %v15689_v11 = vld [vmem:[#allocation102_spill] sm:$0xff] }
 0x792   :  { %v5811_v30 = vpop.f32.mrf.mxu2  ;;  %v5644_v62 = vpop.f32.mrf.mxu1 }
 0x793   :  { %v5812_v1 = vadd.f32 %v5811_v30, %v5643_v13  ;;  %v15690_v13 = vld [vmem:[#allocation99_spill] sm:$0xff]  ;;  %v15691_v30 = vld [vmem:[#allocation100_spill] sm:$0xff] }
 0x794   :  { %v5980_v29 = vpop.f32.mrf.mxu3  ;;  %v5475_v20 = vpop.f32.mrf.mxu0 }
 0x795   :  { %v5981_v60 = vadd.f32 %v5980_v29, %v5812_v1  ;;  %v5645_v41 = vadd.f32 %v5644_v62, %v5475_v20  ;;  %v15692_v1 = vld [vmem:[#allocation101_spill] sm:$0xff] }
 0x797   :  { %v10420_v40 = vpack.c.bf16 %v5981_v60, %v15687_v48 }
 0x799   :  { %10676 = vst [vmem:[#allocation8 + $0x308] sm:$0xff] %v10420_v40 }
 0x79a   :  { %v5813_v61 = vpop.f32.mrf.mxu2  ;;  %v5647_v7 = vpop.f32.mrf.mxu1 }
 0x79b   :  { %v5814_v44 = vadd.f32 %v5813_v61, %v5645_v41  ;;  %v15693_v41 = vld [vmem:[#allocation103_spill] sm:$0xff] }
 0x79c   :  { %v5982_v32 = vpop.f32.mrf.mxu3  ;;  %v5478_v35 = vpop.f32.mrf.mxu0 }
 0x79d   :  { %v5983_v27 = vadd.f32 %v5982_v32, %v5814_v44  ;;  %v5648_v3 = vadd.f32 %v5647_v7, %v5478_v35  ;;  %5686 = vmatmul.bf16.gmra.mxu1 %v15690_v13 }
 0x79f   :  { %5517 = vmatmul.bf16.gmra.mxu0 %v15688_v9  ;;  %v10424_v31 = vpack.c.bf16 %v5983_v27, %v15689_v11  ;;  %5855 = vmatmul.bf16.gmra.mxu2 %v15691_v30  ;;  %v15694_v30 = vld [vmem:[#allocation104_spill] sm:$0xff] }
 0x7a1   :  { %6024 = vmatmul.bf16.gmra.mxu3 %v15692_v1  ;;  %10680 = vst [vmem:[#allocation8 + $0x328] sm:$0xff] %v10424_v31  ;;  %v15695_v1 = vld [vmem:[#allocation108_spill] sm:$0xff] }
 0x7a2   :  { %v5816_v29 = vpop.f32.mrf.mxu2  ;;  %v5649_v48 = vpop.f32.mrf.mxu1 }
 0x7a3   :  { %v5817_v20 = vadd.f32 %v5816_v29, %v5648_v3  ;;  %v15696_v3 = vld [vmem:[#allocation105_spill] sm:$0xff]  ;;  %v15697_v29 = vld [vmem:[#allocation106_spill] sm:$0xff] }
 0x7a4   :  { %v5985_v62 = vpop.f32.mrf.mxu3  ;;  %v5480_v60 = vpop.f32.mrf.mxu0 }
 0x7a5   :  { %v5986_v40 = vadd.f32 %v5985_v62, %v5817_v20  ;;  %v5650_v44 = vadd.f32 %v5649_v48, %v5480_v60  ;;  %v15698_v20 = vld [vmem:[#allocation107_spill] sm:$0xff]  ;;  %v11929_v62 = vld [vmem:[#allocation6 + $0x450] sm:$0xf] }
 0x7a6   :  { %v12661_v60 = vld [vmem:[#allocation6 + $0x46c] sm:$0xf0] }
 0x7a7   :  { %v10428_v61 = vpack.c.bf16 %v5986_v40, %v15693_v41  ;;  %v11930_v40 = vor.u32 %v12661_v60, %v11929_v62  ;;  %v12185_v41 = vld [vmem:[#allocation6 + $0x650] sm:$0xf] }
 0x7a8   :  { %v12597_v62 = vld [vmem:[#allocation6 + $0x26c] sm:$0xf0] }
 0x7a9   :  { %10684 = vst [vmem:[#allocation8 + $0x348] sm:$0xff] %v10428_v61  ;;  %v12725_v61 = vld [vmem:[#allocation6 + $0x66c] sm:$0xf0]  ;;  %6424 = vmatpush.bf16.msra.mxu2 %v11930_v40 }
 0x7aa   :  { %v5818_v32 = vpop.f32.mrf.mxu2  ;;  %v5652_v7 = vpop.f32.mrf.mxu1  ;;  %v15700_v40 = vld [vmem:[#allocation110_spill] sm:$0xff] }
 0x7ab   :  { %v5819_v27 = vadd.f32 %v5818_v32, %v5650_v44 }
 0x7ac   :  { %v5987_v11 = vpop.f32.mrf.mxu3  ;;  %v5483_v35 = vpop.f32.mrf.mxu0 }
 0x7ad   :  { %v5988_v13 = vadd.f32 %v5987_v11, %v5819_v27  ;;  %v5653_v9 = vadd.f32 %v5652_v7, %v5483_v35  ;;  %5691 = vmatmul.bf16.gmra.mxu1 %v15696_v3  ;;  %v12186_v11 = vor.u32 %v12725_v61, %v12185_v41  ;;  %v15701_v61 = vld [vmem:[#allocation114_spill] sm:$0xff] }
 0x7af   :  { %5522 = vmatmul.bf16.gmra.mxu0 %v15694_v30  ;;  %v10432_v31 = vpack.c.bf16 %v5988_v13, %v15695_v1  ;;  %5860 = vmatmul.bf16.gmra.mxu2 %v15697_v29  ;;  %v15699_v1 = vld [vmem:[#allocation109_spill] sm:$0xff] }
 0x7b0   :  { %6593 = vmatpush.bf16.msra.mxu3 %v12186_v11 }
 0x7b1   :  { %6029 = vmatmul.bf16.gmra.mxu3 %v15698_v20  ;;  %10688 = vst [vmem:[#allocation8 + $0x368] sm:$0xff] %v10432_v31  ;;  %v11417_v20 = vld [vmem:[#allocation6 + $0x50] sm:$0xf] }
 0x7b2   :  { %v5821_v48 = vpop.f32.mrf.mxu2  ;;  %v5654_v30 = vpop.f32.mrf.mxu1  ;;  %v12533_v31 = vld [vmem:[#allocation6 + $0x6c] sm:$0xf0] }
 0x7b3   :  { %v5822_v44 = vadd.f32 %v5821_v48, %v5653_v9  ;;  %v11418_v3 = vor.u32 %v12533_v31, %v11417_v20  ;;  %v11674_v48 = vor.u32 %v12597_v62, %v11673_v5  ;;  %v15704_v20 = vld [vmem:[#allocation113_spill] sm:$0xff] }
 0x7b4   :  { %v5990_v32 = vpop.f32.mrf.mxu3  ;;  %v5485_v27 = vpop.f32.mrf.mxu0 }
 0x7b5   :  { %v5991_v13 = vadd.f32 %v5990_v32, %v5822_v44  ;;  %v5655_v7 = vadd.f32 %v5654_v30, %v5485_v27  ;;  %6086 = vmatpush.bf16.msra.mxu0 %v11418_v3  ;;  %6255 = vmatpush.bf16.msra.mxu1 %v11674_v48  ;;  %v15702_v30 = vld [vmem:[#allocation111_spill] sm:$0xff]  ;;  %v15703_v27 = vld [vmem:[#allocation112_spill] sm:$0xff] }
 0x7b7   :  { %v10436_v35 = vpack.c.bf16 %v5991_v13, %v15699_v1 }
 0x7b9   :  { %10692 = vst [vmem:[#allocation8 + $0x388] sm:$0xff] %v10436_v35 }
 0x7ba   :  { %v5823_v29 = vpop.f32.mrf.mxu2  ;;  %v5657_v8 = vpop.f32.mrf.mxu1 }
 0x7bb   :  { %v5824_v60 = vadd.f32 %v5823_v29, %v5655_v7 }
 0x7bc   :  { %v5992_v2 = vpop.f32.mrf.mxu3  ;;  %v5488_v9 = vpop.f32.mrf.mxu0 }
 0x7bd   :  { %v5993_v41 = vadd.f32 %v5992_v2, %v5824_v60  ;;  %v5658_v32 = vadd.f32 %v5657_v8, %v5488_v9  ;;  %5696 = vmatmul.bf16.gmra.mxu1 %v15702_v30  ;;  %v15705_v2 = vld [vmem:[#allocation115_spill] sm:$0xff] }
 0x7bf   :  { %5527 = vmatmul.bf16.gmra.mxu0 %v15700_v40  ;;  %v10440_v44 = vpack.c.bf16 %v5993_v41, %v15701_v61  ;;  %5865 = vmatmul.bf16.gmra.mxu2 %v15703_v27  ;;  %v15706_v41 = vld [vmem:[#allocation116_spill] sm:$0xff]  ;;  %v11641_v27 = vld [vmem:[#allocation6 + $0x210] sm:$0xf] }
 0x7c0   :  { %v15707_v61 = vld [vmem:[#allocation120_spill] sm:$0xff] }
 0x7c1   :  { %6034 = vmatmul.bf16.gmra.mxu3 %v15704_v20  ;;  %10696 = vst [vmem:[#allocation8 + $0x3a8] sm:$0xff] %v10440_v44 }
 0x7c2   :  { %v5826_v29 = vpop.f32.mrf.mxu2  ;;  %v5659_v1 = vpop.f32.mrf.mxu1 }
 0x7c3   :  { %v5827_v11 = vadd.f32 %v5826_v29, %v5658_v32  ;;  %v15708_v32 = vld [vmem:[#allocation117_spill] sm:$0xff]  ;;  %v15709_v29 = vld [vmem:[#allocation118_spill] sm:$0xff] }
 0x7c4   :  { %v5995_v13 = vpop.f32.mrf.mxu3  ;;  %v5490_v5 = vpop.f32.mrf.mxu0 }
 0x7c5   :  { %v5996_v3 = vadd.f32 %v5995_v13, %v5827_v11  ;;  %v5660_v7 = vadd.f32 %v5659_v1, %v5490_v5  ;;  %v15710_v11 = vld [vmem:[#allocation119_spill] sm:$0xff] }
 0x7c7   :  { %v10444_v35 = vpack.c.bf16 %v5996_v3, %v15705_v2 }
 0x7c9   :  { %10700 = vst [vmem:[#allocation8 + $0x3c8] sm:$0xff] %v10444_v35 }
 0x7ca   :  { %v5828_v31 = vpop.f32.mrf.mxu2  ;;  %v5662_v9 = vpop.f32.mrf.mxu1 }
 0x7cb   :  { %v5829_v62 = vadd.f32 %v5828_v31, %v5660_v7  ;;  %v15711_v7 = vld [vmem:[#allocation121_spill] sm:$0xff] }
 0x7cc   :  { %v5997_v8 = vpop.f32.mrf.mxu3  ;;  %v5493_v60 = vpop.f32.mrf.mxu0 }
 0x7cd   :  { %v5998_v48 = vadd.f32 %v5997_v8, %v5829_v62  ;;  %v5663_v20 = vadd.f32 %v5662_v9, %v5493_v60  ;;  %5701 = vmatmul.bf16.gmra.mxu1 %v15708_v32 }
 0x7cf   :  { %5532 = vmatmul.bf16.gmra.mxu0 %v15706_v41  ;;  %v10448_v44 = vpack.c.bf16 %v5998_v48, %v15707_v61  ;;  %5870 = vmatmul.bf16.gmra.mxu2 %v15709_v29  ;;  %v15712_v29 = vld [vmem:[#allocation122_spill] sm:$0xff] }
 0x7d1   :  { %6039 = vmatmul.bf16.gmra.mxu3 %v15710_v11  ;;  %10704 = vst [vmem:[#allocation8 + $0x3e8] sm:$0xff] %v10448_v44  ;;  %v15713_v11 = vld [vmem:[#allocation126_spill] sm:$0xff] }
 0x7d2   :  { %v5831_v13 = vpop.f32.mrf.mxu2  ;;  %v5664_v2 = vpop.f32.mrf.mxu1 }
 0x7d3   :  { %v5832_v5 = vadd.f32 %v5831_v13, %v5663_v20  ;;  %v15714_v20 = vld [vmem:[#allocation123_spill] sm:$0xff]  ;;  %v15715_v13 = vld [vmem:[#allocation124_spill] sm:$0xff] }
 0x7d4   :  { %v6000_v1 = vpop.f32.mrf.mxu3  ;;  %v5495_v3 = vpop.f32.mrf.mxu0 }
 0x7d5   :  { %v6001_v35 = vadd.f32 %v6000_v1, %v5832_v5  ;;  %v5665_v62 = vadd.f32 %v5664_v2, %v5495_v3  ;;  %v15716_v5 = vld [vmem:[#allocation125_spill] sm:$0xff] }
 0x7d7   :  { %v10452_v31 = vpack.c.bf16 %v6001_v35, %v15711_v7 }
 0x7d9   :  { %10708 = vst [vmem:[#allocation8 + $0x408] sm:$0xff] %v10452_v31 }
 0x7da   :  { %v5833_v8 = vpop.f32.mrf.mxu2  ;;  %v5667_v61 = vpop.f32.mrf.mxu1 }
 0x7db   :  { %v5834_v48 = vadd.f32 %v5833_v8, %v5665_v62  ;;  %v15717_v62 = vld [vmem:[#allocation127_spill] sm:$0xff] }
 0x7dc   :  { %v6002_v60 = vpop.f32.mrf.mxu3  ;;  %v5498_v9 = vpop.f32.mrf.mxu0 }
 0x7dd   :  { %v6003_v32 = vadd.f32 %v6002_v60, %v5834_v48  ;;  %v5668_v41 = vadd.f32 %v5667_v61, %v5498_v9  ;;  %5706 = vmatmul.bf16.gmra.mxu1 %v15714_v20 }
 0x7df   :  { %5537 = vmatmul.bf16.gmra.mxu0 %v15712_v29  ;;  %v10456_v44 = vpack.c.bf16 %v6003_v32, %v15713_v11  ;;  %5875 = vmatmul.bf16.gmra.mxu2 %v15715_v13  ;;  %v15718_v13 = vld [vmem:[#allocation128_spill] sm:$0xff] }
 0x7e1   :  { %6044 = vmatmul.bf16.gmra.mxu3 %v15716_v5  ;;  %10712 = vst [vmem:[#allocation8 + $0x428] sm:$0xff] %v10456_v44  ;;  %v15719_v5 = vld [vmem:[#allocation132_spill] sm:$0xff] }
 0x7e2   :  { %v5836_v1 = vpop.f32.mrf.mxu2  ;;  %v5669_v7 = vpop.f32.mrf.mxu1 }
 0x7e3   :  { %v5837_v3 = vadd.f32 %v5836_v1, %v5668_v41  ;;  %v15720_v41 = vld [vmem:[#allocation129_spill] sm:$0xff]  ;;  %v15721_v1 = vld [vmem:[#allocation130_spill] sm:$0xff] }
 0x7e4   :  { %v6005_v2 = vpop.f32.mrf.mxu3  ;;  %v5500_v35 = vpop.f32.mrf.mxu0 }
 0x7e5   :  { %v6006_v31 = vadd.f32 %v6005_v2, %v5837_v3  ;;  %v5670_v48 = vadd.f32 %v5669_v7, %v5500_v35  ;;  %v15722_v3 = vld [vmem:[#allocation131_spill] sm:$0xff]  ;;  %v11897_v2 = vld [vmem:[#allocation6 + $0x410] sm:$0xf] }
 0x7e6   :  { %v12653_v35 = vld [vmem:[#allocation6 + $0x42c] sm:$0xf0] }
 0x7e7   :  { %v10460_v8 = vpack.c.bf16 %v6006_v31, %v15717_v62  ;;  %v11898_v31 = vor.u32 %v12653_v35, %v11897_v2  ;;  %v12153_v62 = vld [vmem:[#allocation6 + $0x610] sm:$0xf] }
 0x7e8   :  { %v12589_v2 = vld [vmem:[#allocation6 + $0x22c] sm:$0xf0] }
 0x7e9   :  { %10716 = vst [vmem:[#allocation8 + $0x448] sm:$0xff] %v10460_v8  ;;  %v12717_v8 = vld [vmem:[#allocation6 + $0x62c] sm:$0xf0]  ;;  %6425 = vmatpush.bf16.msra.mxu2 %v11898_v31 }
 0x7ea   :  { %v5838_v60 = vpop.f32.mrf.mxu2  ;;  %v5672_v61 = vpop.f32.mrf.mxu1  ;;  %v15724_v31 = vld [vmem:[#allocation134_spill] sm:$0xff] }
 0x7eb   :  { %v5839_v32 = vadd.f32 %v5838_v60, %v5670_v48 }
 0x7ec   :  { %v6007_v11 = vpop.f32.mrf.mxu3  ;;  %v5503_v9 = vpop.f32.mrf.mxu0 }
 0x7ed   :  { %v6008_v20 = vadd.f32 %v6007_v11, %v5839_v32  ;;  %v5673_v29 = vadd.f32 %v5672_v61, %v5503_v9  ;;  %5711 = vmatmul.bf16.gmra.mxu1 %v15720_v41  ;;  %v12154_v11 = vor.u32 %v12717_v8, %v12153_v62  ;;  %v15725_v8 = vld [vmem:[#allocation138_spill] sm:$0xff] }
 0x7ef   :  { %5542 = vmatmul.bf16.gmra.mxu0 %v15718_v13  ;;  %v10464_v44 = vpack.c.bf16 %v6008_v20, %v15719_v5  ;;  %5880 = vmatmul.bf16.gmra.mxu2 %v15721_v1  ;;  %v15723_v5 = vld [vmem:[#allocation133_spill] sm:$0xff] }
 0x7f0   :  { %6594 = vmatpush.bf16.msra.mxu3 %v12154_v11 }
 0x7f1   :  { %6049 = vmatmul.bf16.gmra.mxu3 %v15722_v3  ;;  %10720 = vst [vmem:[#allocation8 + $0x468] sm:$0xff] %v10464_v44  ;;  %v11385_v3 = vld [vmem:[#allocation6 + $0x10] sm:$0xf] }
 0x7f2   :  { %v5841_v7 = vpop.f32.mrf.mxu2  ;;  %v5674_v13 = vpop.f32.mrf.mxu1  ;;  %v12525_v44 = vld [vmem:[#allocation6 + $0x2c] sm:$0xf0] }
 0x7f3   :  { %v5842_v48 = vadd.f32 %v5841_v7, %v5673_v29  ;;  %v11386_v41 = vor.u32 %v12525_v44, %v11385_v3  ;;  %v11642_v7 = vor.u32 %v12589_v2, %v11641_v27  ;;  %v15728_v3 = vld [vmem:[#allocation137_spill] sm:$0xff] }
 0x7f4   :  { %v6010_v60 = vpop.f32.mrf.mxu3  ;;  %v5505_v32 = vpop.f32.mrf.mxu0 }
 0x7f5   :  { %v6011_v20 = vadd.f32 %v6010_v60, %v5842_v48  ;;  %v5675_v61 = vadd.f32 %v5674_v13, %v5505_v32  ;;  %6087 = vmatpush.bf16.msra.mxu0 %v11386_v41  ;;  %6256 = vmatpush.bf16.msra.mxu1 %v11642_v7  ;;  %v15726_v13 = vld [vmem:[#allocation135_spill] sm:$0xff]  ;;  %v15727_v32 = vld [vmem:[#allocation136_spill] sm:$0xff] }
 0x7f7   :  { %v10468_v9 = vpack.c.bf16 %v6011_v20, %v15723_v5 }
 0x7f9   :  { %10724 = vst [vmem:[#allocation8 + $0x488] sm:$0xff] %v10468_v9 }
 0x7fa   :  { %v5843_v1 = vpop.f32.mrf.mxu2  ;;  %v5677_v40 = vpop.f32.mrf.mxu1 }
 0x7fb   :  { %v5844_v35 = vadd.f32 %v5843_v1, %v5675_v61 }
 0x7fc   :  { %v6012_v30 = vpop.f32.mrf.mxu3  ;;  %v5508_v29 = vpop.f32.mrf.mxu0 }
 0x7fd   :  { %v6013_v62 = vadd.f32 %v6012_v30, %v5844_v35  ;;  %v5678_v60 = vadd.f32 %v5677_v40, %v5508_v29  ;;  %5716 = vmatmul.bf16.gmra.mxu1 %v15726_v13  ;;  %v15729_v30 = vld [vmem:[#allocation139_spill] sm:$0xff] }
 0x7ff   :  { %5547 = vmatmul.bf16.gmra.mxu0 %v15724_v31  ;;  %v10472_v48 = vpack.c.bf16 %v6013_v62, %v15725_v8  ;;  %5885 = vmatmul.bf16.gmra.mxu2 %v15727_v32  ;;  %v15730_v62 = vld [vmem:[#allocation140_spill] sm:$0xff] }
 0x800   :  { %v15731_v8 = vld [vmem:[#allocation144_spill] sm:$0xff] }
 0x801   :  { %6054 = vmatmul.bf16.gmra.mxu3 %v15728_v3  ;;  %10728 = vst [vmem:[#allocation8 + $0x4a8] sm:$0xff] %v10472_v48 }
 0x802   :  { %v5846_v1 = vpop.f32.mrf.mxu2  ;;  %v5679_v5 = vpop.f32.mrf.mxu1 }
 0x803   :  { %v5847_v11 = vadd.f32 %v5846_v1, %v5678_v60  ;;  %v15732_v60 = vld [vmem:[#allocation141_spill] sm:$0xff]  ;;  %v15733_v1 = vld [vmem:[#allocation142_spill] sm:$0xff] }
 0x804   :  { %v6015_v20 = vpop.f32.mrf.mxu3  ;;  %v5510_v27 = vpop.f32.mrf.mxu0 }
 0x805   :  { %v6016_v41 = vadd.f32 %v6015_v20, %v5847_v11  ;;  %v5680_v61 = vadd.f32 %v5679_v5, %v5510_v27  ;;  %v15734_v11 = vld [vmem:[#allocation143_spill] sm:$0xff] }
 0x807   :  { %v10476_v9 = vpack.c.bf16 %v6016_v41, %v15729_v30 }
 0x809   :  { %10732 = vst [vmem:[#allocation8 + $0x4c8] sm:$0xff] %v10476_v9 }
 0x80a   :  { %v5848_v44 = vpop.f32.mrf.mxu2  ;;  %v5682_v29 = vpop.f32.mrf.mxu1 }
 0x80b   :  { %v5849_v2 = vadd.f32 %v5848_v44, %v5680_v61  ;;  %v15735_v61 = vld [vmem:[#allocation145_spill] sm:$0xff] }
 0x80c   :  { %v6017_v40 = vpop.f32.mrf.mxu3  ;;  %v5513_v35 = vpop.f32.mrf.mxu0 }
 0x80d   :  { %v6018_v7 = vadd.f32 %v6017_v40, %v5849_v2  ;;  %v5683_v3 = vadd.f32 %v5682_v29, %v5513_v35  ;;  %5721 = vmatmul.bf16.gmra.mxu1 %v15732_v60 }
 0x80f   :  { %5552 = vmatmul.bf16.gmra.mxu0 %v15730_v62  ;;  %v10480_v48 = vpack.c.bf16 %v6018_v7, %v15731_v8  ;;  %5890 = vmatmul.bf16.gmra.mxu2 %v15733_v1  ;;  %v15736_v1 = vld [vmem:[#allocation146_spill] sm:$0xff] }
 0x811   :  { %6059 = vmatmul.bf16.gmra.mxu3 %v15734_v11  ;;  %10736 = vst [vmem:[#allocation8 + $0x4e8] sm:$0xff] %v10480_v48  ;;  %v15737_v11 = vld [vmem:[#allocation150_spill] sm:$0xff] }
 0x812   :  { %v5851_v20 = vpop.f32.mrf.mxu2  ;;  %v5684_v30 = vpop.f32.mrf.mxu1 }
 0x813   :  { %v5852_v27 = vadd.f32 %v5851_v20, %v5683_v3  ;;  %v15738_v3 = vld [vmem:[#allocation147_spill] sm:$0xff]  ;;  %v15739_v20 = vld [vmem:[#allocation148_spill] sm:$0xff] }
 0x814   :  { %v6020_v5 = vpop.f32.mrf.mxu3  ;;  %v5515_v41 = vpop.f32.mrf.mxu0 }
 0x815   :  { %v6021_v9 = vadd.f32 %v6020_v5, %v5852_v27  ;;  %v5685_v2 = vadd.f32 %v5684_v30, %v5515_v41  ;;  %v15740_v27 = vld [vmem:[#allocation149_spill] sm:$0xff] }
 0x817   :  { %v10484_v44 = vpack.c.bf16 %v6021_v9, %v15735_v61 }
 0x819   :  { %10740 = vst [vmem:[#allocation8 + $0x508] sm:$0xff] %v10484_v44 }
 0x81a   :  { %v5853_v40 = vpop.f32.mrf.mxu2  ;;  %v5687_v8 = vpop.f32.mrf.mxu1 }
 0x81b   :  { %v5854_v7 = vadd.f32 %v5853_v40, %v5685_v2  ;;  %v15741_v2 = vld [vmem:[#allocation151_spill] sm:$0xff] }
 0x81c   :  { %v6022_v35 = vpop.f32.mrf.mxu3  ;;  %v5518_v29 = vpop.f32.mrf.mxu0 }
 0x81d   :  { %v6023_v60 = vadd.f32 %v6022_v35, %v5854_v7  ;;  %v5688_v62 = vadd.f32 %v5687_v8, %v5518_v29  ;;  %5726 = vmatmul.bf16.gmra.mxu1 %v15738_v3 }
 0x81f   :  { %5557 = vmatmul.bf16.gmra.mxu0 %v15736_v1  ;;  %v10488_v48 = vpack.c.bf16 %v6023_v60, %v15737_v11  ;;  %5895 = vmatmul.bf16.gmra.mxu2 %v15739_v20  ;;  %v15742_v20 = vld [vmem:[#allocation152_spill] sm:$0xff] }
 0x821   :  { %6064 = vmatmul.bf16.gmra.mxu3 %v15740_v27  ;;  %10744 = vst [vmem:[#allocation8 + $0x528] sm:$0xff] %v10488_v48  ;;  %v15743_v27 = vld [vmem:[#allocation156_spill] sm:$0xff] }
 0x822   :  { %v5856_v5 = vpop.f32.mrf.mxu2  ;;  %v5689_v61 = vpop.f32.mrf.mxu1 }
 0x823   :  { %v5857_v41 = vadd.f32 %v5856_v5, %v5688_v62  ;;  %v15744_v62 = vld [vmem:[#allocation153_spill] sm:$0xff]  ;;  %v15745_v5 = vld [vmem:[#allocation154_spill] sm:$0xff] }
 0x824   :  { %v6025_v30 = vpop.f32.mrf.mxu3  ;;  %v5520_v9 = vpop.f32.mrf.mxu0 }
 0x825   :  { %v6026_v44 = vadd.f32 %v6025_v30, %v5857_v41  ;;  %v5690_v7 = vadd.f32 %v5689_v61, %v5520_v9  ;;  %v15746_v41 = vld [vmem:[#allocation155_spill] sm:$0xff]  ;;  %v12705_v30 = vld [vmem:[#allocation6 + $0x5d4] sm:$0xf] }
 0x826   :  { %v12123_v9 = vld [vmem:[#allocation6 + $0x5f0] sm:$0xf0] }
 0x827   :  { %v10492_v40 = vpack.c.bf16 %v6026_v44, %v15741_v2  ;;  %v12126_v44 = vor.u32 %v12705_v30, %v12123_v9  ;;  %v12769_v2 = vld [vmem:[#allocation6 + $0x7d4] sm:$0xf] }
 0x828   :  { %v11867_v30 = vld [vmem:[#allocation6 + $0x3f0] sm:$0xf0] }
 0x829   :  { %10748 = vst [vmem:[#allocation8 + $0x548] sm:$0xff] %v10492_v40  ;;  %v12379_v40 = vld [vmem:[#allocation6 + $0x7f0] sm:$0xf0]  ;;  %7094 = vmatpush.bf16.msrb.mxu2 %v12126_v44 }
 0x82a   :  { %v5858_v35 = vpop.f32.mrf.mxu2  ;;  %v5692_v8 = vpop.f32.mrf.mxu1 }
 0x82b   :  { %v5859_v60 = vadd.f32 %v5858_v35, %v5690_v7 }
 0x82c   :  { %v6027_v11 = vpop.f32.mrf.mxu3  ;;  %v5523_v29 = vpop.f32.mrf.mxu0 }
 0x82d   :  { %v6028_v3 = vadd.f32 %v6027_v11, %v5859_v60  ;;  %v5693_v1 = vadd.f32 %v5692_v8, %v5523_v29  ;;  %5731 = vmatmul.bf16.gmra.mxu1 %v15744_v62  ;;  %v12382_v11 = vor.u32 %v12769_v2, %v12379_v40  ;;  %v12577_v8 = vld [vmem:[#allocation6 + $0x1d4] sm:$0xf] }
 0x82e   :  { %v12641_v62 = vld [vmem:[#allocation6 + $0x3d4] sm:$0xf] }
 0x82f   :  { %5562 = vmatmul.bf16.gmra.mxu0 %v15742_v20  ;;  %v10496_v48 = vpack.c.bf16 %v6028_v3, %v15743_v27  ;;  %5900 = vmatmul.bf16.gmra.mxu2 %v15745_v5 }
 0x830   :  { %7263 = vmatpush.bf16.msrb.mxu3 %v12382_v11 }
 0x831   :  { %6069 = vmatmul.bf16.gmra.mxu3 %v15746_v41  ;;  %10752 = vst [vmem:[#allocation8 + $0x568] sm:$0xff] %v10496_v48  ;;  %v11611_v48 = vld [vmem:[#allocation6 + $0x1f0] sm:$0xf0] }
 0x832   :  { %v5861_v61 = vpop.f32.mrf.mxu2  ;;  %v5694_v20 = vpop.f32.mrf.mxu1  ;;  %v11614_v5 = vor.u32 %v12577_v8, %v11611_v48 }
 0x833   :  { %v5862_v7 = vadd.f32 %v5861_v61, %v5693_v1  ;;  %v11870_v61 = vor.u32 %v12641_v62, %v11867_v30 }
 0x834   :  { %v6030_v35 = vpop.f32.mrf.mxu3  ;;  %v5525_v60 = vpop.f32.mrf.mxu0  ;;  %6756 = vmatpush.bf16.msrb.mxu0 %v11614_v5 }
 0x835   :  { %v6031_v3 = vadd.f32 %v6030_v35, %v5862_v7  ;;  %v5695_v29 = vadd.f32 %v5694_v20, %v5525_v60  ;;  %6925 = vmatpush.bf16.msrb.mxu1 %v11870_v61 }
 0x837   :  { %v10500_v27 = vpack.c.bf16 %v6031_v3, %v13807_v22 }
 0x839   :  { %10756 = vst [vmem:[#allocation8 + $0x588] sm:$0xff] %v10500_v27 }
 0x83a   :  { %v5863_v41 = vpop.f32.mrf.mxu2  ;;  %v5697_v13 = vpop.f32.mrf.mxu1 }
 0x83b   :  { %v5864_v9 = vadd.f32 %v5863_v41, %v5695_v29 }
 0x83c   :  { %v6032_v32 = vpop.f32.mrf.mxu3  ;;  %v5528_v1 = vpop.f32.mrf.mxu0 }
 0x83d   :  { %v6033_v2 = vadd.f32 %v6032_v32, %v5864_v9  ;;  %v5698_v44 = vadd.f32 %v5697_v13, %v5528_v1  ;;  %5736 = vmatmul.bf16.gmra.mxu1 %v13355_v28 }
 0x83f   :  { %5567 = vmatmul.bf16.gmra.mxu0 %v13353_v43  ;;  %v10504_v22 = vpack.c.bf16 %v6033_v2, %v13809_v10  ;;  %5905 = vmatmul.bf16.gmra.mxu2 %v13357_v24 }
 0x841   :  { %6074 = vmatmul.bf16.gmra.mxu3 %v13359_v46  ;;  %10760 = vst [vmem:[#allocation8 + $0x5a8] sm:$0xff] %v10504_v22 }
 0x842   :  { %v5866_v20 = vpop.f32.mrf.mxu2  ;;  %v5699_v7 = vpop.f32.mrf.mxu1 }
 0x843   :  { %v5867_v41 = vadd.f32 %v5866_v20, %v5698_v44 }
 0x844   :  { %v6035_v40 = vpop.f32.mrf.mxu3  ;;  %v5530_v62 = vpop.f32.mrf.mxu0 }
 0x845   :  { %v6036_v5 = vadd.f32 %v6035_v40, %v5867_v41  ;;  %v5700_v35 = vadd.f32 %v5699_v7, %v5530_v62 }
 0x847   :  { %v10508_v32 = vpack.c.bf16 %v6036_v5, %v13815_v12 }
 0x849   :  { %10764 = vst [vmem:[#allocation8 + $0x5c8] sm:$0xff] %v10508_v32  ;;  %v15747_v32 = vld [vmem:[#allocation12_spill] sm:$0xff] }
 0x84a   :  { %v5868_v60 = vpop.f32.mrf.mxu2  ;;  %v5702_v3 = vpop.f32.mrf.mxu1 }
 0x84b   :  { %v5869_v10 = vadd.f32 %v5868_v60, %v5700_v35  ;;  %v15748_v35 = vld [vmem:[#allocation13_spill] sm:$0xff]  ;;  %v15749_v60 = vld [vmem:[#allocation14_spill] sm:$0xff] }
 0x84c   :  { %v6037_v13 = vpop.f32.mrf.mxu3  ;;  %v5533_v11 = vpop.f32.mrf.mxu0 }
 0x84d   :  { %v6038_v27 = vadd.f32 %v6037_v13, %v5869_v10  ;;  %v5703_v8 = vadd.f32 %v5702_v3, %v5533_v11  ;;  %6257 = vmatmul.bf16.vlgmr.msra.gmra.mxu1 %v12893_v51 }
 0x84f   :  { %6088 = vmatmul.bf16.vlgmr.msra.gmra.mxu0 %v12891_v47  ;;  %v10512_v29 = vpack.c.bf16 %v6038_v27, %v13817_v45  ;;  %6426 = vmatmul.bf16.vlgmr.msra.gmra.mxu2 %v12895_v52 }
 0x851   :  { %6595 = vmatmul.bf16.vlgmr.msra.gmra.mxu3 %v12897_v53  ;;  %10768 = vst [vmem:[#allocation8 + $0x5e8] sm:$0xff] %v10512_v29  ;;  %v15750_v29 = vld [vmem:[#allocation157_spill] sm:$0xff] }
 0x852   :  { %v5871_v12 = vpop.f32.mrf.mxu2  ;;  %v5704_v1 = vpop.f32.mrf.mxu1 }
 0x853   :  { %v5872_v48 = vadd.f32 %v5871_v12, %v5703_v8 }
 0x854   :  { %v6040_v30 = vpop.f32.mrf.mxu3  ;;  %v5535_v9 = vpop.f32.mrf.mxu0 }
 0x855   :  { %v6041_v61 = vadd.f32 %v6040_v30, %v5872_v48  ;;  %v5705_v22 = vadd.f32 %v5704_v1, %v5535_v9 }
 0x857   :  { %v10516_v2 = vpack.c.bf16 %v6041_v61, %v13823_v34 }
 0x859   :  { %10772 = vst [vmem:[#allocation8 + $0x608] sm:$0xff] %v10516_v2  ;;  %v15751_v2 = vld [vmem:[#allocation15_spill] sm:$0xff] }
 0x85a   :  { %v5873_v44 = vpop.f32.mrf.mxu2  ;;  %v5707_v40 = vpop.f32.mrf.mxu1 }
 0x85b   :  { %v5874_v45 = vadd.f32 %v5873_v44, %v5705_v22  ;;  %v15752_v22 = vld [vmem:[#allocation159_spill] sm:$0xff] }
 0x85c   :  { %v6042_v20 = vpop.f32.mrf.mxu3  ;;  %v5538_v41 = vpop.f32.mrf.mxu0 }
 0x85d   :  { %v6043_v62 = vadd.f32 %v6042_v20, %v5874_v45  ;;  %v5708_v5 = vadd.f32 %v5707_v40, %v5538_v41  ;;  %6262 = vmatmul.bf16.gmra.mxu1 %v15747_v32  ;;  %v15753_v20 = vld [vmem:[#allocation16_spill] sm:$0xff]  ;;  %v15754_v41 = vld [vmem:[#allocation17_spill] sm:$0xff]  ;;  %v15755_v40 = vld [vmem:[#allocation18_spill] sm:$0xff] }
 0x85f   :  { %6093 = vmatmul.bf16.gmra.mxu0 %v12903_v0  ;;  %v10520_v7 = vpack.c.bf16 %v6043_v62, %v13825_v21  ;;  %6431 = vmatmul.bf16.gmra.mxu2 %v15748_v35  ;;  %v12697_v62 = vld [vmem:[#allocation6 + $0x594] sm:$0xf] }
 0x861   :  { %6600 = vmatmul.bf16.gmra.mxu3 %v15749_v60  ;;  %10776 = vst [vmem:[#allocation8 + $0x628] sm:$0xff] %v10520_v7  ;;  %v12091_v7 = vld [vmem:[#allocation6 + $0x5b0] sm:$0xf0] }
 0x862   :  { %v5876_v34 = vpop.f32.mrf.mxu2  ;;  %v5709_v3 = vpop.f32.mrf.mxu1 }
 0x863   :  { %v5877_v10 = vadd.f32 %v5876_v34, %v5708_v5  ;;  %v12094_v34 = vor.u32 %v12697_v62, %v12091_v7 }
 0x864   :  { %v6045_v13 = vpop.f32.mrf.mxu3  ;;  %v5540_v11 = vpop.f32.mrf.mxu0 }
 0x865   :  { %v6046_v27 = vadd.f32 %v6045_v13, %v5877_v10  ;;  %v5710_v12 = vadd.f32 %v5709_v3, %v5540_v11  ;;  %v12761_v10 = vld [vmem:[#allocation6 + $0x794] sm:$0xf]  ;;  %7095 = vmatpush.bf16.msrb.mxu2 %v12094_v34 }
 0x866   :  { %v12347_v13 = vld [vmem:[#allocation6 + $0x7b0] sm:$0xf0] }
 0x867   :  { %v10524_v8 = vpack.c.bf16 %v6046_v27, %v15750_v29  ;;  %v12350_v29 = vor.u32 %v12761_v10, %v12347_v13 }
 0x869   :  { %10780 = vst [vmem:[#allocation8 + $0x648] sm:$0xff] %v10524_v8  ;;  %7264 = vmatpush.bf16.msrb.mxu3 %v12350_v29 }
 0x86a   :  { %v5878_v48 = vpop.f32.mrf.mxu2  ;;  %v5712_v1 = vpop.f32.mrf.mxu1 }
 0x86b   :  { %v5879_v21 = vadd.f32 %v5878_v48, %v5710_v12 }
 0x86c   :  { %v6047_v30 = vpop.f32.mrf.mxu3  ;;  %v5543_v9 = vpop.f32.mrf.mxu0 }
 0x86d   :  { %v6048_v61 = vadd.f32 %v6047_v30, %v5879_v21  ;;  %v5713_v45 = vadd.f32 %v5712_v1, %v5543_v9  ;;  %6267 = vmatmul.bf16.gmra.mxu1 %v15753_v20  ;;  %v12569_v30 = vld [vmem:[#allocation6 + $0x194] sm:$0xf] }
 0x86e   :  { %v11579_v9 = vld [vmem:[#allocation6 + $0x1b0] sm:$0xf0] }
 0x86f   :  { %6098 = vmatmul.bf16.gmra.mxu0 %v15751_v2  ;;  %v10528_v44 = vpack.c.bf16 %v6048_v61, %v15752_v22  ;;  %6436 = vmatmul.bf16.gmra.mxu2 %v15754_v41  ;;  %v11582_v61 = vor.u32 %v12569_v30, %v11579_v9  ;;  %v12633_v22 = vld [vmem:[#allocation6 + $0x394] sm:$0xf] }
 0x871   :  { %6605 = vmatmul.bf16.gmra.mxu3 %v15755_v40  ;;  %10784 = vst [vmem:[#allocation8 + $0x668] sm:$0xff] %v10528_v44  ;;  %v11835_v44 = vld [vmem:[#allocation6 + $0x3b0] sm:$0xf0]  ;;  %6757 = vmatpush.bf16.msrb.mxu0 %v11582_v61 }
 0x872   :  { %v5881_v5 = vpop.f32.mrf.mxu2  ;;  %v5714_v8 = vpop.f32.mrf.mxu1 }
 0x873   :  { %v5882_v11 = vadd.f32 %v5881_v5, %v5713_v45  ;;  %v11838_v5 = vor.u32 %v12633_v22, %v11835_v44 }
 0x874   :  { %v6050_v3 = vpop.f32.mrf.mxu3  ;;  %v5545_v27 = vpop.f32.mrf.mxu0 }
 0x875   :  { %v6051_v12 = vadd.f32 %v6050_v3, %v5882_v11  ;;  %v5715_v21 = vadd.f32 %v5714_v8, %v5545_v27  ;;  %6926 = vmatpush.bf16.msrb.mxu1 %v11838_v5 }
 0x877   :  { %v10532_v48 = vpack.c.bf16 %v6051_v12, %v13839_v14 }
 0x879   :  { %10788 = vst [vmem:[#allocation8 + $0x688] sm:$0xff] %v10532_v48 }
 0x87a   :  { %v5883_v1 = vpop.f32.mrf.mxu2  ;;  %v5717_v40 = vpop.f32.mrf.mxu1 }
 0x87b   :  { %v5884_v62 = vadd.f32 %v5883_v1, %v5715_v21 }
 0x87c   :  { %v6052_v7 = vpop.f32.mrf.mxu3  ;;  %v5548_v45 = vpop.f32.mrf.mxu0 }
 0x87d   :  { %v6053_v10 = vadd.f32 %v6052_v7, %v5884_v62  ;;  %v5718_v34 = vadd.f32 %v5717_v40, %v5548_v45  ;;  %6272 = vmatmul.bf16.gmra.mxu1 %v12929_v37 }
 0x87f   :  { %6103 = vmatmul.bf16.gmra.mxu0 %v12927_v36  ;;  %v10536_v14 = vpack.c.bf16 %v6053_v10, %v13841_v23  ;;  %6441 = vmatmul.bf16.gmra.mxu2 %v12931_v38 }
 0x881   :  { %6610 = vmatmul.bf16.gmra.mxu3 %v12933_v39  ;;  %10792 = vst [vmem:[#allocation8 + $0x6a8] sm:$0xff] %v10536_v14 }
 0x882   :  { %v5886_v13 = vpop.f32.mrf.mxu2  ;;  %v5719_v29 = vpop.f32.mrf.mxu1 }
 0x883   :  { %v5887_v11 = vadd.f32 %v5886_v13, %v5718_v34 }
 0x884   :  { %v6055_v3 = vpop.f32.mrf.mxu3  ;;  %v5550_v27 = vpop.f32.mrf.mxu0 }
 0x885   :  { %v6056_v8 = vadd.f32 %v6055_v3, %v5887_v11  ;;  %v5720_v48 = vadd.f32 %v5719_v29, %v5550_v27  ;;  %v15756_v29 = vld [vmem:[#allocation160_spill] sm:$0xff] }
 0x887   :  { %v10540_v12 = vpack.c.bf16 %v6056_v8, %v13847_v6 }
 0x889   :  { %10796 = vst [vmem:[#allocation8 + $0x6c8] sm:$0xff] %v10540_v12 }
 0x88a   :  { %v5888_v21 = vpop.f32.mrf.mxu2  ;;  %v5722_v9 = vpop.f32.mrf.mxu1 }
 0x88b   :  { %v5889_v23 = vadd.f32 %v5888_v21, %v5720_v48  ;;  %v15757_v48 = vld [vmem:[#allocation19_spill] sm:$0xff]  ;;  %v15758_v21 = vld [vmem:[#allocation20_spill] sm:$0xff] }
 0x88c   :  { %v6057_v40 = vpop.f32.mrf.mxu3  ;;  %v5553_v30 = vpop.f32.mrf.mxu0 }
 0x88d   :  { %v6058_v1 = vadd.f32 %v6057_v40, %v5889_v23  ;;  %v5723_v22 = vadd.f32 %v5722_v9, %v5553_v30  ;;  %6277 = vmatmul.bf16.gmra.mxu1 %v12941_v50  ;;  %v15759_v23 = vld [vmem:[#allocation21_spill] sm:$0xff] }
 0x88f   :  { %6108 = vmatmul.bf16.gmra.mxu0 %v12939_v49  ;;  %v10544_v61 = vpack.c.bf16 %v6058_v1, %v13849_v42  ;;  %6446 = vmatmul.bf16.gmra.mxu2 %v12943_v54 }
 0x891   :  { %6615 = vmatmul.bf16.gmra.mxu3 %v12945_v55  ;;  %10800 = vst [vmem:[#allocation8 + $0x6e8] sm:$0xff] %v10544_v61 }
 0x892   :  { %v5891_v6 = vpop.f32.mrf.mxu2  ;;  %v5724_v45 = vpop.f32.mrf.mxu1 }
 0x893   :  { %v5892_v44 = vadd.f32 %v5891_v6, %v5723_v22  ;;  %v15760_v22 = vld [vmem:[#allocation161_spill] sm:$0xff] }
 0x894   :  { %v6060_v62 = vpop.f32.mrf.mxu3  ;;  %v5555_v7 = vpop.f32.mrf.mxu0 }
 0x895   :  { %v6061_v5 = vadd.f32 %v6060_v62, %v5892_v44  ;;  %v5725_v14 = vadd.f32 %v5724_v45, %v5555_v7 }
 0x897   :  { %v10548_v10 = vpack.c.bf16 %v6061_v5, %v13855_v17 }
 0x899   :  { %10804 = vst [vmem:[#allocation8 + $0x708] sm:$0xff] %v10548_v10 }
 0x89a   :  { %v5893_v34 = vpop.f32.mrf.mxu2  ;;  %v5727_v3 = vpop.f32.mrf.mxu1 }
 0x89b   :  { %v5894_v42 = vadd.f32 %v5893_v34, %v5725_v14  ;;  %v15761_v34 = vld [vmem:[#allocation22_spill] sm:$0xff] }
 0x89c   :  { %v6062_v13 = vpop.f32.mrf.mxu3  ;;  %v5558_v11 = vpop.f32.mrf.mxu0 }
 0x89d   :  { %v6063_v27 = vadd.f32 %v6062_v13, %v5894_v42  ;;  %v5728_v12 = vadd.f32 %v5727_v3, %v5558_v11  ;;  %6282 = vmatmul.bf16.gmra.mxu1 %v15757_v48  ;;  %v15762_v42 = vld [vmem:[#allocation162_spill] sm:$0xff]  ;;  %v15763_v3 = vld [vmem:[#allocation23_spill] sm:$0xff] }
 0x89f   :  { %6113 = vmatmul.bf16.gmra.mxu0 %v12951_v4  ;;  %v10552_v8 = vpack.c.bf16 %v6063_v27, %v15756_v29  ;;  %6451 = vmatmul.bf16.gmra.mxu2 %v15758_v21  ;;  %v15764_v27 = vld [vmem:[#allocation24_spill] sm:$0xff]  ;;  %v15765_v29 = vld [vmem:[#allocation25_spill] sm:$0xff] }
 0x8a1   :  { %6620 = vmatmul.bf16.gmra.mxu3 %v15759_v23  ;;  %10808 = vst [vmem:[#allocation8 + $0x728] sm:$0xff] %v10552_v8  ;;  %v12689_v8 = vld [vmem:[#allocation6 + $0x554] sm:$0xf] }
 0x8a2   :  { %v5896_v17 = vpop.f32.mrf.mxu2  ;;  %v5729_v1 = vpop.f32.mrf.mxu1 }
 0x8a3   :  { %v5897_v40 = vadd.f32 %v5896_v17, %v5728_v12  ;;  %v12059_v12 = vld [vmem:[#allocation6 + $0x570] sm:$0xf0] }
 0x8a4   :  { %v6065_v30 = vpop.f32.mrf.mxu3  ;;  %v5560_v9 = vpop.f32.mrf.mxu0 }
 0x8a5   :  { %v6066_v61 = vadd.f32 %v6065_v30, %v5897_v40  ;;  %v5730_v44 = vadd.f32 %v5729_v1, %v5560_v9  ;;  %v12062_v40 = vor.u32 %v12689_v8, %v12059_v12  ;;  %v12753_v30 = vld [vmem:[#allocation6 + $0x754] sm:$0xf] }
 0x8a6   :  { %v12315_v9 = vld [vmem:[#allocation6 + $0x770] sm:$0xf0] }
 0x8a7   :  { %v10556_v6 = vpack.c.bf16 %v6066_v61, %v15760_v22  ;;  %7096 = vmatpush.bf16.msrb.mxu2 %v12062_v40 }
 0x8a9   :  { %10812 = vst [vmem:[#allocation8 + $0x748] sm:$0xff] %v10556_v6  ;;  %v12318_v6 = vor.u32 %v12753_v30, %v12315_v9 }
 0x8aa   :  { %v5898_v62 = vpop.f32.mrf.mxu2  ;;  %v5732_v10 = vpop.f32.mrf.mxu1 }
 0x8ab   :  { %v5899_v7 = vadd.f32 %v5898_v62, %v5730_v44  ;;  %7265 = vmatpush.bf16.msrb.mxu3 %v12318_v6 }
 0x8ac   :  { %v6067_v45 = vpop.f32.mrf.mxu3  ;;  %v5563_v5 = vpop.f32.mrf.mxu0 }
 0x8ad   :  { %v6068_v14 = vadd.f32 %v6067_v45, %v5899_v7  ;;  %v5733_v11 = vadd.f32 %v5732_v10, %v5563_v5  ;;  %6287 = vmatmul.bf16.gmra.mxu1 %v15763_v3  ;;  %v12561_v7 = vld [vmem:[#allocation6 + $0x154] sm:$0xf] }
 0x8ae   :  { %v11547_v45 = vld [vmem:[#allocation6 + $0x170] sm:$0xf0] }
 0x8af   :  { %6118 = vmatmul.bf16.gmra.mxu0 %v15761_v34  ;;  %v10560_v13 = vpack.c.bf16 %v6068_v14, %v15762_v42  ;;  %6456 = vmatmul.bf16.gmra.mxu2 %v15764_v27  ;;  %v12625_v5 = vld [vmem:[#allocation6 + $0x354] sm:$0xf]  ;;  %v11550_v10 = vor.u32 %v12561_v7, %v11547_v45 }
 0x8b0   :  { %v11803_v14 = vld [vmem:[#allocation6 + $0x370] sm:$0xf0] }
 0x8b1   :  { %6625 = vmatmul.bf16.gmra.mxu3 %v15765_v29  ;;  %10816 = vst [vmem:[#allocation8 + $0x768] sm:$0xff] %v10560_v13  ;;  %v11806_v13 = vor.u32 %v12625_v5, %v11803_v14  ;;  %6758 = vmatpush.bf16.msrb.mxu0 %v11550_v10 }
 0x8b2   :  { %v5901_v17 = vpop.f32.mrf.mxu2  ;;  %v5734_v44 = vpop.f32.mrf.mxu1 }
 0x8b3   :  { %v5902_v1 = vadd.f32 %v5901_v17, %v5733_v11  ;;  %6927 = vmatpush.bf16.msrb.mxu1 %v11806_v13 }
 0x8b4   :  { %v6070_v61 = vpop.f32.mrf.mxu3  ;;  %v5565_v22 = vpop.f32.mrf.mxu0 }
 0x8b5   :  { %v6071_v62 = vadd.f32 %v6070_v61, %v5902_v1  ;;  %v5735_v8 = vadd.f32 %v5734_v44, %v5565_v22 }
 0x8b7   :  { %v10564_v42 = vpack.c.bf16 %v6071_v62, %v13871_v33 }
 0x8b9   :  { %10820 = vst [vmem:[#allocation8 + $0x788] sm:$0xff] %v10564_v42 }
 0x8ba   :  { %v5903_v11 = vpop.f32.mrf.mxu2  ;;  %v5737_v9 = vpop.f32.mrf.mxu1 }
 0x8bb   :  { %v5904_v12 = vadd.f32 %v5903_v11, %v5735_v8 }
 0x8bc   :  { %v6072_v17 = vpop.f32.mrf.mxu3  ;;  %v5568_v30 = vpop.f32.mrf.mxu0 }
 0x8bd   :  { %v6073_v40 = vadd.f32 %v6072_v17, %v5904_v12  ;;  %v5738_v61 = vadd.f32 %v5737_v9, %v5568_v30  ;;  %6292 = vmatmul.bf16.gmra.mxu1 %v12977_v57 }
 0x8bf   :  { %6123 = vmatmul.bf16.gmra.mxu0 %v12975_v56  ;;  %v10568_v1 = vpack.c.bf16 %v6073_v40, %v13873_v63  ;;  %6461 = vmatmul.bf16.gmra.mxu2 %v12979_v58 }
 0x8c1   :  { %6630 = vmatmul.bf16.gmra.mxu3 %v12981_v59  ;;  %10824 = vst [vmem:[#allocation8 + $0x7a8] sm:$0xff] %v10568_v1 }
 0x8c2   :  { %v5906_v33 = vpop.f32.mrf.mxu2  ;;  %v5739_v62 = vpop.f32.mrf.mxu1 }
 0x8c3   :  { %v5907_v22 = vadd.f32 %v5906_v33, %v5738_v61 }
 0x8c4   :  { %v6075_v6 = vpop.f32.mrf.mxu3  ;;  %v5570_v44 = vpop.f32.mrf.mxu0 }
 0x8c5   :  { %v6076_v7 = vadd.f32 %v6075_v6, %v5907_v22  ;;  %v5740_v5 = vadd.f32 %v5739_v62, %v5570_v44 }
 0x8c7   :  { %v10572_v45 = vpack.c.bf16 %v6076_v7, %v13879_v26 }
 0x8c9   :  { %10828 = vst [vmem:[#allocation8 + $0x7c8] sm:$0xff] %v10572_v45  ;;  %v15766_v45 = vld [vmem:[#allocation27_spill] sm:$0xff] }
 0x8ca   :  { %v5908_v10 = vpop.f32.mrf.mxu2  ;;  %v6258_v13 = vpop.f32.mrf.mxu1 }
 0x8cb   :  { %v5909_v63 = vadd.f32 %v5908_v10, %v5740_v5  ;;  %v15767_v5 = vld [vmem:[#allocation28_spill] sm:$0xff]  ;;  %v15768_v10 = vld [vmem:[#allocation29_spill] sm:$0xff] }
 0x8cc   :  { %v6077_v14 = vpop.f32.mrf.mxu3  ;;  %v6089_v42 = vpop.f32.mrf.mxu0 }
 0x8cd   :  { %v6078_v8 = vadd.f32 %v6077_v14, %v5909_v63  ;;  %v6259_v11 = vadd.f32 %v6258_v13, %v6089_v42  ;;  %6297 = vmatmul.bf16.gmra.mxu1 %v12989_v18  ;;  %v15769_v63 = vld [vmem:[#allocation30_spill] sm:$0xff] }
 0x8cf   :  { %6128 = vmatmul.bf16.gmra.mxu0 %v12987_v16  ;;  %v10576_v12 = vpack.c.bf16 %v6078_v8, %v13881_v15  ;;  %6466 = vmatmul.bf16.gmra.mxu2 %v12991_v19 }
 0x8d1   :  { %6635 = vmatmul.bf16.gmra.mxu3 %v12993_v25  ;;  %10832 = vst [vmem:[#allocation8 + $0x7e8] sm:$0xff] %v10576_v12 }
 0x8d2   :  { %v6427_v26 = vpop.f32.mrf.mxu2  ;;  %v6260_v40 = vpop.f32.mrf.mxu1 }
 0x8d3   :  { %v6428_v17 = vadd.f32 %v6427_v26, %v6259_v11 }
 0x8d4   :  { %v6596_v30 = vpop.f32.mrf.mxu3  ;;  %v6091_v9 = vpop.f32.mrf.mxu0 }
 0x8d5   :  { %v14079_v1 = vadd.f32 %v6596_v30, %v6428_v17  ;;  %v6261_v61 = vadd.f32 %v6260_v40, %v6091_v9 }
 0x8da   :  { %v6429_v33 = vpop.f32.mrf.mxu2  ;;  %v6263_v15 = vpop.f32.mrf.mxu1 }
 0x8db   :  { %v6430_v22 = vadd.f32 %v6429_v33, %v6261_v61 }
 0x8dc   :  { %v6598_v6 = vpop.f32.mrf.mxu3  ;;  %v6094_v44 = vpop.f32.mrf.mxu0 }
 0x8dd   :  { %v14081_v62 = vadd.f32 %v6598_v6, %v6430_v22  ;;  %v6264_v7 = vadd.f32 %v6263_v15, %v6094_v44  ;;  %6302 = vmatmul.bf16.gmra.mxu1 %v15767_v5  ;;  %v15772_v6 = vld [vmem:[#allocation32_spill] sm:$0xff]  ;;  %v15773_v44 = vld [vmem:[#allocation33_spill] sm:$0xff]  ;;  %v15774_v15 = vld [vmem:[#allocation34_spill] sm:$0xff] }
 0x8df   :  { %6133 = vmatmul.bf16.gmra.mxu0 %v15766_v45  ;;  %6471 = vmatmul.bf16.gmra.mxu2 %v15768_v10 }
 0x8e1   :  { %6640 = vmatmul.bf16.gmra.mxu3 %v15769_v63 }
 0x8e2   :  { %v6432_v14 = vpop.f32.mrf.mxu2  ;;  %v6265_v11 = vpop.f32.mrf.mxu1 }
 0x8e3   :  { %v6433_v42 = vadd.f32 %v6432_v14, %v6264_v7  ;;  %v15775_v7 = vld [vmem:[#allocation35_spill] sm:$0xff]  ;;  %v12681_v14 = vld [vmem:[#allocation6 + $0x514] sm:$0xf] }
 0x8e4   :  { %v6601_v13 = vpop.f32.mrf.mxu3  ;;  %v6096_v8 = vpop.f32.mrf.mxu0 }
 0x8e5   :  { %v14087_v12 = vadd.f32 %v6601_v13, %v6433_v42  ;;  %v6266_v26 = vadd.f32 %v6265_v11, %v6096_v8  ;;  %v12027_v42 = vld [vmem:[#allocation6 + $0x530] sm:$0xf0] }
 0x8e6   :  { %v12745_v13 = vld [vmem:[#allocation6 + $0x714] sm:$0xf]  ;;  %v12030_v8 = vor.u32 %v12681_v14, %v12027_v42 }
 0x8e7   :  { %15770 = vst [vmem:[#allocation163_spill] sm:$0xff] %v14087_v12  ;;  %v12283_v11 = vld [vmem:[#allocation6 + $0x730] sm:$0xf0] }
 0x8e8   :  { %7097 = vmatpush.bf16.msrb.mxu2 %v12030_v8 }
 0x8ea   :  { %v6434_v17 = vpop.f32.mrf.mxu2  ;;  %v6268_v61 = vpop.f32.mrf.mxu1 }
 0x8eb   :  { %v6435_v30 = vadd.f32 %v6434_v17, %v6266_v26  ;;  %v12286_v17 = vor.u32 %v12745_v13, %v12283_v11 }
 0x8ec   :  { %v6603_v9 = vpop.f32.mrf.mxu3  ;;  %v6099_v40 = vpop.f32.mrf.mxu0 }
 0x8ed   :  { %v14089_v33 = vadd.f32 %v6603_v9, %v6435_v30  ;;  %v6269_v22 = vadd.f32 %v6268_v61, %v6099_v40  ;;  %6307 = vmatmul.bf16.gmra.mxu1 %v15773_v44  ;;  %7266 = vmatpush.bf16.msrb.mxu3 %v12286_v17  ;;  %v12553_v44 = vld [vmem:[#allocation6 + $0x114] sm:$0xf] }
 0x8ee   :  { %v15778_v17 = vld [vmem:[#allocation38_spill] sm:$0xff] }
 0x8ef   :  { %15771 = vst [vmem:[#allocation164_spill] sm:$0xff] %v14089_v33  ;;  %6138 = vmatmul.bf16.gmra.mxu0 %v15772_v6  ;;  %6476 = vmatmul.bf16.gmra.mxu2 %v15774_v15  ;;  %v11515_v15 = vld [vmem:[#allocation6 + $0x130] sm:$0xf0] }
 0x8f0   :  { %v12617_v33 = vld [vmem:[#allocation6 + $0x314] sm:$0xf] }
 0x8f1   :  { %6645 = vmatmul.bf16.gmra.mxu3 %v15775_v7  ;;  %v11518_v7 = vor.u32 %v12553_v44, %v11515_v15  ;;  %v11771_v6 = vld [vmem:[#allocation6 + $0x330] sm:$0xf0] }
 0x8f2   :  { %v6437_v26 = vpop.f32.mrf.mxu2  ;;  %v6270_v9 = vpop.f32.mrf.mxu1  ;;  %v11774_v10 = vor.u32 %v12617_v33, %v11771_v6 }
 0x8f3   :  { %v6438_v12 = vadd.f32 %v6437_v26, %v6269_v22  ;;  %6759 = vmatpush.bf16.msrb.mxu0 %v11518_v7 }
 0x8f4   :  { %v6606_v63 = vpop.f32.mrf.mxu3  ;;  %v6101_v30 = vpop.f32.mrf.mxu0  ;;  %6928 = vmatpush.bf16.msrb.mxu1 %v11774_v10 }
 0x8f5   :  { %v14095_v40 = vadd.f32 %v6606_v63, %v6438_v12  ;;  %v6271_v61 = vadd.f32 %v6270_v9, %v6101_v30  ;;  %v15779_v63 = vld [vmem:[#allocation39_spill] sm:$0xff]  ;;  %v15780_v12 = vld [vmem:[#allocation40_spill] sm:$0xff]  ;;  %v15781_v30 = vld [vmem:[#allocation41_spill] sm:$0xff] }
 0x8f7   :  { %15776 = vst [vmem:[#allocation31_spill] sm:$0xff] %v14095_v40 }
 0x8fa   :  { %v6439_v14 = vpop.f32.mrf.mxu2  ;;  %v6273_v11 = vpop.f32.mrf.mxu1 }
 0x8fb   :  { %v6440_v42 = vadd.f32 %v6439_v14, %v6271_v61 }
 0x8fc   :  { %v6608_v13 = vpop.f32.mrf.mxu3  ;;  %v6104_v22 = vpop.f32.mrf.mxu0 }
 0x8fd   :  { %v14097_v26 = vadd.f32 %v6608_v13, %v6440_v42  ;;  %v6274_v8 = vadd.f32 %v6273_v11, %v6104_v22  ;;  %6312 = vmatmul.bf16.gmra.mxu1 %v15779_v63 }
 0x8ff   :  { %15777 = vst [vmem:[#allocation36_spill] sm:$0xff] %v14097_v26  ;;  %6143 = vmatmul.bf16.gmra.mxu0 %v15778_v17  ;;  %6481 = vmatmul.bf16.gmra.mxu2 %v15780_v12  ;;  %v15784_v26 = vld [vmem:[#allocation44_spill] sm:$0xff]  ;;  %v15785_v12 = vld [vmem:[#allocation45_spill] sm:$0xff] }
 0x901   :  { %6650 = vmatmul.bf16.gmra.mxu3 %v15781_v30  ;;  %v15786_v30 = vld [vmem:[#allocation46_spill] sm:$0xff] }
 0x902   :  { %v6442_v44 = vpop.f32.mrf.mxu2  ;;  %v6275_v15 = vpop.f32.mrf.mxu1 }
 0x903   :  { %v6443_v33 = vadd.f32 %v6442_v44, %v6274_v8  ;;  %v15787_v8 = vld [vmem:[#allocation47_spill] sm:$0xff] }
 0x904   :  { %v6611_v6 = vpop.f32.mrf.mxu3  ;;  %v6106_v10 = vpop.f32.mrf.mxu0 }
 0x905   :  { %v14103_v7 = vadd.f32 %v6611_v6, %v6443_v33  ;;  %v6276_v9 = vadd.f32 %v6275_v15, %v6106_v10 }
 0x907   :  { %15782 = vst [vmem:[#allocation37_spill] sm:$0xff] %v14103_v7 }
 0x90a   :  { %v6444_v61 = vpop.f32.mrf.mxu2  ;;  %v6278_v22 = vpop.f32.mrf.mxu1 }
 0x90b   :  { %v6445_v14 = vadd.f32 %v6444_v61, %v6276_v9 }
 0x90c   :  { %v6613_v42 = vpop.f32.mrf.mxu3  ;;  %v6109_v13 = vpop.f32.mrf.mxu0 }
 0x90d   :  { %v14105_v11 = vadd.f32 %v6613_v42, %v6445_v14  ;;  %v6279_v63 = vadd.f32 %v6278_v22, %v6109_v13  ;;  %6317 = vmatmul.bf16.gmra.mxu1 %v15785_v12 }
 0x90f   :  { %15783 = vst [vmem:[#allocation42_spill] sm:$0xff] %v14105_v11  ;;  %6148 = vmatmul.bf16.gmra.mxu0 %v15784_v26  ;;  %6486 = vmatmul.bf16.gmra.mxu2 %v15786_v30  ;;  %v15790_v26 = vld [vmem:[#allocation50_spill] sm:$0xff]  ;;  %v15791_v30 = vld [vmem:[#allocation51_spill] sm:$0xff] }
 0x911   :  { %6655 = vmatmul.bf16.gmra.mxu3 %v15787_v8  ;;  %v15792_v8 = vld [vmem:[#allocation52_spill] sm:$0xff] }
 0x912   :  { %v6447_v44 = vpop.f32.mrf.mxu2  ;;  %v6280_v15 = vpop.f32.mrf.mxu1 }
 0x913   :  { %v6448_v33 = vadd.f32 %v6447_v44, %v6279_v63  ;;  %v15793_v63 = vld [vmem:[#allocation53_spill] sm:$0xff] }
 0x914   :  { %v6616_v6 = vpop.f32.mrf.mxu3  ;;  %v6111_v10 = vpop.f32.mrf.mxu0 }
 0x915   :  { %v14111_v9 = vadd.f32 %v6616_v6, %v6448_v33  ;;  %v6281_v61 = vadd.f32 %v6280_v15, %v6111_v10 }
 0x917   :  { %15788 = vst [vmem:[#allocation43_spill] sm:$0xff] %v14111_v9 }
 0x91a   :  { %v6449_v7 = vpop.f32.mrf.mxu2  ;;  %v6283_v22 = vpop.f32.mrf.mxu1 }
 0x91b   :  { %v6450_v14 = vadd.f32 %v6449_v7, %v6281_v61 }
 0x91c   :  { %v6618_v42 = vpop.f32.mrf.mxu3  ;;  %v6114_v13 = vpop.f32.mrf.mxu0 }
 0x91d   :  { %v14113_v11 = vadd.f32 %v6618_v42, %v6450_v14  ;;  %v6284_v12 = vadd.f32 %v6283_v22, %v6114_v13  ;;  %6322 = vmatmul.bf16.gmra.mxu1 %v15791_v30 }
 0x91f   :  { %15789 = vst [vmem:[#allocation48_spill] sm:$0xff] %v14113_v11  ;;  %6153 = vmatmul.bf16.gmra.mxu0 %v15790_v26  ;;  %6491 = vmatmul.bf16.gmra.mxu2 %v15792_v8  ;;  %v15796_v26 = vld [vmem:[#allocation56_spill] sm:$0xff]  ;;  %v15797_v8 = vld [vmem:[#allocation57_spill] sm:$0xff] }
 0x921   :  { %6660 = vmatmul.bf16.gmra.mxu3 %v15793_v63  ;;  %v15798_v63 = vld [vmem:[#allocation58_spill] sm:$0xff] }
 0x922   :  { %v6452_v44 = vpop.f32.mrf.mxu2  ;;  %v6285_v15 = vpop.f32.mrf.mxu1 }
 0x923   :  { %v6453_v33 = vadd.f32 %v6452_v44, %v6284_v12  ;;  %v15799_v12 = vld [vmem:[#allocation59_spill] sm:$0xff]  ;;  %v12673_v44 = vld [vmem:[#allocation6 + $0x4d4] sm:$0xf] }
 0x924   :  { %v6621_v6 = vpop.f32.mrf.mxu3  ;;  %v6116_v10 = vpop.f32.mrf.mxu0 }
 0x925   :  { %v14119_v7 = vadd.f32 %v6621_v6, %v6453_v33  ;;  %v6286_v61 = vadd.f32 %v6285_v15, %v6116_v10  ;;  %v11995_v33 = vld [vmem:[#allocation6 + $0x4f0] sm:$0xf0] }
 0x926   :  { %v12737_v6 = vld [vmem:[#allocation6 + $0x6d4] sm:$0xf]  ;;  %v11998_v10 = vor.u32 %v12673_v44, %v11995_v33 }
 0x927   :  { %15794 = vst [vmem:[#allocation49_spill] sm:$0xff] %v14119_v7  ;;  %v12251_v15 = vld [vmem:[#allocation6 + $0x6f0] sm:$0xf0] }
 0x928   :  { %7098 = vmatpush.bf16.msrb.mxu2 %v11998_v10 }
 0x92a   :  { %v6454_v9 = vpop.f32.mrf.mxu2  ;;  %v6288_v22 = vpop.f32.mrf.mxu1 }
 0x92b   :  { %v6455_v14 = vadd.f32 %v6454_v9, %v6286_v61  ;;  %v12254_v61 = vor.u32 %v12737_v6, %v12251_v15 }
 0x92c   :  { %v6623_v42 = vpop.f32.mrf.mxu3  ;;  %v6119_v13 = vpop.f32.mrf.mxu0 }
 0x92d   :  { %v14121_v11 = vadd.f32 %v6623_v42, %v6455_v14  ;;  %v6289_v30 = vadd.f32 %v6288_v22, %v6119_v13  ;;  %6327 = vmatmul.bf16.gmra.mxu1 %v15797_v8  ;;  %7267 = vmatpush.bf16.msrb.mxu3 %v12254_v61  ;;  %v12545_v8 = vld [vmem:[#allocation6 + $0xd4] sm:$0xf] }
 0x92e   :  { %v15802_v61 = vld [vmem:[#allocation62_spill] sm:$0xff] }
 0x92f   :  { %15795 = vst [vmem:[#allocation54_spill] sm:$0xff] %v14121_v11  ;;  %6158 = vmatmul.bf16.gmra.mxu0 %v15796_v26  ;;  %6496 = vmatmul.bf16.gmra.mxu2 %v15798_v63  ;;  %v11483_v63 = vld [vmem:[#allocation6 + $0xf0] sm:$0xf0] }
 0x930   :  { %v12609_v11 = vld [vmem:[#allocation6 + $0x2d4] sm:$0xf] }
 0x931   :  { %6665 = vmatmul.bf16.gmra.mxu3 %v15799_v12  ;;  %v11486_v12 = vor.u32 %v12545_v8, %v11483_v63  ;;  %v11739_v26 = vld [vmem:[#allocation6 + $0x2f0] sm:$0xf0] }
 0x932   :  { %v6457_v9 = vpop.f32.mrf.mxu2  ;;  %v6290_v42 = vpop.f32.mrf.mxu1  ;;  %v11742_v40 = vor.u32 %v12609_v11, %v11739_v26 }
 0x933   :  { %v6458_v7 = vadd.f32 %v6457_v9, %v6289_v30  ;;  %6760 = vmatpush.bf16.msrb.mxu0 %v11486_v12 }
 0x934   :  { %v6626_v17 = vpop.f32.mrf.mxu3  ;;  %v6121_v14 = vpop.f32.mrf.mxu0  ;;  %6929 = vmatpush.bf16.msrb.mxu1 %v11742_v40 }
 0x935   :  { %v14127_v13 = vadd.f32 %v6626_v17, %v6458_v7  ;;  %v6291_v22 = vadd.f32 %v6290_v42, %v6121_v14  ;;  %v15803_v17 = vld [vmem:[#allocation63_spill] sm:$0xff]  ;;  %v15804_v7 = vld [vmem:[#allocation64_spill] sm:$0xff]  ;;  %v15805_v14 = vld [vmem:[#allocation65_spill] sm:$0xff] }
 0x937   :  { %15800 = vst [vmem:[#allocation55_spill] sm:$0xff] %v14127_v13 }
 0x93a   :  { %v6459_v44 = vpop.f32.mrf.mxu2  ;;  %v6293_v15 = vpop.f32.mrf.mxu1 }
 0x93b   :  { %v6460_v33 = vadd.f32 %v6459_v44, %v6291_v22 }
 0x93c   :  { %v6628_v6 = vpop.f32.mrf.mxu3  ;;  %v6124_v30 = vpop.f32.mrf.mxu0 }
 0x93d   :  { %v14129_v9 = vadd.f32 %v6628_v6, %v6460_v33  ;;  %v6294_v10 = vadd.f32 %v6293_v15, %v6124_v30  ;;  %6332 = vmatmul.bf16.gmra.mxu1 %v15803_v17 }
 0x93f   :  { %15801 = vst [vmem:[#allocation60_spill] sm:$0xff] %v14129_v9  ;;  %6163 = vmatmul.bf16.gmra.mxu0 %v15802_v61  ;;  %6501 = vmatmul.bf16.gmra.mxu2 %v15804_v7  ;;  %v15808_v9 = vld [vmem:[#allocation68_spill] sm:$0xff]  ;;  %v15809_v7 = vld [vmem:[#allocation69_spill] sm:$0xff] }
 0x941   :  { %6670 = vmatmul.bf16.gmra.mxu3 %v15805_v14  ;;  %v15810_v14 = vld [vmem:[#allocation70_spill] sm:$0xff] }
 0x942   :  { %v6462_v8 = vpop.f32.mrf.mxu2  ;;  %v6295_v63 = vpop.f32.mrf.mxu1 }
 0x943   :  { %v6463_v26 = vadd.f32 %v6462_v8, %v6294_v10  ;;  %v15811_v10 = vld [vmem:[#allocation71_spill] sm:$0xff] }
 0x944   :  { %v6631_v11 = vpop.f32.mrf.mxu3  ;;  %v6126_v40 = vpop.f32.mrf.mxu0 }
 0x945   :  { %v14135_v12 = vadd.f32 %v6631_v11, %v6463_v26  ;;  %v6296_v42 = vadd.f32 %v6295_v63, %v6126_v40 }
 0x947   :  { %15806 = vst [vmem:[#allocation61_spill] sm:$0xff] %v14135_v12 }
 0x94a   :  { %v6464_v22 = vpop.f32.mrf.mxu2  ;;  %v6298_v30 = vpop.f32.mrf.mxu1 }
 0x94b   :  { %v6465_v44 = vadd.f32 %v6464_v22, %v6296_v42 }
 0x94c   :  { %v6633_v33 = vpop.f32.mrf.mxu3  ;;  %v6129_v6 = vpop.f32.mrf.mxu0 }
 0x94d   :  { %v14137_v15 = vadd.f32 %v6633_v33, %v6465_v44  ;;  %v6299_v17 = vadd.f32 %v6298_v30, %v6129_v6  ;;  %6337 = vmatmul.bf16.gmra.mxu1 %v15809_v7 }
 0x94f   :  { %15807 = vst [vmem:[#allocation66_spill] sm:$0xff] %v14137_v15  ;;  %6168 = vmatmul.bf16.gmra.mxu0 %v15808_v9  ;;  %6506 = vmatmul.bf16.gmra.mxu2 %v15810_v14  ;;  %v15814_v9 = vld [vmem:[#allocation74_spill] sm:$0xff]  ;;  %v15815_v14 = vld [vmem:[#allocation75_spill] sm:$0xff] }
 0x951   :  { %6675 = vmatmul.bf16.gmra.mxu3 %v15811_v10  ;;  %v15816_v10 = vld [vmem:[#allocation76_spill] sm:$0xff] }
 0x952   :  { %v6467_v8 = vpop.f32.mrf.mxu2  ;;  %v6300_v63 = vpop.f32.mrf.mxu1 }
 0x953   :  { %v6468_v26 = vadd.f32 %v6467_v8, %v6299_v17  ;;  %v15817_v17 = vld [vmem:[#allocation77_spill] sm:$0xff] }
 0x954   :  { %v6636_v11 = vpop.f32.mrf.mxu3  ;;  %v6131_v40 = vpop.f32.mrf.mxu0 }
 0x955   :  { %v14143_v42 = vadd.f32 %v6636_v11, %v6468_v26  ;;  %v6301_v22 = vadd.f32 %v6300_v63, %v6131_v40 }
 0x957   :  { %15812 = vst [vmem:[#allocation67_spill] sm:$0xff] %v14143_v42 }
 0x95a   :  { %v6469_v12 = vpop.f32.mrf.mxu2  ;;  %v6303_v30 = vpop.f32.mrf.mxu1 }
 0x95b   :  { %v6470_v44 = vadd.f32 %v6469_v12, %v6301_v22 }
 0x95c   :  { %v6638_v33 = vpop.f32.mrf.mxu3  ;;  %v6134_v6 = vpop.f32.mrf.mxu0 }
 0x95d   :  { %v14145_v15 = vadd.f32 %v6638_v33, %v6470_v44  ;;  %v6304_v7 = vadd.f32 %v6303_v30, %v6134_v6  ;;  %6342 = vmatmul.bf16.gmra.mxu1 %v15815_v14 }
 0x95f   :  { %15813 = vst [vmem:[#allocation72_spill] sm:$0xff] %v14145_v15  ;;  %6173 = vmatmul.bf16.gmra.mxu0 %v15814_v9  ;;  %6511 = vmatmul.bf16.gmra.mxu2 %v15816_v10  ;;  %v15820_v9 = vld [vmem:[#allocation80_spill] sm:$0xff]  ;;  %v15821_v10 = vld [vmem:[#allocation81_spill] sm:$0xff] }
 0x961   :  { %6680 = vmatmul.bf16.gmra.mxu3 %v15817_v17  ;;  %v15822_v17 = vld [vmem:[#allocation82_spill] sm:$0xff] }
 0x962   :  { %v6472_v8 = vpop.f32.mrf.mxu2  ;;  %v6305_v63 = vpop.f32.mrf.mxu1 }
 0x963   :  { %v6473_v26 = vadd.f32 %v6472_v8, %v6304_v7  ;;  %v15823_v7 = vld [vmem:[#allocation83_spill] sm:$0xff]  ;;  %v12665_v8 = vld [vmem:[#allocation6 + $0x494] sm:$0xf] }
 0x964   :  { %v6641_v11 = vpop.f32.mrf.mxu3  ;;  %v6136_v40 = vpop.f32.mrf.mxu0 }
 0x965   :  { %v14151_v12 = vadd.f32 %v6641_v11, %v6473_v26  ;;  %v6306_v22 = vadd.f32 %v6305_v63, %v6136_v40  ;;  %v11963_v26 = vld [vmem:[#allocation6 + $0x4b0] sm:$0xf0] }
 0x966   :  { %v12729_v11 = vld [vmem:[#allocation6 + $0x694] sm:$0xf]  ;;  %v11966_v40 = vor.u32 %v12665_v8, %v11963_v26 }
 0x967   :  { %15818 = vst [vmem:[#allocation73_spill] sm:$0xff] %v14151_v12  ;;  %v12219_v63 = vld [vmem:[#allocation6 + $0x6b0] sm:$0xf0] }
 0x968   :  { %7099 = vmatpush.bf16.msrb.mxu2 %v11966_v40 }
 0x96a   :  { %v6474_v42 = vpop.f32.mrf.mxu2  ;;  %v6308_v30 = vpop.f32.mrf.mxu1 }
 0x96b   :  { %v6475_v44 = vadd.f32 %v6474_v42, %v6306_v22  ;;  %v12222_v22 = vor.u32 %v12729_v11, %v12219_v63 }
 0x96c   :  { %v6643_v33 = vpop.f32.mrf.mxu3  ;;  %v6139_v6 = vpop.f32.mrf.mxu0 }
 0x96d   :  { %v14153_v15 = vadd.f32 %v6643_v33, %v6475_v44  ;;  %v6309_v14 = vadd.f32 %v6308_v30, %v6139_v6  ;;  %6347 = vmatmul.bf16.gmra.mxu1 %v15821_v10  ;;  %7268 = vmatpush.bf16.msrb.mxu3 %v12222_v22  ;;  %v12537_v10 = vld [vmem:[#allocation6 + $0x94] sm:$0xf] }
 0x96e   :  { %v15826_v22 = vld [vmem:[#allocation86_spill] sm:$0xff] }
 0x96f   :  { %15819 = vst [vmem:[#allocation78_spill] sm:$0xff] %v14153_v15  ;;  %6178 = vmatmul.bf16.gmra.mxu0 %v15820_v9  ;;  %6516 = vmatmul.bf16.gmra.mxu2 %v15822_v17  ;;  %v11451_v17 = vld [vmem:[#allocation6 + $0xb0] sm:$0xf0] }
 0x970   :  { %v12601_v15 = vld [vmem:[#allocation6 + $0x294] sm:$0xf] }
 0x971   :  { %6685 = vmatmul.bf16.gmra.mxu3 %v15823_v7  ;;  %v11454_v7 = vor.u32 %v12537_v10, %v11451_v17  ;;  %v11707_v9 = vld [vmem:[#allocation6 + $0x2b0] sm:$0xf0] }
 0x972   :  { %v6477_v42 = vpop.f32.mrf.mxu2  ;;  %v6310_v33 = vpop.f32.mrf.mxu1  ;;  %v11710_v13 = vor.u32 %v12601_v15, %v11707_v9 }
 0x973   :  { %v6478_v12 = vadd.f32 %v6477_v42, %v6309_v14  ;;  %6761 = vmatpush.bf16.msrb.mxu0 %v11454_v7 }
 0x974   :  { %v6646_v61 = vpop.f32.mrf.mxu3  ;;  %v6141_v44 = vpop.f32.mrf.mxu0  ;;  %6930 = vmatpush.bf16.msrb.mxu1 %v11710_v13 }
 0x975   :  { %v14159_v6 = vadd.f32 %v6646_v61, %v6478_v12  ;;  %v6311_v30 = vadd.f32 %v6310_v33, %v6141_v44  ;;  %v15827_v61 = vld [vmem:[#allocation87_spill] sm:$0xff]  ;;  %v15828_v12 = vld [vmem:[#allocation88_spill] sm:$0xff]  ;;  %v15829_v44 = vld [vmem:[#allocation89_spill] sm:$0xff] }
 0x977   :  { %15824 = vst [vmem:[#allocation79_spill] sm:$0xff] %v14159_v6 }
 0x97a   :  { %v6479_v8 = vpop.f32.mrf.mxu2  ;;  %v6313_v63 = vpop.f32.mrf.mxu1 }
 0x97b   :  { %v6480_v26 = vadd.f32 %v6479_v8, %v6311_v30 }
 0x97c   :  { %v6648_v11 = vpop.f32.mrf.mxu3  ;;  %v6144_v14 = vpop.f32.mrf.mxu0 }
 0x97d   :  { %v14161_v42 = vadd.f32 %v6648_v11, %v6480_v26  ;;  %v6314_v40 = vadd.f32 %v6313_v63, %v6144_v14  ;;  %6352 = vmatmul.bf16.gmra.mxu1 %v15827_v61 }
 0x97f   :  { %15825 = vst [vmem:[#allocation84_spill] sm:$0xff] %v14161_v42  ;;  %6183 = vmatmul.bf16.gmra.mxu0 %v15826_v22  ;;  %6521 = vmatmul.bf16.gmra.mxu2 %v15828_v12  ;;  %v15832_v42 = vld [vmem:[#allocation92_spill] sm:$0xff]  ;;  %v15833_v12 = vld [vmem:[#allocation93_spill] sm:$0xff] }
 0x981   :  { %6690 = vmatmul.bf16.gmra.mxu3 %v15829_v44  ;;  %v15834_v44 = vld [vmem:[#allocation94_spill] sm:$0xff] }
 0x982   :  { %v6482_v10 = vpop.f32.mrf.mxu2  ;;  %v6315_v17 = vpop.f32.mrf.mxu1 }
 0x983   :  { %v6483_v9 = vadd.f32 %v6482_v10, %v6314_v40  ;;  %v15835_v40 = vld [vmem:[#allocation95_spill] sm:$0xff] }
 0x984   :  { %v6651_v15 = vpop.f32.mrf.mxu3  ;;  %v6146_v13 = vpop.f32.mrf.mxu0 }
 0x985   :  { %v14167_v7 = vadd.f32 %v6651_v15, %v6483_v9  ;;  %v6316_v33 = vadd.f32 %v6315_v17, %v6146_v13 }
 0x987   :  { %15830 = vst [vmem:[#allocation85_spill] sm:$0xff] %v14167_v7 }
 0x98a   :  { %v6484_v30 = vpop.f32.mrf.mxu2  ;;  %v6318_v14 = vpop.f32.mrf.mxu1 }
 0x98b   :  { %v6485_v8 = vadd.f32 %v6484_v30, %v6316_v33 }
 0x98c   :  { %v6653_v26 = vpop.f32.mrf.mxu3  ;;  %v6149_v11 = vpop.f32.mrf.mxu0 }
 0x98d   :  { %v14169_v63 = vadd.f32 %v6653_v26, %v6485_v8  ;;  %v6319_v61 = vadd.f32 %v6318_v14, %v6149_v11  ;;  %6357 = vmatmul.bf16.gmra.mxu1 %v15833_v12 }
 0x98f   :  { %15831 = vst [vmem:[#allocation90_spill] sm:$0xff] %v14169_v63  ;;  %6188 = vmatmul.bf16.gmra.mxu0 %v15832_v42  ;;  %6526 = vmatmul.bf16.gmra.mxu2 %v15834_v44  ;;  %v15838_v42 = vld [vmem:[#allocation98_spill] sm:$0xff]  ;;  %v15839_v44 = vld [vmem:[#allocation99_spill] sm:$0xff] }
 0x991   :  { %6695 = vmatmul.bf16.gmra.mxu3 %v15835_v40  ;;  %v15840_v40 = vld [vmem:[#allocation100_spill] sm:$0xff] }
 0x992   :  { %v6487_v10 = vpop.f32.mrf.mxu2  ;;  %v6320_v17 = vpop.f32.mrf.mxu1 }
 0x993   :  { %v6488_v9 = vadd.f32 %v6487_v10, %v6319_v61  ;;  %v15841_v61 = vld [vmem:[#allocation101_spill] sm:$0xff] }
 0x994   :  { %v6656_v15 = vpop.f32.mrf.mxu3  ;;  %v6151_v13 = vpop.f32.mrf.mxu0 }
 0x995   :  { %v14175_v33 = vadd.f32 %v6656_v15, %v6488_v9  ;;  %v6321_v30 = vadd.f32 %v6320_v17, %v6151_v13 }
 0x997   :  { %15836 = vst [vmem:[#allocation91_spill] sm:$0xff] %v14175_v33 }
 0x99a   :  { %v6489_v7 = vpop.f32.mrf.mxu2  ;;  %v6323_v14 = vpop.f32.mrf.mxu1 }
 0x99b   :  { %v6490_v8 = vadd.f32 %v6489_v7, %v6321_v30 }
 0x99c   :  { %v6658_v26 = vpop.f32.mrf.mxu3  ;;  %v6154_v11 = vpop.f32.mrf.mxu0 }
 0x99d   :  { %v14177_v63 = vadd.f32 %v6658_v26, %v6490_v8  ;;  %v6324_v12 = vadd.f32 %v6323_v14, %v6154_v11  ;;  %6362 = vmatmul.bf16.gmra.mxu1 %v15839_v44 }
 0x99f   :  { %15837 = vst [vmem:[#allocation96_spill] sm:$0xff] %v14177_v63  ;;  %6193 = vmatmul.bf16.gmra.mxu0 %v15838_v42  ;;  %6531 = vmatmul.bf16.gmra.mxu2 %v15840_v40  ;;  %v15844_v42 = vld [vmem:[#allocation104_spill] sm:$0xff]  ;;  %v15845_v40 = vld [vmem:[#allocation105_spill] sm:$0xff] }
 0x9a1   :  { %6700 = vmatmul.bf16.gmra.mxu3 %v15841_v61  ;;  %v15846_v61 = vld [vmem:[#allocation106_spill] sm:$0xff] }
 0x9a2   :  { %v6492_v10 = vpop.f32.mrf.mxu2  ;;  %v6325_v17 = vpop.f32.mrf.mxu1 }
 0x9a3   :  { %v6493_v9 = vadd.f32 %v6492_v10, %v6324_v12  ;;  %v15847_v12 = vld [vmem:[#allocation107_spill] sm:$0xff]  ;;  %v12657_v10 = vld [vmem:[#allocation6 + $0x454] sm:$0xf] }
 0x9a4   :  { %v6661_v15 = vpop.f32.mrf.mxu3  ;;  %v6156_v13 = vpop.f32.mrf.mxu0 }
 0x9a5   :  { %v14183_v7 = vadd.f32 %v6661_v15, %v6493_v9  ;;  %v6326_v30 = vadd.f32 %v6325_v17, %v6156_v13  ;;  %v11931_v9 = vld [vmem:[#allocation6 + $0x470] sm:$0xf0] }
 0x9a6   :  { %v12721_v15 = vld [vmem:[#allocation6 + $0x654] sm:$0xf]  ;;  %v11934_v13 = vor.u32 %v12657_v10, %v11931_v9 }
 0x9a7   :  { %15842 = vst [vmem:[#allocation97_spill] sm:$0xff] %v14183_v7  ;;  %v12187_v17 = vld [vmem:[#allocation6 + $0x670] sm:$0xf0] }
 0x9a8   :  { %7100 = vmatpush.bf16.msrb.mxu2 %v11934_v13 }
 0x9aa   :  { %v6494_v33 = vpop.f32.mrf.mxu2  ;;  %v6328_v14 = vpop.f32.mrf.mxu1 }
 0x9ab   :  { %v6495_v8 = vadd.f32 %v6494_v33, %v6326_v30  ;;  %v12190_v30 = vor.u32 %v12721_v15, %v12187_v17 }
 0x9ac   :  { %v6663_v26 = vpop.f32.mrf.mxu3  ;;  %v6159_v11 = vpop.f32.mrf.mxu0 }
 0x9ad   :  { %v14185_v63 = vadd.f32 %v6663_v26, %v6495_v8  ;;  %v6329_v44 = vadd.f32 %v6328_v14, %v6159_v11  ;;  %6367 = vmatmul.bf16.gmra.mxu1 %v15845_v40  ;;  %7269 = vmatpush.bf16.msrb.mxu3 %v12190_v30  ;;  %v12529_v40 = vld [vmem:[#allocation6 + $0x54] sm:$0xf] }
 0x9ae   :  { %v15850_v30 = vld [vmem:[#allocation110_spill] sm:$0xff] }
 0x9af   :  { %15843 = vst [vmem:[#allocation102_spill] sm:$0xff] %v14185_v63  ;;  %6198 = vmatmul.bf16.gmra.mxu0 %v15844_v42  ;;  %6536 = vmatmul.bf16.gmra.mxu2 %v15846_v61  ;;  %v11419_v61 = vld [vmem:[#allocation6 + $0x70] sm:$0xf0] }
 0x9b0   :  { %v12593_v63 = vld [vmem:[#allocation6 + $0x254] sm:$0xf] }
 0x9b1   :  { %6705 = vmatmul.bf16.gmra.mxu3 %v15847_v12  ;;  %v11422_v12 = vor.u32 %v12529_v40, %v11419_v61  ;;  %v11675_v42 = vld [vmem:[#allocation6 + $0x270] sm:$0xf0] }
 0x9b2   :  { %v6497_v33 = vpop.f32.mrf.mxu2  ;;  %v6330_v26 = vpop.f32.mrf.mxu1  ;;  %v11678_v6 = vor.u32 %v12593_v63, %v11675_v42 }
 0x9b3   :  { %v6498_v7 = vadd.f32 %v6497_v33, %v6329_v44  ;;  %6762 = vmatpush.bf16.msrb.mxu0 %v11422_v12 }
 0x9b4   :  { %v6666_v22 = vpop.f32.mrf.mxu3  ;;  %v6161_v8 = vpop.f32.mrf.mxu0  ;;  %6931 = vmatpush.bf16.msrb.mxu1 %v11678_v6 }
 0x9b5   :  { %v14191_v11 = vadd.f32 %v6666_v22, %v6498_v7  ;;  %v6331_v14 = vadd.f32 %v6330_v26, %v6161_v8  ;;  %v15851_v22 = vld [vmem:[#allocation111_spill] sm:$0xff]  ;;  %v15852_v7 = vld [vmem:[#allocation112_spill] sm:$0xff]  ;;  %v15853_v8 = vld [vmem:[#allocation113_spill] sm:$0xff] }
 0x9b7   :  { %15848 = vst [vmem:[#allocation103_spill] sm:$0xff] %v14191_v11 }
 0x9ba   :  { %v6499_v10 = vpop.f32.mrf.mxu2  ;;  %v6333_v17 = vpop.f32.mrf.mxu1 }
 0x9bb   :  { %v6500_v9 = vadd.f32 %v6499_v10, %v6331_v14 }
 0x9bc   :  { %v6668_v15 = vpop.f32.mrf.mxu3  ;;  %v6164_v44 = vpop.f32.mrf.mxu0 }
 0x9bd   :  { %v14193_v33 = vadd.f32 %v6668_v15, %v6500_v9  ;;  %v6334_v13 = vadd.f32 %v6333_v17, %v6164_v44  ;;  %6372 = vmatmul.bf16.gmra.mxu1 %v15851_v22 }
 0x9bf   :  { %15849 = vst [vmem:[#allocation108_spill] sm:$0xff] %v14193_v33  ;;  %6203 = vmatmul.bf16.gmra.mxu0 %v15850_v30  ;;  %6541 = vmatmul.bf16.gmra.mxu2 %v15852_v7  ;;  %v15856_v33 = vld [vmem:[#allocation116_spill] sm:$0xff]  ;;  %v15857_v7 = vld [vmem:[#allocation117_spill] sm:$0xff] }
 0x9c1   :  { %6710 = vmatmul.bf16.gmra.mxu3 %v15853_v8  ;;  %v15858_v8 = vld [vmem:[#allocation118_spill] sm:$0xff] }
 0x9c2   :  { %v6502_v40 = vpop.f32.mrf.mxu2  ;;  %v6335_v61 = vpop.f32.mrf.mxu1 }
 0x9c3   :  { %v6503_v42 = vadd.f32 %v6502_v40, %v6334_v13  ;;  %v15859_v13 = vld [vmem:[#allocation119_spill] sm:$0xff] }
 0x9c4   :  { %v6671_v63 = vpop.f32.mrf.mxu3  ;;  %v6166_v6 = vpop.f32.mrf.mxu0 }
 0x9c5   :  { %v14199_v12 = vadd.f32 %v6671_v63, %v6503_v42  ;;  %v6336_v26 = vadd.f32 %v6335_v61, %v6166_v6 }
 0x9c7   :  { %15854 = vst [vmem:[#allocation109_spill] sm:$0xff] %v14199_v12 }
 0x9ca   :  { %v6504_v14 = vpop.f32.mrf.mxu2  ;;  %v6338_v44 = vpop.f32.mrf.mxu1 }
 0x9cb   :  { %v6505_v10 = vadd.f32 %v6504_v14, %v6336_v26 }
 0x9cc   :  { %v6673_v9 = vpop.f32.mrf.mxu3  ;;  %v6169_v15 = vpop.f32.mrf.mxu0 }
 0x9cd   :  { %v14201_v17 = vadd.f32 %v6673_v9, %v6505_v10  ;;  %v6339_v22 = vadd.f32 %v6338_v44, %v6169_v15  ;;  %6377 = vmatmul.bf16.gmra.mxu1 %v15857_v7 }
 0x9cf   :  { %15855 = vst [vmem:[#allocation114_spill] sm:$0xff] %v14201_v17  ;;  %6208 = vmatmul.bf16.gmra.mxu0 %v15856_v33  ;;  %6546 = vmatmul.bf16.gmra.mxu2 %v15858_v8  ;;  %v15862_v33 = vld [vmem:[#allocation122_spill] sm:$0xff]  ;;  %v15863_v8 = vld [vmem:[#allocation123_spill] sm:$0xff] }
 0x9d1   :  { %6715 = vmatmul.bf16.gmra.mxu3 %v15859_v13  ;;  %v15864_v13 = vld [vmem:[#allocation124_spill] sm:$0xff] }
 0x9d2   :  { %v6507_v40 = vpop.f32.mrf.mxu2  ;;  %v6340_v61 = vpop.f32.mrf.mxu1 }
 0x9d3   :  { %v6508_v42 = vadd.f32 %v6507_v40, %v6339_v22  ;;  %v15865_v22 = vld [vmem:[#allocation125_spill] sm:$0xff] }
 0x9d4   :  { %v6676_v63 = vpop.f32.mrf.mxu3  ;;  %v6171_v6 = vpop.f32.mrf.mxu0 }
 0x9d5   :  { %v14207_v26 = vadd.f32 %v6676_v63, %v6508_v42  ;;  %v6341_v14 = vadd.f32 %v6340_v61, %v6171_v6 }
 0x9d7   :  { %15860 = vst [vmem:[#allocation115_spill] sm:$0xff] %v14207_v26 }
 0x9da   :  { %v6509_v12 = vpop.f32.mrf.mxu2  ;;  %v6343_v44 = vpop.f32.mrf.mxu1 }
 0x9db   :  { %v6510_v10 = vadd.f32 %v6509_v12, %v6341_v14 }
 0x9dc   :  { %v6678_v9 = vpop.f32.mrf.mxu3  ;;  %v6174_v15 = vpop.f32.mrf.mxu0 }
 0x9dd   :  { %v14209_v17 = vadd.f32 %v6678_v9, %v6510_v10  ;;  %v6344_v7 = vadd.f32 %v6343_v44, %v6174_v15  ;;  %6382 = vmatmul.bf16.gmra.mxu1 %v15863_v8 }
 0x9df   :  { %15861 = vst [vmem:[#allocation120_spill] sm:$0xff] %v14209_v17  ;;  %6213 = vmatmul.bf16.gmra.mxu0 %v15862_v33  ;;  %6551 = vmatmul.bf16.gmra.mxu2 %v15864_v13  ;;  %v15868_v33 = vld [vmem:[#allocation128_spill] sm:$0xff]  ;;  %v15869_v13 = vld [vmem:[#allocation129_spill] sm:$0xff] }
 0x9e1   :  { %6720 = vmatmul.bf16.gmra.mxu3 %v15865_v22  ;;  %v15870_v22 = vld [vmem:[#allocation130_spill] sm:$0xff] }
 0x9e2   :  { %v6512_v40 = vpop.f32.mrf.mxu2  ;;  %v6345_v61 = vpop.f32.mrf.mxu1 }
 0x9e3   :  { %v6513_v42 = vadd.f32 %v6512_v40, %v6344_v7  ;;  %v15871_v7 = vld [vmem:[#allocation131_spill] sm:$0xff]  ;;  %v12649_v40 = vld [vmem:[#allocation6 + $0x414] sm:$0xf] }
 0x9e4   :  { %v6681_v63 = vpop.f32.mrf.mxu3  ;;  %v6176_v6 = vpop.f32.mrf.mxu0 }
 0x9e5   :  { %v14215_v12 = vadd.f32 %v6681_v63, %v6513_v42  ;;  %v6346_v14 = vadd.f32 %v6345_v61, %v6176_v6  ;;  %v11899_v42 = vld [vmem:[#allocation6 + $0x430] sm:$0xf0] }
 0x9e6   :  { %v12713_v63 = vld [vmem:[#allocation6 + $0x614] sm:$0xf]  ;;  %v11902_v6 = vor.u32 %v12649_v40, %v11899_v42 }
 0x9e7   :  { %15866 = vst [vmem:[#allocation121_spill] sm:$0xff] %v14215_v12  ;;  %v12155_v61 = vld [vmem:[#allocation6 + $0x630] sm:$0xf0] }
 0x9e8   :  { %7101 = vmatpush.bf16.msrb.mxu2 %v11902_v6 }
 0x9ea   :  { %v6514_v26 = vpop.f32.mrf.mxu2  ;;  %v6348_v44 = vpop.f32.mrf.mxu1 }
 0x9eb   :  { %v6515_v10 = vadd.f32 %v6514_v26, %v6346_v14  ;;  %v12158_v14 = vor.u32 %v12713_v63, %v12155_v61 }
 0x9ec   :  { %v6683_v9 = vpop.f32.mrf.mxu3  ;;  %v6179_v15 = vpop.f32.mrf.mxu0 }
 0x9ed   :  { %v14217_v17 = vadd.f32 %v6683_v9, %v6515_v10  ;;  %v6349_v8 = vadd.f32 %v6348_v44, %v6179_v15  ;;  %6387 = vmatmul.bf16.gmra.mxu1 %v15869_v13  ;;  %7270 = vmatpush.bf16.msrb.mxu3 %v12158_v14  ;;  %v12521_v13 = vld [vmem:[#allocation6 + $0x14] sm:$0xf]  ;;  %v15875_v14 = vld [vmem:[#allocation137_spill] sm:$0xff] }
 0x9ef   :  { %15867 = vst [vmem:[#allocation126_spill] sm:$0xff] %v14217_v17  ;;  %6218 = vmatmul.bf16.gmra.mxu0 %v15868_v33  ;;  %6556 = vmatmul.bf16.gmra.mxu2 %v15870_v22  ;;  %v11387_v22 = vld [vmem:[#allocation6 + $0x30] sm:$0xf0] }
 0x9f0   :  { %v12585_v17 = vld [vmem:[#allocation6 + $0x214] sm:$0xf] }
 0x9f1   :  { %6725 = vmatmul.bf16.gmra.mxu3 %v15871_v7  ;;  %v11390_v7 = vor.u32 %v12521_v13, %v11387_v22  ;;  %v11643_v33 = vld [vmem:[#allocation6 + $0x230] sm:$0xf0] }
 0x9f2   :  { %v6517_v26 = vpop.f32.mrf.mxu2  ;;  %v6350_v9 = vpop.f32.mrf.mxu1  ;;  %v11646_v11 = vor.u32 %v12585_v17, %v11643_v33 }
 0x9f3   :  { %v6518_v12 = vadd.f32 %v6517_v26, %v6349_v8  ;;  %6763 = vmatpush.bf16.msrb.mxu0 %v11390_v7 }
 0x9f4   :  { %v6686_v30 = vpop.f32.mrf.mxu3  ;;  %v6181_v10 = vpop.f32.mrf.mxu0  ;;  %6932 = vmatpush.bf16.msrb.mxu1 %v11646_v11 }
 0x9f5   :  { %v14223_v15 = vadd.f32 %v6686_v30, %v6518_v12  ;;  %v6351_v44 = vadd.f32 %v6350_v9, %v6181_v10  ;;  %v15873_v30 = vld [vmem:[#allocation135_spill] sm:$0xff]  ;;  %v15874_v12 = vld [vmem:[#allocation136_spill] sm:$0xff] }
 0x9fa   :  { %v6519_v40 = vpop.f32.mrf.mxu2  ;;  %v6353_v61 = vpop.f32.mrf.mxu1 }
 0x9fb   :  { %v6520_v42 = vadd.f32 %v6519_v40, %v6351_v44 }
 0x9fc   :  { %v6688_v63 = vpop.f32.mrf.mxu3  ;;  %v6184_v8 = vpop.f32.mrf.mxu0 }
 0x9fd   :  { %v14225_v26 = vadd.f32 %v6688_v63, %v6520_v42  ;;  %v6354_v6 = vadd.f32 %v6353_v61, %v6184_v8  ;;  %6392 = vmatmul.bf16.gmra.mxu1 %v15873_v30  ;;  %v15878_v30 = vld [vmem:[#allocation140_spill] sm:$0xff] }
 0x9ff   :  { %15872 = vst [vmem:[#allocation127_spill] sm:$0xff] %v14225_v26  ;;  %6223 = vmatmul.bf16.gmra.mxu0 %v15724_v31  ;;  %6561 = vmatmul.bf16.gmra.mxu2 %v15874_v12  ;;  %v15879_v12 = vld [vmem:[#allocation141_spill] sm:$0xff] }
 0xa01   :  { %6730 = vmatmul.bf16.gmra.mxu3 %v15875_v14  ;;  %v15880_v14 = vld [vmem:[#allocation142_spill] sm:$0xff] }
 0xa02   :  { %v6522_v13 = vpop.f32.mrf.mxu2  ;;  %v6355_v22 = vpop.f32.mrf.mxu1 }
 0xa03   :  { %v6523_v33 = vadd.f32 %v6522_v13, %v6354_v6  ;;  %v15881_v6 = vld [vmem:[#allocation143_spill] sm:$0xff] }
 0xa04   :  { %v6691_v17 = vpop.f32.mrf.mxu3  ;;  %v6186_v11 = vpop.f32.mrf.mxu0 }
 0xa05   :  { %v14231_v7 = vadd.f32 %v6691_v17, %v6523_v33  ;;  %v6356_v10 = vadd.f32 %v6355_v22, %v6186_v11 }
 0xa07   :  { %15876 = vst [vmem:[#allocation132_spill] sm:$0xff] %v14231_v7 }
 0xa0a   :  { %v6524_v9 = vpop.f32.mrf.mxu2  ;;  %v6358_v63 = vpop.f32.mrf.mxu1 }
 0xa0b   :  { %v6525_v44 = vadd.f32 %v6524_v9, %v6356_v10 }
 0xa0c   :  { %v6693_v40 = vpop.f32.mrf.mxu3  ;;  %v6189_v42 = vpop.f32.mrf.mxu0 }
 0xa0d   :  { %v14233_v8 = vadd.f32 %v6693_v40, %v6525_v44  ;;  %v6359_v61 = vadd.f32 %v6358_v63, %v6189_v42  ;;  %6397 = vmatmul.bf16.gmra.mxu1 %v15879_v12 }
 0xa0f   :  { %15877 = vst [vmem:[#allocation133_spill] sm:$0xff] %v14233_v8  ;;  %6228 = vmatmul.bf16.gmra.mxu0 %v15878_v30  ;;  %6566 = vmatmul.bf16.gmra.mxu2 %v15880_v14  ;;  %v15884_v30 = vld [vmem:[#allocation146_spill] sm:$0xff]  ;;  %v15885_v14 = vld [vmem:[#allocation147_spill] sm:$0xff] }
 0xa11   :  { %6735 = vmatmul.bf16.gmra.mxu3 %v15881_v6  ;;  %v15886_v6 = vld [vmem:[#allocation148_spill] sm:$0xff] }
 0xa12   :  { %v6527_v13 = vpop.f32.mrf.mxu2  ;;  %v6360_v22 = vpop.f32.mrf.mxu1 }
 0xa13   :  { %v6528_v33 = vadd.f32 %v6527_v13, %v6359_v61  ;;  %v15887_v61 = vld [vmem:[#allocation149_spill] sm:$0xff] }
 0xa14   :  { %v6696_v17 = vpop.f32.mrf.mxu3  ;;  %v6191_v11 = vpop.f32.mrf.mxu0 }
 0xa15   :  { %v14239_v10 = vadd.f32 %v6696_v17, %v6528_v33  ;;  %v6361_v9 = vadd.f32 %v6360_v22, %v6191_v11 }
 0xa17   :  { %15882 = vst [vmem:[#allocation138_spill] sm:$0xff] %v14239_v10 }
 0xa1a   :  { %v6529_v7 = vpop.f32.mrf.mxu2  ;;  %v6363_v63 = vpop.f32.mrf.mxu1 }
 0xa1b   :  { %v6530_v44 = vadd.f32 %v6529_v7, %v6361_v9 }
 0xa1c   :  { %v6698_v40 = vpop.f32.mrf.mxu3  ;;  %v6194_v42 = vpop.f32.mrf.mxu0 }
 0xa1d   :  { %v14241_v8 = vadd.f32 %v6698_v40, %v6530_v44  ;;  %v6364_v12 = vadd.f32 %v6363_v63, %v6194_v42  ;;  %6402 = vmatmul.bf16.gmra.mxu1 %v15885_v14 }
 0xa1f   :  { %15883 = vst [vmem:[#allocation139_spill] sm:$0xff] %v14241_v8  ;;  %6233 = vmatmul.bf16.gmra.mxu0 %v15884_v30  ;;  %6571 = vmatmul.bf16.gmra.mxu2 %v15886_v6  ;;  %v15890_v30 = vld [vmem:[#allocation152_spill] sm:$0xff]  ;;  %v15891_v6 = vld [vmem:[#allocation153_spill] sm:$0xff] }
 0xa21   :  { %6740 = vmatmul.bf16.gmra.mxu3 %v15887_v61  ;;  %v15892_v61 = vld [vmem:[#allocation154_spill] sm:$0xff] }
 0xa22   :  { %v6532_v13 = vpop.f32.mrf.mxu2  ;;  %v6365_v22 = vpop.f32.mrf.mxu1 }
 0xa23   :  { %v6533_v33 = vadd.f32 %v6532_v13, %v6364_v12  ;;  %v15893_v12 = vld [vmem:[#allocation155_spill] sm:$0xff] }
 0xa24   :  { %v6701_v17 = vpop.f32.mrf.mxu3  ;;  %v6196_v11 = vpop.f32.mrf.mxu0  ;;  %v12129_v13 = vld [vmem:[#allocation6 + $0x5d8] sm:$0xf] }
 0xa25   :  { %v14247_v7 = vadd.f32 %v6701_v17, %v6533_v33  ;;  %v6366_v9 = vadd.f32 %v6365_v22, %v6196_v11  ;;  %v12710_v33 = vld [vmem:[#allocation6 + $0x5f4] sm:$0xf0] }
 0xa26   :  { %v12385_v17 = vld [vmem:[#allocation6 + $0x7d8] sm:$0xf]  ;;  %v12130_v11 = vor.u32 %v12710_v33, %v12129_v13 }
 0xa27   :  { %15888 = vst [vmem:[#allocation144_spill] sm:$0xff] %v14247_v7  ;;  %v12774_v22 = vld [vmem:[#allocation6 + $0x7f4] sm:$0xf0] }
 0xa28   :  { %7770 = vmatpush.bf16.msra.mxu2 %v12130_v11 }
 0xa2a   :  { %v6534_v10 = vpop.f32.mrf.mxu2  ;;  %v6368_v63 = vpop.f32.mrf.mxu1 }
 0xa2b   :  { %v6535_v44 = vadd.f32 %v6534_v10, %v6366_v9  ;;  %v12386_v9 = vor.u32 %v12774_v22, %v12385_v17 }
 0xa2c   :  { %v6703_v40 = vpop.f32.mrf.mxu3  ;;  %v6199_v42 = vpop.f32.mrf.mxu0 }
 0xa2d   :  { %v14249_v8 = vadd.f32 %v6703_v40, %v6535_v44  ;;  %v6369_v14 = vadd.f32 %v6368_v63, %v6199_v42  ;;  %6407 = vmatmul.bf16.gmra.mxu1 %v15891_v6  ;;  %7939 = vmatpush.bf16.msra.mxu3 %v12386_v9  ;;  %v11617_v6 = vld [vmem:[#allocation6 + $0x1d8] sm:$0xf] }
 0xa2f   :  { %15889 = vst [vmem:[#allocation145_spill] sm:$0xff] %v14249_v8  ;;  %6238 = vmatmul.bf16.gmra.mxu0 %v15890_v30  ;;  %6576 = vmatmul.bf16.gmra.mxu2 %v15892_v61  ;;  %v12582_v61 = vld [vmem:[#allocation6 + $0x1f4] sm:$0xf0] }
 0xa30   :  { %v11873_v8 = vld [vmem:[#allocation6 + $0x3d8] sm:$0xf] }
 0xa31   :  { %6745 = vmatmul.bf16.gmra.mxu3 %v15893_v12  ;;  %v11618_v12 = vor.u32 %v12582_v61, %v11617_v6  ;;  %v12646_v30 = vld [vmem:[#allocation6 + $0x3f4] sm:$0xf0] }
 0xa32   :  { %v6537_v10 = vpop.f32.mrf.mxu2  ;;  %v6370_v40 = vpop.f32.mrf.mxu1  ;;  %v11874_v31 = vor.u32 %v12646_v30, %v11873_v8 }
 0xa33   :  { %v6538_v7 = vadd.f32 %v6537_v10, %v6369_v14  ;;  %7432 = vmatpush.bf16.msra.mxu0 %v11618_v12 }
 0xa34   :  { %v6706_v26 = vpop.f32.mrf.mxu3  ;;  %v6201_v44 = vpop.f32.mrf.mxu0  ;;  %7601 = vmatpush.bf16.msra.mxu1 %v11874_v31 }
 0xa35   :  { %v14255_v42 = vadd.f32 %v6706_v26, %v6538_v7  ;;  %v6371_v63 = vadd.f32 %v6370_v40, %v6201_v44 }
 0xa3a   :  { %v6539_v13 = vpop.f32.mrf.mxu2  ;;  %v6373_v22 = vpop.f32.mrf.mxu1 }
 0xa3b   :  { %v6540_v33 = vadd.f32 %v6539_v13, %v6371_v63 }
 0xa3c   :  { %v6708_v17 = vpop.f32.mrf.mxu3  ;;  %v6204_v14 = vpop.f32.mrf.mxu0 }
 0xa3d   :  { %v14257_v10 = vadd.f32 %v6708_v17, %v6540_v33  ;;  %v6374_v11 = vadd.f32 %v6373_v22, %v6204_v14  ;;  %6412 = vmatmul.bf16.gmra.mxu1 %v13355_v28 }
 0xa3f   :  { %6243 = vmatmul.bf16.gmra.mxu0 %v13353_v43  ;;  %6581 = vmatmul.bf16.gmra.mxu2 %v13357_v24 }
 0xa41   :  { %6750 = vmatmul.bf16.gmra.mxu3 %v13359_v46 }
 0xa42   :  { %v6542_v26 = vpop.f32.mrf.mxu2  ;;  %v6375_v6 = vpop.f32.mrf.mxu1 }
 0xa43   :  { %v6543_v30 = vadd.f32 %v6542_v26, %v6374_v11 }
 0xa44   :  { %v6711_v8 = vpop.f32.mrf.mxu3  ;;  %v6206_v31 = vpop.f32.mrf.mxu0 }
 0xa45   :  { %v14263_v61 = vadd.f32 %v6711_v8, %v6543_v30  ;;  %v6376_v7 = vadd.f32 %v6375_v6, %v6206_v31 }
 0xa4a   :  { %v6544_v12 = vpop.f32.mrf.mxu2  ;;  %v6378_v63 = vpop.f32.mrf.mxu1 }
 0xa4b   :  { %v6545_v9 = vadd.f32 %v6544_v12, %v6376_v7 }
 0xa4c   :  { %v6713_v44 = vpop.f32.mrf.mxu3  ;;  %v6209_v40 = vpop.f32.mrf.mxu0 }
 0xa4d   :  { %v14265_v13 = vadd.f32 %v6713_v44, %v6545_v9  ;;  %v6379_v33 = vadd.f32 %v6378_v63, %v6209_v40  ;;  %6933 = vmatmul.bf16.vlgmr.msrb.gmra.mxu1 %v12893_v51 }
 0xa4f   :  { %6764 = vmatmul.bf16.vlgmr.msrb.gmra.mxu0 %v12891_v47  ;;  %7102 = vmatmul.bf16.vlgmr.msrb.gmra.mxu2 %v12895_v52 }
 0xa51   :  { %7271 = vmatmul.bf16.vlgmr.msrb.gmra.mxu3 %v12897_v53 }
 0xa52   :  { %v6547_v17 = vpop.f32.mrf.mxu2  ;;  %v6380_v26 = vpop.f32.mrf.mxu1 }
 0xa53   :  { %v6548_v14 = vadd.f32 %v6547_v17, %v6379_v33 }
 0xa54   :  { %v6716_v22 = vpop.f32.mrf.mxu3  ;;  %v6211_v11 = vpop.f32.mrf.mxu0 }
 0xa55   :  { %v14271_v30 = vadd.f32 %v6716_v22, %v6548_v14  ;;  %v6381_v8 = vadd.f32 %v6380_v26, %v6211_v11 }
 0xa5a   :  { %v6549_v31 = vpop.f32.mrf.mxu2  ;;  %v6383_v9 = vpop.f32.mrf.mxu1 }
 0xa5b   :  { %v6550_v6 = vadd.f32 %v6549_v31, %v6381_v8 }
 0xa5c   :  { %v6718_v7 = vpop.f32.mrf.mxu3  ;;  %v6214_v12 = vpop.f32.mrf.mxu0 }
 0xa5d   :  { %v14273_v44 = vadd.f32 %v6718_v7, %v6550_v6  ;;  %v6384_v40 = vadd.f32 %v6383_v9, %v6214_v12  ;;  %6938 = vmatmul.bf16.gmra.mxu1 %v15747_v32 }
 0xa5f   :  { %6769 = vmatmul.bf16.gmra.mxu0 %v12903_v0  ;;  %7107 = vmatmul.bf16.gmra.mxu2 %v15748_v35 }
 0xa61   :  { %7276 = vmatmul.bf16.gmra.mxu3 %v15749_v60 }
 0xa62   :  { %v6552_v63 = vpop.f32.mrf.mxu2  ;;  %v6385_v22 = vpop.f32.mrf.mxu1 }
 0xa63   :  { %v6553_v33 = vadd.f32 %v6552_v63, %v6384_v40  ;;  %v15896_v40 = vld [vmem:[#allocation18_spill] sm:$0xff]  ;;  %v12097_v63 = vld [vmem:[#allocation6 + $0x598] sm:$0xf] }
 0xa64   :  { %v6721_v17 = vpop.f32.mrf.mxu3  ;;  %v6216_v14 = vpop.f32.mrf.mxu0 }
 0xa65   :  { %v14279_v11 = vadd.f32 %v6721_v17, %v6553_v33  ;;  %v6386_v26 = vadd.f32 %v6385_v22, %v6216_v14  ;;  %v12702_v33 = vld [vmem:[#allocation6 + $0x5b4] sm:$0xf0] }
 0xa66   :  { %v12353_v17 = vld [vmem:[#allocation6 + $0x798] sm:$0xf]  ;;  %v12098_v14 = vor.u32 %v12702_v33, %v12097_v63 }
 0xa67   :  { %15894 = vst [vmem:[#allocation150_spill] sm:$0xff] %v14279_v11  ;;  %v12766_v22 = vld [vmem:[#allocation6 + $0x7b4] sm:$0xf0] }
 0xa68   :  { %7771 = vmatpush.bf16.msra.mxu2 %v12098_v14 }
 0xa6a   :  { %v6554_v8 = vpop.f32.mrf.mxu2  ;;  %v6388_v12 = vpop.f32.mrf.mxu1 }
 0xa6b   :  { %v6555_v31 = vadd.f32 %v6554_v8, %v6386_v26  ;;  %v12354_v8 = vor.u32 %v12766_v22, %v12353_v17 }
 0xa6c   :  { %v6723_v6 = vpop.f32.mrf.mxu3  ;;  %v6219_v7 = vpop.f32.mrf.mxu0 }
 0xa6d   :  { %v14281_v9 = vadd.f32 %v6723_v6, %v6555_v31  ;;  %v6389_v32 = vadd.f32 %v6388_v12, %v6219_v7  ;;  %6943 = vmatmul.bf16.gmra.mxu1 %v15753_v20  ;;  %7940 = vmatpush.bf16.msra.mxu3 %v12354_v8  ;;  %v11585_v20 = vld [vmem:[#allocation6 + $0x198] sm:$0xf] }
 0xa6f   :  { %15895 = vst [vmem:[#allocation151_spill] sm:$0xff] %v14281_v9  ;;  %6774 = vmatmul.bf16.gmra.mxu0 %v15751_v2  ;;  %7112 = vmatmul.bf16.gmra.mxu2 %v15754_v41  ;;  %v12574_v41 = vld [vmem:[#allocation6 + $0x1b4] sm:$0xf0] }
 0xa70   :  { %v11841_v9 = vld [vmem:[#allocation6 + $0x398] sm:$0xf] }
 0xa71   :  { %7281 = vmatmul.bf16.gmra.mxu3 %v15896_v40  ;;  %v11586_v40 = vor.u32 %v12574_v41, %v11585_v20  ;;  %v12638_v2 = vld [vmem:[#allocation6 + $0x3b4] sm:$0xf0] }
 0xa72   :  { %v6557_v26 = vpop.f32.mrf.mxu2  ;;  %v6390_v6 = vpop.f32.mrf.mxu1  ;;  %v11842_v35 = vor.u32 %v12638_v2, %v11841_v9 }
 0xa73   :  { %v6558_v11 = vadd.f32 %v6557_v26, %v6389_v32  ;;  %7433 = vmatpush.bf16.msra.mxu0 %v11586_v40 }
 0xa74   :  { %v6726_v60 = vpop.f32.mrf.mxu3  ;;  %v6221_v31 = vpop.f32.mrf.mxu0  ;;  %7602 = vmatpush.bf16.msra.mxu1 %v11842_v35 }
 0xa75   :  { %v14287_v7 = vadd.f32 %v6726_v60, %v6558_v11  ;;  %v6391_v12 = vadd.f32 %v6390_v6, %v6221_v31 }
 0xa7a   :  { %v6559_v63 = vpop.f32.mrf.mxu2  ;;  %v6393_v22 = vpop.f32.mrf.mxu1 }
 0xa7b   :  { %v6560_v33 = vadd.f32 %v6559_v63, %v6391_v12 }
 0xa7c   :  { %v6728_v17 = vpop.f32.mrf.mxu3  ;;  %v6224_v32 = vpop.f32.mrf.mxu0 }
 0xa7d   :  { %v14289_v26 = vadd.f32 %v6728_v17, %v6560_v33  ;;  %v6394_v14 = vadd.f32 %v6393_v22, %v6224_v32  ;;  %6948 = vmatmul.bf16.gmra.mxu1 %v12929_v37 }
 0xa7f   :  { %6779 = vmatmul.bf16.gmra.mxu0 %v12927_v36  ;;  %7117 = vmatmul.bf16.gmra.mxu2 %v12931_v38 }
 0xa81   :  { %7286 = vmatmul.bf16.gmra.mxu3 %v12933_v39 }
 0xa82   :  { %v6562_v60 = vpop.f32.mrf.mxu2  ;;  %v6395_v41 = vpop.f32.mrf.mxu1 }
 0xa83   :  { %v6563_v2 = vadd.f32 %v6562_v60, %v6394_v14 }
 0xa84   :  { %v6731_v20 = vpop.f32.mrf.mxu3  ;;  %v6226_v35 = vpop.f32.mrf.mxu0 }
 0xa85   :  { %v14295_v11 = vadd.f32 %v6731_v20, %v6563_v2  ;;  %v6396_v9 = vadd.f32 %v6395_v41, %v6226_v35 }
 0xa8a   :  { %v6564_v40 = vpop.f32.mrf.mxu2  ;;  %v6398_v12 = vpop.f32.mrf.mxu1 }
 0xa8b   :  { %v6565_v8 = vadd.f32 %v6564_v40, %v6396_v9 }
 0xa8c   :  { %v6733_v31 = vpop.f32.mrf.mxu3  ;;  %v6229_v6 = vpop.f32.mrf.mxu0 }
 0xa8d   :  { %v14297_v63 = vadd.f32 %v6733_v31, %v6565_v8  ;;  %v6399_v33 = vadd.f32 %v6398_v12, %v6229_v6  ;;  %6953 = vmatmul.bf16.gmra.mxu1 %v12941_v50 }
 0xa8f   :  { %6784 = vmatmul.bf16.gmra.mxu0 %v12939_v49  ;;  %7122 = vmatmul.bf16.gmra.mxu2 %v12943_v54 }
 0xa91   :  { %7291 = vmatmul.bf16.gmra.mxu3 %v12945_v55 }
 0xa92   :  { %v6567_v17 = vpop.f32.mrf.mxu2  ;;  %v6400_v60 = vpop.f32.mrf.mxu1 }
 0xa93   :  { %v6568_v32 = vadd.f32 %v6567_v17, %v6399_v33 }
 0xa94   :  { %v6736_v22 = vpop.f32.mrf.mxu3  ;;  %v6231_v14 = vpop.f32.mrf.mxu0 }
 0xa95   :  { %v14303_v2 = vadd.f32 %v6736_v22, %v6568_v32  ;;  %v6401_v20 = vadd.f32 %v6400_v60, %v6231_v14 }
 0xa9a   :  { %v6569_v35 = vpop.f32.mrf.mxu2  ;;  %v6403_v8 = vpop.f32.mrf.mxu1 }
 0xa9b   :  { %v6570_v41 = vadd.f32 %v6569_v35, %v6401_v20 }
 0xa9c   :  { %v6738_v9 = vpop.f32.mrf.mxu3  ;;  %v6234_v40 = vpop.f32.mrf.mxu0 }
 0xa9d   :  { %v14305_v31 = vadd.f32 %v6738_v9, %v6570_v41  ;;  %v6404_v6 = vadd.f32 %v6403_v8, %v6234_v40  ;;  %6958 = vmatmul.bf16.gmra.mxu1 %v15757_v48 }
 0xa9f   :  { %15897 = vst [vmem:[#allocation156_spill] sm:$0xff] %v14305_v31  ;;  %6789 = vmatmul.bf16.gmra.mxu0 %v12951_v4  ;;  %7127 = vmatmul.bf16.gmra.mxu2 %v15758_v21 }
 0xaa1   :  { %7296 = vmatmul.bf16.gmra.mxu3 %v15759_v23  ;;  %v12630_v23 = vld [vmem:[#allocation6 + $0x374] sm:$0xf0] }
 0xaa2   :  { %v6572_v12 = vpop.f32.mrf.mxu2  ;;  %v6405_v22 = vpop.f32.mrf.mxu1 }
 0xaa3   :  { %v6573_v33 = vadd.f32 %v6572_v12, %v6404_v6  ;;  %v12065_v6 = vld [vmem:[#allocation6 + $0x558] sm:$0xf] }
 0xaa4   :  { %v6741_v17 = vpop.f32.mrf.mxu3  ;;  %v6236_v32 = vpop.f32.mrf.mxu0  ;;  %v12694_v12 = vld [vmem:[#allocation6 + $0x574] sm:$0xf0] }
 0xaa5   :  { %v14311_v14 = vadd.f32 %v6741_v17, %v6573_v33  ;;  %v6406_v60 = vadd.f32 %v6405_v22, %v6236_v32  ;;  %v12321_v33 = vld [vmem:[#allocation6 + $0x758] sm:$0xf]  ;;  %v12066_v17 = vor.u32 %v12694_v12, %v12065_v6 }
 0xaa6   :  { %v12758_v32 = vld [vmem:[#allocation6 + $0x774] sm:$0xf0] }
 0xaa7   :  { %15898 = vst [vmem:[#allocation157_spill] sm:$0xff] %v14311_v14  ;;  %7772 = vmatpush.bf16.msra.mxu2 %v12066_v17 }
 0xaaa   :  { %v6574_v20 = vpop.f32.mrf.mxu2  ;;  %v6408_v40 = vpop.f32.mrf.mxu1 }
 0xaab   :  { %v6575_v35 = vadd.f32 %v6574_v20, %v6406_v60  ;;  %v12322_v60 = vor.u32 %v12758_v32, %v12321_v33 }
 0xaac   :  { %v6743_v41 = vpop.f32.mrf.mxu3  ;;  %v6239_v9 = vpop.f32.mrf.mxu0 }
 0xaad   :  { %v14313_v8 = vadd.f32 %v6743_v41, %v6575_v35  ;;  %v6409_v48 = vadd.f32 %v6408_v40, %v6239_v9  ;;  %6963 = vmatmul.bf16.gmra.mxu1 %v15763_v3  ;;  %7941 = vmatpush.bf16.msra.mxu3 %v12322_v60  ;;  %v11553_v3 = vld [vmem:[#allocation6 + $0x158] sm:$0xf] }
 0xaaf   :  { %15899 = vst [vmem:[#allocation159_spill] sm:$0xff] %v14313_v8  ;;  %6794 = vmatmul.bf16.gmra.mxu0 %v15761_v34  ;;  %7132 = vmatmul.bf16.gmra.mxu2 %v15764_v27  ;;  %v12566_v27 = vld [vmem:[#allocation6 + $0x174] sm:$0xf0] }
 0xab0   :  { %v11809_v8 = vld [vmem:[#allocation6 + $0x358] sm:$0xf]  ;;  %v11554_v34 = vor.u32 %v12566_v27, %v11553_v3 }
 0xab1   :  { %7301 = vmatmul.bf16.gmra.mxu3 %v15765_v29  ;;  %v11810_v31 = vor.u32 %v12630_v23, %v11809_v8 }
 0xab2   :  { %v6577_v22 = vpop.f32.mrf.mxu2  ;;  %v6410_v41 = vpop.f32.mrf.mxu1  ;;  %7434 = vmatpush.bf16.msra.mxu0 %v11554_v34 }
 0xab3   :  { %v6578_v20 = vadd.f32 %v6577_v22, %v6409_v48  ;;  %7603 = vmatpush.bf16.msra.mxu1 %v11810_v31 }
 0xab4   :  { %v6746_v14 = vpop.f32.mrf.mxu3  ;;  %v6241_v35 = vpop.f32.mrf.mxu0 }
 0xab5   :  { %v14319_v9 = vadd.f32 %v6746_v14, %v6578_v20  ;;  %v6411_v40 = vadd.f32 %v6410_v41, %v6241_v35 }
 0xaba   :  { %v6579_v29 = vpop.f32.mrf.mxu2  ;;  %v6413_v33 = vpop.f32.mrf.mxu1 }
 0xabb   :  { %v6580_v21 = vadd.f32 %v6579_v29, %v6411_v40 }
 0xabc   :  { %v6748_v6 = vpop.f32.mrf.mxu3  ;;  %v6244_v12 = vpop.f32.mrf.mxu0 }
 0xabd   :  { %v14321_v48 = vadd.f32 %v6748_v6, %v6580_v21  ;;  %v6414_v17 = vadd.f32 %v6413_v33, %v6244_v12  ;;  %6968 = vmatmul.bf16.gmra.mxu1 %v12977_v57 }
 0xabf   :  { %6799 = vmatmul.bf16.gmra.mxu0 %v12975_v56  ;;  %7137 = vmatmul.bf16.gmra.mxu2 %v12979_v58 }
 0xac1   :  { %7306 = vmatmul.bf16.gmra.mxu3 %v12981_v59 }
 0xac2   :  { %v6582_v3 = vpop.f32.mrf.mxu2  ;;  %v6415_v32 = vpop.f32.mrf.mxu1 }
 0xac3   :  { %v6583_v27 = vadd.f32 %v6582_v3, %v6414_v17 }
 0xac4   :  { %v6751_v29 = vpop.f32.mrf.mxu3  ;;  %v6246_v14 = vpop.f32.mrf.mxu0 }
 0xac5   :  { %v14327_v23 = vadd.f32 %v6751_v29, %v6583_v27  ;;  %v6416_v34 = vadd.f32 %v6415_v32, %v6246_v14 }
 0xaca   :  { %v6584_v21 = vpop.f32.mrf.mxu2  ;;  %v6934_v60 = vpop.f32.mrf.mxu1 }
 0xacb   :  { %v6585_v8 = vadd.f32 %v6584_v21, %v6416_v34 }
 0xacc   :  { %v6753_v22 = vpop.f32.mrf.mxu3  ;;  %v6765_v31 = vpop.f32.mrf.mxu0 }
 0xacd   :  { %v14329_v20 = vadd.f32 %v6753_v22, %v6585_v8  ;;  %v6935_v35 = vadd.f32 %v6934_v60, %v6765_v31  ;;  %6973 = vmatmul.bf16.gmra.mxu1 %v12989_v18  ;;  %v15900_v60 = vld [vmem:[#allocation29_spill] sm:$0xff] }
 0xacf   :  { %6804 = vmatmul.bf16.gmra.mxu0 %v12987_v16  ;;  %7142 = vmatmul.bf16.gmra.mxu2 %v12991_v19 }
 0xad1   :  { %7311 = vmatmul.bf16.gmra.mxu3 %v12993_v25 }
 0xad2   :  { %v7103_v41 = vpop.f32.mrf.mxu2  ;;  %v6936_v33 = vpop.f32.mrf.mxu1 }
 0xad3   :  { %v7104_v40 = vadd.f32 %v7103_v41, %v6935_v35  ;;  %v15901_v35 = vld [vmem:[#allocation30_spill] sm:$0xff] }
 0xad4   :  { %v7272_v6 = vpop.f32.mrf.mxu3  ;;  %v6767_v12 = vpop.f32.mrf.mxu0 }
 0xad5   :  { %v7273_v17 = vadd.f32 %v7272_v6, %v7104_v40  ;;  %v6937_v27 = vadd.f32 %v6936_v33, %v6767_v12 }
 0xad7   :  { %v10325_v3 = vpack.c.bf16 %v7273_v17, %v14079_v1  ;;  %v15902_v17 = vld [vmem:[#allocation163_spill] sm:$0xff] }
 0xad9   :  { %10581 = vst [vmem:[#allocation8 + $0x10] sm:$0xff] %v10325_v3 }
 0xada   :  { %v7105_v29 = vpop.f32.mrf.mxu2  ;;  %v6939_v21 = vpop.f32.mrf.mxu1 }
 0xadb   :  { %v7106_v14 = vadd.f32 %v7105_v29, %v6937_v27 }
 0xadc   :  { %v7274_v32 = vpop.f32.mrf.mxu3  ;;  %v6770_v34 = vpop.f32.mrf.mxu0 }
 0xadd   :  { %v7275_v8 = vadd.f32 %v7274_v32, %v7106_v14  ;;  %v6940_v31 = vadd.f32 %v6939_v21, %v6770_v34  ;;  %6978 = vmatmul.bf16.gmra.mxu1 %v15767_v5  ;;  %v11777_v5 = vld [vmem:[#allocation6 + $0x318] sm:$0xf] }
 0xadf   :  { %6809 = vmatmul.bf16.gmra.mxu0 %v15766_v45  ;;  %v10329_v22 = vpack.c.bf16 %v7275_v8, %v14081_v62  ;;  %7147 = vmatmul.bf16.gmra.mxu2 %v15900_v60  ;;  %v15903_v8 = vld [vmem:[#allocation32_spill] sm:$0xff] }
 0xae1   :  { %7316 = vmatmul.bf16.gmra.mxu3 %v15901_v35  ;;  %10585 = vst [vmem:[#allocation8 + $0x30] sm:$0xff] %v10329_v22  ;;  %v15904_v35 = vld [vmem:[#allocation164_spill] sm:$0xff] }
 0xae2   :  { %v7108_v1 = vpop.f32.mrf.mxu2  ;;  %v6941_v12 = vpop.f32.mrf.mxu1 }
 0xae3   :  { %v7109_v41 = vadd.f32 %v7108_v1, %v6940_v31  ;;  %v15905_v31 = vld [vmem:[#allocation33_spill] sm:$0xff]  ;;  %v15906_v1 = vld [vmem:[#allocation34_spill] sm:$0xff] }
 0xae4   :  { %v7277_v40 = vpop.f32.mrf.mxu3  ;;  %v6772_v6 = vpop.f32.mrf.mxu0 }
 0xae5   :  { %v7278_v33 = vadd.f32 %v7277_v40, %v7109_v41  ;;  %v6942_v27 = vadd.f32 %v6941_v12, %v6772_v6  ;;  %v15907_v41 = vld [vmem:[#allocation35_spill] sm:$0xff] }
 0xae6   :  { %v12033_v40 = vld [vmem:[#allocation6 + $0x518] sm:$0xf] }
 0xae7   :  { %v10333_v3 = vpack.c.bf16 %v7278_v33, %v15902_v17  ;;  %v12686_v6 = vld [vmem:[#allocation6 + $0x534] sm:$0xf0] }
 0xae8   :  { %v12034_v33 = vor.u32 %v12686_v6, %v12033_v40  ;;  %v12289_v17 = vld [vmem:[#allocation6 + $0x718] sm:$0xf] }
 0xae9   :  { %10589 = vst [vmem:[#allocation8 + $0x50] sm:$0xff] %v10333_v3  ;;  %v12750_v3 = vld [vmem:[#allocation6 + $0x734] sm:$0xf0] }
 0xaea   :  { %v7110_v29 = vpop.f32.mrf.mxu2  ;;  %v6944_v34 = vpop.f32.mrf.mxu1  ;;  %7773 = vmatpush.bf16.msra.mxu2 %v12034_v33  ;;  %v12622_v40 = vld [vmem:[#allocation6 + $0x334] sm:$0xf0]  ;;  %v15909_v33 = vld [vmem:[#allocation38_spill] sm:$0xff] }
 0xaeb   :  { %v7111_v62 = vadd.f32 %v7110_v29, %v6942_v27 }
 0xaec   :  { %v7279_v14 = vpop.f32.mrf.mxu3  ;;  %v6775_v32 = vpop.f32.mrf.mxu0 }
 0xaed   :  { %v7280_v21 = vadd.f32 %v7279_v14, %v7111_v62  ;;  %v6945_v60 = vadd.f32 %v6944_v34, %v6775_v32  ;;  %6983 = vmatmul.bf16.gmra.mxu1 %v15905_v31  ;;  %v12290_v14 = vor.u32 %v12750_v3, %v12289_v17  ;;  %v15908_v32 = vld [vmem:[#allocation31_spill] sm:$0xff]  ;;  %v15910_v3 = vld [vmem:[#allocation36_spill] sm:$0xff] }
 0xaef   :  { %6814 = vmatmul.bf16.gmra.mxu0 %v15903_v8  ;;  %v10337_v22 = vpack.c.bf16 %v7280_v21, %v15904_v35  ;;  %7152 = vmatmul.bf16.gmra.mxu2 %v15906_v1 }
 0xaf0   :  { %7942 = vmatpush.bf16.msra.mxu3 %v12290_v14 }
 0xaf1   :  { %7321 = vmatmul.bf16.gmra.mxu3 %v15907_v41  ;;  %10593 = vst [vmem:[#allocation8 + $0x70] sm:$0xff] %v10337_v22  ;;  %v11521_v41 = vld [vmem:[#allocation6 + $0x118] sm:$0xf] }
 0xaf2   :  { %v7113_v12 = vpop.f32.mrf.mxu2  ;;  %v6946_v8 = vpop.f32.mrf.mxu1  ;;  %v12558_v22 = vld [vmem:[#allocation6 + $0x134] sm:$0xf0] }
 0xaf3   :  { %v7114_v27 = vadd.f32 %v7113_v12, %v6945_v60  ;;  %v11522_v31 = vor.u32 %v12558_v22, %v11521_v41  ;;  %v11778_v12 = vor.u32 %v12622_v40, %v11777_v5  ;;  %v15913_v41 = vld [vmem:[#allocation41_spill] sm:$0xff] }
 0xaf4   :  { %v7282_v29 = vpop.f32.mrf.mxu3  ;;  %v6777_v62 = vpop.f32.mrf.mxu0 }
 0xaf5   :  { %v7283_v35 = vadd.f32 %v7282_v29, %v7114_v27  ;;  %v6947_v21 = vadd.f32 %v6946_v8, %v6777_v62  ;;  %7435 = vmatpush.bf16.msra.mxu0 %v11522_v31  ;;  %7604 = vmatpush.bf16.msra.mxu1 %v11778_v12  ;;  %v15911_v8 = vld [vmem:[#allocation39_spill] sm:$0xff]  ;;  %v15912_v62 = vld [vmem:[#allocation40_spill] sm:$0xff] }
 0xaf7   :  { %v10341_v34 = vpack.c.bf16 %v7283_v35, %v15908_v32 }
 0xaf9   :  { %10597 = vst [vmem:[#allocation8 + $0x90] sm:$0xff] %v10341_v34 }
 0xafa   :  { %v7115_v1 = vpop.f32.mrf.mxu2  ;;  %v6949_v25 = vpop.f32.mrf.mxu1 }
 0xafb   :  { %v7116_v6 = vadd.f32 %v7115_v1, %v6947_v21 }
 0xafc   :  { %v7284_v45 = vpop.f32.mrf.mxu3  ;;  %v6780_v60 = vpop.f32.mrf.mxu0 }
 0xafd   :  { %v7285_v17 = vadd.f32 %v7284_v45, %v7116_v6  ;;  %v6950_v29 = vadd.f32 %v6949_v25, %v6780_v60  ;;  %6988 = vmatmul.bf16.gmra.mxu1 %v15911_v8  ;;  %v15914_v45 = vld [vmem:[#allocation37_spill] sm:$0xff] }
 0xaff   :  { %6819 = vmatmul.bf16.gmra.mxu0 %v15909_v33  ;;  %v10345_v27 = vpack.c.bf16 %v7285_v17, %v15910_v3  ;;  %7157 = vmatmul.bf16.gmra.mxu2 %v15912_v62  ;;  %v15915_v17 = vld [vmem:[#allocation44_spill] sm:$0xff]  ;;  %v15916_v3 = vld [vmem:[#allocation42_spill] sm:$0xff]  ;;  %v11745_v62 = vld [vmem:[#allocation6 + $0x2d8] sm:$0xf] }
 0xb01   :  { %7326 = vmatmul.bf16.gmra.mxu3 %v15913_v41  ;;  %10601 = vst [vmem:[#allocation8 + $0xb0] sm:$0xff] %v10345_v27 }
 0xb02   :  { %v7118_v1 = vpop.f32.mrf.mxu2  ;;  %v6951_v32 = vpop.f32.mrf.mxu1 }
 0xb03   :  { %v7119_v14 = vadd.f32 %v7118_v1, %v6950_v29  ;;  %v15917_v29 = vld [vmem:[#allocation45_spill] sm:$0xff]  ;;  %v15918_v1 = vld [vmem:[#allocation46_spill] sm:$0xff] }
 0xb04   :  { %v7287_v35 = vpop.f32.mrf.mxu3  ;;  %v6782_v5 = vpop.f32.mrf.mxu0 }
 0xb05   :  { %v7288_v31 = vadd.f32 %v7287_v35, %v7119_v14  ;;  %v6952_v21 = vadd.f32 %v6951_v32, %v6782_v5  ;;  %v15919_v14 = vld [vmem:[#allocation47_spill] sm:$0xff] }
 0xb07   :  { %v10349_v34 = vpack.c.bf16 %v7288_v31, %v15914_v45 }
 0xb09   :  { %10605 = vst [vmem:[#allocation8 + $0xd0] sm:$0xff] %v10349_v34 }
 0xb0a   :  { %v7120_v22 = vpop.f32.mrf.mxu2  ;;  %v6954_v60 = vpop.f32.mrf.mxu1 }
 0xb0b   :  { %v7121_v40 = vadd.f32 %v7120_v22, %v6952_v21  ;;  %v15920_v21 = vld [vmem:[#allocation43_spill] sm:$0xff] }
 0xb0c   :  { %v7289_v25 = vpop.f32.mrf.mxu3  ;;  %v6785_v6 = vpop.f32.mrf.mxu0 }
 0xb0d   :  { %v7290_v12 = vadd.f32 %v7289_v25, %v7121_v40  ;;  %v6955_v41 = vadd.f32 %v6954_v60, %v6785_v6  ;;  %6993 = vmatmul.bf16.gmra.mxu1 %v15917_v29 }
 0xb0f   :  { %6824 = vmatmul.bf16.gmra.mxu0 %v15915_v17  ;;  %v10353_v27 = vpack.c.bf16 %v7290_v12, %v15916_v3  ;;  %7162 = vmatmul.bf16.gmra.mxu2 %v15918_v1  ;;  %v15921_v1 = vld [vmem:[#allocation50_spill] sm:$0xff] }
 0xb11   :  { %7331 = vmatmul.bf16.gmra.mxu3 %v15919_v14  ;;  %10609 = vst [vmem:[#allocation8 + $0xf0] sm:$0xff] %v10353_v27  ;;  %v15922_v14 = vld [vmem:[#allocation48_spill] sm:$0xff] }
 0xb12   :  { %v7123_v35 = vpop.f32.mrf.mxu2  ;;  %v6956_v45 = vpop.f32.mrf.mxu1 }
 0xb13   :  { %v7124_v5 = vadd.f32 %v7123_v35, %v6955_v41  ;;  %v15923_v41 = vld [vmem:[#allocation51_spill] sm:$0xff]  ;;  %v15924_v35 = vld [vmem:[#allocation52_spill] sm:$0xff] }
 0xb14   :  { %v7292_v32 = vpop.f32.mrf.mxu3  ;;  %v6787_v31 = vpop.f32.mrf.mxu0 }
 0xb15   :  { %v7293_v34 = vadd.f32 %v7292_v32, %v7124_v5  ;;  %v6957_v40 = vadd.f32 %v6956_v45, %v6787_v31  ;;  %v15925_v5 = vld [vmem:[#allocation53_spill] sm:$0xff] }
 0xb17   :  { %v10357_v22 = vpack.c.bf16 %v7293_v34, %v15920_v21 }
 0xb19   :  { %10613 = vst [vmem:[#allocation8 + $0x110] sm:$0xff] %v10357_v22 }
 0xb1a   :  { %v7125_v25 = vpop.f32.mrf.mxu2  ;;  %v6959_v3 = vpop.f32.mrf.mxu1 }
 0xb1b   :  { %v7126_v12 = vadd.f32 %v7125_v25, %v6957_v40  ;;  %v15926_v40 = vld [vmem:[#allocation49_spill] sm:$0xff] }
 0xb1c   :  { %v7294_v6 = vpop.f32.mrf.mxu3  ;;  %v6790_v60 = vpop.f32.mrf.mxu0 }
 0xb1d   :  { %v7295_v29 = vadd.f32 %v7294_v6, %v7126_v12  ;;  %v6960_v17 = vadd.f32 %v6959_v3, %v6790_v60  ;;  %6998 = vmatmul.bf16.gmra.mxu1 %v15923_v41 }
 0xb1f   :  { %6829 = vmatmul.bf16.gmra.mxu0 %v15921_v1  ;;  %v10361_v27 = vpack.c.bf16 %v7295_v29, %v15922_v14  ;;  %7167 = vmatmul.bf16.gmra.mxu2 %v15924_v35  ;;  %v15927_v35 = vld [vmem:[#allocation56_spill] sm:$0xff] }
 0xb21   :  { %7336 = vmatmul.bf16.gmra.mxu3 %v15925_v5  ;;  %10617 = vst [vmem:[#allocation8 + $0x130] sm:$0xff] %v10361_v27  ;;  %v15928_v5 = vld [vmem:[#allocation54_spill] sm:$0xff] }
 0xb22   :  { %v7128_v32 = vpop.f32.mrf.mxu2  ;;  %v6961_v21 = vpop.f32.mrf.mxu1 }
 0xb23   :  { %v7129_v31 = vadd.f32 %v7128_v32, %v6960_v17  ;;  %v15929_v17 = vld [vmem:[#allocation57_spill] sm:$0xff]  ;;  %v15930_v32 = vld [vmem:[#allocation58_spill] sm:$0xff] }
 0xb24   :  { %v7297_v45 = vpop.f32.mrf.mxu3  ;;  %v6792_v34 = vpop.f32.mrf.mxu0 }
 0xb25   :  { %v7298_v22 = vadd.f32 %v7297_v45, %v7129_v31  ;;  %v6962_v12 = vadd.f32 %v6961_v21, %v6792_v34  ;;  %v15931_v31 = vld [vmem:[#allocation59_spill] sm:$0xff] }
 0xb26   :  { %v12001_v45 = vld [vmem:[#allocation6 + $0x4d8] sm:$0xf] }
 0xb27   :  { %v10365_v25 = vpack.c.bf16 %v7298_v22, %v15926_v40  ;;  %v12678_v34 = vld [vmem:[#allocation6 + $0x4f4] sm:$0xf0] }
 0xb28   :  { %v12002_v22 = vor.u32 %v12678_v34, %v12001_v45  ;;  %v12257_v40 = vld [vmem:[#allocation6 + $0x6d8] sm:$0xf] }
 0xb29   :  { %10621 = vst [vmem:[#allocation8 + $0x150] sm:$0xff] %v10365_v25  ;;  %v12742_v25 = vld [vmem:[#allocation6 + $0x6f4] sm:$0xf0] }
 0xb2a   :  { %v7130_v6 = vpop.f32.mrf.mxu2  ;;  %v6964_v3 = vpop.f32.mrf.mxu1  ;;  %7774 = vmatpush.bf16.msra.mxu2 %v12002_v22  ;;  %v12614_v45 = vld [vmem:[#allocation6 + $0x2f4] sm:$0xf0]  ;;  %v15933_v22 = vld [vmem:[#allocation62_spill] sm:$0xff] }
 0xb2b   :  { %v7131_v29 = vadd.f32 %v7130_v6, %v6962_v12 }
 0xb2c   :  { %v7299_v14 = vpop.f32.mrf.mxu3  ;;  %v6795_v60 = vpop.f32.mrf.mxu0 }
 0xb2d   :  { %v7300_v41 = vadd.f32 %v7299_v14, %v7131_v29  ;;  %v6965_v1 = vadd.f32 %v6964_v3, %v6795_v60  ;;  %7003 = vmatmul.bf16.gmra.mxu1 %v15929_v17  ;;  %v12258_v14 = vor.u32 %v12742_v25, %v12257_v40  ;;  %v15934_v25 = vld [vmem:[#allocation60_spill] sm:$0xff] }
 0xb2f   :  { %6834 = vmatmul.bf16.gmra.mxu0 %v15927_v35  ;;  %v10369_v27 = vpack.c.bf16 %v7300_v41, %v15928_v5  ;;  %7172 = vmatmul.bf16.gmra.mxu2 %v15930_v32  ;;  %v15932_v5 = vld [vmem:[#allocation55_spill] sm:$0xff] }
 0xb30   :  { %7943 = vmatpush.bf16.msra.mxu3 %v12258_v14 }
 0xb31   :  { %7341 = vmatmul.bf16.gmra.mxu3 %v15931_v31  ;;  %10625 = vst [vmem:[#allocation8 + $0x170] sm:$0xff] %v10369_v27  ;;  %v11489_v31 = vld [vmem:[#allocation6 + $0xd8] sm:$0xf] }
 0xb32   :  { %v7133_v21 = vpop.f32.mrf.mxu2  ;;  %v6966_v35 = vpop.f32.mrf.mxu1  ;;  %v12550_v27 = vld [vmem:[#allocation6 + $0xf4] sm:$0xf0] }
 0xb33   :  { %v7134_v12 = vadd.f32 %v7133_v21, %v6965_v1  ;;  %v11490_v17 = vor.u32 %v12550_v27, %v11489_v31  ;;  %v11746_v21 = vor.u32 %v12614_v45, %v11745_v62  ;;  %v15937_v31 = vld [vmem:[#allocation65_spill] sm:$0xff] }
 0xb34   :  { %v7302_v6 = vpop.f32.mrf.mxu3  ;;  %v6797_v29 = vpop.f32.mrf.mxu0 }
 0xb35   :  { %v7303_v41 = vadd.f32 %v7302_v6, %v7134_v12  ;;  %v6967_v3 = vadd.f32 %v6966_v35, %v6797_v29  ;;  %7436 = vmatpush.bf16.msra.mxu0 %v11490_v17  ;;  %7605 = vmatpush.bf16.msra.mxu1 %v11746_v21  ;;  %v15935_v35 = vld [vmem:[#allocation63_spill] sm:$0xff]  ;;  %v15936_v29 = vld [vmem:[#allocation64_spill] sm:$0xff] }
 0xb37   :  { %v10373_v60 = vpack.c.bf16 %v7303_v41, %v15932_v5 }
 0xb39   :  { %10629 = vst [vmem:[#allocation8 + $0x190] sm:$0xff] %v10373_v60 }
 0xb3a   :  { %v7135_v32 = vpop.f32.mrf.mxu2  ;;  %v6969_v33 = vpop.f32.mrf.mxu1 }
 0xb3b   :  { %v7136_v34 = vadd.f32 %v7135_v32, %v6967_v3 }
 0xb3c   :  { %v7304_v8 = vpop.f32.mrf.mxu3  ;;  %v6800_v1 = vpop.f32.mrf.mxu0 }
 0xb3d   :  { %v7305_v40 = vadd.f32 %v7304_v8, %v7136_v34  ;;  %v6970_v6 = vadd.f32 %v6969_v33, %v6800_v1  ;;  %7008 = vmatmul.bf16.gmra.mxu1 %v15935_v35  ;;  %v15938_v8 = vld [vmem:[#allocation61_spill] sm:$0xff] }
 0xb3f   :  { %6839 = vmatmul.bf16.gmra.mxu0 %v15933_v22  ;;  %v10377_v12 = vpack.c.bf16 %v7305_v40, %v15934_v25  ;;  %7177 = vmatmul.bf16.gmra.mxu2 %v15936_v29  ;;  %v15939_v40 = vld [vmem:[#allocation68_spill] sm:$0xff]  ;;  %v15940_v25 = vld [vmem:[#allocation66_spill] sm:$0xff]  ;;  %v11713_v29 = vld [vmem:[#allocation6 + $0x298] sm:$0xf] }
 0xb41   :  { %7346 = vmatmul.bf16.gmra.mxu3 %v15937_v31  ;;  %10633 = vst [vmem:[#allocation8 + $0x1b0] sm:$0xff] %v10377_v12 }
 0xb42   :  { %v7138_v32 = vpop.f32.mrf.mxu2  ;;  %v6971_v5 = vpop.f32.mrf.mxu1 }
 0xb43   :  { %v7139_v14 = vadd.f32 %v7138_v32, %v6970_v6  ;;  %v15941_v6 = vld [vmem:[#allocation69_spill] sm:$0xff]  ;;  %v15942_v32 = vld [vmem:[#allocation70_spill] sm:$0xff] }
 0xb44   :  { %v7307_v41 = vpop.f32.mrf.mxu3  ;;  %v6802_v62 = vpop.f32.mrf.mxu0 }
 0xb45   :  { %v7308_v17 = vadd.f32 %v7307_v41, %v7139_v14  ;;  %v6972_v3 = vadd.f32 %v6971_v5, %v6802_v62  ;;  %v15943_v14 = vld [vmem:[#allocation71_spill] sm:$0xff] }
 0xb47   :  { %v10381_v60 = vpack.c.bf16 %v7308_v17, %v15938_v8 }
 0xb49   :  { %10637 = vst [vmem:[#allocation8 + $0x1d0] sm:$0xff] %v10381_v60 }
 0xb4a   :  { %v7140_v27 = vpop.f32.mrf.mxu2  ;;  %v6974_v1 = vpop.f32.mrf.mxu1 }
 0xb4b   :  { %v7141_v45 = vadd.f32 %v7140_v27, %v6972_v3  ;;  %v15944_v3 = vld [vmem:[#allocation67_spill] sm:$0xff] }
 0xb4c   :  { %v7309_v33 = vpop.f32.mrf.mxu3  ;;  %v6805_v34 = vpop.f32.mrf.mxu0 }
 0xb4d   :  { %v7310_v21 = vadd.f32 %v7309_v33, %v7141_v45  ;;  %v6975_v31 = vadd.f32 %v6974_v1, %v6805_v34  ;;  %7013 = vmatmul.bf16.gmra.mxu1 %v15941_v6 }
 0xb4f   :  { %6844 = vmatmul.bf16.gmra.mxu0 %v15939_v40  ;;  %v10385_v12 = vpack.c.bf16 %v7310_v21, %v15940_v25  ;;  %7182 = vmatmul.bf16.gmra.mxu2 %v15942_v32  ;;  %v15945_v32 = vld [vmem:[#allocation74_spill] sm:$0xff] }
 0xb51   :  { %7351 = vmatmul.bf16.gmra.mxu3 %v15943_v14  ;;  %10641 = vst [vmem:[#allocation8 + $0x1f0] sm:$0xff] %v10385_v12  ;;  %v15946_v14 = vld [vmem:[#allocation72_spill] sm:$0xff] }
 0xb52   :  { %v7143_v41 = vpop.f32.mrf.mxu2  ;;  %v6976_v8 = vpop.f32.mrf.mxu1 }
 0xb53   :  { %v7144_v62 = vadd.f32 %v7143_v41, %v6975_v31  ;;  %v15947_v31 = vld [vmem:[#allocation75_spill] sm:$0xff]  ;;  %v15948_v41 = vld [vmem:[#allocation76_spill] sm:$0xff] }
 0xb54   :  { %v7312_v5 = vpop.f32.mrf.mxu3  ;;  %v6807_v17 = vpop.f32.mrf.mxu0 }
 0xb55   :  { %v7313_v60 = vadd.f32 %v7312_v5, %v7144_v62  ;;  %v6977_v45 = vadd.f32 %v6976_v8, %v6807_v17  ;;  %v15949_v62 = vld [vmem:[#allocation77_spill] sm:$0xff] }
 0xb57   :  { %v10389_v27 = vpack.c.bf16 %v7313_v60, %v15944_v3 }
 0xb59   :  { %10645 = vst [vmem:[#allocation8 + $0x210] sm:$0xff] %v10389_v27 }
 0xb5a   :  { %v7145_v33 = vpop.f32.mrf.mxu2  ;;  %v6979_v25 = vpop.f32.mrf.mxu1 }
 0xb5b   :  { %v7146_v21 = vadd.f32 %v7145_v33, %v6977_v45  ;;  %v15950_v45 = vld [vmem:[#allocation73_spill] sm:$0xff] }
 0xb5c   :  { %v7314_v34 = vpop.f32.mrf.mxu3  ;;  %v6810_v1 = vpop.f32.mrf.mxu0 }
 0xb5d   :  { %v7315_v6 = vadd.f32 %v7314_v34, %v7146_v21  ;;  %v6980_v40 = vadd.f32 %v6979_v25, %v6810_v1  ;;  %7018 = vmatmul.bf16.gmra.mxu1 %v15947_v31 }
 0xb5f   :  { %6849 = vmatmul.bf16.gmra.mxu0 %v15945_v32  ;;  %v10393_v12 = vpack.c.bf16 %v7315_v6, %v15946_v14  ;;  %7187 = vmatmul.bf16.gmra.mxu2 %v15948_v41  ;;  %v15951_v41 = vld [vmem:[#allocation80_spill] sm:$0xff] }
 0xb61   :  { %7356 = vmatmul.bf16.gmra.mxu3 %v15949_v62  ;;  %10649 = vst [vmem:[#allocation8 + $0x230] sm:$0xff] %v10393_v12  ;;  %v15952_v62 = vld [vmem:[#allocation78_spill] sm:$0xff] }
 0xb62   :  { %v7148_v5 = vpop.f32.mrf.mxu2  ;;  %v6981_v3 = vpop.f32.mrf.mxu1 }
 0xb63   :  { %v7149_v17 = vadd.f32 %v7148_v5, %v6980_v40  ;;  %v15953_v40 = vld [vmem:[#allocation81_spill] sm:$0xff]  ;;  %v15954_v5 = vld [vmem:[#allocation82_spill] sm:$0xff] }
 0xb64   :  { %v7317_v8 = vpop.f32.mrf.mxu3  ;;  %v6812_v60 = vpop.f32.mrf.mxu0 }
 0xb65   :  { %v7318_v27 = vadd.f32 %v7317_v8, %v7149_v17  ;;  %v6982_v21 = vadd.f32 %v6981_v3, %v6812_v60  ;;  %v15955_v17 = vld [vmem:[#allocation83_spill] sm:$0xff] }
 0xb66   :  { %v11969_v8 = vld [vmem:[#allocation6 + $0x498] sm:$0xf] }
 0xb67   :  { %v10397_v33 = vpack.c.bf16 %v7318_v27, %v15950_v45  ;;  %v12670_v60 = vld [vmem:[#allocation6 + $0x4b4] sm:$0xf0] }
 0xb68   :  { %v11970_v27 = vor.u32 %v12670_v60, %v11969_v8  ;;  %v12225_v45 = vld [vmem:[#allocation6 + $0x698] sm:$0xf] }
 0xb69   :  { %10653 = vst [vmem:[#allocation8 + $0x250] sm:$0xff] %v10397_v33  ;;  %v12734_v33 = vld [vmem:[#allocation6 + $0x6b4] sm:$0xf0] }
 0xb6a   :  { %v7150_v34 = vpop.f32.mrf.mxu2  ;;  %v6984_v25 = vpop.f32.mrf.mxu1  ;;  %7775 = vmatpush.bf16.msra.mxu2 %v11970_v27  ;;  %v12606_v8 = vld [vmem:[#allocation6 + $0x2b4] sm:$0xf0]  ;;  %v15957_v27 = vld [vmem:[#allocation86_spill] sm:$0xff] }
 0xb6b   :  { %v7151_v6 = vadd.f32 %v7150_v34, %v6982_v21 }
 0xb6c   :  { %v7319_v14 = vpop.f32.mrf.mxu3  ;;  %v6815_v1 = vpop.f32.mrf.mxu0 }
 0xb6d   :  { %v7320_v31 = vadd.f32 %v7319_v14, %v7151_v6  ;;  %v6985_v32 = vadd.f32 %v6984_v25, %v6815_v1  ;;  %7023 = vmatmul.bf16.gmra.mxu1 %v15953_v40  ;;  %v12226_v14 = vor.u32 %v12734_v33, %v12225_v45  ;;  %v15958_v33 = vld [vmem:[#allocation84_spill] sm:$0xff] }
 0xb6f   :  { %6854 = vmatmul.bf16.gmra.mxu0 %v15951_v41  ;;  %v10401_v12 = vpack.c.bf16 %v7320_v31, %v15952_v62  ;;  %7192 = vmatmul.bf16.gmra.mxu2 %v15954_v5  ;;  %v15956_v62 = vld [vmem:[#allocation79_spill] sm:$0xff] }
 0xb70   :  { %7944 = vmatpush.bf16.msra.mxu3 %v12226_v14 }
 0xb71   :  { %7361 = vmatmul.bf16.gmra.mxu3 %v15955_v17  ;;  %10657 = vst [vmem:[#allocation8 + $0x270] sm:$0xff] %v10401_v12  ;;  %v11457_v17 = vld [vmem:[#allocation6 + $0x98] sm:$0xf] }
 0xb72   :  { %v7153_v3 = vpop.f32.mrf.mxu2  ;;  %v6986_v41 = vpop.f32.mrf.mxu1  ;;  %v12542_v12 = vld [vmem:[#allocation6 + $0xb4] sm:$0xf0] }
 0xb73   :  { %v7154_v21 = vadd.f32 %v7153_v3, %v6985_v32  ;;  %v11458_v40 = vor.u32 %v12542_v12, %v11457_v17  ;;  %v11714_v3 = vor.u32 %v12606_v8, %v11713_v29  ;;  %v15961_v17 = vld [vmem:[#allocation89_spill] sm:$0xff] }
 0xb74   :  { %v7322_v34 = vpop.f32.mrf.mxu3  ;;  %v6817_v6 = vpop.f32.mrf.mxu0 }
 0xb75   :  { %v7323_v31 = vadd.f32 %v7322_v34, %v7154_v21  ;;  %v6987_v25 = vadd.f32 %v6986_v41, %v6817_v6  ;;  %7437 = vmatpush.bf16.msra.mxu0 %v11458_v40  ;;  %7606 = vmatpush.bf16.msra.mxu1 %v11714_v3  ;;  %v15959_v41 = vld [vmem:[#allocation87_spill] sm:$0xff]  ;;  %v15960_v6 = vld [vmem:[#allocation88_spill] sm:$0xff] }
 0xb77   :  { %v10405_v1 = vpack.c.bf16 %v7323_v31, %v15956_v62 }
 0xb79   :  { %10661 = vst [vmem:[#allocation8 + $0x290] sm:$0xff] %v10405_v1 }
 0xb7a   :  { %v7155_v5 = vpop.f32.mrf.mxu2  ;;  %v6989_v22 = vpop.f32.mrf.mxu1 }
 0xb7b   :  { %v7156_v60 = vadd.f32 %v7155_v5, %v6987_v25 }
 0xb7c   :  { %v7324_v35 = vpop.f32.mrf.mxu3  ;;  %v6820_v32 = vpop.f32.mrf.mxu0 }
 0xb7d   :  { %v7325_v45 = vadd.f32 %v7324_v35, %v7156_v60  ;;  %v6990_v34 = vadd.f32 %v6989_v22, %v6820_v32  ;;  %7028 = vmatmul.bf16.gmra.mxu1 %v15959_v41  ;;  %v15962_v35 = vld [vmem:[#allocation85_spill] sm:$0xff] }
 0xb7f   :  { %6859 = vmatmul.bf16.gmra.mxu0 %v15957_v27  ;;  %v10409_v21 = vpack.c.bf16 %v7325_v45, %v15958_v33  ;;  %7197 = vmatmul.bf16.gmra.mxu2 %v15960_v6  ;;  %v15963_v45 = vld [vmem:[#allocation92_spill] sm:$0xff]  ;;  %v15964_v33 = vld [vmem:[#allocation90_spill] sm:$0xff]  ;;  %v11681_v6 = vld [vmem:[#allocation6 + $0x258] sm:$0xf] }
 0xb81   :  { %7366 = vmatmul.bf16.gmra.mxu3 %v15961_v17  ;;  %10665 = vst [vmem:[#allocation8 + $0x2b0] sm:$0xff] %v10409_v21 }
 0xb82   :  { %v7158_v5 = vpop.f32.mrf.mxu2  ;;  %v6991_v62 = vpop.f32.mrf.mxu1 }
 0xb83   :  { %v7159_v14 = vadd.f32 %v7158_v5, %v6990_v34  ;;  %v15965_v34 = vld [vmem:[#allocation93_spill] sm:$0xff]  ;;  %v15966_v5 = vld [vmem:[#allocation94_spill] sm:$0xff] }
 0xb84   :  { %v7327_v31 = vpop.f32.mrf.mxu3  ;;  %v6822_v29 = vpop.f32.mrf.mxu0 }
 0xb85   :  { %v7328_v40 = vadd.f32 %v7327_v31, %v7159_v14  ;;  %v6992_v25 = vadd.f32 %v6991_v62, %v6822_v29  ;;  %v15967_v14 = vld [vmem:[#allocation95_spill] sm:$0xff] }
 0xb87   :  { %v10413_v1 = vpack.c.bf16 %v7328_v40, %v15962_v35 }
 0xb89   :  { %10669 = vst [vmem:[#allocation8 + $0x2d0] sm:$0xff] %v10413_v1 }
 0xb8a   :  { %v7160_v12 = vpop.f32.mrf.mxu2  ;;  %v6994_v32 = vpop.f32.mrf.mxu1 }
 0xb8b   :  { %v7161_v8 = vadd.f32 %v7160_v12, %v6992_v25  ;;  %v15968_v25 = vld [vmem:[#allocation91_spill] sm:$0xff] }
 0xb8c   :  { %v7329_v22 = vpop.f32.mrf.mxu3  ;;  %v6825_v60 = vpop.f32.mrf.mxu0 }
 0xb8d   :  { %v7330_v3 = vadd.f32 %v7329_v22, %v7161_v8  ;;  %v6995_v17 = vadd.f32 %v6994_v32, %v6825_v60  ;;  %7033 = vmatmul.bf16.gmra.mxu1 %v15965_v34 }
 0xb8f   :  { %6864 = vmatmul.bf16.gmra.mxu0 %v15963_v45  ;;  %v10417_v21 = vpack.c.bf16 %v7330_v3, %v15964_v33  ;;  %7202 = vmatmul.bf16.gmra.mxu2 %v15966_v5  ;;  %v15969_v5 = vld [vmem:[#allocation98_spill] sm:$0xff] }
 0xb91   :  { %7371 = vmatmul.bf16.gmra.mxu3 %v15967_v14  ;;  %10673 = vst [vmem:[#allocation8 + $0x2f0] sm:$0xff] %v10417_v21  ;;  %v15970_v14 = vld [vmem:[#allocation96_spill] sm:$0xff] }
 0xb92   :  { %v7163_v31 = vpop.f32.mrf.mxu2  ;;  %v6996_v35 = vpop.f32.mrf.mxu1 }
 0xb93   :  { %v7164_v29 = vadd.f32 %v7163_v31, %v6995_v17  ;;  %v15971_v17 = vld [vmem:[#allocation99_spill] sm:$0xff]  ;;  %v15972_v31 = vld [vmem:[#allocation100_spill] sm:$0xff] }
 0xb94   :  { %v7332_v62 = vpop.f32.mrf.mxu3  ;;  %v6827_v40 = vpop.f32.mrf.mxu0 }
 0xb95   :  { %v7333_v1 = vadd.f32 %v7332_v62, %v7164_v29  ;;  %v6997_v8 = vadd.f32 %v6996_v35, %v6827_v40  ;;  %v15973_v29 = vld [vmem:[#allocation101_spill] sm:$0xff] }
 0xb97   :  { %v10421_v12 = vpack.c.bf16 %v7333_v1, %v15968_v25 }
 0xb99   :  { %10677 = vst [vmem:[#allocation8 + $0x310] sm:$0xff] %v10421_v12 }
 0xb9a   :  { %v7165_v22 = vpop.f32.mrf.mxu2  ;;  %v6999_v33 = vpop.f32.mrf.mxu1 }
 0xb9b   :  { %v7166_v3 = vadd.f32 %v7165_v22, %v6997_v8  ;;  %v15974_v8 = vld [vmem:[#allocation97_spill] sm:$0xff] }
 0xb9c   :  { %v7334_v60 = vpop.f32.mrf.mxu3  ;;  %v6830_v32 = vpop.f32.mrf.mxu0 }
 0xb9d   :  { %v7335_v34 = vadd.f32 %v7334_v60, %v7166_v3  ;;  %v7000_v45 = vadd.f32 %v6999_v33, %v6830_v32  ;;  %7038 = vmatmul.bf16.gmra.mxu1 %v15971_v17 }
 0xb9f   :  { %6869 = vmatmul.bf16.gmra.mxu0 %v15969_v5  ;;  %v10425_v21 = vpack.c.bf16 %v7335_v34, %v15970_v14  ;;  %7207 = vmatmul.bf16.gmra.mxu2 %v15972_v31  ;;  %v15975_v31 = vld [vmem:[#allocation104_spill] sm:$0xff] }
 0xba1   :  { %7376 = vmatmul.bf16.gmra.mxu3 %v15973_v29  ;;  %10681 = vst [vmem:[#allocation8 + $0x330] sm:$0xff] %v10425_v21  ;;  %v15976_v29 = vld [vmem:[#allocation102_spill] sm:$0xff] }
 0xba2   :  { %v7168_v62 = vpop.f32.mrf.mxu2  ;;  %v7001_v25 = vpop.f32.mrf.mxu1 }
 0xba3   :  { %v7169_v40 = vadd.f32 %v7168_v62, %v7000_v45  ;;  %v15977_v45 = vld [vmem:[#allocation105_spill] sm:$0xff]  ;;  %v15978_v62 = vld [vmem:[#allocation106_spill] sm:$0xff] }
 0xba4   :  { %v7337_v35 = vpop.f32.mrf.mxu3  ;;  %v6832_v1 = vpop.f32.mrf.mxu0 }
 0xba5   :  { %v7338_v12 = vadd.f32 %v7337_v35, %v7169_v40  ;;  %v7002_v3 = vadd.f32 %v7001_v25, %v6832_v1  ;;  %v15979_v40 = vld [vmem:[#allocation107_spill] sm:$0xff] }
 0xba6   :  { %v11937_v35 = vld [vmem:[#allocation6 + $0x458] sm:$0xf] }
 0xba7   :  { %v10429_v22 = vpack.c.bf16 %v7338_v12, %v15974_v8  ;;  %v12662_v1 = vld [vmem:[#allocation6 + $0x474] sm:$0xf0] }
 0xba8   :  { %v11938_v12 = vor.u32 %v12662_v1, %v11937_v35  ;;  %v12193_v8 = vld [vmem:[#allocation6 + $0x658] sm:$0xf] }
 0xba9   :  { %10685 = vst [vmem:[#allocation8 + $0x350] sm:$0xff] %v10429_v22  ;;  %v12726_v22 = vld [vmem:[#allocation6 + $0x674] sm:$0xf0] }
 0xbaa   :  { %v7170_v60 = vpop.f32.mrf.mxu2  ;;  %v7004_v33 = vpop.f32.mrf.mxu1  ;;  %7776 = vmatpush.bf16.msra.mxu2 %v11938_v12  ;;  %v12598_v35 = vld [vmem:[#allocation6 + $0x274] sm:$0xf0]  ;;  %v15981_v12 = vld [vmem:[#allocation110_spill] sm:$0xff] }
 0xbab   :  { %v7171_v34 = vadd.f32 %v7170_v60, %v7002_v3 }
 0xbac   :  { %v7339_v14 = vpop.f32.mrf.mxu3  ;;  %v6835_v32 = vpop.f32.mrf.mxu0 }
 0xbad   :  { %v7340_v17 = vadd.f32 %v7339_v14, %v7171_v34  ;;  %v7005_v5 = vadd.f32 %v7004_v33, %v6835_v32  ;;  %7043 = vmatmul.bf16.gmra.mxu1 %v15977_v45  ;;  %v12194_v14 = vor.u32 %v12726_v22, %v12193_v8  ;;  %v15982_v22 = vld [vmem:[#allocation108_spill] sm:$0xff] }
 0xbaf   :  { %6874 = vmatmul.bf16.gmra.mxu0 %v15975_v31  ;;  %v10433_v21 = vpack.c.bf16 %v7340_v17, %v15976_v29  ;;  %7212 = vmatmul.bf16.gmra.mxu2 %v15978_v62  ;;  %v15980_v29 = vld [vmem:[#allocation103_spill] sm:$0xff] }
 0xbb0   :  { %7945 = vmatpush.bf16.msra.mxu3 %v12194_v14 }
 0xbb1   :  { %7381 = vmatmul.bf16.gmra.mxu3 %v15979_v40  ;;  %10689 = vst [vmem:[#allocation8 + $0x370] sm:$0xff] %v10433_v21  ;;  %v11425_v40 = vld [vmem:[#allocation6 + $0x58] sm:$0xf] }
 0xbb2   :  { %v7173_v25 = vpop.f32.mrf.mxu2  ;;  %v7006_v31 = vpop.f32.mrf.mxu1  ;;  %v12534_v21 = vld [vmem:[#allocation6 + $0x74] sm:$0xf0] }
 0xbb3   :  { %v7174_v3 = vadd.f32 %v7173_v25, %v7005_v5  ;;  %v11426_v45 = vor.u32 %v12534_v21, %v11425_v40  ;;  %v11682_v25 = vor.u32 %v12598_v35, %v11681_v6  ;;  %v15985_v40 = vld [vmem:[#allocation113_spill] sm:$0xff] }
 0xbb4   :  { %v7342_v60 = vpop.f32.mrf.mxu3  ;;  %v6837_v34 = vpop.f32.mrf.mxu0 }
 0xbb5   :  { %v7343_v17 = vadd.f32 %v7342_v60, %v7174_v3  ;;  %v7007_v33 = vadd.f32 %v7006_v31, %v6837_v34  ;;  %7438 = vmatpush.bf16.msra.mxu0 %v11426_v45  ;;  %7607 = vmatpush.bf16.msra.mxu1 %v11682_v25  ;;  %v15983_v31 = vld [vmem:[#allocation111_spill] sm:$0xff]  ;;  %v15984_v34 = vld [vmem:[#allocation112_spill] sm:$0xff] }
 0xbb7   :  { %v10437_v32 = vpack.c.bf16 %v7343_v17, %v15980_v29 }
 0xbb9   :  { %10693 = vst [vmem:[#allocation8 + $0x390] sm:$0xff] %v10437_v32 }
 0xbba   :  { %v7175_v62 = vpop.f32.mrf.mxu2  ;;  %v7009_v27 = vpop.f32.mrf.mxu1 }
 0xbbb   :  { %v7176_v1 = vadd.f32 %v7175_v62, %v7007_v33 }
 0xbbc   :  { %v7344_v41 = vpop.f32.mrf.mxu3  ;;  %v6840_v5 = vpop.f32.mrf.mxu0 }
 0xbbd   :  { %v7345_v8 = vadd.f32 %v7344_v41, %v7176_v1  ;;  %v7010_v60 = vadd.f32 %v7009_v27, %v6840_v5  ;;  %7048 = vmatmul.bf16.gmra.mxu1 %v15983_v31  ;;  %v15986_v41 = vld [vmem:[#allocation109_spill] sm:$0xff] }
 0xbbf   :  { %6879 = vmatmul.bf16.gmra.mxu0 %v15981_v12  ;;  %v10441_v3 = vpack.c.bf16 %v7345_v8, %v15982_v22  ;;  %7217 = vmatmul.bf16.gmra.mxu2 %v15984_v34  ;;  %v15987_v8 = vld [vmem:[#allocation116_spill] sm:$0xff]  ;;  %v15988_v22 = vld [vmem:[#allocation114_spill] sm:$0xff] }
 0xbc1   :  { %7386 = vmatmul.bf16.gmra.mxu3 %v15985_v40  ;;  %10697 = vst [vmem:[#allocation8 + $0x3b0] sm:$0xff] %v10441_v3 }
 0xbc2   :  { %v7178_v62 = vpop.f32.mrf.mxu2  ;;  %v7011_v29 = vpop.f32.mrf.mxu1 }
 0xbc3   :  { %v7179_v14 = vadd.f32 %v7178_v62, %v7010_v60  ;;  %v15989_v60 = vld [vmem:[#allocation117_spill] sm:$0xff]  ;;  %v15990_v62 = vld [vmem:[#allocation118_spill] sm:$0xff] }
 0xbc4   :  { %v7347_v17 = vpop.f32.mrf.mxu3  ;;  %v6842_v6 = vpop.f32.mrf.mxu0 }
 0xbc5   :  { %v7348_v45 = vadd.f32 %v7347_v17, %v7179_v14  ;;  %v7012_v33 = vadd.f32 %v7011_v29, %v6842_v6  ;;  %v15991_v14 = vld [vmem:[#allocation119_spill] sm:$0xff] }
 0xbc7   :  { %v10445_v32 = vpack.c.bf16 %v7348_v45, %v15986_v41 }
 0xbc9   :  { %10701 = vst [vmem:[#allocation8 + $0x3d0] sm:$0xff] %v10445_v32 }
 0xbca   :  { %v7180_v21 = vpop.f32.mrf.mxu2  ;;  %v7014_v5 = vpop.f32.mrf.mxu1 }
 0xbcb   :  { %v7181_v35 = vadd.f32 %v7180_v21, %v7012_v33  ;;  %v15992_v33 = vld [vmem:[#allocation115_spill] sm:$0xff] }
 0xbcc   :  { %v7349_v27 = vpop.f32.mrf.mxu3  ;;  %v6845_v1 = vpop.f32.mrf.mxu0 }
 0xbcd   :  { %v7350_v25 = vadd.f32 %v7349_v27, %v7181_v35  ;;  %v7015_v40 = vadd.f32 %v7014_v5, %v6845_v1  ;;  %7053 = vmatmul.bf16.gmra.mxu1 %v15989_v60 }
 0xbcf   :  { %6884 = vmatmul.bf16.gmra.mxu0 %v15987_v8  ;;  %v10449_v3 = vpack.c.bf16 %v7350_v25, %v15988_v22  ;;  %7222 = vmatmul.bf16.gmra.mxu2 %v15990_v62  ;;  %v15993_v62 = vld [vmem:[#allocation122_spill] sm:$0xff] }
 0xbd1   :  { %7391 = vmatmul.bf16.gmra.mxu3 %v15991_v14  ;;  %10705 = vst [vmem:[#allocation8 + $0x3f0] sm:$0xff] %v10449_v3  ;;  %v15994_v14 = vld [vmem:[#allocation120_spill] sm:$0xff] }
 0xbd2   :  { %v7183_v17 = vpop.f32.mrf.mxu2  ;;  %v7016_v41 = vpop.f32.mrf.mxu1 }
 0xbd3   :  { %v7184_v6 = vadd.f32 %v7183_v17, %v7015_v40  ;;  %v15995_v40 = vld [vmem:[#allocation123_spill] sm:$0xff]  ;;  %v15996_v17 = vld [vmem:[#allocation124_spill] sm:$0xff] }
 0xbd4   :  { %v7352_v29 = vpop.f32.mrf.mxu3  ;;  %v6847_v45 = vpop.f32.mrf.mxu0 }
 0xbd5   :  { %v7353_v32 = vadd.f32 %v7352_v29, %v7184_v6  ;;  %v7017_v35 = vadd.f32 %v7016_v41, %v6847_v45  ;;  %v15997_v6 = vld [vmem:[#allocation125_spill] sm:$0xff] }
 0xbd7   :  { %v10453_v21 = vpack.c.bf16 %v7353_v32, %v15992_v33 }
 0xbd9   :  { %10709 = vst [vmem:[#allocation8 + $0x410] sm:$0xff] %v10453_v21 }
 0xbda   :  { %v7185_v27 = vpop.f32.mrf.mxu2  ;;  %v7019_v22 = vpop.f32.mrf.mxu1 }
 0xbdb   :  { %v7186_v25 = vadd.f32 %v7185_v27, %v7017_v35  ;;  %v15998_v35 = vld [vmem:[#allocation121_spill] sm:$0xff] }
 0xbdc   :  { %v7354_v1 = vpop.f32.mrf.mxu3  ;;  %v6850_v5 = vpop.f32.mrf.mxu0 }
 0xbdd   :  { %v7355_v60 = vadd.f32 %v7354_v1, %v7186_v25  ;;  %v7020_v8 = vadd.f32 %v7019_v22, %v6850_v5  ;;  %7058 = vmatmul.bf16.gmra.mxu1 %v15995_v40 }
 0xbdf   :  { %6889 = vmatmul.bf16.gmra.mxu0 %v15993_v62  ;;  %v10457_v3 = vpack.c.bf16 %v7355_v60, %v15994_v14  ;;  %7227 = vmatmul.bf16.gmra.mxu2 %v15996_v17  ;;  %v15999_v17 = vld [vmem:[#allocation128_spill] sm:$0xff] }
 0xbe1   :  { %7396 = vmatmul.bf16.gmra.mxu3 %v15997_v6  ;;  %10713 = vst [vmem:[#allocation8 + $0x430] sm:$0xff] %v10457_v3  ;;  %v16000_v6 = vld [vmem:[#allocation126_spill] sm:$0xff] }
 0xbe2   :  { %v7188_v29 = vpop.f32.mrf.mxu2  ;;  %v7021_v33 = vpop.f32.mrf.mxu1 }
 0xbe3   :  { %v7189_v45 = vadd.f32 %v7188_v29, %v7020_v8  ;;  %v16001_v8 = vld [vmem:[#allocation129_spill] sm:$0xff]  ;;  %v16002_v29 = vld [vmem:[#allocation130_spill] sm:$0xff] }
 0xbe4   :  { %v7357_v41 = vpop.f32.mrf.mxu3  ;;  %v6852_v32 = vpop.f32.mrf.mxu0 }
 0xbe5   :  { %v7358_v21 = vadd.f32 %v7357_v41, %v7189_v45  ;;  %v7022_v25 = vadd.f32 %v7021_v33, %v6852_v32  ;;  %v16003_v45 = vld [vmem:[#allocation131_spill] sm:$0xff] }
 0xbe6   :  { %v11905_v41 = vld [vmem:[#allocation6 + $0x418] sm:$0xf] }
 0xbe7   :  { %v10461_v27 = vpack.c.bf16 %v7358_v21, %v15998_v35  ;;  %v12654_v32 = vld [vmem:[#allocation6 + $0x434] sm:$0xf0] }
 0xbe8   :  { %v11906_v21 = vor.u32 %v12654_v32, %v11905_v41  ;;  %v12161_v35 = vld [vmem:[#allocation6 + $0x618] sm:$0xf] }
 0xbe9   :  { %10717 = vst [vmem:[#allocation8 + $0x450] sm:$0xff] %v10461_v27  ;;  %v12718_v27 = vld [vmem:[#allocation6 + $0x634] sm:$0xf0] }
 0xbea   :  { %v7190_v1 = vpop.f32.mrf.mxu2  ;;  %v7024_v22 = vpop.f32.mrf.mxu1  ;;  %7777 = vmatpush.bf16.msra.mxu2 %v11906_v21  ;;  %v12590_v41 = vld [vmem:[#allocation6 + $0x234] sm:$0xf0]  ;;  %v16004_v21 = vld [vmem:[#allocation134_spill] sm:$0xff] }
 0xbeb   :  { %v7191_v60 = vadd.f32 %v7190_v1, %v7022_v25 }
 0xbec   :  { %v7359_v14 = vpop.f32.mrf.mxu3  ;;  %v6855_v5 = vpop.f32.mrf.mxu0 }
 0xbed   :  { %v7360_v40 = vadd.f32 %v7359_v14, %v7191_v60  ;;  %v7025_v62 = vadd.f32 %v7024_v22, %v6855_v5  ;;  %7063 = vmatmul.bf16.gmra.mxu1 %v16001_v8  ;;  %v12162_v14 = vor.u32 %v12718_v27, %v12161_v35  ;;  %v11393_v22 = vld [vmem:[#allocation6 + $0x18] sm:$0xf] }
 0xbee   :  { %v11649_v8 = vld [vmem:[#allocation6 + $0x218] sm:$0xf] }
 0xbef   :  { %6894 = vmatmul.bf16.gmra.mxu0 %v15999_v17  ;;  %v10465_v3 = vpack.c.bf16 %v7360_v40, %v16000_v6  ;;  %7232 = vmatmul.bf16.gmra.mxu2 %v16002_v29  ;;  %v16005_v27 = vld [vmem:[#allocation127_spill] sm:$0xff] }
 0xbf0   :  { %7946 = vmatpush.bf16.msra.mxu3 %v12162_v14 }
 0xbf1   :  { %7401 = vmatmul.bf16.gmra.mxu3 %v16003_v45  ;;  %10721 = vst [vmem:[#allocation8 + $0x470] sm:$0xff] %v10465_v3  ;;  %v12526_v3 = vld [vmem:[#allocation6 + $0x34] sm:$0xf0] }
 0xbf2   :  { %v7193_v33 = vpop.f32.mrf.mxu2  ;;  %v7026_v17 = vpop.f32.mrf.mxu1  ;;  %v11394_v29 = vor.u32 %v12526_v3, %v11393_v22 }
 0xbf3   :  { %v7194_v25 = vadd.f32 %v7193_v33, %v7025_v62  ;;  %v11650_v33 = vor.u32 %v12590_v41, %v11649_v8 }
 0xbf4   :  { %v7362_v1 = vpop.f32.mrf.mxu3  ;;  %v6857_v60 = vpop.f32.mrf.mxu0  ;;  %7439 = vmatpush.bf16.msra.mxu0 %v11394_v29 }
 0xbf5   :  { %v7363_v40 = vadd.f32 %v7362_v1, %v7194_v25  ;;  %v7027_v5 = vadd.f32 %v7026_v17, %v6857_v60  ;;  %7608 = vmatpush.bf16.msra.mxu1 %v11650_v33  ;;  %v16006_v17 = vld [vmem:[#allocation135_spill] sm:$0xff]  ;;  %v16007_v1 = vld [vmem:[#allocation136_spill] sm:$0xff]  ;;  %v16008_v60 = vld [vmem:[#allocation137_spill] sm:$0xff] }
 0xbf7   :  { %v10469_v6 = vpack.c.bf16 %v7363_v40, %v14223_v15 }
 0xbf9   :  { %10725 = vst [vmem:[#allocation8 + $0x490] sm:$0xff] %v10469_v6 }
 0xbfa   :  { %v7195_v45 = vpop.f32.mrf.mxu2  ;;  %v7029_v31 = vpop.f32.mrf.mxu1 }
 0xbfb   :  { %v7196_v32 = vadd.f32 %v7195_v45, %v7027_v5 }
 0xbfc   :  { %v7364_v34 = vpop.f32.mrf.mxu3  ;;  %v6860_v62 = vpop.f32.mrf.mxu0 }
 0xbfd   :  { %v7365_v35 = vadd.f32 %v7364_v34, %v7196_v32  ;;  %v7030_v25 = vadd.f32 %v7029_v31, %v6860_v62  ;;  %7068 = vmatmul.bf16.gmra.mxu1 %v16006_v17  ;;  %v16009_v34 = vld [vmem:[#allocation132_spill] sm:$0xff] }
 0xbff   :  { %6899 = vmatmul.bf16.gmra.mxu0 %v16004_v21  ;;  %v10473_v15 = vpack.c.bf16 %v7365_v35, %v16005_v27  ;;  %7237 = vmatmul.bf16.gmra.mxu2 %v16007_v1  ;;  %v16010_v35 = vld [vmem:[#allocation140_spill] sm:$0xff]  ;;  %v16011_v27 = vld [vmem:[#allocation133_spill] sm:$0xff] }
 0xc01   :  { %7406 = vmatmul.bf16.gmra.mxu3 %v16008_v60  ;;  %10729 = vst [vmem:[#allocation8 + $0x4b0] sm:$0xff] %v10473_v15 }
 0xc02   :  { %v7198_v45 = vpop.f32.mrf.mxu2  ;;  %v7031_v6 = vpop.f32.mrf.mxu1 }
 0xc03   :  { %v7199_v14 = vadd.f32 %v7198_v45, %v7030_v25  ;;  %v16012_v25 = vld [vmem:[#allocation141_spill] sm:$0xff]  ;;  %v16013_v45 = vld [vmem:[#allocation142_spill] sm:$0xff] }
 0xc04   :  { %v7367_v40 = vpop.f32.mrf.mxu3  ;;  %v6862_v8 = vpop.f32.mrf.mxu0 }
 0xc05   :  { %v7368_v29 = vadd.f32 %v7367_v40, %v7199_v14  ;;  %v7032_v22 = vadd.f32 %v7031_v6, %v6862_v8  ;;  %v16014_v14 = vld [vmem:[#allocation143_spill] sm:$0xff] }
 0xc07   :  { %v10477_v5 = vpack.c.bf16 %v7368_v29, %v16009_v34 }
 0xc09   :  { %10733 = vst [vmem:[#allocation8 + $0x4d0] sm:$0xff] %v10477_v5 }
 0xc0a   :  { %v7200_v3 = vpop.f32.mrf.mxu2  ;;  %v7034_v62 = vpop.f32.mrf.mxu1 }
 0xc0b   :  { %v7201_v41 = vadd.f32 %v7200_v3, %v7032_v22  ;;  %v16015_v22 = vld [vmem:[#allocation138_spill] sm:$0xff] }
 0xc0c   :  { %v7369_v31 = vpop.f32.mrf.mxu3  ;;  %v6865_v32 = vpop.f32.mrf.mxu0 }
 0xc0d   :  { %v7370_v33 = vadd.f32 %v7369_v31, %v7201_v41  ;;  %v7035_v60 = vadd.f32 %v7034_v62, %v6865_v32  ;;  %7073 = vmatmul.bf16.gmra.mxu1 %v16012_v25 }
 0xc0f   :  { %6904 = vmatmul.bf16.gmra.mxu0 %v16010_v35  ;;  %v10481_v15 = vpack.c.bf16 %v7370_v33, %v16011_v27  ;;  %7242 = vmatmul.bf16.gmra.mxu2 %v16013_v45  ;;  %v16016_v45 = vld [vmem:[#allocation146_spill] sm:$0xff] }
 0xc11   :  { %7411 = vmatmul.bf16.gmra.mxu3 %v16014_v14  ;;  %10737 = vst [vmem:[#allocation8 + $0x4f0] sm:$0xff] %v10481_v15  ;;  %v16017_v14 = vld [vmem:[#allocation139_spill] sm:$0xff] }
 0xc12   :  { %v7203_v40 = vpop.f32.mrf.mxu2  ;;  %v7036_v34 = vpop.f32.mrf.mxu1 }
 0xc13   :  { %v7204_v8 = vadd.f32 %v7203_v40, %v7035_v60  ;;  %v16018_v60 = vld [vmem:[#allocation147_spill] sm:$0xff]  ;;  %v16019_v40 = vld [vmem:[#allocation148_spill] sm:$0xff] }
 0xc14   :  { %v7372_v6 = vpop.f32.mrf.mxu3  ;;  %v6867_v29 = vpop.f32.mrf.mxu0 }
 0xc15   :  { %v7373_v5 = vadd.f32 %v7372_v6, %v7204_v8  ;;  %v7037_v41 = vadd.f32 %v7036_v34, %v6867_v29  ;;  %v16020_v8 = vld [vmem:[#allocation149_spill] sm:$0xff] }
 0xc17   :  { %v10485_v3 = vpack.c.bf16 %v7373_v5, %v16015_v22 }
 0xc19   :  { %10741 = vst [vmem:[#allocation8 + $0x510] sm:$0xff] %v10485_v3 }
 0xc1a   :  { %v7205_v31 = vpop.f32.mrf.mxu2  ;;  %v7039_v27 = vpop.f32.mrf.mxu1 }
 0xc1b   :  { %v7206_v33 = vadd.f32 %v7205_v31, %v7037_v41  ;;  %v16021_v41 = vld [vmem:[#allocation144_spill] sm:$0xff] }
 0xc1c   :  { %v7374_v32 = vpop.f32.mrf.mxu3  ;;  %v6870_v62 = vpop.f32.mrf.mxu0 }
 0xc1d   :  { %v7375_v25 = vadd.f32 %v7374_v32, %v7206_v33  ;;  %v7040_v35 = vadd.f32 %v7039_v27, %v6870_v62  ;;  %7078 = vmatmul.bf16.gmra.mxu1 %v16018_v60 }
 0xc1f   :  { %6909 = vmatmul.bf16.gmra.mxu0 %v16016_v45  ;;  %v10489_v15 = vpack.c.bf16 %v7375_v25, %v16017_v14  ;;  %7247 = vmatmul.bf16.gmra.mxu2 %v16019_v40  ;;  %v16022_v40 = vld [vmem:[#allocation152_spill] sm:$0xff] }
 0xc21   :  { %7416 = vmatmul.bf16.gmra.mxu3 %v16020_v8  ;;  %10745 = vst [vmem:[#allocation8 + $0x530] sm:$0xff] %v10489_v15  ;;  %v16023_v8 = vld [vmem:[#allocation145_spill] sm:$0xff] }
 0xc22   :  { %v7208_v6 = vpop.f32.mrf.mxu2  ;;  %v7041_v22 = vpop.f32.mrf.mxu1 }
 0xc23   :  { %v7209_v29 = vadd.f32 %v7208_v6, %v7040_v35  ;;  %v16024_v35 = vld [vmem:[#allocation153_spill] sm:$0xff]  ;;  %v16025_v6 = vld [vmem:[#allocation154_spill] sm:$0xff] }
 0xc24   :  { %v7377_v34 = vpop.f32.mrf.mxu3  ;;  %v6872_v5 = vpop.f32.mrf.mxu0 }
 0xc25   :  { %v7378_v3 = vadd.f32 %v7377_v34, %v7209_v29  ;;  %v7042_v33 = vadd.f32 %v7041_v22, %v6872_v5  ;;  %v16026_v29 = vld [vmem:[#allocation155_spill] sm:$0xff] }
 0xc26   :  { %v12706_v34 = vld [vmem:[#allocation6 + $0x5dc] sm:$0xf] }
 0xc27   :  { %v10493_v31 = vpack.c.bf16 %v7378_v3, %v16021_v41  ;;  %v12131_v5 = vld [vmem:[#allocation6 + $0x5f8] sm:$0xf0] }
 0xc28   :  { %v12134_v3 = vor.u32 %v12706_v34, %v12131_v5  ;;  %v12770_v41 = vld [vmem:[#allocation6 + $0x7dc] sm:$0xf] }
 0xc29   :  { %10749 = vst [vmem:[#allocation8 + $0x550] sm:$0xff] %v10493_v31  ;;  %v12387_v31 = vld [vmem:[#allocation6 + $0x7f8] sm:$0xf0] }
 0xc2a   :  { %v7210_v32 = vpop.f32.mrf.mxu2  ;;  %v7044_v27 = vpop.f32.mrf.mxu1  ;;  %8446 = vmatpush.bf16.msrb.mxu2 %v12134_v3  ;;  %v11875_v34 = vld [vmem:[#allocation6 + $0x3f8] sm:$0xf0] }
 0xc2b   :  { %v7211_v25 = vadd.f32 %v7210_v32, %v7042_v33 }
 0xc2c   :  { %v7379_v14 = vpop.f32.mrf.mxu3  ;;  %v6875_v62 = vpop.f32.mrf.mxu0 }
 0xc2d   :  { %v7380_v60 = vadd.f32 %v7379_v14, %v7211_v25  ;;  %v7045_v45 = vadd.f32 %v7044_v27, %v6875_v62  ;;  %7083 = vmatmul.bf16.gmra.mxu1 %v16024_v35  ;;  %v12390_v14 = vor.u32 %v12770_v41, %v12387_v31  ;;  %v12578_v27 = vld [vmem:[#allocation6 + $0x1dc] sm:$0xf] }
 0xc2e   :  { %v12642_v35 = vld [vmem:[#allocation6 + $0x3dc] sm:$0xf] }
 0xc2f   :  { %6914 = vmatmul.bf16.gmra.mxu0 %v16022_v40  ;;  %v10497_v15 = vpack.c.bf16 %v7380_v60, %v16023_v8  ;;  %7252 = vmatmul.bf16.gmra.mxu2 %v16025_v6 }
 0xc30   :  { %8615 = vmatpush.bf16.msrb.mxu3 %v12390_v14 }
 0xc31   :  { %7421 = vmatmul.bf16.gmra.mxu3 %v16026_v29  ;;  %10753 = vst [vmem:[#allocation8 + $0x570] sm:$0xff] %v10497_v15  ;;  %v11619_v15 = vld [vmem:[#allocation6 + $0x1f8] sm:$0xf0] }
 0xc32   :  { %v7213_v22 = vpop.f32.mrf.mxu2  ;;  %v7046_v40 = vpop.f32.mrf.mxu1  ;;  %v11622_v6 = vor.u32 %v12578_v27, %v11619_v15 }
 0xc33   :  { %v7214_v33 = vadd.f32 %v7213_v22, %v7045_v45  ;;  %v11878_v22 = vor.u32 %v12642_v35, %v11875_v34 }
 0xc34   :  { %v7382_v32 = vpop.f32.mrf.mxu3  ;;  %v6877_v25 = vpop.f32.mrf.mxu0  ;;  %8108 = vmatpush.bf16.msrb.mxu0 %v11622_v6 }
 0xc35   :  { %v7383_v60 = vadd.f32 %v7382_v32, %v7214_v33  ;;  %v7047_v62 = vadd.f32 %v7046_v40, %v6877_v25  ;;  %8277 = vmatpush.bf16.msrb.mxu1 %v11878_v22 }
 0xc37   :  { %v10501_v8 = vpack.c.bf16 %v7383_v60, %v14255_v42 }
 0xc39   :  { %10757 = vst [vmem:[#allocation8 + $0x590] sm:$0xff] %v10501_v8 }
 0xc3a   :  { %v7215_v29 = vpop.f32.mrf.mxu2  ;;  %v7049_v17 = vpop.f32.mrf.mxu1 }
 0xc3b   :  { %v7216_v5 = vadd.f32 %v7215_v29, %v7047_v62 }
 0xc3c   :  { %v7384_v1 = vpop.f32.mrf.mxu3  ;;  %v6880_v45 = vpop.f32.mrf.mxu0 }
 0xc3d   :  { %v7385_v41 = vadd.f32 %v7384_v1, %v7216_v5  ;;  %v7050_v3 = vadd.f32 %v7049_v17, %v6880_v45  ;;  %7088 = vmatmul.bf16.gmra.mxu1 %v13355_v28 }
 0xc3f   :  { %6919 = vmatmul.bf16.gmra.mxu0 %v13353_v43  ;;  %v10505_v42 = vpack.c.bf16 %v7385_v41, %v14257_v10  ;;  %7257 = vmatmul.bf16.gmra.mxu2 %v13357_v24 }
 0xc41   :  { %7426 = vmatmul.bf16.gmra.mxu3 %v13359_v46  ;;  %10761 = vst [vmem:[#allocation8 + $0x5b0] sm:$0xff] %v10505_v42 }
 0xc42   :  { %v7218_v40 = vpop.f32.mrf.mxu2  ;;  %v7051_v33 = vpop.f32.mrf.mxu1 }
 0xc43   :  { %v7219_v29 = vadd.f32 %v7218_v40, %v7050_v3 }
 0xc44   :  { %v7387_v31 = vpop.f32.mrf.mxu3  ;;  %v6882_v35 = vpop.f32.mrf.mxu0 }
 0xc45   :  { %v7388_v6 = vadd.f32 %v7387_v31, %v7219_v29  ;;  %v7052_v32 = vadd.f32 %v7051_v33, %v6882_v35 }
 0xc47   :  { %v10509_v1 = vpack.c.bf16 %v7388_v6, %v14263_v61 }
 0xc49   :  { %10765 = vst [vmem:[#allocation8 + $0x5d0] sm:$0xff] %v10509_v1  ;;  %v16027_v1 = vld [vmem:[#allocation12_spill] sm:$0xff] }
 0xc4a   :  { %v7220_v25 = vpop.f32.mrf.mxu2  ;;  %v7054_v60 = vpop.f32.mrf.mxu1 }
 0xc4b   :  { %v7221_v10 = vadd.f32 %v7220_v25, %v7052_v32  ;;  %v16028_v32 = vld [vmem:[#allocation13_spill] sm:$0xff]  ;;  %v16029_v25 = vld [vmem:[#allocation14_spill] sm:$0xff] }
 0xc4c   :  { %v7389_v17 = vpop.f32.mrf.mxu3  ;;  %v6885_v14 = vpop.f32.mrf.mxu0 }
 0xc4d   :  { %v7390_v8 = vadd.f32 %v7389_v17, %v7221_v10  ;;  %v7055_v27 = vadd.f32 %v7054_v60, %v6885_v14  ;;  %7609 = vmatmul.bf16.vlgmr.msra.gmra.mxu1 %v12893_v51 }
 0xc4f   :  { %7440 = vmatmul.bf16.vlgmr.msra.gmra.mxu0 %v12891_v47  ;;  %v10513_v62 = vpack.c.bf16 %v7390_v8, %v14265_v13  ;;  %7778 = vmatmul.bf16.vlgmr.msra.gmra.mxu2 %v12895_v52 }
 0xc51   :  { %7947 = vmatmul.bf16.vlgmr.msra.gmra.mxu3 %v12897_v53  ;;  %10769 = vst [vmem:[#allocation8 + $0x5f0] sm:$0xff] %v10513_v62  ;;  %v16030_v62 = vld [vmem:[#allocation150_spill] sm:$0xff] }
 0xc52   :  { %v7223_v61 = vpop.f32.mrf.mxu2  ;;  %v7056_v45 = vpop.f32.mrf.mxu1 }
 0xc53   :  { %v7224_v15 = vadd.f32 %v7223_v61, %v7055_v27 }
 0xc54   :  { %v7392_v34 = vpop.f32.mrf.mxu3  ;;  %v6887_v5 = vpop.f32.mrf.mxu0 }
 0xc55   :  { %v7393_v22 = vadd.f32 %v7392_v34, %v7224_v15  ;;  %v7057_v42 = vadd.f32 %v7056_v45, %v6887_v5 }
 0xc57   :  { %v10517_v41 = vpack.c.bf16 %v7393_v22, %v14271_v30 }
 0xc59   :  { %10773 = vst [vmem:[#allocation8 + $0x610] sm:$0xff] %v10517_v41  ;;  %v16031_v41 = vld [vmem:[#allocation15_spill] sm:$0xff] }
 0xc5a   :  { %v7225_v3 = vpop.f32.mrf.mxu2  ;;  %v7059_v31 = vpop.f32.mrf.mxu1 }
 0xc5b   :  { %v7226_v13 = vadd.f32 %v7225_v3, %v7057_v42  ;;  %v16032_v42 = vld [vmem:[#allocation151_spill] sm:$0xff] }
 0xc5c   :  { %v7394_v40 = vpop.f32.mrf.mxu3  ;;  %v6890_v29 = vpop.f32.mrf.mxu0 }
 0xc5d   :  { %v7395_v35 = vadd.f32 %v7394_v40, %v7226_v13  ;;  %v7060_v6 = vadd.f32 %v7059_v31, %v6890_v29  ;;  %7614 = vmatmul.bf16.gmra.mxu1 %v16027_v1  ;;  %v16033_v40 = vld [vmem:[#allocation16_spill] sm:$0xff]  ;;  %v16034_v29 = vld [vmem:[#allocation17_spill] sm:$0xff]  ;;  %v16035_v31 = vld [vmem:[#allocation18_spill] sm:$0xff] }
 0xc5f   :  { %7445 = vmatmul.bf16.gmra.mxu0 %v12903_v0  ;;  %v10521_v33 = vpack.c.bf16 %v7395_v35, %v14273_v44  ;;  %7783 = vmatmul.bf16.gmra.mxu2 %v16028_v32  ;;  %v12698_v35 = vld [vmem:[#allocation6 + $0x59c] sm:$0xf] }
 0xc61   :  { %7952 = vmatmul.bf16.gmra.mxu3 %v16029_v25  ;;  %10777 = vst [vmem:[#allocation8 + $0x630] sm:$0xff] %v10521_v33  ;;  %v12099_v33 = vld [vmem:[#allocation6 + $0x5b8] sm:$0xf0] }
 0xc62   :  { %v7228_v30 = vpop.f32.mrf.mxu2  ;;  %v7061_v60 = vpop.f32.mrf.mxu1 }
 0xc63   :  { %v7229_v10 = vadd.f32 %v7228_v30, %v7060_v6  ;;  %v12102_v30 = vor.u32 %v12698_v35, %v12099_v33 }
 0xc64   :  { %v7397_v17 = vpop.f32.mrf.mxu3  ;;  %v6892_v14 = vpop.f32.mrf.mxu0 }
 0xc65   :  { %v7398_v8 = vadd.f32 %v7397_v17, %v7229_v10  ;;  %v7062_v61 = vadd.f32 %v7061_v60, %v6892_v14  ;;  %v12762_v10 = vld [vmem:[#allocation6 + $0x79c] sm:$0xf]  ;;  %8447 = vmatpush.bf16.msrb.mxu2 %v12102_v30 }
 0xc66   :  { %v12355_v17 = vld [vmem:[#allocation6 + $0x7b8] sm:$0xf0] }
 0xc67   :  { %v10525_v27 = vpack.c.bf16 %v7398_v8, %v16030_v62  ;;  %v12358_v62 = vor.u32 %v12762_v10, %v12355_v17 }
 0xc69   :  { %10781 = vst [vmem:[#allocation8 + $0x650] sm:$0xff] %v10525_v27  ;;  %8616 = vmatpush.bf16.msrb.mxu3 %v12358_v62 }
 0xc6a   :  { %v7230_v15 = vpop.f32.mrf.mxu2  ;;  %v7064_v45 = vpop.f32.mrf.mxu1 }
 0xc6b   :  { %v7231_v44 = vadd.f32 %v7230_v15, %v7062_v61 }
 0xc6c   :  { %v7399_v34 = vpop.f32.mrf.mxu3  ;;  %v6895_v5 = vpop.f32.mrf.mxu0 }
 0xc6d   :  { %v7400_v22 = vadd.f32 %v7399_v34, %v7231_v44  ;;  %v7065_v13 = vadd.f32 %v7064_v45, %v6895_v5  ;;  %7619 = vmatmul.bf16.gmra.mxu1 %v16033_v40  ;;  %v12570_v34 = vld [vmem:[#allocation6 + $0x19c] sm:$0xf] }
 0xc6e   :  { %v11587_v5 = vld [vmem:[#allocation6 + $0x1b8] sm:$0xf0] }
 0xc6f   :  { %7450 = vmatmul.bf16.gmra.mxu0 %v16031_v41  ;;  %v10529_v3 = vpack.c.bf16 %v7400_v22, %v16032_v42  ;;  %7788 = vmatmul.bf16.gmra.mxu2 %v16034_v29  ;;  %v11590_v22 = vor.u32 %v12570_v34, %v11587_v5  ;;  %v12634_v42 = vld [vmem:[#allocation6 + $0x39c] sm:$0xf] }
 0xc71   :  { %7957 = vmatmul.bf16.gmra.mxu3 %v16035_v31  ;;  %10785 = vst [vmem:[#allocation8 + $0x670] sm:$0xff] %v10529_v3  ;;  %v11843_v3 = vld [vmem:[#allocation6 + $0x3b8] sm:$0xf0]  ;;  %8109 = vmatpush.bf16.msrb.mxu0 %v11590_v22 }
 0xc72   :  { %v7233_v6 = vpop.f32.mrf.mxu2  ;;  %v7066_v27 = vpop.f32.mrf.mxu1 }
 0xc73   :  { %v7234_v14 = vadd.f32 %v7233_v6, %v7065_v13  ;;  %v11846_v6 = vor.u32 %v12634_v42, %v11843_v3 }
 0xc74   :  { %v7402_v60 = vpop.f32.mrf.mxu3  ;;  %v6897_v8 = vpop.f32.mrf.mxu0 }
 0xc75   :  { %v7403_v61 = vadd.f32 %v7402_v60, %v7234_v14  ;;  %v7067_v44 = vadd.f32 %v7066_v27, %v6897_v8  ;;  %8278 = vmatpush.bf16.msrb.mxu1 %v11846_v6 }
 0xc77   :  { %v10533_v15 = vpack.c.bf16 %v7403_v61, %v14287_v7 }
 0xc79   :  { %10789 = vst [vmem:[#allocation8 + $0x690] sm:$0xff] %v10533_v15 }
 0xc7a   :  { %v7235_v45 = vpop.f32.mrf.mxu2  ;;  %v7069_v31 = vpop.f32.mrf.mxu1 }
 0xc7b   :  { %v7236_v35 = vadd.f32 %v7235_v45, %v7067_v44 }
 0xc7c   :  { %v7404_v33 = vpop.f32.mrf.mxu3  ;;  %v6900_v13 = vpop.f32.mrf.mxu0 }
 0xc7d   :  { %v7405_v10 = vadd.f32 %v7404_v33, %v7236_v35  ;;  %v7070_v30 = vadd.f32 %v7069_v31, %v6900_v13  ;;  %7624 = vmatmul.bf16.gmra.mxu1 %v12929_v37 }
 0xc7f   :  { %7455 = vmatmul.bf16.gmra.mxu0 %v12927_v36  ;;  %v10537_v7 = vpack.c.bf16 %v7405_v10, %v14289_v26  ;;  %7793 = vmatmul.bf16.gmra.mxu2 %v12931_v38 }
 0xc81   :  { %7962 = vmatmul.bf16.gmra.mxu3 %v12933_v39  ;;  %10793 = vst [vmem:[#allocation8 + $0x6b0] sm:$0xff] %v10537_v7 }
 0xc82   :  { %v7238_v17 = vpop.f32.mrf.mxu2  ;;  %v7071_v62 = vpop.f32.mrf.mxu1 }
 0xc83   :  { %v7239_v14 = vadd.f32 %v7238_v17, %v7070_v30 }
 0xc84   :  { %v7407_v60 = vpop.f32.mrf.mxu3  ;;  %v6902_v8 = vpop.f32.mrf.mxu0 }
 0xc85   :  { %v7408_v27 = vadd.f32 %v7407_v60, %v7239_v14  ;;  %v7072_v15 = vadd.f32 %v7071_v62, %v6902_v8  ;;  %v16036_v62 = vld [vmem:[#allocation156_spill] sm:$0xff] }
 0xc87   :  { %v10541_v61 = vpack.c.bf16 %v7408_v27, %v14295_v11 }
 0xc89   :  { %10797 = vst [vmem:[#allocation8 + $0x6d0] sm:$0xff] %v10541_v61 }
 0xc8a   :  { %v7240_v44 = vpop.f32.mrf.mxu2  ;;  %v7074_v5 = vpop.f32.mrf.mxu1 }
 0xc8b   :  { %v7241_v26 = vadd.f32 %v7240_v44, %v7072_v15  ;;  %v16037_v15 = vld [vmem:[#allocation19_spill] sm:$0xff]  ;;  %v16038_v44 = vld [vmem:[#allocation20_spill] sm:$0xff] }
 0xc8c   :  { %v7409_v31 = vpop.f32.mrf.mxu3  ;;  %v6905_v34 = vpop.f32.mrf.mxu0 }
 0xc8d   :  { %v7410_v45 = vadd.f32 %v7409_v31, %v7241_v26  ;;  %v7075_v42 = vadd.f32 %v7074_v5, %v6905_v34  ;;  %7629 = vmatmul.bf16.gmra.mxu1 %v12941_v50  ;;  %v16039_v26 = vld [vmem:[#allocation21_spill] sm:$0xff] }
 0xc8f   :  { %7460 = vmatmul.bf16.gmra.mxu0 %v12939_v49  ;;  %v10545_v22 = vpack.c.bf16 %v7410_v45, %v14297_v63  ;;  %7798 = vmatmul.bf16.gmra.mxu2 %v12943_v54 }
 0xc91   :  { %7967 = vmatmul.bf16.gmra.mxu3 %v12945_v55  ;;  %10801 = vst [vmem:[#allocation8 + $0x6f0] sm:$0xff] %v10545_v22 }
 0xc92   :  { %v7243_v11 = vpop.f32.mrf.mxu2  ;;  %v7076_v13 = vpop.f32.mrf.mxu1 }
 0xc93   :  { %v7244_v3 = vadd.f32 %v7243_v11, %v7075_v42  ;;  %v16040_v42 = vld [vmem:[#allocation157_spill] sm:$0xff] }
 0xc94   :  { %v7412_v35 = vpop.f32.mrf.mxu3  ;;  %v6907_v33 = vpop.f32.mrf.mxu0 }
 0xc95   :  { %v7413_v6 = vadd.f32 %v7412_v35, %v7244_v3  ;;  %v7077_v7 = vadd.f32 %v7076_v13, %v6907_v33 }
 0xc97   :  { %v10549_v10 = vpack.c.bf16 %v7413_v6, %v14303_v2 }
 0xc99   :  { %10805 = vst [vmem:[#allocation8 + $0x710] sm:$0xff] %v10549_v10 }
 0xc9a   :  { %v7245_v30 = vpop.f32.mrf.mxu2  ;;  %v7079_v60 = vpop.f32.mrf.mxu1 }
 0xc9b   :  { %v7246_v63 = vadd.f32 %v7245_v30, %v7077_v7  ;;  %v16041_v30 = vld [vmem:[#allocation22_spill] sm:$0xff] }
 0xc9c   :  { %v7414_v17 = vpop.f32.mrf.mxu3  ;;  %v6910_v14 = vpop.f32.mrf.mxu0 }
 0xc9d   :  { %v7415_v8 = vadd.f32 %v7414_v17, %v7246_v63  ;;  %v7080_v61 = vadd.f32 %v7079_v60, %v6910_v14  ;;  %7634 = vmatmul.bf16.gmra.mxu1 %v16037_v15  ;;  %v16042_v63 = vld [vmem:[#allocation159_spill] sm:$0xff] }
 0xc9e   :  { %v16043_v60 = vld [vmem:[#allocation23_spill] sm:$0xff] }
 0xc9f   :  { %7465 = vmatmul.bf16.gmra.mxu0 %v12951_v4  ;;  %v10553_v27 = vpack.c.bf16 %v7415_v8, %v16036_v62  ;;  %7803 = vmatmul.bf16.gmra.mxu2 %v16038_v44  ;;  %v16044_v8 = vld [vmem:[#allocation24_spill] sm:$0xff]  ;;  %v16045_v62 = vld [vmem:[#allocation25_spill] sm:$0xff] }
 0xca1   :  { %7972 = vmatmul.bf16.gmra.mxu3 %v16039_v26  ;;  %10809 = vst [vmem:[#allocation8 + $0x730] sm:$0xff] %v10553_v27  ;;  %v12690_v27 = vld [vmem:[#allocation6 + $0x55c] sm:$0xf] }
 0xca2   :  { %v7248_v2 = vpop.f32.mrf.mxu2  ;;  %v7081_v45 = vpop.f32.mrf.mxu1 }
 0xca3   :  { %v7249_v31 = vadd.f32 %v7248_v2, %v7080_v61  ;;  %v12067_v61 = vld [vmem:[#allocation6 + $0x578] sm:$0xf0] }
 0xca4   :  { %v7417_v34 = vpop.f32.mrf.mxu3  ;;  %v6912_v5 = vpop.f32.mrf.mxu0 }
 0xca5   :  { %v7418_v22 = vadd.f32 %v7417_v34, %v7249_v31  ;;  %v7082_v3 = vadd.f32 %v7081_v45, %v6912_v5  ;;  %v12070_v31 = vor.u32 %v12690_v27, %v12067_v61  ;;  %v12754_v34 = vld [vmem:[#allocation6 + $0x75c] sm:$0xf] }
 0xca6   :  { %v12323_v5 = vld [vmem:[#allocation6 + $0x778] sm:$0xf0] }
 0xca7   :  { %v10557_v11 = vpack.c.bf16 %v7418_v22, %v16040_v42  ;;  %8448 = vmatpush.bf16.msrb.mxu2 %v12070_v31 }
 0xca9   :  { %10813 = vst [vmem:[#allocation8 + $0x750] sm:$0xff] %v10557_v11  ;;  %v12326_v11 = vor.u32 %v12754_v34, %v12323_v5 }
 0xcaa   :  { %v7250_v35 = vpop.f32.mrf.mxu2  ;;  %v7084_v10 = vpop.f32.mrf.mxu1 }
 0xcab   :  { %v7251_v33 = vadd.f32 %v7250_v35, %v7082_v3  ;;  %8617 = vmatpush.bf16.msrb.mxu3 %v12326_v11 }
 0xcac   :  { %v7419_v13 = vpop.f32.mrf.mxu3  ;;  %v6915_v6 = vpop.f32.mrf.mxu0 }
 0xcad   :  { %v7420_v7 = vadd.f32 %v7419_v13, %v7251_v33  ;;  %v7085_v14 = vadd.f32 %v7084_v10, %v6915_v6  ;;  %7639 = vmatmul.bf16.gmra.mxu1 %v16043_v60  ;;  %v12562_v33 = vld [vmem:[#allocation6 + $0x15c] sm:$0xf] }
 0xcae   :  { %v11555_v13 = vld [vmem:[#allocation6 + $0x178] sm:$0xf0] }
 0xcaf   :  { %7470 = vmatmul.bf16.gmra.mxu0 %v16041_v30  ;;  %v10561_v17 = vpack.c.bf16 %v7420_v7, %v16042_v63  ;;  %7808 = vmatmul.bf16.gmra.mxu2 %v16044_v8  ;;  %v12626_v6 = vld [vmem:[#allocation6 + $0x35c] sm:$0xf]  ;;  %v11558_v10 = vor.u32 %v12562_v33, %v11555_v13 }
 0xcb0   :  { %v11811_v7 = vld [vmem:[#allocation6 + $0x378] sm:$0xf0] }
 0xcb1   :  { %7977 = vmatmul.bf16.gmra.mxu3 %v16045_v62  ;;  %10817 = vst [vmem:[#allocation8 + $0x770] sm:$0xff] %v10561_v17  ;;  %v11814_v17 = vor.u32 %v12626_v6, %v11811_v7  ;;  %8110 = vmatpush.bf16.msrb.mxu0 %v11558_v10 }
 0xcb2   :  { %v7253_v2 = vpop.f32.mrf.mxu2  ;;  %v7086_v3 = vpop.f32.mrf.mxu1 }
 0xcb3   :  { %v7254_v45 = vadd.f32 %v7253_v2, %v7085_v14  ;;  %8279 = vmatpush.bf16.msrb.mxu1 %v11814_v17 }
 0xcb4   :  { %v7422_v22 = vpop.f32.mrf.mxu3  ;;  %v6917_v42 = vpop.f32.mrf.mxu0 }
 0xcb5   :  { %v7423_v35 = vadd.f32 %v7422_v22, %v7254_v45  ;;  %v7087_v27 = vadd.f32 %v7086_v3, %v6917_v42 }
 0xcb7   :  { %v10565_v63 = vpack.c.bf16 %v7423_v35, %v14319_v9 }
 0xcb9   :  { %10821 = vst [vmem:[#allocation8 + $0x790] sm:$0xff] %v10565_v63 }
 0xcba   :  { %v7255_v14 = vpop.f32.mrf.mxu2  ;;  %v7089_v5 = vpop.f32.mrf.mxu1 }
 0xcbb   :  { %v7256_v61 = vadd.f32 %v7255_v14, %v7087_v27 }
 0xcbc   :  { %v7424_v2 = vpop.f32.mrf.mxu3  ;;  %v6920_v34 = vpop.f32.mrf.mxu0 }
 0xcbd   :  { %v7425_v31 = vadd.f32 %v7424_v2, %v7256_v61  ;;  %v7090_v22 = vadd.f32 %v7089_v5, %v6920_v34  ;;  %7644 = vmatmul.bf16.gmra.mxu1 %v12977_v57  ;;  %v16046_v2 = vld [vmem:[#allocation26_spill] sm:$0xff] }
 0xcbf   :  { %7475 = vmatmul.bf16.gmra.mxu0 %v12975_v56  ;;  %v10569_v45 = vpack.c.bf16 %v7425_v31, %v14321_v48  ;;  %7813 = vmatmul.bf16.gmra.mxu2 %v12979_v58 }
 0xcc1   :  { %7982 = vmatmul.bf16.gmra.mxu3 %v12981_v59  ;;  %10825 = vst [vmem:[#allocation8 + $0x7b0] sm:$0xff] %v10569_v45 }
 0xcc2   :  { %v7258_v9 = vpop.f32.mrf.mxu2  ;;  %v7091_v35 = vpop.f32.mrf.mxu1 }
 0xcc3   :  { %v7259_v42 = vadd.f32 %v7258_v9, %v7090_v22 }
 0xcc4   :  { %v7427_v11 = vpop.f32.mrf.mxu3  ;;  %v6922_v3 = vpop.f32.mrf.mxu0 }
 0xcc5   :  { %v7428_v33 = vadd.f32 %v7427_v11, %v7259_v42  ;;  %v7092_v6 = vadd.f32 %v7091_v35, %v6922_v3 }
 0xcc7   :  { %v10573_v13 = vpack.c.bf16 %v7428_v33, %v14327_v23 }
 0xcc9   :  { %10829 = vst [vmem:[#allocation8 + $0x7d0] sm:$0xff] %v10573_v13 }
 0xcca   :  { %v7260_v10 = vpop.f32.mrf.mxu2  ;;  %v7610_v17 = vpop.f32.mrf.mxu1 }
 0xccb   :  { %v7261_v48 = vadd.f32 %v7260_v10, %v7092_v6  ;;  %v16047_v6 = vld [vmem:[#allocation27_spill] sm:$0xff]  ;;  %v16048_v10 = vld [vmem:[#allocation28_spill] sm:$0xff] }
 0xccc   :  { %v7429_v7 = vpop.f32.mrf.mxu3  ;;  %v7441_v63 = vpop.f32.mrf.mxu0 }
 0xccd   :  { %v7430_v27 = vadd.f32 %v7429_v7, %v7261_v48  ;;  %v7611_v14 = vadd.f32 %v7610_v17, %v7441_v63  ;;  %7649 = vmatmul.bf16.gmra.mxu1 %v12989_v18  ;;  %v16049_v48 = vld [vmem:[#allocation29_spill] sm:$0xff]  ;;  %v16050_v7 = vld [vmem:[#allocation30_spill] sm:$0xff] }
 0xccf   :  { %7480 = vmatmul.bf16.gmra.mxu0 %v12987_v16  ;;  %v10577_v61 = vpack.c.bf16 %v7430_v27, %v14329_v20  ;;  %7818 = vmatmul.bf16.gmra.mxu2 %v12991_v19 }
 0xcd1   :  { %7987 = vmatmul.bf16.gmra.mxu3 %v16046_v2  ;;  %10833 = vst [vmem:[#allocation8 + $0x7f0] sm:$0xff] %v10577_v61 }
 0xcd2   :  { %v7779_v23 = vpop.f32.mrf.mxu2  ;;  %v7612_v45 = vpop.f32.mrf.mxu1 }
 0xcd3   :  { %v7780_v34 = vadd.f32 %v7779_v23, %v7611_v14 }
 0xcd4   :  { %v7948_v5 = vpop.f32.mrf.mxu3  ;;  %v7443_v31 = vpop.f32.mrf.mxu0 }
 0xcd5   :  { %v14527_v22 = vadd.f32 %v7948_v5, %v7780_v34  ;;  %v7613_v9 = vadd.f32 %v7612_v45, %v7443_v31 }
 0xcda   :  { %v7781_v42 = vpop.f32.mrf.mxu2  ;;  %v7615_v20 = vpop.f32.mrf.mxu1 }
 0xcdb   :  { %v7782_v11 = vadd.f32 %v7781_v42, %v7613_v9 }
 0xcdc   :  { %v7950_v3 = vpop.f32.mrf.mxu3  ;;  %v7446_v35 = vpop.f32.mrf.mxu0 }
 0xcdd   :  { %v14529_v33 = vadd.f32 %v7950_v3, %v7782_v11  ;;  %v7616_v13 = vadd.f32 %v7615_v20, %v7446_v35  ;;  %7654 = vmatmul.bf16.gmra.mxu1 %v16048_v10  ;;  %v16053_v35 = vld [vmem:[#allocation32_spill] sm:$0xff]  ;;  %v16054_v20 = vld [vmem:[#allocation33_spill] sm:$0xff] }
 0xcdf   :  { %7485 = vmatmul.bf16.gmra.mxu0 %v16047_v6  ;;  %7823 = vmatmul.bf16.gmra.mxu2 %v16049_v48 }
 0xce1   :  { %7992 = vmatmul.bf16.gmra.mxu3 %v16050_v7  ;;  %v16055_v7 = vld [vmem:[#allocation34_spill] sm:$0xff] }
 0xce2   :  { %v7784_v63 = vpop.f32.mrf.mxu2  ;;  %v7617_v61 = vpop.f32.mrf.mxu1 }
 0xce3   :  { %v7785_v17 = vadd.f32 %v7784_v63, %v7616_v13  ;;  %v16056_v13 = vld [vmem:[#allocation35_spill] sm:$0xff] }
 0xce4   :  { %v7953_v27 = vpop.f32.mrf.mxu3  ;;  %v7448_v14 = vpop.f32.mrf.mxu0  ;;  %v12682_v63 = vld [vmem:[#allocation6 + $0x51c] sm:$0xf] }
 0xce5   :  { %v14535_v23 = vadd.f32 %v7953_v27, %v7785_v17  ;;  %v7618_v34 = vadd.f32 %v7617_v61, %v7448_v14  ;;  %v12035_v17 = vld [vmem:[#allocation6 + $0x538] sm:$0xf0] }
 0xce6   :  { %v12746_v27 = vld [vmem:[#allocation6 + $0x71c] sm:$0xf]  ;;  %v12038_v14 = vor.u32 %v12682_v63, %v12035_v17 }
 0xce7   :  { %16051 = vst [vmem:[#allocation160_spill] sm:$0xff] %v14535_v23  ;;  %v12291_v61 = vld [vmem:[#allocation6 + $0x738] sm:$0xf0] }
 0xce8   :  { %8449 = vmatpush.bf16.msrb.mxu2 %v12038_v14 }
 0xcea   :  { %v7786_v5 = vpop.f32.mrf.mxu2  ;;  %v7620_v42 = vpop.f32.mrf.mxu1 }
 0xceb   :  { %v7787_v31 = vadd.f32 %v7786_v5, %v7618_v34  ;;  %v12294_v5 = vor.u32 %v12746_v27, %v12291_v61 }
 0xcec   :  { %v7955_v45 = vpop.f32.mrf.mxu3  ;;  %v7451_v9 = vpop.f32.mrf.mxu0 }
 0xced   :  { %v14537_v11 = vadd.f32 %v7955_v45, %v7787_v31  ;;  %v7621_v3 = vadd.f32 %v7620_v42, %v7451_v9  ;;  %7659 = vmatmul.bf16.gmra.mxu1 %v16054_v20  ;;  %8618 = vmatpush.bf16.msrb.mxu3 %v12294_v5  ;;  %v12554_v20 = vld [vmem:[#allocation6 + $0x11c] sm:$0xf]  ;;  %v16059_v5 = vld [vmem:[#allocation38_spill] sm:$0xff] }
 0xcef   :  { %16052 = vst [vmem:[#allocation161_spill] sm:$0xff] %v14537_v11  ;;  %7490 = vmatmul.bf16.gmra.mxu0 %v16053_v35  ;;  %7828 = vmatmul.bf16.gmra.mxu2 %v16055_v7  ;;  %v11523_v7 = vld [vmem:[#allocation6 + $0x138] sm:$0xf0] }
 0xcf0   :  { %v12618_v11 = vld [vmem:[#allocation6 + $0x31c] sm:$0xf] }
 0xcf1   :  { %7997 = vmatmul.bf16.gmra.mxu3 %v16056_v13  ;;  %v11526_v13 = vor.u32 %v12554_v20, %v11523_v7  ;;  %v11779_v35 = vld [vmem:[#allocation6 + $0x338] sm:$0xf0] }
 0xcf2   :  { %v7789_v34 = vpop.f32.mrf.mxu2  ;;  %v7622_v45 = vpop.f32.mrf.mxu1  ;;  %v11782_v10 = vor.u32 %v12618_v11, %v11779_v35 }
 0xcf3   :  { %v7790_v23 = vadd.f32 %v7789_v34, %v7621_v3  ;;  %8111 = vmatpush.bf16.msrb.mxu0 %v11526_v13 }
 0xcf4   :  { %v7958_v48 = vpop.f32.mrf.mxu3  ;;  %v7453_v31 = vpop.f32.mrf.mxu0  ;;  %8280 = vmatpush.bf16.msrb.mxu1 %v11782_v10 }
 0xcf5   :  { %v14543_v9 = vadd.f32 %v7958_v48, %v7790_v23  ;;  %v7623_v42 = vadd.f32 %v7622_v45, %v7453_v31  ;;  %v16060_v48 = vld [vmem:[#allocation39_spill] sm:$0xff]  ;;  %v16061_v23 = vld [vmem:[#allocation40_spill] sm:$0xff]  ;;  %v16062_v31 = vld [vmem:[#allocation41_spill] sm:$0xff] }
 0xcf7   :  { %16057 = vst [vmem:[#allocation162_spill] sm:$0xff] %v14543_v9 }
 0xcfa   :  { %v7791_v63 = vpop.f32.mrf.mxu2  ;;  %v7625_v61 = vpop.f32.mrf.mxu1 }
 0xcfb   :  { %v7792_v17 = vadd.f32 %v7791_v63, %v7623_v42 }
 0xcfc   :  { %v7960_v27 = vpop.f32.mrf.mxu3  ;;  %v7456_v3 = vpop.f32.mrf.mxu0 }
 0xcfd   :  { %v14545_v34 = vadd.f32 %v7960_v27, %v7792_v17  ;;  %v7626_v14 = vadd.f32 %v7625_v61, %v7456_v3  ;;  %7664 = vmatmul.bf16.gmra.mxu1 %v16060_v48 }
 0xcff   :  { %16058 = vst [vmem:[#allocation163_spill] sm:$0xff] %v14545_v34  ;;  %7495 = vmatmul.bf16.gmra.mxu0 %v16059_v5  ;;  %7833 = vmatmul.bf16.gmra.mxu2 %v16061_v23  ;;  %v16065_v34 = vld [vmem:[#allocation44_spill] sm:$0xff]  ;;  %v16066_v23 = vld [vmem:[#allocation45_spill] sm:$0xff] }
 0xd01   :  { %8002 = vmatmul.bf16.gmra.mxu3 %v16062_v31  ;;  %v16067_v31 = vld [vmem:[#allocation46_spill] sm:$0xff] }
 0xd02   :  { %v7794_v7 = vpop.f32.mrf.mxu2  ;;  %v7627_v20 = vpop.f32.mrf.mxu1 }
 0xd03   :  { %v7795_v11 = vadd.f32 %v7794_v7, %v7626_v14  ;;  %v16068_v14 = vld [vmem:[#allocation47_spill] sm:$0xff] }
 0xd04   :  { %v7963_v35 = vpop.f32.mrf.mxu3  ;;  %v7458_v10 = vpop.f32.mrf.mxu0 }
 0xd05   :  { %v14551_v13 = vadd.f32 %v7963_v35, %v7795_v11  ;;  %v7628_v45 = vadd.f32 %v7627_v20, %v7458_v10 }
 0xd07   :  { %16063 = vst [vmem:[#allocation164_spill] sm:$0xff] %v14551_v13 }
 0xd0a   :  { %v7796_v42 = vpop.f32.mrf.mxu2  ;;  %v7630_v3 = vpop.f32.mrf.mxu1 }
 0xd0b   :  { %v7797_v63 = vadd.f32 %v7796_v42, %v7628_v45 }
 0xd0c   :  { %v7965_v17 = vpop.f32.mrf.mxu3  ;;  %v7461_v27 = vpop.f32.mrf.mxu0 }
 0xd0d   :  { %v14553_v61 = vadd.f32 %v7965_v17, %v7797_v63  ;;  %v7631_v48 = vadd.f32 %v7630_v3, %v7461_v27  ;;  %7669 = vmatmul.bf16.gmra.mxu1 %v16066_v23 }
 0xd0f   :  { %16064 = vst [vmem:[#allocation31_spill] sm:$0xff] %v14553_v61  ;;  %7500 = vmatmul.bf16.gmra.mxu0 %v16065_v34  ;;  %7838 = vmatmul.bf16.gmra.mxu2 %v16067_v31  ;;  %v16071_v34 = vld [vmem:[#allocation50_spill] sm:$0xff]  ;;  %v16072_v31 = vld [vmem:[#allocation51_spill] sm:$0xff] }
 0xd11   :  { %8007 = vmatmul.bf16.gmra.mxu3 %v16068_v14  ;;  %v16073_v14 = vld [vmem:[#allocation52_spill] sm:$0xff] }
 0xd12   :  { %v7799_v7 = vpop.f32.mrf.mxu2  ;;  %v7632_v20 = vpop.f32.mrf.mxu1 }
 0xd13   :  { %v7800_v11 = vadd.f32 %v7799_v7, %v7631_v48  ;;  %v16074_v48 = vld [vmem:[#allocation53_spill] sm:$0xff] }
 0xd14   :  { %v7968_v35 = vpop.f32.mrf.mxu3  ;;  %v7463_v10 = vpop.f32.mrf.mxu0 }
 0xd15   :  { %v14559_v45 = vadd.f32 %v7968_v35, %v7800_v11  ;;  %v7633_v42 = vadd.f32 %v7632_v20, %v7463_v10 }
 0xd17   :  { %16069 = vst [vmem:[#allocation36_spill] sm:$0xff] %v14559_v45 }
 0xd1a   :  { %v7801_v13 = vpop.f32.mrf.mxu2  ;;  %v7635_v3 = vpop.f32.mrf.mxu1 }
 0xd1b   :  { %v7802_v63 = vadd.f32 %v7801_v13, %v7633_v42 }
 0xd1c   :  { %v7970_v17 = vpop.f32.mrf.mxu3  ;;  %v7466_v27 = vpop.f32.mrf.mxu0 }
 0xd1d   :  { %v14561_v61 = vadd.f32 %v7970_v17, %v7802_v63  ;;  %v7636_v23 = vadd.f32 %v7635_v3, %v7466_v27  ;;  %7674 = vmatmul.bf16.gmra.mxu1 %v16072_v31 }
 0xd1f   :  { %16070 = vst [vmem:[#allocation37_spill] sm:$0xff] %v14561_v61  ;;  %7505 = vmatmul.bf16.gmra.mxu0 %v16071_v34  ;;  %7843 = vmatmul.bf16.gmra.mxu2 %v16073_v14  ;;  %v16077_v34 = vld [vmem:[#allocation56_spill] sm:$0xff]  ;;  %v16078_v14 = vld [vmem:[#allocation57_spill] sm:$0xff] }
 0xd21   :  { %8012 = vmatmul.bf16.gmra.mxu3 %v16074_v48  ;;  %v16079_v48 = vld [vmem:[#allocation58_spill] sm:$0xff] }
 0xd22   :  { %v7804_v7 = vpop.f32.mrf.mxu2  ;;  %v7637_v20 = vpop.f32.mrf.mxu1 }
 0xd23   :  { %v7805_v11 = vadd.f32 %v7804_v7, %v7636_v23  ;;  %v16080_v23 = vld [vmem:[#allocation59_spill] sm:$0xff] }
 0xd24   :  { %v7973_v35 = vpop.f32.mrf.mxu3  ;;  %v7468_v10 = vpop.f32.mrf.mxu0  ;;  %v12674_v7 = vld [vmem:[#allocation6 + $0x4dc] sm:$0xf] }
 0xd25   :  { %v14567_v13 = vadd.f32 %v7973_v35, %v7805_v11  ;;  %v7638_v42 = vadd.f32 %v7637_v20, %v7468_v10  ;;  %v12003_v11 = vld [vmem:[#allocation6 + $0x4f8] sm:$0xf0] }
 0xd26   :  { %v12738_v35 = vld [vmem:[#allocation6 + $0x6dc] sm:$0xf]  ;;  %v12006_v10 = vor.u32 %v12674_v7, %v12003_v11 }
 0xd27   :  { %16075 = vst [vmem:[#allocation42_spill] sm:$0xff] %v14567_v13  ;;  %v12259_v20 = vld [vmem:[#allocation6 + $0x6f8] sm:$0xf0] }
 0xd28   :  { %8450 = vmatpush.bf16.msrb.mxu2 %v12006_v10 }
 0xd2a   :  { %v7806_v45 = vpop.f32.mrf.mxu2  ;;  %v7640_v3 = vpop.f32.mrf.mxu1 }
 0xd2b   :  { %v7807_v63 = vadd.f32 %v7806_v45, %v7638_v42  ;;  %v12262_v42 = vor.u32 %v12738_v35, %v12259_v20 }
 0xd2c   :  { %v7975_v17 = vpop.f32.mrf.mxu3  ;;  %v7471_v27 = vpop.f32.mrf.mxu0 }
 0xd2d   :  { %v14569_v61 = vadd.f32 %v7975_v17, %v7807_v63  ;;  %v7641_v31 = vadd.f32 %v7640_v3, %v7471_v27  ;;  %7679 = vmatmul.bf16.gmra.mxu1 %v16078_v14  ;;  %8619 = vmatpush.bf16.msrb.mxu3 %v12262_v42  ;;  %v12546_v14 = vld [vmem:[#allocation6 + $0xdc] sm:$0xf]  ;;  %v16083_v42 = vld [vmem:[#allocation62_spill] sm:$0xff] }
 0xd2f   :  { %16076 = vst [vmem:[#allocation43_spill] sm:$0xff] %v14569_v61  ;;  %7510 = vmatmul.bf16.gmra.mxu0 %v16077_v34  ;;  %7848 = vmatmul.bf16.gmra.mxu2 %v16079_v48  ;;  %v11491_v48 = vld [vmem:[#allocation6 + $0xf8] sm:$0xf0] }
 0xd30   :  { %v12610_v61 = vld [vmem:[#allocation6 + $0x2dc] sm:$0xf] }
 0xd31   :  { %8017 = vmatmul.bf16.gmra.mxu3 %v16080_v23  ;;  %v11494_v23 = vor.u32 %v12546_v14, %v11491_v48  ;;  %v11747_v34 = vld [vmem:[#allocation6 + $0x2f8] sm:$0xf0] }
 0xd32   :  { %v7809_v45 = vpop.f32.mrf.mxu2  ;;  %v7642_v17 = vpop.f32.mrf.mxu1  ;;  %v11750_v9 = vor.u32 %v12610_v61, %v11747_v34 }
 0xd33   :  { %v7810_v13 = vadd.f32 %v7809_v45, %v7641_v31  ;;  %8112 = vmatpush.bf16.msrb.mxu0 %v11494_v23 }
 0xd34   :  { %v7978_v5 = vpop.f32.mrf.mxu3  ;;  %v7473_v63 = vpop.f32.mrf.mxu0  ;;  %8281 = vmatpush.bf16.msrb.mxu1 %v11750_v9 }
 0xd35   :  { %v14575_v27 = vadd.f32 %v7978_v5, %v7810_v13  ;;  %v7643_v3 = vadd.f32 %v7642_v17, %v7473_v63  ;;  %v16084_v5 = vld [vmem:[#allocation63_spill] sm:$0xff]  ;;  %v16085_v13 = vld [vmem:[#allocation64_spill] sm:$0xff]  ;;  %v16086_v63 = vld [vmem:[#allocation65_spill] sm:$0xff] }
 0xd37   :  { %16081 = vst [vmem:[#allocation48_spill] sm:$0xff] %v14575_v27 }
 0xd3a   :  { %v7811_v7 = vpop.f32.mrf.mxu2  ;;  %v7645_v20 = vpop.f32.mrf.mxu1 }
 0xd3b   :  { %v7812_v11 = vadd.f32 %v7811_v7, %v7643_v3 }
 0xd3c   :  { %v7980_v35 = vpop.f32.mrf.mxu3  ;;  %v7476_v31 = vpop.f32.mrf.mxu0 }
 0xd3d   :  { %v14577_v45 = vadd.f32 %v7980_v35, %v7812_v11  ;;  %v7646_v10 = vadd.f32 %v7645_v20, %v7476_v31  ;;  %7684 = vmatmul.bf16.gmra.mxu1 %v16084_v5 }
 0xd3f   :  { %16082 = vst [vmem:[#allocation49_spill] sm:$0xff] %v14577_v45  ;;  %7515 = vmatmul.bf16.gmra.mxu0 %v16083_v42  ;;  %7853 = vmatmul.bf16.gmra.mxu2 %v16085_v13  ;;  %v16089_v45 = vld [vmem:[#allocation68_spill] sm:$0xff]  ;;  %v16090_v13 = vld [vmem:[#allocation69_spill] sm:$0xff] }
 0xd41   :  { %8022 = vmatmul.bf16.gmra.mxu3 %v16086_v63  ;;  %v16091_v63 = vld [vmem:[#allocation70_spill] sm:$0xff] }
 0xd42   :  { %v7814_v14 = vpop.f32.mrf.mxu2  ;;  %v7647_v48 = vpop.f32.mrf.mxu1 }
 0xd43   :  { %v7815_v34 = vadd.f32 %v7814_v14, %v7646_v10  ;;  %v16092_v10 = vld [vmem:[#allocation71_spill] sm:$0xff] }
 0xd44   :  { %v7983_v61 = vpop.f32.mrf.mxu3  ;;  %v7478_v9 = vpop.f32.mrf.mxu0 }
 0xd45   :  { %v14583_v23 = vadd.f32 %v7983_v61, %v7815_v34  ;;  %v7648_v17 = vadd.f32 %v7647_v48, %v7478_v9 }
 0xd47   :  { %16087 = vst [vmem:[#allocation54_spill] sm:$0xff] %v14583_v23 }
 0xd4a   :  { %v7816_v3 = vpop.f32.mrf.mxu2  ;;  %v7650_v31 = vpop.f32.mrf.mxu1 }
 0xd4b   :  { %v7817_v7 = vadd.f32 %v7816_v3, %v7648_v17 }
 0xd4c   :  { %v7985_v11 = vpop.f32.mrf.mxu3  ;;  %v7481_v35 = vpop.f32.mrf.mxu0 }
 0xd4d   :  { %v14585_v20 = vadd.f32 %v7985_v11, %v7817_v7  ;;  %v7651_v5 = vadd.f32 %v7650_v31, %v7481_v35  ;;  %7689 = vmatmul.bf16.gmra.mxu1 %v16090_v13 }
 0xd4f   :  { %16088 = vst [vmem:[#allocation55_spill] sm:$0xff] %v14585_v20  ;;  %7520 = vmatmul.bf16.gmra.mxu0 %v16089_v45  ;;  %7858 = vmatmul.bf16.gmra.mxu2 %v16091_v63  ;;  %v16095_v45 = vld [vmem:[#allocation74_spill] sm:$0xff]  ;;  %v16096_v63 = vld [vmem:[#allocation75_spill] sm:$0xff] }
 0xd51   :  { %8027 = vmatmul.bf16.gmra.mxu3 %v16092_v10  ;;  %v16097_v10 = vld [vmem:[#allocation76_spill] sm:$0xff] }
 0xd52   :  { %v7819_v14 = vpop.f32.mrf.mxu2  ;;  %v7652_v48 = vpop.f32.mrf.mxu1 }
 0xd53   :  { %v7820_v34 = vadd.f32 %v7819_v14, %v7651_v5  ;;  %v16098_v5 = vld [vmem:[#allocation77_spill] sm:$0xff] }
 0xd54   :  { %v7988_v61 = vpop.f32.mrf.mxu3  ;;  %v7483_v9 = vpop.f32.mrf.mxu0 }
 0xd55   :  { %v14591_v17 = vadd.f32 %v7988_v61, %v7820_v34  ;;  %v7653_v3 = vadd.f32 %v7652_v48, %v7483_v9 }
 0xd57   :  { %16093 = vst [vmem:[#allocation60_spill] sm:$0xff] %v14591_v17 }
 0xd5a   :  { %v7821_v23 = vpop.f32.mrf.mxu2  ;;  %v7655_v31 = vpop.f32.mrf.mxu1 }
 0xd5b   :  { %v7822_v7 = vadd.f32 %v7821_v23, %v7653_v3 }
 0xd5c   :  { %v7990_v11 = vpop.f32.mrf.mxu3  ;;  %v7486_v35 = vpop.f32.mrf.mxu0 }
 0xd5d   :  { %v14593_v20 = vadd.f32 %v7990_v11, %v7822_v7  ;;  %v7656_v13 = vadd.f32 %v7655_v31, %v7486_v35  ;;  %7694 = vmatmul.bf16.gmra.mxu1 %v16096_v63 }
 0xd5f   :  { %16094 = vst [vmem:[#allocation61_spill] sm:$0xff] %v14593_v20  ;;  %7525 = vmatmul.bf16.gmra.mxu0 %v16095_v45  ;;  %7863 = vmatmul.bf16.gmra.mxu2 %v16097_v10  ;;  %v16101_v45 = vld [vmem:[#allocation80_spill] sm:$0xff]  ;;  %v16102_v10 = vld [vmem:[#allocation81_spill] sm:$0xff] }
 0xd61   :  { %8032 = vmatmul.bf16.gmra.mxu3 %v16098_v5  ;;  %v16103_v5 = vld [vmem:[#allocation82_spill] sm:$0xff] }
 0xd62   :  { %v7824_v14 = vpop.f32.mrf.mxu2  ;;  %v7657_v48 = vpop.f32.mrf.mxu1 }
 0xd63   :  { %v7825_v34 = vadd.f32 %v7824_v14, %v7656_v13  ;;  %v16104_v13 = vld [vmem:[#allocation83_spill] sm:$0xff] }
 0xd64   :  { %v7993_v61 = vpop.f32.mrf.mxu3  ;;  %v7488_v9 = vpop.f32.mrf.mxu0  ;;  %v12666_v14 = vld [vmem:[#allocation6 + $0x49c] sm:$0xf] }
 0xd65   :  { %v14599_v23 = vadd.f32 %v7993_v61, %v7825_v34  ;;  %v7658_v3 = vadd.f32 %v7657_v48, %v7488_v9  ;;  %v11971_v34 = vld [vmem:[#allocation6 + $0x4b8] sm:$0xf0] }
 0xd66   :  { %v12730_v61 = vld [vmem:[#allocation6 + $0x69c] sm:$0xf]  ;;  %v11974_v9 = vor.u32 %v12666_v14, %v11971_v34 }
 0xd67   :  { %16099 = vst [vmem:[#allocation66_spill] sm:$0xff] %v14599_v23  ;;  %v12227_v48 = vld [vmem:[#allocation6 + $0x6b8] sm:$0xf0] }
 0xd68   :  { %8451 = vmatpush.bf16.msrb.mxu2 %v11974_v9 }
 0xd6a   :  { %v7826_v17 = vpop.f32.mrf.mxu2  ;;  %v7660_v31 = vpop.f32.mrf.mxu1 }
 0xd6b   :  { %v7827_v7 = vadd.f32 %v7826_v17, %v7658_v3  ;;  %v12230_v3 = vor.u32 %v12730_v61, %v12227_v48 }
 0xd6c   :  { %v7995_v11 = vpop.f32.mrf.mxu3  ;;  %v7491_v35 = vpop.f32.mrf.mxu0 }
 0xd6d   :  { %v14601_v20 = vadd.f32 %v7995_v11, %v7827_v7  ;;  %v7661_v63 = vadd.f32 %v7660_v31, %v7491_v35  ;;  %7699 = vmatmul.bf16.gmra.mxu1 %v16102_v10  ;;  %8620 = vmatpush.bf16.msrb.mxu3 %v12230_v3  ;;  %v12538_v10 = vld [vmem:[#allocation6 + $0x9c] sm:$0xf]  ;;  %v16107_v3 = vld [vmem:[#allocation86_spill] sm:$0xff] }
 0xd6f   :  { %16100 = vst [vmem:[#allocation67_spill] sm:$0xff] %v14601_v20  ;;  %7530 = vmatmul.bf16.gmra.mxu0 %v16101_v45  ;;  %7868 = vmatmul.bf16.gmra.mxu2 %v16103_v5  ;;  %v11459_v5 = vld [vmem:[#allocation6 + $0xb8] sm:$0xf0] }
 0xd70   :  { %v12602_v20 = vld [vmem:[#allocation6 + $0x29c] sm:$0xf] }
 0xd71   :  { %8037 = vmatmul.bf16.gmra.mxu3 %v16104_v13  ;;  %v11462_v13 = vor.u32 %v12538_v10, %v11459_v5  ;;  %v11715_v45 = vld [vmem:[#allocation6 + $0x2b8] sm:$0xf0] }
 0xd72   :  { %v7829_v17 = vpop.f32.mrf.mxu2  ;;  %v7662_v11 = vpop.f32.mrf.mxu1  ;;  %v11718_v27 = vor.u32 %v12602_v20, %v11715_v45 }
 0xd73   :  { %v7830_v23 = vadd.f32 %v7829_v17, %v7661_v63  ;;  %8113 = vmatpush.bf16.msrb.mxu0 %v11462_v13 }
 0xd74   :  { %v7998_v42 = vpop.f32.mrf.mxu3  ;;  %v7493_v7 = vpop.f32.mrf.mxu0  ;;  %8282 = vmatpush.bf16.msrb.mxu1 %v11718_v27 }
 0xd75   :  { %v14607_v35 = vadd.f32 %v7998_v42, %v7830_v23  ;;  %v7663_v31 = vadd.f32 %v7662_v11, %v7493_v7  ;;  %v16108_v42 = vld [vmem:[#allocation87_spill] sm:$0xff]  ;;  %v16109_v23 = vld [vmem:[#allocation88_spill] sm:$0xff]  ;;  %v16110_v7 = vld [vmem:[#allocation89_spill] sm:$0xff] }
 0xd77   :  { %16105 = vst [vmem:[#allocation72_spill] sm:$0xff] %v14607_v35 }
 0xd7a   :  { %v7831_v14 = vpop.f32.mrf.mxu2  ;;  %v7665_v48 = vpop.f32.mrf.mxu1 }
 0xd7b   :  { %v7832_v34 = vadd.f32 %v7831_v14, %v7663_v31 }
 0xd7c   :  { %v8000_v61 = vpop.f32.mrf.mxu3  ;;  %v7496_v63 = vpop.f32.mrf.mxu0 }
 0xd7d   :  { %v14609_v17 = vadd.f32 %v8000_v61, %v7832_v34  ;;  %v7666_v9 = vadd.f32 %v7665_v48, %v7496_v63  ;;  %7704 = vmatmul.bf16.gmra.mxu1 %v16108_v42 }
 0xd7f   :  { %16106 = vst [vmem:[#allocation73_spill] sm:$0xff] %v14609_v17  ;;  %7535 = vmatmul.bf16.gmra.mxu0 %v16107_v3  ;;  %7873 = vmatmul.bf16.gmra.mxu2 %v16109_v23  ;;  %v16113_v17 = vld [vmem:[#allocation92_spill] sm:$0xff]  ;;  %v16114_v23 = vld [vmem:[#allocation93_spill] sm:$0xff] }
 0xd81   :  { %8042 = vmatmul.bf16.gmra.mxu3 %v16110_v7  ;;  %v16115_v7 = vld [vmem:[#allocation94_spill] sm:$0xff] }
 0xd82   :  { %v7834_v10 = vpop.f32.mrf.mxu2  ;;  %v7667_v5 = vpop.f32.mrf.mxu1 }
 0xd83   :  { %v7835_v45 = vadd.f32 %v7834_v10, %v7666_v9  ;;  %v16116_v9 = vld [vmem:[#allocation95_spill] sm:$0xff] }
 0xd84   :  { %v8003_v20 = vpop.f32.mrf.mxu3  ;;  %v7498_v27 = vpop.f32.mrf.mxu0 }
 0xd85   :  { %v14615_v13 = vadd.f32 %v8003_v20, %v7835_v45  ;;  %v7668_v11 = vadd.f32 %v7667_v5, %v7498_v27 }
 0xd87   :  { %16111 = vst [vmem:[#allocation78_spill] sm:$0xff] %v14615_v13 }
 0xd8a   :  { %v7836_v31 = vpop.f32.mrf.mxu2  ;;  %v7670_v63 = vpop.f32.mrf.mxu1 }
 0xd8b   :  { %v7837_v14 = vadd.f32 %v7836_v31, %v7668_v11 }
 0xd8c   :  { %v8005_v34 = vpop.f32.mrf.mxu3  ;;  %v7501_v61 = vpop.f32.mrf.mxu0 }
 0xd8d   :  { %v14617_v48 = vadd.f32 %v8005_v34, %v7837_v14  ;;  %v7671_v42 = vadd.f32 %v7670_v63, %v7501_v61  ;;  %7709 = vmatmul.bf16.gmra.mxu1 %v16114_v23 }
 0xd8f   :  { %16112 = vst [vmem:[#allocation79_spill] sm:$0xff] %v14617_v48  ;;  %7540 = vmatmul.bf16.gmra.mxu0 %v16113_v17  ;;  %7878 = vmatmul.bf16.gmra.mxu2 %v16115_v7  ;;  %v16119_v17 = vld [vmem:[#allocation98_spill] sm:$0xff]  ;;  %v16120_v7 = vld [vmem:[#allocation99_spill] sm:$0xff] }
 0xd91   :  { %8047 = vmatmul.bf16.gmra.mxu3 %v16116_v9  ;;  %v16121_v9 = vld [vmem:[#allocation100_spill] sm:$0xff] }
 0xd92   :  { %v7839_v10 = vpop.f32.mrf.mxu2  ;;  %v7672_v5 = vpop.f32.mrf.mxu1 }
 0xd93   :  { %v7840_v45 = vadd.f32 %v7839_v10, %v7671_v42  ;;  %v16122_v42 = vld [vmem:[#allocation101_spill] sm:$0xff] }
 0xd94   :  { %v8008_v20 = vpop.f32.mrf.mxu3  ;;  %v7503_v27 = vpop.f32.mrf.mxu0 }
 0xd95   :  { %v14623_v11 = vadd.f32 %v8008_v20, %v7840_v45  ;;  %v7673_v31 = vadd.f32 %v7672_v5, %v7503_v27 }
 0xd97   :  { %16117 = vst [vmem:[#allocation84_spill] sm:$0xff] %v14623_v11 }
 0xd9a   :  { %v7841_v13 = vpop.f32.mrf.mxu2  ;;  %v7675_v63 = vpop.f32.mrf.mxu1 }
 0xd9b   :  { %v7842_v14 = vadd.f32 %v7841_v13, %v7673_v31 }
 0xd9c   :  { %v8010_v34 = vpop.f32.mrf.mxu3  ;;  %v7506_v61 = vpop.f32.mrf.mxu0 }
 0xd9d   :  { %v14625_v48 = vadd.f32 %v8010_v34, %v7842_v14  ;;  %v7676_v23 = vadd.f32 %v7675_v63, %v7506_v61  ;;  %7714 = vmatmul.bf16.gmra.mxu1 %v16120_v7 }
 0xd9f   :  { %16118 = vst [vmem:[#allocation85_spill] sm:$0xff] %v14625_v48  ;;  %7545 = vmatmul.bf16.gmra.mxu0 %v16119_v17  ;;  %7883 = vmatmul.bf16.gmra.mxu2 %v16121_v9  ;;  %v16125_v17 = vld [vmem:[#allocation104_spill] sm:$0xff]  ;;  %v16126_v9 = vld [vmem:[#allocation105_spill] sm:$0xff] }
 0xda1   :  { %8052 = vmatmul.bf16.gmra.mxu3 %v16122_v42  ;;  %v16127_v42 = vld [vmem:[#allocation106_spill] sm:$0xff] }
 0xda2   :  { %v7844_v10 = vpop.f32.mrf.mxu2  ;;  %v7677_v5 = vpop.f32.mrf.mxu1 }
 0xda3   :  { %v7845_v45 = vadd.f32 %v7844_v10, %v7676_v23  ;;  %v16128_v23 = vld [vmem:[#allocation107_spill] sm:$0xff] }
 0xda4   :  { %v8013_v20 = vpop.f32.mrf.mxu3  ;;  %v7508_v27 = vpop.f32.mrf.mxu0  ;;  %v12658_v10 = vld [vmem:[#allocation6 + $0x45c] sm:$0xf] }
 0xda5   :  { %v14631_v13 = vadd.f32 %v8013_v20, %v7845_v45  ;;  %v7678_v31 = vadd.f32 %v7677_v5, %v7508_v27  ;;  %v11939_v45 = vld [vmem:[#allocation6 + $0x478] sm:$0xf0] }
 0xda6   :  { %v12722_v20 = vld [vmem:[#allocation6 + $0x65c] sm:$0xf]  ;;  %v11942_v27 = vor.u32 %v12658_v10, %v11939_v45 }
 0xda7   :  { %16123 = vst [vmem:[#allocation90_spill] sm:$0xff] %v14631_v13  ;;  %v12195_v5 = vld [vmem:[#allocation6 + $0x678] sm:$0xf0] }
 0xda8   :  { %8452 = vmatpush.bf16.msrb.mxu2 %v11942_v27 }
 0xdaa   :  { %v7846_v11 = vpop.f32.mrf.mxu2  ;;  %v7680_v63 = vpop.f32.mrf.mxu1 }
 0xdab   :  { %v7847_v14 = vadd.f32 %v7846_v11, %v7678_v31  ;;  %v12198_v31 = vor.u32 %v12722_v20, %v12195_v5 }
 0xdac   :  { %v8015_v34 = vpop.f32.mrf.mxu3  ;;  %v7511_v61 = vpop.f32.mrf.mxu0 }
 0xdad   :  { %v14633_v48 = vadd.f32 %v8015_v34, %v7847_v14  ;;  %v7681_v7 = vadd.f32 %v7680_v63, %v7511_v61  ;;  %7719 = vmatmul.bf16.gmra.mxu1 %v16126_v9  ;;  %8621 = vmatpush.bf16.msrb.mxu3 %v12198_v31  ;;  %v12530_v9 = vld [vmem:[#allocation6 + $0x5c] sm:$0xf]  ;;  %v16132_v31 = vld [vmem:[#allocation113_spill] sm:$0xff] }
 0xdaf   :  { %16124 = vst [vmem:[#allocation91_spill] sm:$0xff] %v14633_v48  ;;  %7550 = vmatmul.bf16.gmra.mxu0 %v16125_v17  ;;  %7888 = vmatmul.bf16.gmra.mxu2 %v16127_v42  ;;  %v11427_v42 = vld [vmem:[#allocation6 + $0x78] sm:$0xf0] }
 0xdb0   :  { %v12594_v48 = vld [vmem:[#allocation6 + $0x25c] sm:$0xf] }
 0xdb1   :  { %8057 = vmatmul.bf16.gmra.mxu3 %v16128_v23  ;;  %v11430_v23 = vor.u32 %v12530_v9, %v11427_v42  ;;  %v11683_v17 = vld [vmem:[#allocation6 + $0x278] sm:$0xf0] }
 0xdb2   :  { %v7849_v11 = vpop.f32.mrf.mxu2  ;;  %v7682_v34 = vpop.f32.mrf.mxu1  ;;  %v11686_v35 = vor.u32 %v12594_v48, %v11683_v17 }
 0xdb3   :  { %v7850_v13 = vadd.f32 %v7849_v11, %v7681_v7  ;;  %8114 = vmatpush.bf16.msrb.mxu0 %v11430_v23 }
 0xdb4   :  { %v8018_v3 = vpop.f32.mrf.mxu3  ;;  %v7513_v14 = vpop.f32.mrf.mxu0  ;;  %8283 = vmatpush.bf16.msrb.mxu1 %v11686_v35 }
 0xdb5   :  { %v14639_v61 = vadd.f32 %v8018_v3, %v7850_v13  ;;  %v7683_v63 = vadd.f32 %v7682_v34, %v7513_v14  ;;  %v16130_v3 = vld [vmem:[#allocation111_spill] sm:$0xff]  ;;  %v16131_v13 = vld [vmem:[#allocation112_spill] sm:$0xff] }
 0xdba   :  { %v7851_v10 = vpop.f32.mrf.mxu2  ;;  %v7685_v5 = vpop.f32.mrf.mxu1 }
 0xdbb   :  { %v7852_v45 = vadd.f32 %v7851_v10, %v7683_v63 }
 0xdbc   :  { %v8020_v20 = vpop.f32.mrf.mxu3  ;;  %v7516_v7 = vpop.f32.mrf.mxu0 }
 0xdbd   :  { %v14641_v11 = vadd.f32 %v8020_v20, %v7852_v45  ;;  %v7686_v27 = vadd.f32 %v7685_v5, %v7516_v7  ;;  %7724 = vmatmul.bf16.gmra.mxu1 %v16130_v3  ;;  %v16135_v3 = vld [vmem:[#allocation116_spill] sm:$0xff] }
 0xdbf   :  { %16129 = vst [vmem:[#allocation96_spill] sm:$0xff] %v14641_v11  ;;  %7555 = vmatmul.bf16.gmra.mxu0 %v15981_v12  ;;  %7893 = vmatmul.bf16.gmra.mxu2 %v16131_v13  ;;  %v16136_v13 = vld [vmem:[#allocation117_spill] sm:$0xff] }
 0xdc1   :  { %8062 = vmatmul.bf16.gmra.mxu3 %v16132_v31  ;;  %v16137_v31 = vld [vmem:[#allocation118_spill] sm:$0xff] }
 0xdc2   :  { %v7854_v9 = vpop.f32.mrf.mxu2  ;;  %v7687_v42 = vpop.f32.mrf.mxu1 }
 0xdc3   :  { %v7855_v17 = vadd.f32 %v7854_v9, %v7686_v27  ;;  %v16138_v27 = vld [vmem:[#allocation119_spill] sm:$0xff] }
 0xdc4   :  { %v8023_v48 = vpop.f32.mrf.mxu3  ;;  %v7518_v35 = vpop.f32.mrf.mxu0 }
 0xdc5   :  { %v14647_v23 = vadd.f32 %v8023_v48, %v7855_v17  ;;  %v7688_v14 = vadd.f32 %v7687_v42, %v7518_v35 }
 0xdc7   :  { %16133 = vst [vmem:[#allocation97_spill] sm:$0xff] %v14647_v23 }
 0xdca   :  { %v7856_v34 = vpop.f32.mrf.mxu2  ;;  %v7690_v20 = vpop.f32.mrf.mxu1 }
 0xdcb   :  { %v7857_v63 = vadd.f32 %v7856_v34, %v7688_v14 }
 0xdcc   :  { %v8025_v10 = vpop.f32.mrf.mxu3  ;;  %v7521_v45 = vpop.f32.mrf.mxu0 }
 0xdcd   :  { %v14649_v7 = vadd.f32 %v8025_v10, %v7857_v63  ;;  %v7691_v5 = vadd.f32 %v7690_v20, %v7521_v45  ;;  %7729 = vmatmul.bf16.gmra.mxu1 %v16136_v13 }
 0xdcf   :  { %16134 = vst [vmem:[#allocation102_spill] sm:$0xff] %v14649_v7  ;;  %7560 = vmatmul.bf16.gmra.mxu0 %v16135_v3  ;;  %7898 = vmatmul.bf16.gmra.mxu2 %v16137_v31  ;;  %v16141_v3 = vld [vmem:[#allocation122_spill] sm:$0xff]  ;;  %v16142_v31 = vld [vmem:[#allocation123_spill] sm:$0xff] }
 0xdd1   :  { %8067 = vmatmul.bf16.gmra.mxu3 %v16138_v27  ;;  %v16143_v27 = vld [vmem:[#allocation124_spill] sm:$0xff] }
 0xdd2   :  { %v7859_v9 = vpop.f32.mrf.mxu2  ;;  %v7692_v42 = vpop.f32.mrf.mxu1 }
 0xdd3   :  { %v7860_v17 = vadd.f32 %v7859_v9, %v7691_v5  ;;  %v16144_v5 = vld [vmem:[#allocation125_spill] sm:$0xff] }
 0xdd4   :  { %v8028_v48 = vpop.f32.mrf.mxu3  ;;  %v7523_v35 = vpop.f32.mrf.mxu0 }
 0xdd5   :  { %v14655_v14 = vadd.f32 %v8028_v48, %v7860_v17  ;;  %v7693_v34 = vadd.f32 %v7692_v42, %v7523_v35 }
 0xdd7   :  { %16139 = vst [vmem:[#allocation103_spill] sm:$0xff] %v14655_v14 }
 0xdda   :  { %v7861_v23 = vpop.f32.mrf.mxu2  ;;  %v7695_v20 = vpop.f32.mrf.mxu1 }
 0xddb   :  { %v7862_v63 = vadd.f32 %v7861_v23, %v7693_v34 }
 0xddc   :  { %v8030_v10 = vpop.f32.mrf.mxu3  ;;  %v7526_v45 = vpop.f32.mrf.mxu0 }
 0xddd   :  { %v14657_v7 = vadd.f32 %v8030_v10, %v7862_v63  ;;  %v7696_v13 = vadd.f32 %v7695_v20, %v7526_v45  ;;  %7734 = vmatmul.bf16.gmra.mxu1 %v16142_v31 }
 0xddf   :  { %16140 = vst [vmem:[#allocation108_spill] sm:$0xff] %v14657_v7  ;;  %7565 = vmatmul.bf16.gmra.mxu0 %v16141_v3  ;;  %7903 = vmatmul.bf16.gmra.mxu2 %v16143_v27  ;;  %v16147_v3 = vld [vmem:[#allocation128_spill] sm:$0xff]  ;;  %v16148_v27 = vld [vmem:[#allocation129_spill] sm:$0xff] }
 0xde1   :  { %8072 = vmatmul.bf16.gmra.mxu3 %v16144_v5  ;;  %v16149_v5 = vld [vmem:[#allocation130_spill] sm:$0xff] }
 0xde2   :  { %v7864_v9 = vpop.f32.mrf.mxu2  ;;  %v7697_v42 = vpop.f32.mrf.mxu1 }
 0xde3   :  { %v7865_v17 = vadd.f32 %v7864_v9, %v7696_v13  ;;  %v16150_v13 = vld [vmem:[#allocation131_spill] sm:$0xff] }
 0xde4   :  { %v8033_v48 = vpop.f32.mrf.mxu3  ;;  %v7528_v35 = vpop.f32.mrf.mxu0  ;;  %v12650_v9 = vld [vmem:[#allocation6 + $0x41c] sm:$0xf] }
 0xde5   :  { %v14663_v23 = vadd.f32 %v8033_v48, %v7865_v17  ;;  %v7698_v34 = vadd.f32 %v7697_v42, %v7528_v35  ;;  %v11907_v17 = vld [vmem:[#allocation6 + $0x438] sm:$0xf0] }
 0xde6   :  { %v12714_v48 = vld [vmem:[#allocation6 + $0x61c] sm:$0xf]  ;;  %v11910_v35 = vor.u32 %v12650_v9, %v11907_v17 }
 0xde7   :  { %16145 = vst [vmem:[#allocation109_spill] sm:$0xff] %v14663_v23  ;;  %v12163_v42 = vld [vmem:[#allocation6 + $0x638] sm:$0xf0] }
 0xde8   :  { %8453 = vmatpush.bf16.msrb.mxu2 %v11910_v35 }
 0xdea   :  { %v7866_v14 = vpop.f32.mrf.mxu2  ;;  %v7700_v20 = vpop.f32.mrf.mxu1 }
 0xdeb   :  { %v7867_v63 = vadd.f32 %v7866_v14, %v7698_v34  ;;  %v12166_v34 = vor.u32 %v12714_v48, %v12163_v42 }
 0xdec   :  { %v8035_v10 = vpop.f32.mrf.mxu3  ;;  %v7531_v45 = vpop.f32.mrf.mxu0 }
 0xded   :  { %v14665_v7 = vadd.f32 %v8035_v10, %v7867_v63  ;;  %v7701_v31 = vadd.f32 %v7700_v20, %v7531_v45  ;;  %7739 = vmatmul.bf16.gmra.mxu1 %v16148_v27  ;;  %8622 = vmatpush.bf16.msrb.mxu3 %v12166_v34  ;;  %v12522_v27 = vld [vmem:[#allocation6 + $0x1c] sm:$0xf]  ;;  %v16153_v34 = vld [vmem:[#allocation137_spill] sm:$0xff] }
 0xdef   :  { %16146 = vst [vmem:[#allocation114_spill] sm:$0xff] %v14665_v7  ;;  %7570 = vmatmul.bf16.gmra.mxu0 %v16147_v3  ;;  %7908 = vmatmul.bf16.gmra.mxu2 %v16149_v5  ;;  %v11395_v5 = vld [vmem:[#allocation6 + $0x38] sm:$0xf0] }
 0xdf0   :  { %v12586_v7 = vld [vmem:[#allocation6 + $0x21c] sm:$0xf] }
 0xdf1   :  { %8077 = vmatmul.bf16.gmra.mxu3 %v16150_v13  ;;  %v11398_v13 = vor.u32 %v12522_v27, %v11395_v5  ;;  %v11651_v3 = vld [vmem:[#allocation6 + $0x238] sm:$0xf0] }
 0xdf2   :  { %v7869_v14 = vpop.f32.mrf.mxu2  ;;  %v7702_v10 = vpop.f32.mrf.mxu1  ;;  %v11654_v12 = vor.u32 %v12586_v7, %v11651_v3 }
 0xdf3   :  { %v7870_v23 = vadd.f32 %v7869_v14, %v7701_v31  ;;  %8115 = vmatpush.bf16.msrb.mxu0 %v11398_v13 }
 0xdf4   :  { %v8038_v11 = vpop.f32.mrf.mxu3  ;;  %v7533_v63 = vpop.f32.mrf.mxu0  ;;  %8284 = vmatpush.bf16.msrb.mxu1 %v11654_v12 }
 0xdf5   :  { %v14671_v45 = vadd.f32 %v8038_v11, %v7870_v23  ;;  %v7703_v20 = vadd.f32 %v7702_v10, %v7533_v63  ;;  %v16151_v11 = vld [vmem:[#allocation135_spill] sm:$0xff]  ;;  %v16152_v23 = vld [vmem:[#allocation136_spill] sm:$0xff] }
 0xdfa   :  { %v7871_v9 = vpop.f32.mrf.mxu2  ;;  %v7705_v42 = vpop.f32.mrf.mxu1 }
 0xdfb   :  { %v7872_v17 = vadd.f32 %v7871_v9, %v7703_v20 }
 0xdfc   :  { %v8040_v48 = vpop.f32.mrf.mxu3  ;;  %v7536_v31 = vpop.f32.mrf.mxu0 }
 0xdfd   :  { %v14673_v14 = vadd.f32 %v8040_v48, %v7872_v17  ;;  %v7706_v35 = vadd.f32 %v7705_v42, %v7536_v31  ;;  %7744 = vmatmul.bf16.gmra.mxu1 %v16151_v11  ;;  %v16156_v11 = vld [vmem:[#allocation140_spill] sm:$0xff] }
 0xdff   :  { %7575 = vmatmul.bf16.gmra.mxu0 %v16004_v21  ;;  %7913 = vmatmul.bf16.gmra.mxu2 %v16152_v23  ;;  %v16157_v23 = vld [vmem:[#allocation141_spill] sm:$0xff] }
 0xe01   :  { %8082 = vmatmul.bf16.gmra.mxu3 %v16153_v34  ;;  %v16158_v34 = vld [vmem:[#allocation142_spill] sm:$0xff] }
 0xe02   :  { %v7874_v27 = vpop.f32.mrf.mxu2  ;;  %v7707_v5 = vpop.f32.mrf.mxu1 }
 0xe03   :  { %v7875_v3 = vadd.f32 %v7874_v27, %v7706_v35  ;;  %v16159_v35 = vld [vmem:[#allocation143_spill] sm:$0xff] }
 0xe04   :  { %v8043_v7 = vpop.f32.mrf.mxu3  ;;  %v7538_v12 = vpop.f32.mrf.mxu0 }
 0xe05   :  { %v14679_v13 = vadd.f32 %v8043_v7, %v7875_v3  ;;  %v7708_v63 = vadd.f32 %v7707_v5, %v7538_v12 }
 0xe07   :  { %16154 = vst [vmem:[#allocation115_spill] sm:$0xff] %v14679_v13 }
 0xe0a   :  { %v7876_v10 = vpop.f32.mrf.mxu2  ;;  %v7710_v48 = vpop.f32.mrf.mxu1 }
 0xe0b   :  { %v7877_v20 = vadd.f32 %v7876_v10, %v7708_v63 }
 0xe0c   :  { %v8045_v9 = vpop.f32.mrf.mxu3  ;;  %v7541_v17 = vpop.f32.mrf.mxu0 }
 0xe0d   :  { %v14681_v31 = vadd.f32 %v8045_v9, %v7877_v20  ;;  %v7711_v42 = vadd.f32 %v7710_v48, %v7541_v17  ;;  %7749 = vmatmul.bf16.gmra.mxu1 %v16157_v23 }
 0xe0f   :  { %16155 = vst [vmem:[#allocation120_spill] sm:$0xff] %v14681_v31  ;;  %7580 = vmatmul.bf16.gmra.mxu0 %v16156_v11  ;;  %7918 = vmatmul.bf16.gmra.mxu2 %v16158_v34  ;;  %v16162_v11 = vld [vmem:[#allocation146_spill] sm:$0xff]  ;;  %v16163_v34 = vld [vmem:[#allocation147_spill] sm:$0xff] }
 0xe11   :  { %8087 = vmatmul.bf16.gmra.mxu3 %v16159_v35  ;;  %v16164_v35 = vld [vmem:[#allocation148_spill] sm:$0xff] }
 0xe12   :  { %v7879_v27 = vpop.f32.mrf.mxu2  ;;  %v7712_v5 = vpop.f32.mrf.mxu1 }
 0xe13   :  { %v7880_v3 = vadd.f32 %v7879_v27, %v7711_v42  ;;  %v16165_v42 = vld [vmem:[#allocation149_spill] sm:$0xff] }
 0xe14   :  { %v8048_v7 = vpop.f32.mrf.mxu3  ;;  %v7543_v12 = vpop.f32.mrf.mxu0 }
 0xe15   :  { %v14687_v63 = vadd.f32 %v8048_v7, %v7880_v3  ;;  %v7713_v10 = vadd.f32 %v7712_v5, %v7543_v12 }
 0xe17   :  { %16160 = vst [vmem:[#allocation121_spill] sm:$0xff] %v14687_v63 }
 0xe1a   :  { %v7881_v13 = vpop.f32.mrf.mxu2  ;;  %v7715_v48 = vpop.f32.mrf.mxu1 }
 0xe1b   :  { %v7882_v20 = vadd.f32 %v7881_v13, %v7713_v10 }
 0xe1c   :  { %v8050_v9 = vpop.f32.mrf.mxu3  ;;  %v7546_v17 = vpop.f32.mrf.mxu0 }
 0xe1d   :  { %v14689_v31 = vadd.f32 %v8050_v9, %v7882_v20  ;;  %v7716_v23 = vadd.f32 %v7715_v48, %v7546_v17  ;;  %7754 = vmatmul.bf16.gmra.mxu1 %v16163_v34 }
 0xe1f   :  { %16161 = vst [vmem:[#allocation126_spill] sm:$0xff] %v14689_v31  ;;  %7585 = vmatmul.bf16.gmra.mxu0 %v16162_v11  ;;  %7923 = vmatmul.bf16.gmra.mxu2 %v16164_v35  ;;  %v16168_v11 = vld [vmem:[#allocation152_spill] sm:$0xff]  ;;  %v16169_v35 = vld [vmem:[#allocation153_spill] sm:$0xff] }
 0xe21   :  { %8092 = vmatmul.bf16.gmra.mxu3 %v16165_v42  ;;  %v16170_v42 = vld [vmem:[#allocation154_spill] sm:$0xff] }
 0xe22   :  { %v7884_v27 = vpop.f32.mrf.mxu2  ;;  %v7717_v5 = vpop.f32.mrf.mxu1 }
 0xe23   :  { %v7885_v3 = vadd.f32 %v7884_v27, %v7716_v23  ;;  %v16171_v23 = vld [vmem:[#allocation155_spill] sm:$0xff] }
 0xe24   :  { %v8053_v7 = vpop.f32.mrf.mxu3  ;;  %v7548_v12 = vpop.f32.mrf.mxu0 }
 0xe25   :  { %v14695_v13 = vadd.f32 %v8053_v7, %v7885_v3  ;;  %v7718_v10 = vadd.f32 %v7717_v5, %v7548_v12 }
 0xe27   :  { %16166 = vst [vmem:[#allocation134_spill] sm:$0xff] %v14695_v13 }
 0xe2a   :  { %v7886_v63 = vpop.f32.mrf.mxu2  ;;  %v7720_v48 = vpop.f32.mrf.mxu1 }
 0xe2b   :  { %v7887_v20 = vadd.f32 %v7886_v63, %v7718_v10 }
 0xe2c   :  { %v8055_v9 = vpop.f32.mrf.mxu3  ;;  %v7551_v17 = vpop.f32.mrf.mxu0 }
 0xe2d   :  { %v14697_v31 = vadd.f32 %v8055_v9, %v7887_v20  ;;  %v7721_v34 = vadd.f32 %v7720_v48, %v7551_v17  ;;  %7759 = vmatmul.bf16.gmra.mxu1 %v16169_v35 }
 0xe2f   :  { %16167 = vst [vmem:[#allocation127_spill] sm:$0xff] %v14697_v31  ;;  %7590 = vmatmul.bf16.gmra.mxu0 %v16168_v11  ;;  %7928 = vmatmul.bf16.gmra.mxu2 %v16170_v42 }
 0xe31   :  { %8097 = vmatmul.bf16.gmra.mxu3 %v16171_v23 }
 0xe32   :  { %v7889_v27 = vpop.f32.mrf.mxu2  ;;  %v7722_v5 = vpop.f32.mrf.mxu1 }
 0xe33   :  { %v7890_v3 = vadd.f32 %v7889_v27, %v7721_v34 }
 0xe34   :  { %v8058_v7 = vpop.f32.mrf.mxu3  ;;  %v7553_v12 = vpop.f32.mrf.mxu0 }
 0xe35   :  { %v14703_v63 = vadd.f32 %v8058_v7, %v7890_v3  ;;  %v7723_v10 = vadd.f32 %v7722_v5, %v7553_v12 }
 0xe3a   :  { %v7891_v13 = vpop.f32.mrf.mxu2  ;;  %v7725_v48 = vpop.f32.mrf.mxu1 }
 0xe3b   :  { %v7892_v20 = vadd.f32 %v7891_v13, %v7723_v10 }
 0xe3c   :  { %v8060_v9 = vpop.f32.mrf.mxu3  ;;  %v7556_v17 = vpop.f32.mrf.mxu0 }
 0xe3d   :  { %v14705_v31 = vadd.f32 %v8060_v9, %v7892_v20  ;;  %v7726_v35 = vadd.f32 %v7725_v48, %v7556_v17  ;;  %7764 = vmatmul.bf16.gmra.mxu1 %v13355_v28 }
 0xe3f   :  { %16172 = vst [vmem:[#allocation132_spill] sm:$0xff] %v14705_v31  ;;  %7595 = vmatmul.bf16.gmra.mxu0 %v13353_v43  ;;  %7933 = vmatmul.bf16.gmra.mxu2 %v13357_v24 }
 0xe41   :  { %8102 = vmatmul.bf16.gmra.mxu3 %v13359_v46 }
 0xe42   :  { %v7894_v34 = vpop.f32.mrf.mxu2  ;;  %v7727_v12 = vpop.f32.mrf.mxu1 }
 0xe43   :  { %v7895_v27 = vadd.f32 %v7894_v34, %v7726_v35 }
 0xe44   :  { %v8063_v3 = vpop.f32.mrf.mxu3  ;;  %v7558_v7 = vpop.f32.mrf.mxu0 }
 0xe45   :  { %v14711_v13 = vadd.f32 %v8063_v3, %v7895_v27  ;;  %v7728_v5 = vadd.f32 %v7727_v12, %v7558_v7 }
 0xe4a   :  { %v7896_v10 = vpop.f32.mrf.mxu2  ;;  %v7730_v48 = vpop.f32.mrf.mxu1 }
 0xe4b   :  { %v7897_v20 = vadd.f32 %v7896_v10, %v7728_v5 }
 0xe4c   :  { %v8065_v9 = vpop.f32.mrf.mxu3  ;;  %v7561_v17 = vpop.f32.mrf.mxu0 }
 0xe4d   :  { %v14713_v31 = vadd.f32 %v8065_v9, %v7897_v20  ;;  %v7731_v28 = vadd.f32 %v7730_v48, %v7561_v17  ;;  %8285 = vmatmul.bf16.vlgmr.msrb.gmra.mxu1 %v12893_v51 }
 0xe4f   :  { %8116 = vmatmul.bf16.vlgmr.msrb.gmra.mxu0 %v12891_v47  ;;  %8454 = vmatmul.bf16.vlgmr.msrb.gmra.mxu2 %v12895_v52 }
 0xe51   :  { %8623 = vmatmul.bf16.vlgmr.msrb.gmra.mxu3 %v12897_v53 }
 0xe52   :  { %v7899_v35 = vpop.f32.mrf.mxu2  ;;  %v7732_v7 = vpop.f32.mrf.mxu1 }
 0xe53   :  { %v7900_v34 = vadd.f32 %v7899_v35, %v7731_v28 }
 0xe54   :  { %v8068_v27 = vpop.f32.mrf.mxu3  ;;  %v7563_v3 = vpop.f32.mrf.mxu0 }
 0xe55   :  { %v14719_v12 = vadd.f32 %v8068_v27, %v7900_v34  ;;  %v7733_v5 = vadd.f32 %v7732_v7, %v7563_v3 }
 0xe5a   :  { %v7901_v10 = vpop.f32.mrf.mxu2  ;;  %v7735_v48 = vpop.f32.mrf.mxu1 }
 0xe5b   :  { %v7902_v20 = vadd.f32 %v7901_v10, %v7733_v5 }
 0xe5c   :  { %v8070_v9 = vpop.f32.mrf.mxu3  ;;  %v7566_v17 = vpop.f32.mrf.mxu0 }
 0xe5d   :  { %v14721_v47 = vadd.f32 %v8070_v9, %v7902_v20  ;;  %v7736_v51 = vadd.f32 %v7735_v48, %v7566_v17  ;;  %8290 = vmatmul.bf16.gmra.mxu1 %v16027_v1 }
 0xe5f   :  { %8121 = vmatmul.bf16.gmra.mxu0 %v12903_v0  ;;  %8459 = vmatmul.bf16.gmra.mxu2 %v16028_v32  ;;  %v16173_v32 = vld [vmem:[#allocation18_spill] sm:$0xff] }
 0xe61   :  { %8628 = vmatmul.bf16.gmra.mxu3 %v16029_v25 }
 0xe62   :  { %v7904_v52 = vpop.f32.mrf.mxu2  ;;  %v7737_v34 = vpop.f32.mrf.mxu1 }
 0xe63   :  { %v7905_v53 = vadd.f32 %v7904_v52, %v7736_v51 }
 0xe64   :  { %v8073_v28 = vpop.f32.mrf.mxu3  ;;  %v7568_v35 = vpop.f32.mrf.mxu0 }
 0xe65   :  { %v14727_v27 = vadd.f32 %v8073_v28, %v7905_v53  ;;  %v7738_v3 = vadd.f32 %v7737_v34, %v7568_v35 }
 0xe6a   :  { %v7906_v7 = vpop.f32.mrf.mxu2  ;;  %v7740_v9 = vpop.f32.mrf.mxu1 }
 0xe6b   :  { %v7907_v5 = vadd.f32 %v7906_v7, %v7738_v3 }
 0xe6c   :  { %v8075_v10 = vpop.f32.mrf.mxu3  ;;  %v7571_v20 = vpop.f32.mrf.mxu0 }
 0xe6d   :  { %v14729_v0 = vadd.f32 %v8075_v10, %v7907_v5  ;;  %v7741_v1 = vadd.f32 %v7740_v9, %v7571_v20  ;;  %8295 = vmatmul.bf16.gmra.mxu1 %v16033_v40 }
 0xe6f   :  { %8126 = vmatmul.bf16.gmra.mxu0 %v16031_v41  ;;  %8464 = vmatmul.bf16.gmra.mxu2 %v16034_v29 }
 0xe71   :  { %8633 = vmatmul.bf16.gmra.mxu3 %v16173_v32 }
 0xe72   :  { %v7909_v25 = vpop.f32.mrf.mxu2  ;;  %v7742_v52 = vpop.f32.mrf.mxu1 }
 0xe73   :  { %v7910_v17 = vadd.f32 %v7909_v25, %v7741_v1 }
 0xe74   :  { %v8078_v48 = vpop.f32.mrf.mxu3  ;;  %v7573_v51 = vpop.f32.mrf.mxu0 }
 0xe75   :  { %v14735_v53 = vadd.f32 %v8078_v48, %v7910_v17  ;;  %v7743_v28 = vadd.f32 %v7742_v52, %v7573_v51 }
 0xe7a   :  { %v7911_v35 = vpop.f32.mrf.mxu2  ;;  %v7745_v5 = vpop.f32.mrf.mxu1 }
 0xe7b   :  { %v7912_v34 = vadd.f32 %v7911_v35, %v7743_v28 }
 0xe7c   :  { %v8080_v3 = vpop.f32.mrf.mxu3  ;;  %v7576_v7 = vpop.f32.mrf.mxu0 }
 0xe7d   :  { %v14737_v41 = vadd.f32 %v8080_v3, %v7912_v34  ;;  %v7746_v40 = vadd.f32 %v7745_v5, %v7576_v7  ;;  %8300 = vmatmul.bf16.gmra.mxu1 %v12929_v37 }
 0xe7f   :  { %8131 = vmatmul.bf16.gmra.mxu0 %v12927_v36  ;;  %8469 = vmatmul.bf16.gmra.mxu2 %v12931_v38 }
 0xe81   :  { %8638 = vmatmul.bf16.gmra.mxu3 %v12933_v39 }
 0xe82   :  { %v7914_v29 = vpop.f32.mrf.mxu2  ;;  %v7747_v1 = vpop.f32.mrf.mxu1 }
 0xe83   :  { %v7915_v10 = vadd.f32 %v7914_v29, %v7746_v40 }
 0xe84   :  { %v8083_v20 = vpop.f32.mrf.mxu3  ;;  %v7578_v9 = vpop.f32.mrf.mxu0 }
 0xe85   :  { %v14743_v32 = vadd.f32 %v8083_v20, %v7915_v10  ;;  %v7748_v25 = vadd.f32 %v7747_v1, %v7578_v9 }
 0xe8a   :  { %v7916_v17 = vpop.f32.mrf.mxu2  ;;  %v7750_v28 = vpop.f32.mrf.mxu1 }
 0xe8b   :  { %v7917_v48 = vadd.f32 %v7916_v17, %v7748_v25 }
 0xe8c   :  { %v8085_v51 = vpop.f32.mrf.mxu3  ;;  %v7581_v52 = vpop.f32.mrf.mxu0 }
 0xe8d   :  { %v14745_v36 = vadd.f32 %v8085_v51, %v7917_v48  ;;  %v7751_v37 = vadd.f32 %v7750_v28, %v7581_v52  ;;  %8305 = vmatmul.bf16.gmra.mxu1 %v12941_v50 }
 0xe8f   :  { %8136 = vmatmul.bf16.gmra.mxu0 %v12939_v49  ;;  %8474 = vmatmul.bf16.gmra.mxu2 %v12943_v54 }
 0xe91   :  { %8643 = vmatmul.bf16.gmra.mxu3 %v12945_v55 }
 0xe92   :  { %v7919_v38 = vpop.f32.mrf.mxu2  ;;  %v7752_v3 = vpop.f32.mrf.mxu1 }
 0xe93   :  { %v7920_v39 = vadd.f32 %v7919_v38, %v7751_v37 }
 0xe94   :  { %v8088_v35 = vpop.f32.mrf.mxu3  ;;  %v7583_v34 = vpop.f32.mrf.mxu0 }
 0xe95   :  { %v14751_v7 = vadd.f32 %v8088_v35, %v7920_v39  ;;  %v7753_v5 = vadd.f32 %v7752_v3, %v7583_v34 }
 0xe9a   :  { %v7921_v40 = vpop.f32.mrf.mxu2  ;;  %v7755_v9 = vpop.f32.mrf.mxu1 }
 0xe9b   :  { %v7922_v29 = vadd.f32 %v7921_v40, %v7753_v5 }
 0xe9c   :  { %v8090_v10 = vpop.f32.mrf.mxu3  ;;  %v7586_v20 = vpop.f32.mrf.mxu0 }
 0xe9d   :  { %v14753_v49 = vadd.f32 %v8090_v10, %v7922_v29  ;;  %v7756_v50 = vadd.f32 %v7755_v9, %v7586_v20  ;;  %8310 = vmatmul.bf16.gmra.mxu1 %v16037_v15 }
 0xe9f   :  { %8141 = vmatmul.bf16.gmra.mxu0 %v12951_v4  ;;  %8479 = vmatmul.bf16.gmra.mxu2 %v16038_v44 }
 0xea1   :  { %8648 = vmatmul.bf16.gmra.mxu3 %v16039_v26 }
 0xea2   :  { %v7924_v54 = vpop.f32.mrf.mxu2  ;;  %v7757_v17 = vpop.f32.mrf.mxu1 }
 0xea3   :  { %v7925_v55 = vadd.f32 %v7924_v54, %v7756_v50 }
 0xea4   :  { %v8093_v1 = vpop.f32.mrf.mxu3  ;;  %v7588_v25 = vpop.f32.mrf.mxu0 }
 0xea5   :  { %v14759_v48 = vadd.f32 %v8093_v1, %v7925_v55  ;;  %v7758_v51 = vadd.f32 %v7757_v17, %v7588_v25 }
 0xeaa   :  { %v7926_v52 = vpop.f32.mrf.mxu2  ;;  %v7760_v39 = vpop.f32.mrf.mxu1 }
 0xeab   :  { %v7927_v28 = vadd.f32 %v7926_v52, %v7758_v51 }
 0xeac   :  { %v8095_v37 = vpop.f32.mrf.mxu3  ;;  %v7591_v38 = vpop.f32.mrf.mxu0 }
 0xead   :  { %v14761_v4 = vadd.f32 %v8095_v37, %v7927_v28  ;;  %v7761_v15 = vadd.f32 %v7760_v39, %v7591_v38  ;;  %8315 = vmatmul.bf16.gmra.mxu1 %v16043_v60 }
 0xeaf   :  { %8146 = vmatmul.bf16.gmra.mxu0 %v16041_v30  ;;  %8484 = vmatmul.bf16.gmra.mxu2 %v16044_v8 }
 0xeb1   :  { %8653 = vmatmul.bf16.gmra.mxu3 %v16045_v62 }
 0xeb2   :  { %v7929_v44 = vpop.f32.mrf.mxu2  ;;  %v7762_v3 = vpop.f32.mrf.mxu1 }
 0xeb3   :  { %v7930_v26 = vadd.f32 %v7929_v44, %v7761_v15 }
 0xeb4   :  { %v8098_v35 = vpop.f32.mrf.mxu3  ;;  %v7593_v34 = vpop.f32.mrf.mxu0 }
 0xeb5   :  { %v14767_v5 = vadd.f32 %v8098_v35, %v7930_v26  ;;  %v7763_v40 = vadd.f32 %v7762_v3, %v7593_v34 }
 0xeba   :  { %v7931_v29 = vpop.f32.mrf.mxu2  ;;  %v7765_v50 = vpop.f32.mrf.mxu1 }
 0xebb   :  { %v7932_v10 = vadd.f32 %v7931_v29, %v7763_v40 }
 0xebc   :  { %v8100_v20 = vpop.f32.mrf.mxu3  ;;  %v7596_v9 = vpop.f32.mrf.mxu0 }
 0xebd   :  { %v14769_v30 = vadd.f32 %v8100_v20, %v7932_v10  ;;  %v7766_v60 = vadd.f32 %v7765_v50, %v7596_v9  ;;  %8320 = vmatmul.bf16.gmra.mxu1 %v12977_v57  ;;  %v16174_v20 = vld [vmem:[#allocation28_spill] sm:$0xff]  ;;  %v16175_v9 = vld [vmem:[#allocation29_spill] sm:$0xff]  ;;  %v16176_v50 = vld [vmem:[#allocation30_spill] sm:$0xff] }
 0xebf   :  { %8151 = vmatmul.bf16.gmra.mxu0 %v12975_v56  ;;  %8489 = vmatmul.bf16.gmra.mxu2 %v12979_v58 }
 0xec1   :  { %8658 = vmatmul.bf16.gmra.mxu3 %v12981_v59 }
 0xec2   :  { %v7934_v8 = vpop.f32.mrf.mxu2  ;;  %v7767_v1 = vpop.f32.mrf.mxu1 }
 0xec3   :  { %v7935_v62 = vadd.f32 %v7934_v8, %v7766_v60 }
 0xec4   :  { %v8103_v54 = vpop.f32.mrf.mxu3  ;;  %v7598_v55 = vpop.f32.mrf.mxu0 }
 0xec5   :  { %v14775_v25 = vadd.f32 %v8103_v54, %v7935_v62  ;;  %v7768_v17 = vadd.f32 %v7767_v1, %v7598_v55  ;;  %v16177_v1 = vld [vmem:[#allocation160_spill] sm:$0xff] }
 0xeca   :  { %v7936_v51 = vpop.f32.mrf.mxu2  ;;  %v8286_v38 = vpop.f32.mrf.mxu1 }
 0xecb   :  { %v7937_v52 = vadd.f32 %v7936_v51, %v7768_v17 }
 0xecc   :  { %v8105_v28 = vpop.f32.mrf.mxu3  ;;  %v8117_v37 = vpop.f32.mrf.mxu0 }
 0xecd   :  { %v14777_v56 = vadd.f32 %v8105_v28, %v7937_v52  ;;  %v8287_v57 = vadd.f32 %v8286_v38, %v8117_v37  ;;  %8325 = vmatmul.bf16.gmra.mxu1 %v12989_v18 }
 0xecf   :  { %8156 = vmatmul.bf16.gmra.mxu0 %v12987_v16  ;;  %8494 = vmatmul.bf16.gmra.mxu2 %v12991_v19 }
 0xed1   :  { %8663 = vmatmul.bf16.gmra.mxu3 %v16046_v2 }
 0xed2   :  { %v8455_v58 = vpop.f32.mrf.mxu2  ;;  %v8288_v44 = vpop.f32.mrf.mxu1 }
 0xed3   :  { %v8456_v59 = vadd.f32 %v8455_v58, %v8287_v57  ;;  %v16178_v57 = vld [vmem:[#allocation32_spill] sm:$0xff]  ;;  %v16179_v58 = vld [vmem:[#allocation161_spill] sm:$0xff] }
 0xed4   :  { %v8624_v39 = vpop.f32.mrf.mxu3  ;;  %v8119_v15 = vpop.f32.mrf.mxu0 }
 0xed5   :  { %v8625_v26 = vadd.f32 %v8624_v39, %v8456_v59  ;;  %v8289_v34 = vadd.f32 %v8288_v44, %v8119_v15  ;;  %v16180_v15 = vld [vmem:[#allocation33_spill] sm:$0xff]  ;;  %v16181_v44 = vld [vmem:[#allocation34_spill] sm:$0xff] }
 0xed7   :  { %v10326_v35 = vpack.c.bf16 %v8625_v26, %v14527_v22  ;;  %v16182_v26 = vld [vmem:[#allocation35_spill] sm:$0xff] }
 0xed9   :  { %10582 = vst [vmem:[#allocation8 + $0x18] sm:$0xff] %v10326_v35 }
 0xeda   :  { %v8457_v3 = vpop.f32.mrf.mxu2  ;;  %v8291_v10 = vpop.f32.mrf.mxu1 }
 0xedb   :  { %v8458_v40 = vadd.f32 %v8457_v3, %v8289_v34 }
 0xedc   :  { %v8626_v16 = vpop.f32.mrf.mxu3  ;;  %v8122_v29 = vpop.f32.mrf.mxu0 }
 0xedd   :  { %v8627_v18 = vadd.f32 %v8626_v16, %v8458_v40  ;;  %v8292_v2 = vadd.f32 %v8291_v10, %v8122_v29  ;;  %8330 = vmatmul.bf16.gmra.mxu1 %v16174_v20  ;;  %v16183_v10 = vld [vmem:[#allocation162_spill] sm:$0xff] }
 0xedf   :  { %8161 = vmatmul.bf16.gmra.mxu0 %v16047_v6  ;;  %v10330_v19 = vpack.c.bf16 %v8627_v18, %v14529_v33  ;;  %8499 = vmatmul.bf16.gmra.mxu2 %v16175_v9 }
 0xee1   :  { %8668 = vmatmul.bf16.gmra.mxu3 %v16176_v50  ;;  %10586 = vst [vmem:[#allocation8 + $0x38] sm:$0xff] %v10330_v19 }
 0xee2   :  { %v8460_v22 = vpop.f32.mrf.mxu2  ;;  %v8293_v54 = vpop.f32.mrf.mxu1 }
 0xee3   :  { %v8461_v60 = vadd.f32 %v8460_v22, %v8292_v2 }
 0xee4   :  { %v8629_v8 = vpop.f32.mrf.mxu3  ;;  %v8124_v62 = vpop.f32.mrf.mxu0 }
 0xee5   :  { %v8630_v55 = vadd.f32 %v8629_v8, %v8461_v60  ;;  %v8294_v6 = vadd.f32 %v8293_v54, %v8124_v62  ;;  %v16184_v8 = vld [vmem:[#allocation38_spill] sm:$0xff]  ;;  %v16185_v62 = vld [vmem:[#allocation163_spill] sm:$0xff] }
 0xee7   :  { %v10334_v17 = vpack.c.bf16 %v8630_v55, %v16177_v1  ;;  %v16186_v1 = vld [vmem:[#allocation39_spill] sm:$0xff] }
 0xee9   :  { %10590 = vst [vmem:[#allocation8 + $0x58] sm:$0xff] %v10334_v17  ;;  %v16187_v17 = vld [vmem:[#allocation40_spill] sm:$0xff] }
 0xeea   :  { %v8462_v51 = vpop.f32.mrf.mxu2  ;;  %v8296_v37 = vpop.f32.mrf.mxu1 }
 0xeeb   :  { %v8463_v33 = vadd.f32 %v8462_v51, %v8294_v6  ;;  %v16188_v6 = vld [vmem:[#allocation41_spill] sm:$0xff] }
 0xeec   :  { %v8631_v52 = vpop.f32.mrf.mxu3  ;;  %v8127_v28 = vpop.f32.mrf.mxu0 }
 0xeed   :  { %v8632_v38 = vadd.f32 %v8631_v52, %v8463_v33  ;;  %v8297_v39 = vadd.f32 %v8296_v37, %v8127_v28  ;;  %8335 = vmatmul.bf16.gmra.mxu1 %v16180_v15 }
 0xeef   :  { %8166 = vmatmul.bf16.gmra.mxu0 %v16178_v57  ;;  %v10338_v59 = vpack.c.bf16 %v8632_v38, %v16179_v58  ;;  %8504 = vmatmul.bf16.gmra.mxu2 %v16181_v44  ;;  %v16189_v57 = vld [vmem:[#allocation164_spill] sm:$0xff] }
 0xef1   :  { %8673 = vmatmul.bf16.gmra.mxu3 %v16182_v26  ;;  %10594 = vst [vmem:[#allocation8 + $0x78] sm:$0xff] %v10338_v59 }
 0xef2   :  { %v8465_v35 = vpop.f32.mrf.mxu2  ;;  %v8298_v16 = vpop.f32.mrf.mxu1 }
 0xef3   :  { %v8466_v34 = vadd.f32 %v8465_v35, %v8297_v39 }
 0xef4   :  { %v8634_v3 = vpop.f32.mrf.mxu3  ;;  %v8129_v40 = vpop.f32.mrf.mxu0 }
 0xef5   :  { %v8635_v29 = vadd.f32 %v8634_v3, %v8466_v34  ;;  %v8299_v19 = vadd.f32 %v8298_v16, %v8129_v40  ;;  %v16190_v3 = vld [vmem:[#allocation44_spill] sm:$0xff]  ;;  %v16191_v40 = vld [vmem:[#allocation31_spill] sm:$0xff] }
 0xef7   :  { %v10342_v18 = vpack.c.bf16 %v8635_v29, %v16183_v10  ;;  %v16192_v10 = vld [vmem:[#allocation45_spill] sm:$0xff] }
 0xef9   :  { %10598 = vst [vmem:[#allocation8 + $0x98] sm:$0xff] %v10342_v18  ;;  %v16193_v18 = vld [vmem:[#allocation46_spill] sm:$0xff] }
 0xefa   :  { %v8467_v2 = vpop.f32.mrf.mxu2  ;;  %v8301_v22 = vpop.f32.mrf.mxu1 }
 0xefb   :  { %v8468_v20 = vadd.f32 %v8467_v2, %v8299_v19  ;;  %v16194_v19 = vld [vmem:[#allocation47_spill] sm:$0xff] }
 0xefc   :  { %v8636_v9 = vpop.f32.mrf.mxu3  ;;  %v8132_v50 = vpop.f32.mrf.mxu0 }
 0xefd   :  { %v8637_v60 = vadd.f32 %v8636_v9, %v8468_v20  ;;  %v8302_v55 = vadd.f32 %v8301_v22, %v8132_v50  ;;  %8340 = vmatmul.bf16.gmra.mxu1 %v16186_v1 }
 0xeff   :  { %8171 = vmatmul.bf16.gmra.mxu0 %v16184_v8  ;;  %v10346_v54 = vpack.c.bf16 %v8637_v60, %v16185_v62  ;;  %8509 = vmatmul.bf16.gmra.mxu2 %v16187_v17  ;;  %v16195_v8 = vld [vmem:[#allocation36_spill] sm:$0xff] }
 0xf01   :  { %8678 = vmatmul.bf16.gmra.mxu3 %v16188_v6  ;;  %10602 = vst [vmem:[#allocation8 + $0xb8] sm:$0xff] %v10346_v54 }
 0xf02   :  { %v8470_v51 = vpop.f32.mrf.mxu2  ;;  %v8303_v37 = vpop.f32.mrf.mxu1 }
 0xf03   :  { %v8471_v33 = vadd.f32 %v8470_v51, %v8302_v55 }
 0xf04   :  { %v8639_v52 = vpop.f32.mrf.mxu3  ;;  %v8134_v28 = vpop.f32.mrf.mxu0 }
 0xf05   :  { %v8640_v38 = vadd.f32 %v8639_v52, %v8471_v33  ;;  %v8304_v59 = vadd.f32 %v8303_v37, %v8134_v28  ;;  %v16196_v52 = vld [vmem:[#allocation50_spill] sm:$0xff]  ;;  %v16197_v28 = vld [vmem:[#allocation37_spill] sm:$0xff] }
 0xf07   :  { %v10350_v58 = vpack.c.bf16 %v8640_v38, %v16189_v57  ;;  %v16198_v57 = vld [vmem:[#allocation51_spill] sm:$0xff] }
 0xf09   :  { %10606 = vst [vmem:[#allocation8 + $0xd8] sm:$0xff] %v10350_v58  ;;  %v16199_v58 = vld [vmem:[#allocation52_spill] sm:$0xff] }
 0xf0a   :  { %v8472_v39 = vpop.f32.mrf.mxu2  ;;  %v8306_v35 = vpop.f32.mrf.mxu1 }
 0xf0b   :  { %v8473_v15 = vadd.f32 %v8472_v39, %v8304_v59  ;;  %v16200_v59 = vld [vmem:[#allocation53_spill] sm:$0xff] }
 0xf0c   :  { %v8641_v44 = vpop.f32.mrf.mxu3  ;;  %v8137_v26 = vpop.f32.mrf.mxu0 }
 0xf0d   :  { %v8642_v34 = vadd.f32 %v8641_v44, %v8473_v15  ;;  %v8307_v29 = vadd.f32 %v8306_v35, %v8137_v26  ;;  %8345 = vmatmul.bf16.gmra.mxu1 %v16192_v10 }
 0xf0f   :  { %8176 = vmatmul.bf16.gmra.mxu0 %v16190_v3  ;;  %v10354_v16 = vpack.c.bf16 %v8642_v34, %v16191_v40  ;;  %8514 = vmatmul.bf16.gmra.mxu2 %v16193_v18  ;;  %v16201_v3 = vld [vmem:[#allocation42_spill] sm:$0xff] }
 0xf11   :  { %8683 = vmatmul.bf16.gmra.mxu3 %v16194_v19  ;;  %10610 = vst [vmem:[#allocation8 + $0xf8] sm:$0xff] %v10354_v16 }
 0xf12   :  { %v8475_v2 = vpop.f32.mrf.mxu2  ;;  %v8308_v22 = vpop.f32.mrf.mxu1 }
 0xf13   :  { %v8476_v20 = vadd.f32 %v8475_v2, %v8307_v29 }
 0xf14   :  { %v8644_v9 = vpop.f32.mrf.mxu3  ;;  %v8139_v50 = vpop.f32.mrf.mxu0 }
 0xf15   :  { %v8645_v60 = vadd.f32 %v8644_v9, %v8476_v20  ;;  %v8309_v54 = vadd.f32 %v8308_v22, %v8139_v50  ;;  %v16202_v9 = vld [vmem:[#allocation56_spill] sm:$0xff]  ;;  %v16203_v50 = vld [vmem:[#allocation43_spill] sm:$0xff] }
 0xf17   :  { %v10358_v62 = vpack.c.bf16 %v8645_v60, %v16195_v8  ;;  %v16204_v8 = vld [vmem:[#allocation57_spill] sm:$0xff] }
 0xf19   :  { %10614 = vst [vmem:[#allocation8 + $0x118] sm:$0xff] %v10358_v62  ;;  %v16205_v62 = vld [vmem:[#allocation58_spill] sm:$0xff] }
 0xf1a   :  { %v8477_v55 = vpop.f32.mrf.mxu2  ;;  %v8311_v51 = vpop.f32.mrf.mxu1 }
 0xf1b   :  { %v8478_v1 = vadd.f32 %v8477_v55, %v8309_v54  ;;  %v16206_v54 = vld [vmem:[#allocation59_spill] sm:$0xff] }
 0xf1c   :  { %v8646_v17 = vpop.f32.mrf.mxu3  ;;  %v8142_v6 = vpop.f32.mrf.mxu0 }
 0xf1d   :  { %v8647_v33 = vadd.f32 %v8646_v17, %v8478_v1  ;;  %v8312_v38 = vadd.f32 %v8311_v51, %v8142_v6  ;;  %8350 = vmatmul.bf16.gmra.mxu1 %v16198_v57 }
 0xf1f   :  { %8181 = vmatmul.bf16.gmra.mxu0 %v16196_v52  ;;  %v10362_v37 = vpack.c.bf16 %v8647_v33, %v16197_v28  ;;  %8519 = vmatmul.bf16.gmra.mxu2 %v16199_v58  ;;  %v16207_v52 = vld [vmem:[#allocation48_spill] sm:$0xff] }
 0xf21   :  { %8688 = vmatmul.bf16.gmra.mxu3 %v16200_v59  ;;  %10618 = vst [vmem:[#allocation8 + $0x138] sm:$0xff] %v10362_v37 }
 0xf22   :  { %v8480_v39 = vpop.f32.mrf.mxu2  ;;  %v8313_v35 = vpop.f32.mrf.mxu1 }
 0xf23   :  { %v8481_v15 = vadd.f32 %v8480_v39, %v8312_v38 }
 0xf24   :  { %v8649_v44 = vpop.f32.mrf.mxu3  ;;  %v8144_v26 = vpop.f32.mrf.mxu0 }
 0xf25   :  { %v8650_v34 = vadd.f32 %v8649_v44, %v8481_v15  ;;  %v8314_v16 = vadd.f32 %v8313_v35, %v8144_v26  ;;  %v16208_v44 = vld [vmem:[#allocation62_spill] sm:$0xff]  ;;  %v16209_v26 = vld [vmem:[#allocation49_spill] sm:$0xff] }
 0xf27   :  { %v10366_v40 = vpack.c.bf16 %v8650_v34, %v16201_v3  ;;  %v16210_v3 = vld [vmem:[#allocation63_spill] sm:$0xff] }
 0xf29   :  { %10622 = vst [vmem:[#allocation8 + $0x158] sm:$0xff] %v10366_v40  ;;  %v16211_v40 = vld [vmem:[#allocation64_spill] sm:$0xff] }
 0xf2a   :  { %v8482_v29 = vpop.f32.mrf.mxu2  ;;  %v8316_v2 = vpop.f32.mrf.mxu1 }
 0xf2b   :  { %v8483_v10 = vadd.f32 %v8482_v29, %v8314_v16  ;;  %v16212_v16 = vld [vmem:[#allocation65_spill] sm:$0xff] }
 0xf2c   :  { %v8651_v18 = vpop.f32.mrf.mxu3  ;;  %v8147_v19 = vpop.f32.mrf.mxu0 }
 0xf2d   :  { %v8652_v20 = vadd.f32 %v8651_v18, %v8483_v10  ;;  %v8317_v60 = vadd.f32 %v8316_v2, %v8147_v19  ;;  %8355 = vmatmul.bf16.gmra.mxu1 %v16204_v8 }
 0xf2f   :  { %8186 = vmatmul.bf16.gmra.mxu0 %v16202_v9  ;;  %v10370_v22 = vpack.c.bf16 %v8652_v20, %v16203_v50  ;;  %8524 = vmatmul.bf16.gmra.mxu2 %v16205_v62  ;;  %v16213_v9 = vld [vmem:[#allocation54_spill] sm:$0xff] }
 0xf31   :  { %8693 = vmatmul.bf16.gmra.mxu3 %v16206_v54  ;;  %10626 = vst [vmem:[#allocation8 + $0x178] sm:$0xff] %v10370_v22 }
 0xf32   :  { %v8485_v55 = vpop.f32.mrf.mxu2  ;;  %v8318_v51 = vpop.f32.mrf.mxu1 }
 0xf33   :  { %v8486_v1 = vadd.f32 %v8485_v55, %v8317_v60 }
 0xf34   :  { %v8654_v17 = vpop.f32.mrf.mxu3  ;;  %v8149_v6 = vpop.f32.mrf.mxu0 }
 0xf35   :  { %v8655_v33 = vadd.f32 %v8654_v17, %v8486_v1  ;;  %v8319_v37 = vadd.f32 %v8318_v51, %v8149_v6  ;;  %v16214_v17 = vld [vmem:[#allocation68_spill] sm:$0xff]  ;;  %v16215_v6 = vld [vmem:[#allocation55_spill] sm:$0xff] }
 0xf37   :  { %v10374_v28 = vpack.c.bf16 %v8655_v33, %v16207_v52  ;;  %v16216_v52 = vld [vmem:[#allocation69_spill] sm:$0xff] }
 0xf39   :  { %10630 = vst [vmem:[#allocation8 + $0x198] sm:$0xff] %v10374_v28  ;;  %v16217_v28 = vld [vmem:[#allocation70_spill] sm:$0xff] }
 0xf3a   :  { %v8487_v38 = vpop.f32.mrf.mxu2  ;;  %v8321_v39 = vpop.f32.mrf.mxu1 }
 0xf3b   :  { %v8488_v57 = vadd.f32 %v8487_v38, %v8319_v37  ;;  %v16218_v37 = vld [vmem:[#allocation71_spill] sm:$0xff] }
 0xf3c   :  { %v8656_v58 = vpop.f32.mrf.mxu3  ;;  %v8152_v59 = vpop.f32.mrf.mxu0 }
 0xf3d   :  { %v8657_v15 = vadd.f32 %v8656_v58, %v8488_v57  ;;  %v8322_v34 = vadd.f32 %v8321_v39, %v8152_v59  ;;  %8360 = vmatmul.bf16.gmra.mxu1 %v16210_v3 }
 0xf3f   :  { %8191 = vmatmul.bf16.gmra.mxu0 %v16208_v44  ;;  %v10378_v35 = vpack.c.bf16 %v8657_v15, %v16209_v26  ;;  %8529 = vmatmul.bf16.gmra.mxu2 %v16211_v40  ;;  %v16219_v44 = vld [vmem:[#allocation60_spill] sm:$0xff] }
 0xf41   :  { %8698 = vmatmul.bf16.gmra.mxu3 %v16212_v16  ;;  %10634 = vst [vmem:[#allocation8 + $0x1b8] sm:$0xff] %v10378_v35 }
 0xf42   :  { %v8490_v29 = vpop.f32.mrf.mxu2  ;;  %v8323_v2 = vpop.f32.mrf.mxu1 }
 0xf43   :  { %v8491_v10 = vadd.f32 %v8490_v29, %v8322_v34 }
 0xf44   :  { %v8659_v18 = vpop.f32.mrf.mxu3  ;;  %v8154_v19 = vpop.f32.mrf.mxu0 }
 0xf45   :  { %v8660_v20 = vadd.f32 %v8659_v18, %v8491_v10  ;;  %v8324_v22 = vadd.f32 %v8323_v2, %v8154_v19  ;;  %v16220_v18 = vld [vmem:[#allocation74_spill] sm:$0xff]  ;;  %v16221_v19 = vld [vmem:[#allocation61_spill] sm:$0xff] }
 0xf47   :  { %v10382_v50 = vpack.c.bf16 %v8660_v20, %v16213_v9  ;;  %v16222_v9 = vld [vmem:[#allocation75_spill] sm:$0xff] }
 0xf49   :  { %10638 = vst [vmem:[#allocation8 + $0x1d8] sm:$0xff] %v10382_v50  ;;  %v16223_v50 = vld [vmem:[#allocation76_spill] sm:$0xff] }
 0xf4a   :  { %v8492_v60 = vpop.f32.mrf.mxu2  ;;  %v8326_v55 = vpop.f32.mrf.mxu1 }
 0xf4b   :  { %v8493_v8 = vadd.f32 %v8492_v60, %v8324_v22  ;;  %v16224_v22 = vld [vmem:[#allocation77_spill] sm:$0xff] }
 0xf4c   :  { %v8661_v62 = vpop.f32.mrf.mxu3  ;;  %v8157_v54 = vpop.f32.mrf.mxu0 }
 0xf4d   :  { %v8662_v1 = vadd.f32 %v8661_v62, %v8493_v8  ;;  %v8327_v33 = vadd.f32 %v8326_v55, %v8157_v54  ;;  %8365 = vmatmul.bf16.gmra.mxu1 %v16216_v52 }
 0xf4f   :  { %8196 = vmatmul.bf16.gmra.mxu0 %v16214_v17  ;;  %v10386_v51 = vpack.c.bf16 %v8662_v1, %v16215_v6  ;;  %8534 = vmatmul.bf16.gmra.mxu2 %v16217_v28  ;;  %v16225_v17 = vld [vmem:[#allocation66_spill] sm:$0xff] }
 0xf51   :  { %8703 = vmatmul.bf16.gmra.mxu3 %v16218_v37  ;;  %10642 = vst [vmem:[#allocation8 + $0x1f8] sm:$0xff] %v10386_v51 }
 0xf52   :  { %v8495_v38 = vpop.f32.mrf.mxu2  ;;  %v8328_v39 = vpop.f32.mrf.mxu1 }
 0xf53   :  { %v8496_v57 = vadd.f32 %v8495_v38, %v8327_v33 }
 0xf54   :  { %v8664_v58 = vpop.f32.mrf.mxu3  ;;  %v8159_v59 = vpop.f32.mrf.mxu0 }
 0xf55   :  { %v8665_v15 = vadd.f32 %v8664_v58, %v8496_v57  ;;  %v8329_v35 = vadd.f32 %v8328_v39, %v8159_v59  ;;  %v16226_v58 = vld [vmem:[#allocation80_spill] sm:$0xff]  ;;  %v16227_v59 = vld [vmem:[#allocation67_spill] sm:$0xff] }
 0xf57   :  { %v10390_v26 = vpack.c.bf16 %v8665_v15, %v16219_v44  ;;  %v16228_v44 = vld [vmem:[#allocation81_spill] sm:$0xff] }
 0xf59   :  { %10646 = vst [vmem:[#allocation8 + $0x218] sm:$0xff] %v10390_v26  ;;  %v16229_v26 = vld [vmem:[#allocation82_spill] sm:$0xff] }
 0xf5a   :  { %v8497_v34 = vpop.f32.mrf.mxu2  ;;  %v8331_v29 = vpop.f32.mrf.mxu1 }
 0xf5b   :  { %v8498_v3 = vadd.f32 %v8497_v34, %v8329_v35  ;;  %v16230_v35 = vld [vmem:[#allocation83_spill] sm:$0xff] }
 0xf5c   :  { %v8666_v40 = vpop.f32.mrf.mxu3  ;;  %v8162_v16 = vpop.f32.mrf.mxu0 }
 0xf5d   :  { %v8667_v10 = vadd.f32 %v8666_v40, %v8498_v3  ;;  %v8332_v20 = vadd.f32 %v8331_v29, %v8162_v16  ;;  %8370 = vmatmul.bf16.gmra.mxu1 %v16222_v9 }
 0xf5f   :  { %8201 = vmatmul.bf16.gmra.mxu0 %v16220_v18  ;;  %v10394_v2 = vpack.c.bf16 %v8667_v10, %v16221_v19  ;;  %8539 = vmatmul.bf16.gmra.mxu2 %v16223_v50  ;;  %v16231_v18 = vld [vmem:[#allocation72_spill] sm:$0xff] }
 0xf61   :  { %8708 = vmatmul.bf16.gmra.mxu3 %v16224_v22  ;;  %10650 = vst [vmem:[#allocation8 + $0x238] sm:$0xff] %v10394_v2 }
 0xf62   :  { %v8500_v60 = vpop.f32.mrf.mxu2  ;;  %v8333_v55 = vpop.f32.mrf.mxu1 }
 0xf63   :  { %v8501_v8 = vadd.f32 %v8500_v60, %v8332_v20 }
 0xf64   :  { %v8669_v62 = vpop.f32.mrf.mxu3  ;;  %v8164_v54 = vpop.f32.mrf.mxu0 }
 0xf65   :  { %v8670_v1 = vadd.f32 %v8669_v62, %v8501_v8  ;;  %v8334_v51 = vadd.f32 %v8333_v55, %v8164_v54  ;;  %v16232_v62 = vld [vmem:[#allocation86_spill] sm:$0xff]  ;;  %v16233_v54 = vld [vmem:[#allocation73_spill] sm:$0xff] }
 0xf67   :  { %v10398_v6 = vpack.c.bf16 %v8670_v1, %v16225_v17  ;;  %v16234_v17 = vld [vmem:[#allocation87_spill] sm:$0xff] }
 0xf69   :  { %10654 = vst [vmem:[#allocation8 + $0x258] sm:$0xff] %v10398_v6  ;;  %v16235_v6 = vld [vmem:[#allocation88_spill] sm:$0xff] }
 0xf6a   :  { %v8502_v33 = vpop.f32.mrf.mxu2  ;;  %v8336_v38 = vpop.f32.mrf.mxu1 }
 0xf6b   :  { %v8503_v52 = vadd.f32 %v8502_v33, %v8334_v51  ;;  %v16236_v51 = vld [vmem:[#allocation89_spill] sm:$0xff] }
 0xf6c   :  { %v8671_v28 = vpop.f32.mrf.mxu3  ;;  %v8167_v37 = vpop.f32.mrf.mxu0 }
 0xf6d   :  { %v8672_v57 = vadd.f32 %v8671_v28, %v8503_v52  ;;  %v8337_v15 = vadd.f32 %v8336_v38, %v8167_v37  ;;  %8375 = vmatmul.bf16.gmra.mxu1 %v16228_v44 }
 0xf6f   :  { %8206 = vmatmul.bf16.gmra.mxu0 %v16226_v58  ;;  %v10402_v39 = vpack.c.bf16 %v8672_v57, %v16227_v59  ;;  %8544 = vmatmul.bf16.gmra.mxu2 %v16229_v26  ;;  %v16237_v58 = vld [vmem:[#allocation78_spill] sm:$0xff] }
 0xf71   :  { %8713 = vmatmul.bf16.gmra.mxu3 %v16230_v35  ;;  %10658 = vst [vmem:[#allocation8 + $0x278] sm:$0xff] %v10402_v39 }
 0xf72   :  { %v8505_v34 = vpop.f32.mrf.mxu2  ;;  %v8338_v29 = vpop.f32.mrf.mxu1 }
 0xf73   :  { %v8506_v3 = vadd.f32 %v8505_v34, %v8337_v15 }
 0xf74   :  { %v8674_v40 = vpop.f32.mrf.mxu3  ;;  %v8169_v16 = vpop.f32.mrf.mxu0 }
 0xf75   :  { %v8675_v10 = vadd.f32 %v8674_v40, %v8506_v3  ;;  %v8339_v2 = vadd.f32 %v8338_v29, %v8169_v16  ;;  %v16238_v40 = vld [vmem:[#allocation92_spill] sm:$0xff]  ;;  %v16239_v16 = vld [vmem:[#allocation79_spill] sm:$0xff] }
 0xf77   :  { %v10406_v19 = vpack.c.bf16 %v8675_v10, %v16231_v18  ;;  %v16240_v18 = vld [vmem:[#allocation93_spill] sm:$0xff] }
 0xf79   :  { %10662 = vst [vmem:[#allocation8 + $0x298] sm:$0xff] %v10406_v19  ;;  %v16241_v19 = vld [vmem:[#allocation94_spill] sm:$0xff] }
 0xf7a   :  { %v8507_v20 = vpop.f32.mrf.mxu2  ;;  %v8341_v60 = vpop.f32.mrf.mxu1 }
 0xf7b   :  { %v8508_v9 = vadd.f32 %v8507_v20, %v8339_v2  ;;  %v16242_v2 = vld [vmem:[#allocation95_spill] sm:$0xff] }
 0xf7c   :  { %v8676_v50 = vpop.f32.mrf.mxu3  ;;  %v8172_v22 = vpop.f32.mrf.mxu0 }
 0xf7d   :  { %v8677_v8 = vadd.f32 %v8676_v50, %v8508_v9  ;;  %v8342_v1 = vadd.f32 %v8341_v60, %v8172_v22  ;;  %8380 = vmatmul.bf16.gmra.mxu1 %v16234_v17 }
 0xf7f   :  { %8211 = vmatmul.bf16.gmra.mxu0 %v16232_v62  ;;  %v10410_v55 = vpack.c.bf16 %v8677_v8, %v16233_v54  ;;  %8549 = vmatmul.bf16.gmra.mxu2 %v16235_v6  ;;  %v16243_v62 = vld [vmem:[#allocation84_spill] sm:$0xff] }
 0xf81   :  { %8718 = vmatmul.bf16.gmra.mxu3 %v16236_v51  ;;  %10666 = vst [vmem:[#allocation8 + $0x2b8] sm:$0xff] %v10410_v55 }
 0xf82   :  { %v8510_v33 = vpop.f32.mrf.mxu2  ;;  %v8343_v38 = vpop.f32.mrf.mxu1 }
 0xf83   :  { %v8511_v52 = vadd.f32 %v8510_v33, %v8342_v1 }
 0xf84   :  { %v8679_v28 = vpop.f32.mrf.mxu3  ;;  %v8174_v37 = vpop.f32.mrf.mxu0 }
 0xf85   :  { %v8680_v57 = vadd.f32 %v8679_v28, %v8511_v52  ;;  %v8344_v39 = vadd.f32 %v8343_v38, %v8174_v37  ;;  %v16244_v28 = vld [vmem:[#allocation98_spill] sm:$0xff]  ;;  %v16245_v37 = vld [vmem:[#allocation85_spill] sm:$0xff] }
 0xf87   :  { %v10414_v59 = vpack.c.bf16 %v8680_v57, %v16237_v58  ;;  %v16246_v58 = vld [vmem:[#allocation99_spill] sm:$0xff] }
 0xf89   :  { %10670 = vst [vmem:[#allocation8 + $0x2d8] sm:$0xff] %v10414_v59  ;;  %v16247_v59 = vld [vmem:[#allocation100_spill] sm:$0xff] }
 0xf8a   :  { %v8512_v15 = vpop.f32.mrf.mxu2  ;;  %v8346_v34 = vpop.f32.mrf.mxu1 }
 0xf8b   :  { %v8513_v44 = vadd.f32 %v8512_v15, %v8344_v39  ;;  %v16248_v39 = vld [vmem:[#allocation101_spill] sm:$0xff] }
 0xf8c   :  { %v8681_v26 = vpop.f32.mrf.mxu3  ;;  %v8177_v35 = vpop.f32.mrf.mxu0 }
 0xf8d   :  { %v8682_v3 = vadd.f32 %v8681_v26, %v8513_v44  ;;  %v8347_v10 = vadd.f32 %v8346_v34, %v8177_v35  ;;  %8385 = vmatmul.bf16.gmra.mxu1 %v16240_v18 }
 0xf8f   :  { %8216 = vmatmul.bf16.gmra.mxu0 %v16238_v40  ;;  %v10418_v29 = vpack.c.bf16 %v8682_v3, %v16239_v16  ;;  %8554 = vmatmul.bf16.gmra.mxu2 %v16241_v19  ;;  %v16249_v40 = vld [vmem:[#allocation90_spill] sm:$0xff] }
 0xf91   :  { %8723 = vmatmul.bf16.gmra.mxu3 %v16242_v2  ;;  %10674 = vst [vmem:[#allocation8 + $0x2f8] sm:$0xff] %v10418_v29 }
 0xf92   :  { %v8515_v20 = vpop.f32.mrf.mxu2  ;;  %v8348_v60 = vpop.f32.mrf.mxu1 }
 0xf93   :  { %v8516_v9 = vadd.f32 %v8515_v20, %v8347_v10 }
 0xf94   :  { %v8684_v50 = vpop.f32.mrf.mxu3  ;;  %v8179_v22 = vpop.f32.mrf.mxu0 }
 0xf95   :  { %v8685_v8 = vadd.f32 %v8684_v50, %v8516_v9  ;;  %v8349_v55 = vadd.f32 %v8348_v60, %v8179_v22  ;;  %v16250_v50 = vld [vmem:[#allocation104_spill] sm:$0xff]  ;;  %v16251_v22 = vld [vmem:[#allocation91_spill] sm:$0xff] }
 0xf97   :  { %v10422_v54 = vpack.c.bf16 %v8685_v8, %v16243_v62  ;;  %v16252_v62 = vld [vmem:[#allocation105_spill] sm:$0xff] }
 0xf99   :  { %10678 = vst [vmem:[#allocation8 + $0x318] sm:$0xff] %v10422_v54  ;;  %v16253_v54 = vld [vmem:[#allocation106_spill] sm:$0xff] }
 0xf9a   :  { %v8517_v1 = vpop.f32.mrf.mxu2  ;;  %v8351_v33 = vpop.f32.mrf.mxu1 }
 0xf9b   :  { %v8518_v17 = vadd.f32 %v8517_v1, %v8349_v55  ;;  %v16254_v55 = vld [vmem:[#allocation107_spill] sm:$0xff] }
 0xf9c   :  { %v8686_v6 = vpop.f32.mrf.mxu3  ;;  %v8182_v51 = vpop.f32.mrf.mxu0 }
 0xf9d   :  { %v8687_v52 = vadd.f32 %v8686_v6, %v8518_v17  ;;  %v8352_v57 = vadd.f32 %v8351_v33, %v8182_v51  ;;  %8390 = vmatmul.bf16.gmra.mxu1 %v16246_v58 }
 0xf9f   :  { %8221 = vmatmul.bf16.gmra.mxu0 %v16244_v28  ;;  %v10426_v38 = vpack.c.bf16 %v8687_v52, %v16245_v37  ;;  %8559 = vmatmul.bf16.gmra.mxu2 %v16247_v59 }
 0xfa1   :  { %8728 = vmatmul.bf16.gmra.mxu3 %v16248_v39  ;;  %10682 = vst [vmem:[#allocation8 + $0x338] sm:$0xff] %v10426_v38 }
 0xfa2   :  { %v8520_v15 = vpop.f32.mrf.mxu2  ;;  %v8353_v34 = vpop.f32.mrf.mxu1 }
 0xfa3   :  { %v8521_v44 = vadd.f32 %v8520_v15, %v8352_v57 }
 0xfa4   :  { %v8689_v26 = vpop.f32.mrf.mxu3  ;;  %v8184_v35 = vpop.f32.mrf.mxu0 }
 0xfa5   :  { %v8690_v3 = vadd.f32 %v8689_v26, %v8521_v44  ;;  %v8354_v29 = vadd.f32 %v8353_v34, %v8184_v35  ;;  %v16255_v44 = vld [vmem:[#allocation110_spill] sm:$0xff]  ;;  %v16256_v26 = vld [vmem:[#allocation96_spill] sm:$0xff] }
 0xfa7   :  { %v10430_v16 = vpack.c.bf16 %v8690_v3, %v16249_v40  ;;  %v16257_v3 = vld [vmem:[#allocation111_spill] sm:$0xff]  ;;  %v16258_v40 = vld [vmem:[#allocation112_spill] sm:$0xff] }
 0xfa9   :  { %10686 = vst [vmem:[#allocation8 + $0x358] sm:$0xff] %v10430_v16  ;;  %v16259_v16 = vld [vmem:[#allocation113_spill] sm:$0xff] }
 0xfaa   :  { %v8522_v10 = vpop.f32.mrf.mxu2  ;;  %v8356_v20 = vpop.f32.mrf.mxu1 }
 0xfab   :  { %v8523_v18 = vadd.f32 %v8522_v10, %v8354_v29 }
 0xfac   :  { %v8691_v19 = vpop.f32.mrf.mxu3  ;;  %v8187_v2 = vpop.f32.mrf.mxu0 }
 0xfad   :  { %v8692_v9 = vadd.f32 %v8691_v19, %v8523_v18  ;;  %v8357_v8 = vadd.f32 %v8356_v20, %v8187_v2  ;;  %8395 = vmatmul.bf16.gmra.mxu1 %v16252_v62  ;;  %v16260_v20 = vld [vmem:[#allocation97_spill] sm:$0xff] }
 0xfaf   :  { %8226 = vmatmul.bf16.gmra.mxu0 %v16250_v50  ;;  %v10434_v60 = vpack.c.bf16 %v8692_v9, %v16251_v22  ;;  %8564 = vmatmul.bf16.gmra.mxu2 %v16253_v54 }
 0xfb1   :  { %8733 = vmatmul.bf16.gmra.mxu3 %v16254_v55  ;;  %10690 = vst [vmem:[#allocation8 + $0x378] sm:$0xff] %v10434_v60 }
 0xfb2   :  { %v8525_v1 = vpop.f32.mrf.mxu2  ;;  %v8358_v33 = vpop.f32.mrf.mxu1 }
 0xfb3   :  { %v8526_v17 = vadd.f32 %v8525_v1, %v8357_v8  ;;  %v16261_v1 = vld [vmem:[#allocation116_spill] sm:$0xff] }
 0xfb4   :  { %v8694_v6 = vpop.f32.mrf.mxu3  ;;  %v8189_v51 = vpop.f32.mrf.mxu0 }
 0xfb5   :  { %v8695_v52 = vadd.f32 %v8694_v6, %v8526_v17  ;;  %v8359_v37 = vadd.f32 %v8358_v33, %v8189_v51  ;;  %v16262_v17 = vld [vmem:[#allocation102_spill] sm:$0xff]  ;;  %v16263_v33 = vld [vmem:[#allocation117_spill] sm:$0xff] }
 0xfb7   :  { %v10438_v28 = vpack.c.bf16 %v8695_v52, %v14639_v61  ;;  %v16264_v52 = vld [vmem:[#allocation118_spill] sm:$0xff] }
 0xfb9   :  { %10694 = vst [vmem:[#allocation8 + $0x398] sm:$0xff] %v10438_v28  ;;  %v16265_v28 = vld [vmem:[#allocation119_spill] sm:$0xff] }
 0xfba   :  { %v8527_v38 = vpop.f32.mrf.mxu2  ;;  %v8361_v39 = vpop.f32.mrf.mxu1 }
 0xfbb   :  { %v8528_v57 = vadd.f32 %v8527_v38, %v8359_v37 }
 0xfbc   :  { %v8696_v58 = vpop.f32.mrf.mxu3  ;;  %v8192_v59 = vpop.f32.mrf.mxu0 }
 0xfbd   :  { %v8697_v15 = vadd.f32 %v8696_v58, %v8528_v57  ;;  %v8362_v34 = vadd.f32 %v8361_v39, %v8192_v59  ;;  %8400 = vmatmul.bf16.gmra.mxu1 %v16257_v3 }
 0xfbf   :  { %8231 = vmatmul.bf16.gmra.mxu0 %v16255_v44  ;;  %v10442_v35 = vpack.c.bf16 %v8697_v15, %v16256_v26  ;;  %8569 = vmatmul.bf16.gmra.mxu2 %v16258_v40  ;;  %v16266_v15 = vld [vmem:[#allocation103_spill] sm:$0xff] }
 0xfc1   :  { %8738 = vmatmul.bf16.gmra.mxu3 %v16259_v16  ;;  %10698 = vst [vmem:[#allocation8 + $0x3b8] sm:$0xff] %v10442_v35 }
 0xfc2   :  { %v8530_v61 = vpop.f32.mrf.mxu2  ;;  %v8363_v19 = vpop.f32.mrf.mxu1 }
 0xfc3   :  { %v8531_v29 = vadd.f32 %v8530_v61, %v8362_v34 }
 0xfc4   :  { %v8699_v10 = vpop.f32.mrf.mxu3  ;;  %v8194_v18 = vpop.f32.mrf.mxu0 }
 0xfc5   :  { %v8700_v2 = vadd.f32 %v8699_v10, %v8531_v29  ;;  %v8364_v50 = vadd.f32 %v8363_v19, %v8194_v18  ;;  %v16267_v29 = vld [vmem:[#allocation122_spill] sm:$0xff]  ;;  %v16268_v10 = vld [vmem:[#allocation108_spill] sm:$0xff] }
 0xfc7   :  { %v10446_v9 = vpack.c.bf16 %v8700_v2, %v16260_v20  ;;  %v16269_v2 = vld [vmem:[#allocation123_spill] sm:$0xff]  ;;  %v16270_v20 = vld [vmem:[#allocation124_spill] sm:$0xff] }
 0xfc9   :  { %10702 = vst [vmem:[#allocation8 + $0x3d8] sm:$0xff] %v10446_v9  ;;  %v16271_v9 = vld [vmem:[#allocation125_spill] sm:$0xff] }
 0xfca   :  { %v8532_v22 = vpop.f32.mrf.mxu2  ;;  %v8366_v54 = vpop.f32.mrf.mxu1 }
 0xfcb   :  { %v8533_v60 = vadd.f32 %v8532_v22, %v8364_v50 }
 0xfcc   :  { %v8701_v8 = vpop.f32.mrf.mxu3  ;;  %v8197_v62 = vpop.f32.mrf.mxu0 }
 0xfcd   :  { %v8702_v55 = vadd.f32 %v8701_v8, %v8533_v60  ;;  %v8367_v51 = vadd.f32 %v8366_v54, %v8197_v62  ;;  %8405 = vmatmul.bf16.gmra.mxu1 %v16263_v33 }
 0xfcf   :  { %8236 = vmatmul.bf16.gmra.mxu0 %v16261_v1  ;;  %v10450_v6 = vpack.c.bf16 %v8702_v55, %v16262_v17  ;;  %8574 = vmatmul.bf16.gmra.mxu2 %v16264_v52  ;;  %v16272_v55 = vld [vmem:[#allocation109_spill] sm:$0xff] }
 0xfd1   :  { %8743 = vmatmul.bf16.gmra.mxu3 %v16265_v28  ;;  %10706 = vst [vmem:[#allocation8 + $0x3f8] sm:$0xff] %v10450_v6 }
 0xfd2   :  { %v8535_v37 = vpop.f32.mrf.mxu2  ;;  %v8368_v59 = vpop.f32.mrf.mxu1 }
 0xfd3   :  { %v8536_v38 = vadd.f32 %v8535_v37, %v8367_v51 }
 0xfd4   :  { %v8704_v57 = vpop.f32.mrf.mxu3  ;;  %v8199_v58 = vpop.f32.mrf.mxu0 }
 0xfd5   :  { %v8705_v39 = vadd.f32 %v8704_v57, %v8536_v38  ;;  %v8369_v26 = vadd.f32 %v8368_v59, %v8199_v58  ;;  %v16273_v38 = vld [vmem:[#allocation128_spill] sm:$0xff]  ;;  %v16274_v57 = vld [vmem:[#allocation114_spill] sm:$0xff] }
 0xfd7   :  { %v10454_v44 = vpack.c.bf16 %v8705_v39, %v16266_v15  ;;  %v16275_v39 = vld [vmem:[#allocation129_spill] sm:$0xff]  ;;  %v16276_v15 = vld [vmem:[#allocation130_spill] sm:$0xff] }
 0xfd9   :  { %10710 = vst [vmem:[#allocation8 + $0x418] sm:$0xff] %v10454_v44  ;;  %v16277_v44 = vld [vmem:[#allocation131_spill] sm:$0xff] }
 0xfda   :  { %v8537_v35 = vpop.f32.mrf.mxu2  ;;  %v8371_v16 = vpop.f32.mrf.mxu1 }
 0xfdb   :  { %v8538_v34 = vadd.f32 %v8537_v35, %v8369_v26 }
 0xfdc   :  { %v8706_v3 = vpop.f32.mrf.mxu3  ;;  %v8202_v40 = vpop.f32.mrf.mxu0 }
 0xfdd   :  { %v8707_v61 = vadd.f32 %v8706_v3, %v8538_v34  ;;  %v8372_v19 = vadd.f32 %v8371_v16, %v8202_v40  ;;  %8410 = vmatmul.bf16.gmra.mxu1 %v16269_v2 }
 0xfdf   :  { %8241 = vmatmul.bf16.gmra.mxu0 %v16267_v29  ;;  %v10458_v18 = vpack.c.bf16 %v8707_v61, %v16268_v10  ;;  %8579 = vmatmul.bf16.gmra.mxu2 %v16270_v20 }
 0xfe1   :  { %8748 = vmatmul.bf16.gmra.mxu3 %v16271_v9  ;;  %10714 = vst [vmem:[#allocation8 + $0x438] sm:$0xff] %v10458_v18 }
 0xfe2   :  { %v8540_v50 = vpop.f32.mrf.mxu2  ;;  %v8373_v62 = vpop.f32.mrf.mxu1 }
 0xfe3   :  { %v8541_v22 = vadd.f32 %v8540_v50, %v8372_v19 }
 0xfe4   :  { %v8709_v60 = vpop.f32.mrf.mxu3  ;;  %v8204_v8 = vpop.f32.mrf.mxu0 }
 0xfe5   :  { %v8710_v54 = vadd.f32 %v8709_v60, %v8541_v22  ;;  %v8374_v17 = vadd.f32 %v8373_v62, %v8204_v8  ;;  %v16278_v60 = vld [vmem:[#allocation135_spill] sm:$0xff]  ;;  %v16279_v8 = vld [vmem:[#allocation136_spill] sm:$0xff]  ;;  %v16280_v62 = vld [vmem:[#allocation137_spill] sm:$0xff] }
 0xfe7   :  { %v10462_v1 = vpack.c.bf16 %v8710_v54, %v16272_v55 }
 0xfe9   :  { %10718 = vst [vmem:[#allocation8 + $0x458] sm:$0xff] %v10462_v1 }
 0xfea   :  { %v8542_v6 = vpop.f32.mrf.mxu2  ;;  %v8376_v28 = vpop.f32.mrf.mxu1 }
 0xfeb   :  { %v8543_v51 = vadd.f32 %v8542_v6, %v8374_v17 }
 0xfec   :  { %v8711_v33 = vpop.f32.mrf.mxu3  ;;  %v8207_v52 = vpop.f32.mrf.mxu0 }
 0xfed   :  { %v8712_v37 = vadd.f32 %v8711_v33, %v8543_v51  ;;  %v8377_v59 = vadd.f32 %v8376_v28, %v8207_v52  ;;  %8415 = vmatmul.bf16.gmra.mxu1 %v16275_v39  ;;  %v16281_v51 = vld [vmem:[#allocation115_spill] sm:$0xff] }
 0xfef   :  { %8246 = vmatmul.bf16.gmra.mxu0 %v16273_v38  ;;  %v10466_v58 = vpack.c.bf16 %v8712_v37, %v16274_v57  ;;  %8584 = vmatmul.bf16.gmra.mxu2 %v16276_v15 }
 0xff1   :  { %8753 = vmatmul.bf16.gmra.mxu3 %v16277_v44  ;;  %10722 = vst [vmem:[#allocation8 + $0x478] sm:$0xff] %v10466_v58  ;;  %v16282_v58 = vld [vmem:[#allocation140_spill] sm:$0xff]  ;;  %v16284_v44 = vld [vmem:[#allocation141_spill] sm:$0xff] }
 0xff2   :  { %v8545_v26 = vpop.f32.mrf.mxu2  ;;  %v8378_v40 = vpop.f32.mrf.mxu1 }
 0xff3   :  { %v8546_v35 = vadd.f32 %v8545_v26, %v8377_v59  ;;  %v16283_v59 = vld [vmem:[#allocation120_spill] sm:$0xff]  ;;  %v16285_v26 = vld [vmem:[#allocation142_spill] sm:$0xff] }
 0xff4   :  { %v8714_v34 = vpop.f32.mrf.mxu3  ;;  %v8209_v3 = vpop.f32.mrf.mxu0 }
 0xff5   :  { %v8715_v16 = vadd.f32 %v8714_v34, %v8546_v35  ;;  %v8379_v29 = vadd.f32 %v8378_v40, %v8209_v3  ;;  %v16286_v35 = vld [vmem:[#allocation143_spill] sm:$0xff] }
 0xff7   :  { %v10470_v61 = vpack.c.bf16 %v8715_v16, %v14671_v45 }
 0xff9   :  { %10726 = vst [vmem:[#allocation8 + $0x498] sm:$0xff] %v10470_v61 }
 0xffa   :  { %v8547_v10 = vpop.f32.mrf.mxu2  ;;  %v8381_v20 = vpop.f32.mrf.mxu1 }
 0xffb   :  { %v8548_v18 = vadd.f32 %v8547_v10, %v8379_v29  ;;  %v16287_v10 = vld [vmem:[#allocation121_spill] sm:$0xff] }
 0xffc   :  { %v8716_v19 = vpop.f32.mrf.mxu3  ;;  %v8212_v2 = vpop.f32.mrf.mxu0 }
 0xffd   :  { %v8717_v9 = vadd.f32 %v8716_v19, %v8548_v18  ;;  %v8382_v22 = vadd.f32 %v8381_v20, %v8212_v2  ;;  %8420 = vmatmul.bf16.gmra.mxu1 %v16278_v60 }
 0xfff   :  { %8251 = vmatmul.bf16.gmra.mxu0 %v16004_v21  ;;  %v10474_v50 = vpack.c.bf16 %v8717_v9, %v14673_v14  ;;  %8589 = vmatmul.bf16.gmra.mxu2 %v16279_v8  ;;  %v16288_v8 = vld [vmem:[#allocation146_spill] sm:$0xff] }
0x1001   :  { %8758 = vmatmul.bf16.gmra.mxu3 %v16280_v62  ;;  %10730 = vst [vmem:[#allocation8 + $0x4b8] sm:$0xff] %v10474_v50  ;;  %v16289_v62 = vld [vmem:[#allocation126_spill] sm:$0xff] }
0x1002   :  { %v8550_v45 = vpop.f32.mrf.mxu2  ;;  %v8383_v17 = vpop.f32.mrf.mxu1 }
0x1003   :  { %v8551_v54 = vadd.f32 %v8550_v45, %v8382_v22 }
0x1004   :  { %v8719_v55 = vpop.f32.mrf.mxu3  ;;  %v8214_v1 = vpop.f32.mrf.mxu0 }
0x1005   :  { %v8720_v6 = vadd.f32 %v8719_v55, %v8551_v54  ;;  %v8384_v21 = vadd.f32 %v8383_v17, %v8214_v1  ;;  %v16290_v55 = vld [vmem:[#allocation147_spill] sm:$0xff]  ;;  %v16291_v1 = vld [vmem:[#allocation148_spill] sm:$0xff]  ;;  %v16292_v17 = vld [vmem:[#allocation149_spill] sm:$0xff] }
0x1007   :  { %v10478_v33 = vpack.c.bf16 %v8720_v6, %v16281_v51 }
0x1009   :  { %10734 = vst [vmem:[#allocation8 + $0x4d8] sm:$0xff] %v10478_v33 }
0x100a   :  { %v8552_v52 = vpop.f32.mrf.mxu2  ;;  %v8386_v38 = vpop.f32.mrf.mxu1 }
0x100b   :  { %v8553_v14 = vadd.f32 %v8552_v52, %v8384_v21 }
0x100c   :  { %v8721_v28 = vpop.f32.mrf.mxu3  ;;  %v8217_v37 = vpop.f32.mrf.mxu0 }
0x100d   :  { %v8722_v57 = vadd.f32 %v8721_v28, %v8553_v14  ;;  %v8387_v15 = vadd.f32 %v8386_v38, %v8217_v37  ;;  %8425 = vmatmul.bf16.gmra.mxu1 %v16284_v44  ;;  %v16293_v28 = vld [vmem:[#allocation134_spill] sm:$0xff] }
0x100f   :  { %8256 = vmatmul.bf16.gmra.mxu0 %v16282_v58  ;;  %v10482_v39 = vpack.c.bf16 %v8722_v57, %v16283_v59  ;;  %8594 = vmatmul.bf16.gmra.mxu2 %v16285_v26  ;;  %v16294_v26 = vld [vmem:[#allocation127_spill] sm:$0xff] }
0x1011   :  { %8763 = vmatmul.bf16.gmra.mxu3 %v16286_v35  ;;  %10738 = vst [vmem:[#allocation8 + $0x4f8] sm:$0xff] %v10482_v39 }
0x1012   :  { %v8555_v34 = vpop.f32.mrf.mxu2  ;;  %v8388_v61 = vpop.f32.mrf.mxu1 }
0x1013   :  { %v8556_v3 = vadd.f32 %v8555_v34, %v8387_v15 }
0x1014   :  { %v8724_v40 = vpop.f32.mrf.mxu3  ;;  %v8219_v16 = vpop.f32.mrf.mxu0 }
0x1015   :  { %v8725_v29 = vadd.f32 %v8724_v40, %v8556_v3  ;;  %v8389_v19 = vadd.f32 %v8388_v61, %v8219_v16  ;;  %v16295_v3 = vld [vmem:[#allocation153_spill] sm:$0xff] }
0x1017   :  { %v10486_v18 = vpack.c.bf16 %v8725_v29, %v16287_v10 }
0x1019   :  { %10742 = vst [vmem:[#allocation8 + $0x518] sm:$0xff] %v10486_v18 }
0x101a   :  { %v8557_v2 = vpop.f32.mrf.mxu2  ;;  %v8391_v22 = vpop.f32.mrf.mxu1 }
0x101b   :  { %v8558_v20 = vadd.f32 %v8557_v2, %v8389_v19 }
0x101c   :  { %v8726_v9 = vpop.f32.mrf.mxu3  ;;  %v8222_v50 = vpop.f32.mrf.mxu0 }
0x101d   :  { %v8727_v60 = vadd.f32 %v8726_v9, %v8558_v20  ;;  %v8392_v54 = vadd.f32 %v8391_v22, %v8222_v50  ;;  %8430 = vmatmul.bf16.gmra.mxu1 %v16290_v55 }
0x101f   :  { %8261 = vmatmul.bf16.gmra.mxu0 %v16288_v8  ;;  %v10490_v45 = vpack.c.bf16 %v8727_v60, %v16289_v62  ;;  %8599 = vmatmul.bf16.gmra.mxu2 %v16291_v1  ;;  %v16297_v62 = vld [vmem:[#allocation158_spill] sm:$0xff] }
0x1021   :  { %8768 = vmatmul.bf16.gmra.mxu3 %v16292_v17  ;;  %10746 = vst [vmem:[#allocation8 + $0x538] sm:$0xff] %v10490_v45 }
0x1022   :  { %v8560_v6 = vpop.f32.mrf.mxu2  ;;  %v8393_v52 = vpop.f32.mrf.mxu1 }
0x1023   :  { %v8561_v51 = vadd.f32 %v8560_v6, %v8392_v54 }
0x1024   :  { %v8729_v33 = vpop.f32.mrf.mxu3  ;;  %v8224_v21 = vpop.f32.mrf.mxu0 }
0x1025   :  { %v8730_v14 = vadd.f32 %v8729_v33, %v8561_v51  ;;  %v8394_v38 = vadd.f32 %v8393_v52, %v8224_v21 }
0x1027   :  { %v10494_v37 = vpack.c.bf16 %v8730_v14, %v16293_v28 }
0x1029   :  { %10750 = vst [vmem:[#allocation8 + $0x558] sm:$0xff] %v10494_v37 }
0x102a   :  { %v8562_v57 = vpop.f32.mrf.mxu2  ;;  %v8396_v15 = vpop.f32.mrf.mxu1 }
0x102b   :  { %v8563_v58 = vadd.f32 %v8562_v57, %v8394_v38 }
0x102c   :  { %v8731_v59 = vpop.f32.mrf.mxu3  ;;  %v8227_v39 = vpop.f32.mrf.mxu0 }
0x102d   :  { %v8732_v44 = vadd.f32 %v8731_v59, %v8563_v58  ;;  %v8397_v34 = vadd.f32 %v8396_v15, %v8227_v39  ;;  %8435 = vmatmul.bf16.gmra.mxu1 %v16295_v3 }
0x102f   :  { %8266 = vmatmul.bf16.gmra.mxu0 %v16168_v11  ;;  %v10498_v35 = vpack.c.bf16 %v8732_v44, %v16294_v26  ;;  %8604 = vmatmul.bf16.gmra.mxu2 %v16170_v42  ;;  %v16296_v42 = vld [vmem:[#allocation132_spill] sm:$0xff] }
0x1031   :  { %8773 = vmatmul.bf16.gmra.mxu3 %v16171_v23  ;;  %10754 = vst [vmem:[#allocation8 + $0x578] sm:$0xff] %v10498_v35 }
0x1032   :  { %v8565_v40 = vpop.f32.mrf.mxu2  ;;  %v8398_v10 = vpop.f32.mrf.mxu1 }
0x1033   :  { %v8566_v16 = vadd.f32 %v8565_v40, %v8397_v34 }
0x1034   :  { %v8734_v61 = vpop.f32.mrf.mxu3  ;;  %v8229_v29 = vpop.f32.mrf.mxu0 }
0x1035   :  { %v8735_v18 = vadd.f32 %v8734_v61, %v8566_v16  ;;  %v8399_v11 = vadd.f32 %v8398_v10, %v8229_v29 }
0x1037   :  { %v10502_v19 = vpack.c.bf16 %v8735_v18, %v14703_v63 }
0x1039   :  { %10758 = vst [vmem:[#allocation8 + $0x598] sm:$0xff] %v10502_v19 }
0x103a   :  { %v8567_v2 = vpop.f32.mrf.mxu2  ;;  %v8401_v22 = vpop.f32.mrf.mxu1 }
0x103b   :  { %v8568_v20 = vadd.f32 %v8567_v2, %v8399_v11 }
0x103c   :  { %v8736_v9 = vpop.f32.mrf.mxu3  ;;  %v8232_v50 = vpop.f32.mrf.mxu0 }
0x103d   :  { %v8737_v60 = vadd.f32 %v8736_v9, %v8568_v20  ;;  %v8402_v8 = vadd.f32 %v8401_v22, %v8232_v50  ;;  %8440 = vmatmul.bf16.gmra.mxu1 %v16297_v62 }
0x103f   :  { %8271 = vmatmul.bf16.gmra.mxu0 %v13353_v43  ;;  %v10506_v23 = vpack.c.bf16 %v8737_v60, %v16296_v42  ;;  %8609 = vmatmul.bf16.gmra.mxu2 %v13357_v24 }
0x1041   :  { %8778 = vmatmul.bf16.gmra.mxu3 %v13359_v46  ;;  %10762 = vst [vmem:[#allocation8 + $0x5b8] sm:$0xff] %v10506_v23 }
0x1042   :  { %v8570_v63 = vpop.f32.mrf.mxu2  ;;  %v8403_v1 = vpop.f32.mrf.mxu1 }
0x1043   :  { %v8571_v45 = vadd.f32 %v8570_v63, %v8402_v8 }
0x1044   :  { %v8739_v54 = vpop.f32.mrf.mxu3  ;;  %v8234_v55 = vpop.f32.mrf.mxu0 }
0x1045   :  { %v8740_v17 = vadd.f32 %v8739_v54, %v8571_v45  ;;  %v8404_v43 = vadd.f32 %v8403_v1, %v8234_v55 }
0x1047   :  { %v10510_v6 = vpack.c.bf16 %v8740_v17, %v14711_v13 }
0x1049   :  { %10766 = vst [vmem:[#allocation8 + $0x5d8] sm:$0xff] %v10510_v6 }
0x104a   :  { %v8572_v51 = vpop.f32.mrf.mxu2  ;;  %v8406_v14 = vpop.f32.mrf.mxu1 }
0x104b   :  { %v8573_v33 = vadd.f32 %v8572_v51, %v8404_v43 }
0x104c   :  { %v8741_v21 = vpop.f32.mrf.mxu3  ;;  %v8237_v52 = vpop.f32.mrf.mxu0 }
0x104d   :  { %v8742_v28 = vadd.f32 %v8741_v21, %v8573_v33  ;;  %v8407_v46 = vadd.f32 %v8406_v14, %v8237_v52 }
0x104f   :  { %v10514_v24 = vpack.c.bf16 %v8742_v28, %v14713_v31 }
0x1051   :  { %10770 = vst [vmem:[#allocation8 + $0x5f8] sm:$0xff] %v10514_v24 }
0x1052   :  { %v8575_v37 = vpop.f32.mrf.mxu2  ;;  %v8408_v59 = vpop.f32.mrf.mxu1 }
0x1053   :  { %v8576_v38 = vadd.f32 %v8575_v37, %v8407_v46 }
0x1054   :  { %v8744_v57 = vpop.f32.mrf.mxu3  ;;  %v8239_v58 = vpop.f32.mrf.mxu0 }
0x1055   :  { %v8745_v39 = vadd.f32 %v8744_v57, %v8576_v38  ;;  %v8409_v15 = vadd.f32 %v8408_v59, %v8239_v58 }
0x1057   :  { %v10518_v13 = vpack.c.bf16 %v8745_v39, %v14719_v12 }
0x1059   :  { %10774 = vst [vmem:[#allocation8 + $0x618] sm:$0xff] %v10518_v13 }
0x105a   :  { %v8577_v44 = vpop.f32.mrf.mxu2  ;;  %v8411_v3 = vpop.f32.mrf.mxu1 }
0x105b   :  { %v8578_v26 = vadd.f32 %v8577_v44, %v8409_v15 }
0x105c   :  { %v8746_v35 = vpop.f32.mrf.mxu3  ;;  %v8242_v34 = vpop.f32.mrf.mxu0 }
0x105d   :  { %v8747_v40 = vadd.f32 %v8746_v35, %v8578_v26  ;;  %v8412_v16 = vadd.f32 %v8411_v3, %v8242_v34 }
0x105f   :  { %v10522_v31 = vpack.c.bf16 %v8747_v40, %v14721_v47 }
0x1061   :  { %10778 = vst [vmem:[#allocation8 + $0x638] sm:$0xff] %v10522_v31 }
0x1062   :  { %v8580_v61 = vpop.f32.mrf.mxu2  ;;  %v8413_v19 = vpop.f32.mrf.mxu1 }
0x1063   :  { %v8581_v29 = vadd.f32 %v8580_v61, %v8412_v16 }
0x1064   :  { %v8749_v10 = vpop.f32.mrf.mxu3  ;;  %v8244_v18 = vpop.f32.mrf.mxu0 }
0x1065   :  { %v8750_v11 = vadd.f32 %v8749_v10, %v8581_v29  ;;  %v8414_v2 = vadd.f32 %v8413_v19, %v8244_v18 }
0x1067   :  { %v10526_v12 = vpack.c.bf16 %v8750_v11, %v14727_v27 }
0x1069   :  { %10782 = vst [vmem:[#allocation8 + $0x658] sm:$0xff] %v10526_v12 }
0x106a   :  { %v8582_v20 = vpop.f32.mrf.mxu2  ;;  %v8416_v60 = vpop.f32.mrf.mxu1 }
0x106b   :  { %v8583_v9 = vadd.f32 %v8582_v20, %v8414_v2 }
0x106c   :  { %v8751_v50 = vpop.f32.mrf.mxu3  ;;  %v8247_v22 = vpop.f32.mrf.mxu0 }
0x106d   :  { %v8752_v42 = vadd.f32 %v8751_v50, %v8583_v9  ;;  %v8417_v23 = vadd.f32 %v8416_v60, %v8247_v22 }
0x106f   :  { %v10530_v47 = vpack.c.bf16 %v8752_v42, %v14729_v0 }
0x1071   :  { %10786 = vst [vmem:[#allocation8 + $0x678] sm:$0xff] %v10530_v47 }
0x1072   :  { %v8585_v8 = vpop.f32.mrf.mxu2  ;;  %v8418_v54 = vpop.f32.mrf.mxu1 }
0x1073   :  { %v8586_v62 = vadd.f32 %v8585_v8, %v8417_v23 }
0x1074   :  { %v8754_v63 = vpop.f32.mrf.mxu3  ;;  %v8249_v45 = vpop.f32.mrf.mxu0 }
0x1075   :  { %v8755_v55 = vadd.f32 %v8754_v63, %v8586_v62  ;;  %v8419_v1 = vadd.f32 %v8418_v54, %v8249_v45 }
0x1077   :  { %v10534_v27 = vpack.c.bf16 %v8755_v55, %v14735_v53 }
0x1079   :  { %10790 = vst [vmem:[#allocation8 + $0x698] sm:$0xff] %v10534_v27 }
0x107a   :  { %v8587_v17 = vpop.f32.mrf.mxu2  ;;  %v8421_v33 = vpop.f32.mrf.mxu1 }
0x107b   :  { %v8588_v6 = vadd.f32 %v8587_v17, %v8419_v1 }
0x107c   :  { %v8756_v43 = vpop.f32.mrf.mxu3  ;;  %v8252_v51 = vpop.f32.mrf.mxu0 }
0x107d   :  { %v8757_v21 = vadd.f32 %v8756_v43, %v8588_v6  ;;  %v8422_v52 = vadd.f32 %v8421_v33, %v8252_v51 }
0x107f   :  { %v10538_v0 = vpack.c.bf16 %v8757_v21, %v14737_v41 }
0x1081   :  { %10794 = vst [vmem:[#allocation8 + $0x6b8] sm:$0xff] %v10538_v0 }
0x1082   :  { %v8590_v14 = vpop.f32.mrf.mxu2  ;;  %v8423_v37 = vpop.f32.mrf.mxu1 }
0x1083   :  { %v8591_v28 = vadd.f32 %v8590_v14, %v8422_v52 }
0x1084   :  { %v8759_v24 = vpop.f32.mrf.mxu3  ;;  %v8254_v46 = vpop.f32.mrf.mxu0 }
0x1085   :  { %v8760_v38 = vadd.f32 %v8759_v24, %v8591_v28  ;;  %v8424_v57 = vadd.f32 %v8423_v37, %v8254_v46 }
0x1087   :  { %v10542_v53 = vpack.c.bf16 %v8760_v38, %v14743_v32 }
0x1089   :  { %10798 = vst [vmem:[#allocation8 + $0x6d8] sm:$0xff] %v10542_v53 }
0x108a   :  { %v8592_v58 = vpop.f32.mrf.mxu2  ;;  %v8426_v15 = vpop.f32.mrf.mxu1 }
0x108b   :  { %v8593_v59 = vadd.f32 %v8592_v58, %v8424_v57 }
0x108c   :  { %v8761_v39 = vpop.f32.mrf.mxu3  ;;  %v8257_v13 = vpop.f32.mrf.mxu0 }
0x108d   :  { %v8762_v44 = vadd.f32 %v8761_v39, %v8593_v59  ;;  %v8427_v26 = vadd.f32 %v8426_v15, %v8257_v13 }
0x108f   :  { %v10546_v41 = vpack.c.bf16 %v8762_v44, %v14745_v36 }
0x1091   :  { %10802 = vst [vmem:[#allocation8 + $0x6f8] sm:$0xff] %v10546_v41 }
0x1092   :  { %v8595_v35 = vpop.f32.mrf.mxu2  ;;  %v8428_v31 = vpop.f32.mrf.mxu1 }
0x1093   :  { %v8596_v34 = vadd.f32 %v8595_v35, %v8427_v26 }
0x1094   :  { %v8764_v3 = vpop.f32.mrf.mxu3  ;;  %v8259_v40 = vpop.f32.mrf.mxu0 }
0x1095   :  { %v8765_v16 = vadd.f32 %v8764_v3, %v8596_v34  ;;  %v8429_v61 = vadd.f32 %v8428_v31, %v8259_v40 }
0x1097   :  { %v10550_v32 = vpack.c.bf16 %v8765_v16, %v14751_v7 }
0x1099   :  { %10806 = vst [vmem:[#allocation8 + $0x718] sm:$0xff] %v10550_v32 }
0x109a   :  { %v8597_v29 = vpop.f32.mrf.mxu2  ;;  %v8431_v11 = vpop.f32.mrf.mxu1 }
0x109b   :  { %v8598_v10 = vadd.f32 %v8597_v29, %v8429_v61 }
0x109c   :  { %v8766_v18 = vpop.f32.mrf.mxu3  ;;  %v8262_v19 = vpop.f32.mrf.mxu0 }
0x109d   :  { %v8767_v12 = vadd.f32 %v8766_v18, %v8598_v10  ;;  %v8432_v2 = vadd.f32 %v8431_v11, %v8262_v19 }
0x109f   :  { %v10554_v36 = vpack.c.bf16 %v8767_v12, %v14753_v49 }
0x10a1   :  { %10810 = vst [vmem:[#allocation8 + $0x738] sm:$0xff] %v10554_v36 }
0x10a2   :  { %v8600_v20 = vpop.f32.mrf.mxu2  ;;  %v8433_v60 = vpop.f32.mrf.mxu1 }
0x10a3   :  { %v8601_v9 = vadd.f32 %v8600_v20, %v8432_v2 }
0x10a4   :  { %v8769_v50 = vpop.f32.mrf.mxu3  ;;  %v8264_v22 = vpop.f32.mrf.mxu0 }
0x10a5   :  { %v8770_v42 = vadd.f32 %v8769_v50, %v8601_v9  ;;  %v8434_v47 = vadd.f32 %v8433_v60, %v8264_v22 }
0x10a7   :  { %v10558_v7 = vpack.c.bf16 %v8770_v42, %v14759_v48 }
0x10a9   :  { %10814 = vst [vmem:[#allocation8 + $0x758] sm:$0xff] %v10558_v7 }
0x10aa   :  { %v8602_v23 = vpop.f32.mrf.mxu2  ;;  %v8436_v45 = vpop.f32.mrf.mxu1 }
0x10ab   :  { %v8603_v8 = vadd.f32 %v8602_v23, %v8434_v47 }
0x10ac   :  { %v8771_v62 = vpop.f32.mrf.mxu3  ;;  %v8267_v63 = vpop.f32.mrf.mxu0 }
0x10ad   :  { %v8772_v54 = vadd.f32 %v8771_v62, %v8603_v8  ;;  %v8437_v55 = vadd.f32 %v8436_v45, %v8267_v63 }
0x10af   :  { %v10562_v49 = vpack.c.bf16 %v8772_v54, %v14761_v4 }
0x10b1   :  { %10818 = vst [vmem:[#allocation8 + $0x778] sm:$0xff] %v10562_v49 }
0x10b2   :  { %v8605_v27 = vpop.f32.mrf.mxu2  ;;  %v8438_v43 = vpop.f32.mrf.mxu1 }
0x10b3   :  { %v8606_v1 = vadd.f32 %v8605_v27, %v8437_v55 }
0x10b4   :  { %v8774_v17 = vpop.f32.mrf.mxu3  ;;  %v8269_v6 = vpop.f32.mrf.mxu0 }
0x10b5   :  { %v8775_v51 = vadd.f32 %v8774_v17, %v8606_v1  ;;  %v8439_v33 = vadd.f32 %v8438_v43, %v8269_v6 }
0x10b7   :  { %v10566_v48 = vpack.c.bf16 %v8775_v51, %v14767_v5 }
0x10b9   :  { %10822 = vst [vmem:[#allocation8 + $0x798] sm:$0xff] %v10566_v48 }
0x10ba   :  { %v8607_v21 = vpop.f32.mrf.mxu2  ;;  %v8441_v28 = vpop.f32.mrf.mxu1 }
0x10bb   :  { %v8608_v0 = vadd.f32 %v8607_v21, %v8439_v33 }
0x10bc   :  { %v8776_v52 = vpop.f32.mrf.mxu3  ;;  %v8272_v14 = vpop.f32.mrf.mxu0 }
0x10bd   :  { %v8777_v24 = vadd.f32 %v8776_v52, %v8608_v0  ;;  %v8442_v46 = vadd.f32 %v8441_v28, %v8272_v14 }
0x10bf   :  { %v10570_v4 = vpack.c.bf16 %v8777_v24, %v14769_v30 }
0x10c1   :  { %10826 = vst [vmem:[#allocation8 + $0x7b8] sm:$0xff] %v10570_v4 }
0x10c2   :  { %v8610_v37 = vpop.f32.mrf.mxu2  ;;  %v8443_v59 = vpop.f32.mrf.mxu1 }
0x10c3   :  { %v8611_v38 = vadd.f32 %v8610_v37, %v8442_v46 }
0x10c4   :  { %v8779_v53 = vpop.f32.mrf.mxu3  ;;  %v8274_v58 = vpop.f32.mrf.mxu0 }
0x10c5   :  { %v8780_v57 = vadd.f32 %v8779_v53, %v8611_v38  ;;  %v8444_v39 = vadd.f32 %v8443_v59, %v8274_v58 }
0x10c7   :  { %v10574_v5 = vpack.c.bf16 %v8780_v57, %v14775_v25 }
0x10c9   :  { %10830 = vst [vmem:[#allocation8 + $0x7d8] sm:$0xff] %v10574_v5 }
0x10ca   :  { %v8612_v13 = vpop.f32.mrf.mxu2 }
0x10cb   :  { %v8613_v15 = vadd.f32 %v8612_v13, %v8444_v39 }
0x10cc   :  { %v8781_v44 = vpop.f32.mrf.mxu3 }
0x10cd   :  { %v8782_v30 = vadd.f32 %v8781_v44, %v8613_v15 }
0x10cf   :  { %v10578_v41 = vpack.c.bf16 %v8782_v30, %v14777_v56 }
0x10d1   :  { %10834 = vst [vmem:[#allocation8 + $0x7f8] sm:$0xff] %v10578_v41 }
0x10d2   :  { %10847 = dma.vmem_to_hbm [thread:$0]  %s10840_s1, 32768, %s10842_s25, [#allocation5], %s12864_s21, %s12864_s21, %s12865_s22  }
0x10d3   :  { %12858 = dma.done.wait [#allocation5], 32768  }
0x10d4   :  { %12859 = vsyncadd [#allocation5], 4294934528 }
0x10d5   :  { %10852 = vsyncpa [#allocation4], 1 }
0x10d6   :  { %10853 = vsyncpa [#allocation7], 1 }
0x10d7   :  { %10854 = vsyncpa [#allocation5], 1 }

</bundles_post_ra>
